<compile_context>
chip_gen: v7x
topology: tpu7x:2x2x1
jax: 0.10.0
libtpu: 0.0.40
codegen_flags: <defaults>
</compile_context>

<pallas_src>
import functools

import jax
import jax.numpy as jnp
from jax import lax
from jax.experimental import pallas as pl
from jax.experimental.pallas import tpu as pltpu


# ------------------------------ Pallas kernel ------------------------------

def _sem_att_kernel(xf_ref, m_left_ref, m_right_ref,
                    w_sem_ref, b_sem_ref, w_csem_ref, b_csem_ref,
                    m_eff_ref, vrow_ref, wv_ref, bv_ref, wdot_ref, bdot_ref,
                    g_pam_ref, g_cam_ref,
                    att_ref, sem_ref,
                    semp_scr, *, H, W, PAD):
    f32, bf16 = jnp.float32, jnp.bfloat16
    N = H * W
    NP = N + 2 * PAD

    # Column-wrap masks for horizontal taps of the flattened 3x3 convs
    # (vertical out-of-range taps land in the zero pad rows of the slab).
    m_left = m_left_ref[...]      # (N, 1): 0 where w == 0     (dw = -1 invalid)
    m_right = m_right_ref[...]    # (N, 1): 0 where w == W - 1 (dw = +1 invalid)

    def conv3x3(load_rows, w_ref, cin, cout):
        # 3x3 'same' conv as 9 row-shifted (N, cin) @ (cin, cout) MXU matmuls.
        acc = jnp.zeros((N, cout), f32)
        k = 0
        for dh in (-1, 0, 1):
            for dw in (-1, 0, 1):
                tap = load_rows(PAD + dh * W + dw)            # (N, cin) f32
                if dw == -1:
                    tap = tap * m_left
                elif dw == 1:
                    tap = tap * m_right
                wk = w_ref[k * cin:(k + 1) * cin, :]          # (cin, cout) bf16
                acc = acc + jnp.dot(tap.astype(bf16), wk,
                                    preferred_element_type=f32)
                k += 1
        return acc

    # ---- semantic module placeholder: 3x3 conv (64 -> 128) + ReLU ----------
    sem = conv3x3(lambda r: xf_ref[0, r:r + N, :], w_sem_ref, 64, 128)
    sem = jnp.maximum(sem + b_sem_ref[...], 0.0)              # (N, 128) f32
    sem_ref[0] = sem

    # Row-padded copy in VMEM so conv_sem never round-trips HBM.
    semp_scr[0:PAD, :] = jnp.zeros((PAD, 128), f32)
    semp_scr[PAD + N:NP, :] = jnp.zeros((PAD, 128), f32)
    semp_scr[PAD:PAD + N, :] = sem

    # ---- semModule_conv = conv_sem(semModule): 3x3 conv (128 -> 64) --------
    semconv = conv3x3(lambda r: semp_scr[r:r + N, :], w_csem_ref, 128, 64)
    semconv = semconv + b_csem_ref[...]                        # (N, 64) f32

    # ---- PAM (position attention); q/k folded into M = Wq Wk^T -------------
    x_f32 = xf_ref[0, PAD:PAD + N, :]                          # (N, 64) f32
    x = x_f32.astype(bf16)
    xt = x_f32.T.astype(bf16)                                  # (64, N), reused

    a = jnp.dot(x, m_eff_ref[...], preferred_element_type=f32) + vrow_ref[...]
    energy = jnp.dot(a.astype(bf16), xt, preferred_element_type=f32)   # (N, N)
    # TODO(synk): the (N, N) energy is held whole; for large feature maps this
    # should become flash-style key-block tiling with online softmax.
    energy = energy - jnp.max(energy, axis=-1, keepdims=True)
    p = jnp.exp(energy)
    attn = p * pl.reciprocal(jnp.sum(p, axis=-1, keepdims=True), approx=True)

    vproj = jnp.dot(x, wv_ref[...], preferred_element_type=f32) + bv_ref[...]
    pam = jnp.dot(attn.astype(bf16), vproj.astype(bf16),
                  preferred_element_type=f32)
    pam = g_pam_ref[...] * pam + x_f32

    # ---- CAM (channel attention) --------------------------------------------
    energy_c = jnp.dot(xt, x, preferred_element_type=f32)      # (64, 64)
    # DANet uses softmax(max - energy) == softmax(-energy); single stable shift.
    energy_c = jnp.min(energy_c, axis=-1, keepdims=True) - energy_c
    pc = jnp.exp(energy_c)
    attn_c = pc * pl.reciprocal(jnp.sum(pc, axis=-1, keepdims=True), approx=True)
    cam = lax.dot_general(x, attn_c.astype(bf16), (((1,), (1,)), ((), ())),
                          preferred_element_type=f32)          # x @ attn_c^T
    cam = g_cam_ref[...] * cam + x_f32

    # ---- attention = conv_dot((pam + cam) * semModule_conv) -----------------
    prod = ((pam + cam) * semconv).astype(bf16)
    att = jnp.dot(prod, wdot_ref[...], preferred_element_type=f32) + bdot_ref[...]
    att_ref[0] = att.astype(att_ref.dtype)


# --------------------------------- wrapper ---------------------------------

def conv3x3_weight_to_matmul(w):              # (Cout,Cin,3,3) -> (9*Cin, Cout)
    cout, cin = w.shape[:2]
    return jnp.transpose(w, (2, 3, 1, 0)).reshape(9 * cin, cout)


def conv1x1_weight_to_matmul(w):              # (Cout,Cin,1,1) -> (Cin, Cout)
    cout, cin = w.shape[:2]
    return w.reshape(cout, cin).T


def sem_att_block_forward(x, p):
    B, C, H, W = x.shape
    assert C == 64, "SemAttBlock requires 64 input channels"
    N = H * W
    PAD = ((W + 1 + 7) // 8) * 8              # >= W + 1, multiple of 8 sublanes
    NP = N + 2 * PAD
    bf16 = jnp.bfloat16

    # NHWC, flattened spatial, zero-padded rows (3x3 conv -> 9 row shifts).
    x2d = jnp.transpose(x, (0, 2, 3, 1)).reshape(B, N, C)
    xf = jnp.pad(x2d, ((0, 0), (PAD, PAD), (0, 0)))

    w_idx = jnp.arange(N, dtype=jnp.int32) % W
    m_left = (w_idx >= 1).astype(jnp.float32).reshape(N, 1)
    m_right = (w_idx <= W - 2).astype(jnp.float32).reshape(N, 1)

    w_sem = conv3x3_weight_to_matmul(p['w_sem']).astype(bf16)        # (576,128)
    b_sem = p['b_sem'].reshape(1, 128)
    w_csem = conv3x3_weight_to_matmul(p['w_conv_sem']).astype(bf16)  # (1152,64)
    b_csem = p['b_conv_sem'].reshape(1, 64)

    wq = conv1x1_weight_to_matmul(p['wq'])                            # (64, 8)
    wk = conv1x1_weight_to_matmul(p['wk'])                            # (64, 8)
    m_eff = (wq @ wk.T).astype(bf16)                                  # (64, 64)
    vrow = (wk @ p['bq']).reshape(1, C).astype(jnp.float32)           # (1, 64)
    wv = conv1x1_weight_to_matmul(p['wv']).astype(bf16)
    bv = p['bv'].reshape(1, C)
    wdot = conv1x1_weight_to_matmul(p['w_conv_dot']).astype(bf16)
    bdot = p['b_conv_dot'].reshape(1, C)
    g_pam = p['gamma_pam'].reshape(1, 1).astype(jnp.float32)
    g_cam = p['gamma_cam'].reshape(1, 1).astype(jnp.float32)

    args = (xf, m_left, m_right, w_sem, b_sem, w_csem, b_csem,
            m_eff, vrow, wv, bv, wdot, bdot, g_pam, g_cam)

    flops = 2 * B * N * (9 * C * 128 + 9 * 128 * C + 5 * C * C + 2 * N * C)
    transcendentals = B * (N * N + C * C + N + C)
    bytes_accessed = (sum(int(a.size) * a.dtype.itemsize for a in args)
                      + B * N * (C + 128) * 4)

    bcast2 = lambda *_: (0, 0)
    per_b3 = lambda b: (b, 0, 0)

    kernel = functools.partial(_sem_att_kernel, H=H, W=W, PAD=PAD)

    att, sem = pl.pallas_call(
        kernel,
        grid=(B,),
        in_specs=[
            pl.BlockSpec((1, NP, C), per_b3),         # padded x slab
            pl.BlockSpec((N, 1), bcast2),             # mask for dw = -1
            pl.BlockSpec((N, 1), bcast2),             # mask for dw = +1
            pl.BlockSpec((9 * C, 128), bcast2),       # w_sem (bf16)
            pl.BlockSpec((1, 128), bcast2),           # b_sem
            pl.BlockSpec((9 * 128, C), bcast2),       # w_conv_sem (bf16)
            pl.BlockSpec((1, C), bcast2),             # b_conv_sem
            pl.BlockSpec((C, C), bcast2),             # M = Wq Wk^T (bf16)
            pl.BlockSpec((1, C), bcast2),             # vrow = Wk bq
            pl.BlockSpec((C, C), bcast2),             # Wv (bf16)
            pl.BlockSpec((1, C), bcast2),             # bv
            pl.BlockSpec((C, C), bcast2),             # w_conv_dot (bf16)
            pl.BlockSpec((1, C), bcast2),             # b_conv_dot
            pl.BlockSpec((1, 1), bcast2),             # gamma_pam
            pl.BlockSpec((1, 1), bcast2),             # gamma_cam
        ],
        out_specs=[
            pl.BlockSpec((1, N, C), per_b3),
            pl.BlockSpec((1, N, 128), per_b3),
        ],
        out_shape=[
            jax.ShapeDtypeStruct((B, N, C), jnp.float32),      # attention
            jax.ShapeDtypeStruct((B, N, 128), jnp.float32),    # semModule
        ],
        scratch_shapes=[pltpu.VMEM((NP, 128), jnp.float32)],
        compiler_params=pltpu.CompilerParams(
            dimension_semantics=("parallel",),
            vmem_limit_bytes=32 * 1024 * 1024),
        cost_estimate=pl.CostEstimate(
            flops=flops, transcendentals=transcendentals,
            bytes_accessed=bytes_accessed),
    )(*args)

    # NCHW only at the API boundary (matches the PyTorch module's interface).
    attention = att.reshape(B, H, W, C).transpose(0, 3, 1, 2)
    semModule = sem.reshape(B, H, W, 128).transpose(0, 3, 1, 2)
    semVector = semModule.reshape(-1)
    return attention, semVector, semModule


def init_params(key, in_channels=64):
    ks = jax.random.split(key, 12)

    def conv_w(k, cout, cin, kh, kw):
        fan_in = cin * kh * kw
        return jax.random.normal(k, (cout, cin, kh, kw), jnp.float32) / jnp.sqrt(fan_in)

    def bias(k, n):
        return 0.05 * jax.random.normal(k, (n,), jnp.float32)

    c8 = in_channels // 8
    p = {}
    # PosChanAttModule (PAM + CAM) parameters.
    p['wq'] = conv_w(ks[0], c8, in_channels, 1, 1)
    p['bq'] = bias(ks[1], c8)
    p['wk'] = conv_w(ks[2], c8, in_channels, 1, 1)
    p['bk'] = bias(ks[3], c8)                 # cancels under row-softmax
    p['wv'] = conv_w(ks[4], in_channels, in_channels, 1, 1)
    p['bv'] = bias(ks[5], in_channels)
    # PyTorch DANet initializes gamma = 0; passed as runtime scalars so the
    # attention math is still executed (no constant folding of 0 * out).
    p['gamma_pam'] = jnp.zeros((1,), jnp.float32)
    p['gamma_cam'] = jnp.zeros((1,), jnp.float32)
    # Simplified semantic module: 3x3 conv 64 -> 128 + ReLU.
    p['w_sem'] = conv_w(ks[6], 128, in_channels, 3, 3)
    p['b_sem'] = bias(ks[7], 128)
    # conv_sem: 3x3 conv 128 -> 64, padding 1.
    p['w_conv_sem'] = conv_w(ks[8], 64, 128, 3, 3)
    p['b_conv_sem'] = bias(ks[9], 64)
    # conv_dot: 1x1 conv 64 -> 64.
    p['w_conv_dot'] = conv_w(ks[10], 64, 64, 1, 1)
    p['b_conv_dot'] = bias(ks[11], 64)
    return p


if __name__ == "__main__":
    key = jax.random.PRNGKey(0)
    kx, kp = jax.random.split(key)
    B, C, H, W = 2, 64, 16, 16
    x = jax.random.normal(kx, (B, C, H, W), jnp.float32)
    params = init_params(kp, in_channels=C)

    fwd = jax.jit(lambda xx: sem_att_block_forward(xx, params))
    attention, semVector, semModule = fwd(x)
    jax.block_until_ready((attention, semVector, semModule))

    assert attention.shape == (B, 64, H, W)
    assert semModule.shape == (B, 128, H, W)
    assert semVector.shape == (B * 128 * H * W,)
    assert bool(jnp.all(jnp.isfinite(attention)))
    assert bool(jnp.all(jnp.isfinite(semModule)))
    print("KERNEL_OK")
</pallas_src>

<mosaic_0001>
module attributes {stable_mosaic.version = 11 : i64} {
  func.func @_sem_att_kernel(%arg0: i32, %arg1: memref<1x304x64xf32, #tpu.memory_space<vmem>>, %arg2: memref<256x1xf32, #tpu.memory_space<vmem>>, %arg3: memref<256x1xf32, #tpu.memory_space<vmem>>, %arg4: memref<576x128xbf16, #tpu.memory_space<vmem>>, %arg5: memref<1x128xf32, #tpu.memory_space<vmem>>, %arg6: memref<1152x64xbf16, #tpu.memory_space<vmem>>, %arg7: memref<1x64xf32, #tpu.memory_space<vmem>>, %arg8: memref<64x64xbf16, #tpu.memory_space<vmem>>, %arg9: memref<1x64xf32, #tpu.memory_space<vmem>>, %arg10: memref<64x64xbf16, #tpu.memory_space<vmem>>, %arg11: memref<1x64xf32, #tpu.memory_space<vmem>>, %arg12: memref<64x64xbf16, #tpu.memory_space<vmem>>, %arg13: memref<1x64xf32, #tpu.memory_space<vmem>>, %arg14: memref<1x1xf32, #tpu.memory_space<vmem>>, %arg15: memref<1x1xf32, #tpu.memory_space<vmem>>, %arg16: memref<1x256x64xf32, #tpu.memory_space<vmem>>, %arg17: memref<1x256x128xf32, #tpu.memory_space<vmem>>, %arg18: memref<304x128xf32, #tpu.memory_space<vmem>>) attributes {dimension_semantics = [#tpu.dimension_semantics<parallel>], iteration_bounds = array<i64: 2>, scalar_prefetch = 0 : i64, scratch_operands = 1 : i64, tpu.core_type = #tpu.core_type<tc>, window_params = [{transform_indices = @transform_0, window_bounds = array<i64: 1, 304, 64>}, {pipeline_mode = #tpu.pipeline_mode<synchronous>, transform_indices = @transform_1, window_bounds = array<i64: 256, 1>}, {pipeline_mode = #tpu.pipeline_mode<synchronous>, transform_indices = @transform_2, window_bounds = array<i64: 256, 1>}, {pipeline_mode = #tpu.pipeline_mode<synchronous>, transform_indices = @transform_3, window_bounds = array<i64: 576, 128>}, {pipeline_mode = #tpu.pipeline_mode<synchronous>, transform_indices = @transform_4, window_bounds = array<i64: 1, 128>}, {pipeline_mode = #tpu.pipeline_mode<synchronous>, transform_indices = @transform_5, window_bounds = array<i64: 1152, 64>}, {pipeline_mode = #tpu.pipeline_mode<synchronous>, transform_indices = @transform_6, window_bounds = array<i64: 1, 64>}, {pipeline_mode = #tpu.pipeline_mode<synchronous>, transform_indices = @transform_7, window_bounds = array<i64: 64, 64>}, {pipeline_mode = #tpu.pipeline_mode<synchronous>, transform_indices = @transform_8, window_bounds = array<i64: 1, 64>}, {pipeline_mode = #tpu.pipeline_mode<synchronous>, transform_indices = @transform_9, window_bounds = array<i64: 64, 64>}, {pipeline_mode = #tpu.pipeline_mode<synchronous>, transform_indices = @transform_10, window_bounds = array<i64: 1, 64>}, {pipeline_mode = #tpu.pipeline_mode<synchronous>, transform_indices = @transform_11, window_bounds = array<i64: 64, 64>}, {pipeline_mode = #tpu.pipeline_mode<synchronous>, transform_indices = @transform_12, window_bounds = array<i64: 1, 64>}, {pipeline_mode = #tpu.pipeline_mode<synchronous>, transform_indices = @transform_13, window_bounds = array<i64: 1, 1>}, {pipeline_mode = #tpu.pipeline_mode<synchronous>, transform_indices = @transform_14, window_bounds = array<i64: 1, 1>}, {transform_indices = @transform_15, window_bounds = array<i64: 1, 256, 64>}, {transform_indices = @transform_16, window_bounds = array<i64: 1, 256, 128>}]} {
    %c0 = arith.constant 0 : index
    %c0_0 = arith.constant 0 : index
    %0 = vector.load %arg2[%c0, %c0_0] : memref<256x1xf32, #tpu.memory_space<vmem>>, vector<256x1xf32>
    %c0_1 = arith.constant 0 : index
    %c0_2 = arith.constant 0 : index
    %1 = vector.load %arg3[%c0_1, %c0_2] : memref<256x1xf32, #tpu.memory_space<vmem>>, vector<256x1xf32>
    %cst = arith.constant 0.000000e+00 : f32
    %2 = vector.broadcast %cst : f32 to vector<256x128xf32>
    %c0_3 = arith.constant 0 : index
    %c7 = arith.constant 7 : index
    %c0_4 = arith.constant 0 : index
    %3 = vector.load %arg1[%c0_3, %c7, %c0_4] : memref<1x304x64xf32, #tpu.memory_space<vmem>>, vector<1x256x64xf32>
    %4 = vector.shape_cast %3 : vector<1x256x64xf32> to vector<256x64xf32>
    %5 = vector.broadcast %0 : vector<256x1xf32> to vector<256x64xf32>
    %6 = arith.mulf %4, %5 : vector<256x64xf32>
    %c0_5 = arith.constant 0 : index
    %c0_6 = arith.constant 0 : index
    %7 = vector.load %arg4[%c0_5, %c0_6] : memref<576x128xbf16, #tpu.memory_space<vmem>>, vector<64x128xbf16>
    %8 = arith.truncf %6 : vector<256x64xf32> to vector<256x64xbf16>
    %cst_7 = arith.constant dense<0.000000e+00> : vector<256x128xf32>
    %9 = tpu.matmul %8, %7, %cst_7 {dimension_numbers = #tpu.dot_dimension_numbers<[1], [0], [0], [1], [0, 0, 1, 1], [], []>} : vector<256x64xbf16>, vector<64x128xbf16>, vector<256x128xf32> -> vector<256x128xf32>
    %10 = arith.addf %2, %9 : vector<256x128xf32>
    %c0_8 = arith.constant 0 : index
    %c8 = arith.constant 8 : index
    %c0_9 = arith.constant 0 : index
    %11 = vector.load %arg1[%c0_8, %c8, %c0_9] : memref<1x304x64xf32, #tpu.memory_space<vmem>>, vector<1x256x64xf32>
    %12 = vector.shape_cast %11 : vector<1x256x64xf32> to vector<256x64xf32>
    %c64 = arith.constant 64 : index
    %c0_10 = arith.constant 0 : index
    %13 = vector.load %arg4[%c64, %c0_10] : memref<576x128xbf16, #tpu.memory_space<vmem>>, vector<64x128xbf16>
    %14 = arith.truncf %12 : vector<256x64xf32> to vector<256x64xbf16>
    %cst_11 = arith.constant dense<0.000000e+00> : vector<256x128xf32>
    %15 = tpu.matmul %14, %13, %cst_11 {dimension_numbers = #tpu.dot_dimension_numbers<[1], [0], [0], [1], [0, 0, 1, 1], [], []>} : vector<256x64xbf16>, vector<64x128xbf16>, vector<256x128xf32> -> vector<256x128xf32>
    %16 = arith.addf %10, %15 : vector<256x128xf32>
    %c0_12 = arith.constant 0 : index
    %c9 = arith.constant 9 : index
    %c0_13 = arith.constant 0 : index
    %17 = vector.load %arg1[%c0_12, %c9, %c0_13] : memref<1x304x64xf32, #tpu.memory_space<vmem>>, vector<1x256x64xf32>
    %18 = vector.shape_cast %17 : vector<1x256x64xf32> to vector<256x64xf32>
    %19 = vector.broadcast %1 : vector<256x1xf32> to vector<256x64xf32>
    %20 = arith.mulf %18, %19 : vector<256x64xf32>
    %c128 = arith.constant 128 : index
    %c0_14 = arith.constant 0 : index
    %21 = vector.load %arg4[%c128, %c0_14] : memref<576x128xbf16, #tpu.memory_space<vmem>>, vector<64x128xbf16>
    %22 = arith.truncf %20 : vector<256x64xf32> to vector<256x64xbf16>
    %cst_15 = arith.constant dense<0.000000e+00> : vector<256x128xf32>
    %23 = tpu.matmul %22, %21, %cst_15 {dimension_numbers = #tpu.dot_dimension_numbers<[1], [0], [0], [1], [0, 0, 1, 1], [], []>} : vector<256x64xbf16>, vector<64x128xbf16>, vector<256x128xf32> -> vector<256x128xf32>
    %24 = arith.addf %16, %23 : vector<256x128xf32>
    %c0_16 = arith.constant 0 : index
    %c23 = arith.constant 23 : index
    %c0_17 = arith.constant 0 : index
    %25 = vector.load %arg1[%c0_16, %c23, %c0_17] : memref<1x304x64xf32, #tpu.memory_space<vmem>>, vector<1x256x64xf32>
    %26 = vector.shape_cast %25 : vector<1x256x64xf32> to vector<256x64xf32>
    %27 = vector.broadcast %0 : vector<256x1xf32> to vector<256x64xf32>
    %28 = arith.mulf %26, %27 : vector<256x64xf32>
    %c192 = arith.constant 192 : index
    %c0_18 = arith.constant 0 : index
    %29 = vector.load %arg4[%c192, %c0_18] : memref<576x128xbf16, #tpu.memory_space<vmem>>, vector<64x128xbf16>
    %30 = arith.truncf %28 : vector<256x64xf32> to vector<256x64xbf16>
    %cst_19 = arith.constant dense<0.000000e+00> : vector<256x128xf32>
    %31 = tpu.matmul %30, %29, %cst_19 {dimension_numbers = #tpu.dot_dimension_numbers<[1], [0], [0], [1], [0, 0, 1, 1], [], []>} : vector<256x64xbf16>, vector<64x128xbf16>, vector<256x128xf32> -> vector<256x128xf32>
    %32 = arith.addf %24, %31 : vector<256x128xf32>
    %c0_20 = arith.constant 0 : index
    %c24 = arith.constant 24 : index
    %c0_21 = arith.constant 0 : index
    %33 = vector.load %arg1[%c0_20, %c24, %c0_21] : memref<1x304x64xf32, #tpu.memory_space<vmem>>, vector<1x256x64xf32>
    %34 = vector.shape_cast %33 : vector<1x256x64xf32> to vector<256x64xf32>
    %c256 = arith.constant 256 : index
    %c0_22 = arith.constant 0 : index
    %35 = vector.load %arg4[%c256, %c0_22] : memref<576x128xbf16, #tpu.memory_space<vmem>>, vector<64x128xbf16>
    %36 = arith.truncf %34 : vector<256x64xf32> to vector<256x64xbf16>
    %cst_23 = arith.constant dense<0.000000e+00> : vector<256x128xf32>
    %37 = tpu.matmul %36, %35, %cst_23 {dimension_numbers = #tpu.dot_dimension_numbers<[1], [0], [0], [1], [0, 0, 1, 1], [], []>} : vector<256x64xbf16>, vector<64x128xbf16>, vector<256x128xf32> -> vector<256x128xf32>
    %38 = arith.addf %32, %37 : vector<256x128xf32>
    %c0_24 = arith.constant 0 : index
    %c25 = arith.constant 25 : index
    %c0_25 = arith.constant 0 : index
    %39 = vector.load %arg1[%c0_24, %c25, %c0_25] : memref<1x304x64xf32, #tpu.memory_space<vmem>>, vector<1x256x64xf32>
    %40 = vector.shape_cast %39 : vector<1x256x64xf32> to vector<256x64xf32>
    %41 = vector.broadcast %1 : vector<256x1xf32> to vector<256x64xf32>
    %42 = arith.mulf %40, %41 : vector<256x64xf32>
    %c320 = arith.constant 320 : index
    %c0_26 = arith.constant 0 : index
    %43 = vector.load %arg4[%c320, %c0_26] : memref<576x128xbf16, #tpu.memory_space<vmem>>, vector<64x128xbf16>
    %44 = arith.truncf %42 : vector<256x64xf32> to vector<256x64xbf16>
    %cst_27 = arith.constant dense<0.000000e+00> : vector<256x128xf32>
    %45 = tpu.matmul %44, %43, %cst_27 {dimension_numbers = #tpu.dot_dimension_numbers<[1], [0], [0], [1], [0, 0, 1, 1], [], []>} : vector<256x64xbf16>, vector<64x128xbf16>, vector<256x128xf32> -> vector<256x128xf32>
    %46 = arith.addf %38, %45 : vector<256x128xf32>
    %c0_28 = arith.constant 0 : index
    %c39 = arith.constant 39 : index
    %c0_29 = arith.constant 0 : index
    %47 = vector.load %arg1[%c0_28, %c39, %c0_29] : memref<1x304x64xf32, #tpu.memory_space<vmem>>, vector<1x256x64xf32>
    %48 = vector.shape_cast %47 : vector<1x256x64xf32> to vector<256x64xf32>
    %49 = vector.broadcast %0 : vector<256x1xf32> to vector<256x64xf32>
    %50 = arith.mulf %48, %49 : vector<256x64xf32>
    %c384 = arith.constant 384 : index
    %c0_30 = arith.constant 0 : index
    %51 = vector.load %arg4[%c384, %c0_30] : memref<576x128xbf16, #tpu.memory_space<vmem>>, vector<64x128xbf16>
    %52 = arith.truncf %50 : vector<256x64xf32> to vector<256x64xbf16>
    %cst_31 = arith.constant dense<0.000000e+00> : vector<256x128xf32>
    %53 = tpu.matmul %52, %51, %cst_31 {dimension_numbers = #tpu.dot_dimension_numbers<[1], [0], [0], [1], [0, 0, 1, 1], [], []>} : vector<256x64xbf16>, vector<64x128xbf16>, vector<256x128xf32> -> vector<256x128xf32>
    %54 = arith.addf %46, %53 : vector<256x128xf32>
    %c0_32 = arith.constant 0 : index
    %c40 = arith.constant 40 : index
    %c0_33 = arith.constant 0 : index
    %55 = vector.load %arg1[%c0_32, %c40, %c0_33] : memref<1x304x64xf32, #tpu.memory_space<vmem>>, vector<1x256x64xf32>
    %56 = vector.shape_cast %55 : vector<1x256x64xf32> to vector<256x64xf32>
    %c448 = arith.constant 448 : index
    %c0_34 = arith.constant 0 : index
    %57 = vector.load %arg4[%c448, %c0_34] : memref<576x128xbf16, #tpu.memory_space<vmem>>, vector<64x128xbf16>
    %58 = arith.truncf %56 : vector<256x64xf32> to vector<256x64xbf16>
    %cst_35 = arith.constant dense<0.000000e+00> : vector<256x128xf32>
    %59 = tpu.matmul %58, %57, %cst_35 {dimension_numbers = #tpu.dot_dimension_numbers<[1], [0], [0], [1], [0, 0, 1, 1], [], []>} : vector<256x64xbf16>, vector<64x128xbf16>, vector<256x128xf32> -> vector<256x128xf32>
    %60 = arith.addf %54, %59 : vector<256x128xf32>
    %c0_36 = arith.constant 0 : index
    %c41 = arith.constant 41 : index
    %c0_37 = arith.constant 0 : index
    %61 = vector.load %arg1[%c0_36, %c41, %c0_37] : memref<1x304x64xf32, #tpu.memory_space<vmem>>, vector<1x256x64xf32>
    %62 = vector.shape_cast %61 : vector<1x256x64xf32> to vector<256x64xf32>
    %63 = vector.broadcast %1 : vector<256x1xf32> to vector<256x64xf32>
    %64 = arith.mulf %62, %63 : vector<256x64xf32>
    %c512 = arith.constant 512 : index
    %c0_38 = arith.constant 0 : index
    %65 = vector.load %arg4[%c512, %c0_38] : memref<576x128xbf16, #tpu.memory_space<vmem>>, vector<64x128xbf16>
    %66 = arith.truncf %64 : vector<256x64xf32> to vector<256x64xbf16>
    %cst_39 = arith.constant dense<0.000000e+00> : vector<256x128xf32>
    %67 = tpu.matmul %66, %65, %cst_39 {dimension_numbers = #tpu.dot_dimension_numbers<[1], [0], [0], [1], [0, 0, 1, 1], [], []>} : vector<256x64xbf16>, vector<64x128xbf16>, vector<256x128xf32> -> vector<256x128xf32>
    %68 = arith.addf %60, %67 : vector<256x128xf32>
    %c0_40 = arith.constant 0 : index
    %c0_41 = arith.constant 0 : index
    %69 = vector.load %arg5[%c0_40, %c0_41] : memref<1x128xf32, #tpu.memory_space<vmem>>, vector<1x128xf32>
    %70 = vector.broadcast %69 : vector<1x128xf32> to vector<256x128xf32>
    %71 = arith.addf %68, %70 : vector<256x128xf32>
    %cst_42 = arith.constant 0.000000e+00 : f32
    %72 = vector.broadcast %cst_42 : f32 to vector<256x128xf32>
    %73 = arith.maximumf %71, %72 : vector<256x128xf32>
    %c0_43 = arith.constant 0 : index
    %c0_44 = arith.constant 0 : index
    %c0_45 = arith.constant 0 : index
    %74 = vector.load %arg17[%c0_43, %c0_44, %c0_45] : memref<1x256x128xf32, #tpu.memory_space<vmem>>, vector<1x256x128xf32>
    %75 = vector.shape_cast %74 : vector<1x256x128xf32> to vector<256x128xf32>
    %76 = vector.shape_cast %73 : vector<256x128xf32> to vector<1x256x128xf32>
    tpu.vector_store %arg17[%c0_43, %c0_44, %c0_45], %76 {strides = array<i32>} : memref<1x256x128xf32, #tpu.memory_space<vmem>>, vector<1x256x128xf32>,
    %cst_46 = arith.constant 0.000000e+00 : f32
    %77 = vector.broadcast %cst_46 : f32 to vector<24x128xf32>
    %c0_47 = arith.constant 0 : index
    %c0_48 = arith.constant 0 : index
    %78 = vector.load %arg18[%c0_47, %c0_48] : memref<304x128xf32, #tpu.memory_space<vmem>>, vector<24x128xf32>
    tpu.vector_store %arg18[%c0_47, %c0_48], %77 {strides = array<i32>} : memref<304x128xf32, #tpu.memory_space<vmem>>, vector<24x128xf32>,
    %cst_49 = arith.constant 0.000000e+00 : f32
    %79 = vector.broadcast %cst_49 : f32 to vector<24x128xf32>
    %c280 = arith.constant 280 : index
    %c0_50 = arith.constant 0 : index
    %80 = vector.load %arg18[%c280, %c0_50] : memref<304x128xf32, #tpu.memory_space<vmem>>, vector<24x128xf32>
    tpu.vector_store %arg18[%c280, %c0_50], %79 {strides = array<i32>} : memref<304x128xf32, #tpu.memory_space<vmem>>, vector<24x128xf32>,
    %c24_51 = arith.constant 24 : index
    %c0_52 = arith.constant 0 : index
    %81 = vector.load %arg18[%c24_51, %c0_52] : memref<304x128xf32, #tpu.memory_space<vmem>>, vector<256x128xf32>
    tpu.vector_store %arg18[%c24_51, %c0_52], %73 {strides = array<i32>} : memref<304x128xf32, #tpu.memory_space<vmem>>, vector<256x128xf32>,
    %cst_53 = arith.constant 0.000000e+00 : f32
    %82 = vector.broadcast %cst_53 : f32 to vector<256x64xf32>
    %c7_54 = arith.constant 7 : index
    %c0_55 = arith.constant 0 : index
    %83 = vector.load %arg18[%c7_54, %c0_55] : memref<304x128xf32, #tpu.memory_space<vmem>>, vector<256x128xf32>
    %84 = vector.broadcast %0 : vector<256x1xf32> to vector<256x128xf32>
    %85 = arith.mulf %83, %84 : vector<256x128xf32>
    %c0_56 = arith.constant 0 : index
    %c0_57 = arith.constant 0 : index
    %86 = vector.load %arg6[%c0_56, %c0_57] : memref<1152x64xbf16, #tpu.memory_space<vmem>>, vector<128x64xbf16>
    %87 = arith.truncf %85 : vector<256x128xf32> to vector<256x128xbf16>
    %cst_58 = arith.constant dense<0.000000e+00> : vector<256x64xf32>
    %88 = tpu.matmul %87, %86, %cst_58 {dimension_numbers = #tpu.dot_dimension_numbers<[1], [0], [0], [1], [0, 0, 1, 1], [], []>} : vector<256x128xbf16>, vector<128x64xbf16>, vector<256x64xf32> -> vector<256x64xf32>
    %89 = arith.addf %82, %88 : vector<256x64xf32>
    %c8_59 = arith.constant 8 : index
    %c0_60 = arith.constant 0 : index
    %90 = vector.load %arg18[%c8_59, %c0_60] : memref<304x128xf32, #tpu.memory_space<vmem>>, vector<256x128xf32>
    %c128_61 = arith.constant 128 : index
    %c0_62 = arith.constant 0 : index
    %91 = vector.load %arg6[%c128_61, %c0_62] : memref<1152x64xbf16, #tpu.memory_space<vmem>>, vector<128x64xbf16>
    %92 = arith.truncf %90 : vector<256x128xf32> to vector<256x128xbf16>
    %cst_63 = arith.constant dense<0.000000e+00> : vector<256x64xf32>
    %93 = tpu.matmul %92, %91, %cst_63 {dimension_numbers = #tpu.dot_dimension_numbers<[1], [0], [0], [1], [0, 0, 1, 1], [], []>} : vector<256x128xbf16>, vector<128x64xbf16>, vector<256x64xf32> -> vector<256x64xf32>
    %94 = arith.addf %89, %93 : vector<256x64xf32>
    %c9_64 = arith.constant 9 : index
    %c0_65 = arith.constant 0 : index
    %95 = vector.load %arg18[%c9_64, %c0_65] : memref<304x128xf32, #tpu.memory_space<vmem>>, vector<256x128xf32>
    %96 = vector.broadcast %1 : vector<256x1xf32> to vector<256x128xf32>
    %97 = arith.mulf %95, %96 : vector<256x128xf32>
    %c256_66 = arith.constant 256 : index
    %c0_67 = arith.constant 0 : index
    %98 = vector.load %arg6[%c256_66, %c0_67] : memref<1152x64xbf16, #tpu.memory_space<vmem>>, vector<128x64xbf16>
    %99 = arith.truncf %97 : vector<256x128xf32> to vector<256x128xbf16>
    %cst_68 = arith.constant dense<0.000000e+00> : vector<256x64xf32>
    %100 = tpu.matmul %99, %98, %cst_68 {dimension_numbers = #tpu.dot_dimension_numbers<[1], [0], [0], [1], [0, 0, 1, 1], [], []>} : vector<256x128xbf16>, vector<128x64xbf16>, vector<256x64xf32> -> vector<256x64xf32>
    %101 = arith.addf %94, %100 : vector<256x64xf32>
    %c23_69 = arith.constant 23 : index
    %c0_70 = arith.constant 0 : index
    %102 = vector.load %arg18[%c23_69, %c0_70] : memref<304x128xf32, #tpu.memory_space<vmem>>, vector<256x128xf32>
    %103 = vector.broadcast %0 : vector<256x1xf32> to vector<256x128xf32>
    %104 = arith.mulf %102, %103 : vector<256x128xf32>
    %c384_71 = arith.constant 384 : index
    %c0_72 = arith.constant 0 : index
    %105 = vector.load %arg6[%c384_71, %c0_72] : memref<1152x64xbf16, #tpu.memory_space<vmem>>, vector<128x64xbf16>
    %106 = arith.truncf %104 : vector<256x128xf32> to vector<256x128xbf16>
    %cst_73 = arith.constant dense<0.000000e+00> : vector<256x64xf32>
    %107 = tpu.matmul %106, %105, %cst_73 {dimension_numbers = #tpu.dot_dimension_numbers<[1], [0], [0], [1], [0, 0, 1, 1], [], []>} : vector<256x128xbf16>, vector<128x64xbf16>, vector<256x64xf32> -> vector<256x64xf32>
    %108 = arith.addf %101, %107 : vector<256x64xf32>
    %c24_74 = arith.constant 24 : index
    %c0_75 = arith.constant 0 : index
    %109 = vector.load %arg18[%c24_74, %c0_75] : memref<304x128xf32, #tpu.memory_space<vmem>>, vector<256x128xf32>
    %c512_76 = arith.constant 512 : index
    %c0_77 = arith.constant 0 : index
    %110 = vector.load %arg6[%c512_76, %c0_77] : memref<1152x64xbf16, #tpu.memory_space<vmem>>, vector<128x64xbf16>
    %111 = arith.truncf %109 : vector<256x128xf32> to vector<256x128xbf16>
    %cst_78 = arith.constant dense<0.000000e+00> : vector<256x64xf32>
    %112 = tpu.matmul %111, %110, %cst_78 {dimension_numbers = #tpu.dot_dimension_numbers<[1], [0], [0], [1], [0, 0, 1, 1], [], []>} : vector<256x128xbf16>, vector<128x64xbf16>, vector<256x64xf32> -> vector<256x64xf32>
    %113 = arith.addf %108, %112 : vector<256x64xf32>
    %c25_79 = arith.constant 25 : index
    %c0_80 = arith.constant 0 : index
    %114 = vector.load %arg18[%c25_79, %c0_80] : memref<304x128xf32, #tpu.memory_space<vmem>>, vector<256x128xf32>
    %115 = vector.broadcast %1 : vector<256x1xf32> to vector<256x128xf32>
    %116 = arith.mulf %114, %115 : vector<256x128xf32>
    %c640 = arith.constant 640 : index
    %c0_81 = arith.constant 0 : index
    %117 = vector.load %arg6[%c640, %c0_81] : memref<1152x64xbf16, #tpu.memory_space<vmem>>, vector<128x64xbf16>
    %118 = arith.truncf %116 : vector<256x128xf32> to vector<256x128xbf16>
    %cst_82 = arith.constant dense<0.000000e+00> : vector<256x64xf32>
    %119 = tpu.matmul %118, %117, %cst_82 {dimension_numbers = #tpu.dot_dimension_numbers<[1], [0], [0], [1], [0, 0, 1, 1], [], []>} : vector<256x128xbf16>, vector<128x64xbf16>, vector<256x64xf32> -> vector<256x64xf32>
    %120 = arith.addf %113, %119 : vector<256x64xf32>
    %c39_83 = arith.constant 39 : index
    %c0_84 = arith.constant 0 : index
    %121 = vector.load %arg18[%c39_83, %c0_84] : memref<304x128xf32, #tpu.memory_space<vmem>>, vector<256x128xf32>
    %122 = vector.broadcast %0 : vector<256x1xf32> to vector<256x128xf32>
    %123 = arith.mulf %121, %122 : vector<256x128xf32>
    %c768 = arith.constant 768 : index
    %c0_85 = arith.constant 0 : index
    %124 = vector.load %arg6[%c768, %c0_85] : memref<1152x64xbf16, #tpu.memory_space<vmem>>, vector<128x64xbf16>
    %125 = arith.truncf %123 : vector<256x128xf32> to vector<256x128xbf16>
    %cst_86 = arith.constant dense<0.000000e+00> : vector<256x64xf32>
    %126 = tpu.matmul %125, %124, %cst_86 {dimension_numbers = #tpu.dot_dimension_numbers<[1], [0], [0], [1], [0, 0, 1, 1], [], []>} : vector<256x128xbf16>, vector<128x64xbf16>, vector<256x64xf32> -> vector<256x64xf32>
    %127 = arith.addf %120, %126 : vector<256x64xf32>
    %c40_87 = arith.constant 40 : index
    %c0_88 = arith.constant 0 : index
    %128 = vector.load %arg18[%c40_87, %c0_88] : memref<304x128xf32, #tpu.memory_space<vmem>>, vector<256x128xf32>
    %c896 = arith.constant 896 : index
    %c0_89 = arith.constant 0 : index
    %129 = vector.load %arg6[%c896, %c0_89] : memref<1152x64xbf16, #tpu.memory_space<vmem>>, vector<128x64xbf16>
    %130 = arith.truncf %128 : vector<256x128xf32> to vector<256x128xbf16>
    %cst_90 = arith.constant dense<0.000000e+00> : vector<256x64xf32>
    %131 = tpu.matmul %130, %129, %cst_90 {dimension_numbers = #tpu.dot_dimension_numbers<[1], [0], [0], [1], [0, 0, 1, 1], [], []>} : vector<256x128xbf16>, vector<128x64xbf16>, vector<256x64xf32> -> vector<256x64xf32>
    %132 = arith.addf %127, %131 : vector<256x64xf32>
    %c41_91 = arith.constant 41 : index
    %c0_92 = arith.constant 0 : index
    %133 = vector.load %arg18[%c41_91, %c0_92] : memref<304x128xf32, #tpu.memory_space<vmem>>, vector<256x128xf32>
    %134 = vector.broadcast %1 : vector<256x1xf32> to vector<256x128xf32>
    %135 = arith.mulf %133, %134 : vector<256x128xf32>
    %c1024 = arith.constant 1024 : index
    %c0_93 = arith.constant 0 : index
    %136 = vector.load %arg6[%c1024, %c0_93] : memref<1152x64xbf16, #tpu.memory_space<vmem>>, vector<128x64xbf16>
    %137 = arith.truncf %135 : vector<256x128xf32> to vector<256x128xbf16>
    %cst_94 = arith.constant dense<0.000000e+00> : vector<256x64xf32>
    %138 = tpu.matmul %137, %136, %cst_94 {dimension_numbers = #tpu.dot_dimension_numbers<[1], [0], [0], [1], [0, 0, 1, 1], [], []>} : vector<256x128xbf16>, vector<128x64xbf16>, vector<256x64xf32> -> vector<256x64xf32>
    %139 = arith.addf %132, %138 : vector<256x64xf32>
    %c0_95 = arith.constant 0 : index
    %c0_96 = arith.constant 0 : index
    %140 = vector.load %arg7[%c0_95, %c0_96] : memref<1x64xf32, #tpu.memory_space<vmem>>, vector<1x64xf32>
    %141 = vector.broadcast %140 : vector<1x64xf32> to vector<256x64xf32>
    %142 = arith.addf %139, %141 : vector<256x64xf32>
    %c0_97 = arith.constant 0 : index
    %c24_98 = arith.constant 24 : index
    %c0_99 = arith.constant 0 : index
    %143 = vector.load %arg1[%c0_97, %c24_98, %c0_99] : memref<1x304x64xf32, #tpu.memory_space<vmem>>, vector<1x256x64xf32>
    %144 = vector.shape_cast %143 : vector<1x256x64xf32> to vector<256x64xf32>
    %145 = arith.truncf %144 : vector<256x64xf32> to vector<256x64xbf16>
    %146 = tpu.transpose %144, [1, 0] : vector<256x64xf32> -> vector<64x256xf32>
    %147 = arith.truncf %146 : vector<64x256xf32> to vector<64x256xbf16>
    %c0_100 = arith.constant 0 : index
    %c0_101 = arith.constant 0 : index
    %148 = vector.load %arg8[%c0_100, %c0_101] : memref<64x64xbf16, #tpu.memory_space<vmem>>, vector<64x64xbf16>
    %cst_102 = arith.constant dense<0.000000e+00> : vector<256x64xf32>
    %149 = tpu.matmul %145, %148, %cst_102 {dimension_numbers = #tpu.dot_dimension_numbers<[1], [0], [0], [1], [0, 0, 1, 1], [], []>} : vector<256x64xbf16>, vector<64x64xbf16>, vector<256x64xf32> -> vector<256x64xf32>
    %c0_103 = arith.constant 0 : index
    %c0_104 = arith.constant 0 : index
    %150 = vector.load %arg9[%c0_103, %c0_104] : memref<1x64xf32, #tpu.memory_space<vmem>>, vector<1x64xf32>
    %151 = vector.broadcast %150 : vector<1x64xf32> to vector<256x64xf32>
    %152 = arith.addf %149, %151 : vector<256x64xf32>
    %153 = arith.truncf %152 : vector<256x64xf32> to vector<256x64xbf16>
    %cst_105 = arith.constant dense<0.000000e+00> : vector<256x256xf32>
    %154 = tpu.matmul %153, %147, %cst_105 {dimension_numbers = #tpu.dot_dimension_numbers<[1], [0], [0], [1], [0, 0, 1, 1], [], []>} : vector<256x64xbf16>, vector<64x256xbf16>, vector<256x256xf32> -> vector<256x256xf32>
    %cst_106 = arith.constant dense<0xFF800000> : vector<256xf32>
    %155 = vector.multi_reduction <maximumf>, %154, %cst_106 [1] : vector<256x256xf32> to vector<256xf32>
    %156 = vector.shape_cast %155 : vector<256xf32> to vector<256x1xf32>
    %157 = vector.broadcast %156 : vector<256x1xf32> to vector<256x256xf32>
    %158 = arith.subf %154, %157 : vector<256x256xf32>
    %159 = math.exp %158 : vector<256x256xf32>
    %cst_107 = arith.constant dense<0.000000e+00> : vector<256xf32>
    %160 = vector.multi_reduction <add>, %159, %cst_107 [1] : vector<256x256xf32> to vector<256xf32>
    %161 = vector.shape_cast %160 : vector<256xf32> to vector<256x1xf32>
    %162 = tpu.reciprocal %161 {approx = true} : vector<256x1xf32> -> vector<256x1xf32>
    %163 = vector.broadcast %162 : vector<256x1xf32> to vector<256x256xf32>
    %164 = arith.mulf %159, %163 : vector<256x256xf32>
    %c0_108 = arith.constant 0 : index
    %c0_109 = arith.constant 0 : index
    %165 = vector.load %arg10[%c0_108, %c0_109] : memref<64x64xbf16, #tpu.memory_space<vmem>>, vector<64x64xbf16>
    %cst_110 = arith.constant dense<0.000000e+00> : vector<256x64xf32>
    %166 = tpu.matmul %145, %165, %cst_110 {dimension_numbers = #tpu.dot_dimension_numbers<[1], [0], [0], [1], [0, 0, 1, 1], [], []>} : vector<256x64xbf16>, vector<64x64xbf16>, vector<256x64xf32> -> vector<256x64xf32>
    %c0_111 = arith.constant 0 : index
    %c0_112 = arith.constant 0 : index
    %167 = vector.load %arg11[%c0_111, %c0_112] : memref<1x64xf32, #tpu.memory_space<vmem>>, vector<1x64xf32>
    %168 = vector.broadcast %167 : vector<1x64xf32> to vector<256x64xf32>
    %169 = arith.addf %166, %168 : vector<256x64xf32>
    %170 = arith.truncf %164 : vector<256x256xf32> to vector<256x256xbf16>
    %171 = arith.truncf %169 : vector<256x64xf32> to vector<256x64xbf16>
    %cst_113 = arith.constant dense<0.000000e+00> : vector<256x64xf32>
    %172 = tpu.matmul %170, %171, %cst_113 {dimension_numbers = #tpu.dot_dimension_numbers<[1], [0], [0], [1], [0, 0, 1, 1], [], []>} : vector<256x256xbf16>, vector<256x64xbf16>, vector<256x64xf32> -> vector<256x64xf32>
    %c0_114 = arith.constant 0 : index
    %c0_115 = arith.constant 0 : index
    %173 = vector.load %arg14[%c0_114, %c0_115] : memref<1x1xf32, #tpu.memory_space<vmem>>, vector<1x1xf32>
    %174 = vector.broadcast %173 : vector<1x1xf32> to vector<256x64xf32>
    %175 = arith.mulf %174, %172 : vector<256x64xf32>
    %176 = arith.addf %175, %144 : vector<256x64xf32>
    %cst_116 = arith.constant dense<0.000000e+00> : vector<64x64xf32>
    %177 = tpu.matmul %147, %145, %cst_116 {dimension_numbers = #tpu.dot_dimension_numbers<[1], [0], [0], [1], [0, 0, 1, 1], [], []>} : vector<64x256xbf16>, vector<256x64xbf16>, vector<64x64xf32> -> vector<64x64xf32>
    %cst_117 = arith.constant dense<0x7F800000> : vector<64xf32>
    %178 = vector.multi_reduction <minimumf>, %177, %cst_117 [1] : vector<64x64xf32> to vector<64xf32>
    %179 = vector.shape_cast %178 : vector<64xf32> to vector<64x1xf32>
    %180 = vector.broadcast %179 : vector<64x1xf32> to vector<64x64xf32>
    %181 = arith.subf %180, %177 : vector<64x64xf32>
    %182 = math.exp %181 : vector<64x64xf32>
    %cst_118 = arith.constant dense<0.000000e+00> : vector<64xf32>
    %183 = vector.multi_reduction <add>, %182, %cst_118 [1] : vector<64x64xf32> to vector<64xf32>
    %184 = vector.shape_cast %183 : vector<64xf32> to vector<64x1xf32>
    %185 = tpu.reciprocal %184 {approx = true} : vector<64x1xf32> -> vector<64x1xf32>
    %186 = vector.broadcast %185 : vector<64x1xf32> to vector<64x64xf32>
    %187 = arith.mulf %182, %186 : vector<64x64xf32>
    %188 = arith.truncf %187 : vector<64x64xf32> to vector<64x64xbf16>
    %cst_119 = arith.constant dense<0.000000e+00> : vector<256x64xf32>
    %189 = tpu.matmul %145, %188, %cst_119 {dimension_numbers = #tpu.dot_dimension_numbers<[1], [1], [0], [0], [0, 0, 1, 0], [], []>} : vector<256x64xbf16>, vector<64x64xbf16>, vector<256x64xf32> -> vector<256x64xf32>
    %c0_120 = arith.constant 0 : index
    %c0_121 = arith.constant 0 : index
    %190 = vector.load %arg15[%c0_120, %c0_121] : memref<1x1xf32, #tpu.memory_space<vmem>>, vector<1x1xf32>
    %191 = vector.broadcast %190 : vector<1x1xf32> to vector<256x64xf32>
    %192 = arith.mulf %191, %189 : vector<256x64xf32>
    %193 = arith.addf %192, %144 : vector<256x64xf32>
    %194 = arith.addf %176, %193 : vector<256x64xf32>
    %195 = arith.mulf %194, %142 : vector<256x64xf32>
    %196 = arith.truncf %195 : vector<256x64xf32> to vector<256x64xbf16>
    %c0_122 = arith.constant 0 : index
    %c0_123 = arith.constant 0 : index
    %197 = vector.load %arg12[%c0_122, %c0_123] : memref<64x64xbf16, #tpu.memory_space<vmem>>, vector<64x64xbf16>
    %cst_124 = arith.constant dense<0.000000e+00> : vector<256x64xf32>
    %198 = tpu.matmul %196, %197, %cst_124 {dimension_numbers = #tpu.dot_dimension_numbers<[1], [0], [0], [1], [0, 0, 1, 1], [], []>} : vector<256x64xbf16>, vector<64x64xbf16>, vector<256x64xf32> -> vector<256x64xf32>
    %c0_125 = arith.constant 0 : index
    %c0_126 = arith.constant 0 : index
    %199 = vector.load %arg13[%c0_125, %c0_126] : memref<1x64xf32, #tpu.memory_space<vmem>>, vector<1x64xf32>
    %200 = vector.broadcast %199 : vector<1x64xf32> to vector<256x64xf32>
    %201 = arith.addf %198, %200 : vector<256x64xf32>
    %c0_127 = arith.constant 0 : index
    %c0_128 = arith.constant 0 : index
    %c0_129 = arith.constant 0 : index
    %202 = vector.load %arg16[%c0_127, %c0_128, %c0_129] : memref<1x256x64xf32, #tpu.memory_space<vmem>>, vector<1x256x64xf32>
    %203 = vector.shape_cast %202 : vector<1x256x64xf32> to vector<256x64xf32>
    %204 = vector.shape_cast %201 : vector<256x64xf32> to vector<1x256x64xf32>
    tpu.vector_store %arg16[%c0_127, %c0_128, %c0_129], %204 {strides = array<i32>} : memref<1x256x64xf32, #tpu.memory_space<vmem>>, vector<1x256x64xf32>,
    return
  }
  func.func @transform_0(%arg0: i32) -> (i32, i32, i32) {
    %c0_i32 = arith.constant 0 : i32
    %c0_i32_0 = arith.constant 0 : i32
    %c0_i32_1 = arith.constant 0 : i32
    return %arg0, %c0_i32, %c0_i32_0 : i32, i32, i32
  }
  func.func @transform_1(%arg0: i32) -> (i32, i32) {
    %c0_i32 = arith.constant 0 : i32
    %c0_i32_0 = arith.constant 0 : i32
    %c0_i32_1 = arith.constant 0 : i32
    return %c0_i32, %c0_i32_0 : i32, i32
  }
  func.func @transform_2(%arg0: i32) -> (i32, i32) {
    %c0_i32 = arith.constant 0 : i32
    %c0_i32_0 = arith.constant 0 : i32
    %c0_i32_1 = arith.constant 0 : i32
    return %c0_i32, %c0_i32_0 : i32, i32
  }
  func.func @transform_3(%arg0: i32) -> (i32, i32) {
    %c0_i32 = arith.constant 0 : i32
    %c0_i32_0 = arith.constant 0 : i32
    %c0_i32_1 = arith.constant 0 : i32
    return %c0_i32, %c0_i32_0 : i32, i32
  }
  func.func @transform_4(%arg0: i32) -> (i32, i32) {
    %c0_i32 = arith.constant 0 : i32
    %c0_i32_0 = arith.constant 0 : i32
    %c0_i32_1 = arith.constant 0 : i32
    return %c0_i32, %c0_i32_0 : i32, i32
  }
  func.func @transform_5(%arg0: i32) -> (i32, i32) {
    %c0_i32 = arith.constant 0 : i32
    %c0_i32_0 = arith.constant 0 : i32
    %c0_i32_1 = arith.constant 0 : i32
    return %c0_i32, %c0_i32_0 : i32, i32
  }
  func.func @transform_6(%arg0: i32) -> (i32, i32) {
    %c0_i32 = arith.constant 0 : i32
    %c0_i32_0 = arith.constant 0 : i32
    %c0_i32_1 = arith.constant 0 : i32
    return %c0_i32, %c0_i32_0 : i32, i32
  }
  func.func @transform_7(%arg0: i32) -> (i32, i32) {
    %c0_i32 = arith.constant 0 : i32
    %c0_i32_0 = arith.constant 0 : i32
    %c0_i32_1 = arith.constant 0 : i32
    return %c0_i32, %c0_i32_0 : i32, i32
  }
  func.func @transform_8(%arg0: i32) -> (i32, i32) {
    %c0_i32 = arith.constant 0 : i32
    %c0_i32_0 = arith.constant 0 : i32
    %c0_i32_1 = arith.constant 0 : i32
    return %c0_i32, %c0_i32_0 : i32, i32
  }
  func.func @transform_9(%arg0: i32) -> (i32, i32) {
    %c0_i32 = arith.constant 0 : i32
    %c0_i32_0 = arith.constant 0 : i32
    %c0_i32_1 = arith.constant 0 : i32
    return %c0_i32, %c0_i32_0 : i32, i32
  }
  func.func @transform_10(%arg0: i32) -> (i32, i32) {
    %c0_i32 = arith.constant 0 : i32
    %c0_i32_0 = arith.constant 0 : i32
    %c0_i32_1 = arith.constant 0 : i32
    return %c0_i32, %c0_i32_0 : i32, i32
  }
  func.func @transform_11(%arg0: i32) -> (i32, i32) {
    %c0_i32 = arith.constant 0 : i32
    %c0_i32_0 = arith.constant 0 : i32
    %c0_i32_1 = arith.constant 0 : i32
    return %c0_i32, %c0_i32_0 : i32, i32
  }
  func.func @transform_12(%arg0: i32) -> (i32, i32) {
    %c0_i32 = arith.constant 0 : i32
    %c0_i32_0 = arith.constant 0 : i32
    %c0_i32_1 = arith.constant 0 : i32
    return %c0_i32, %c0_i32_0 : i32, i32
  }
  func.func @transform_13(%arg0: i32) -> (i32, i32) {
    %c0_i32 = arith.constant 0 : i32
    %c0_i32_0 = arith.constant 0 : i32
    %c0_i32_1 = arith.constant 0 : i32
    return %c0_i32, %c0_i32_0 : i32, i32
  }
  func.func @transform_14(%arg0: i32) -> (i32, i32) {
    %c0_i32 = arith.constant 0 : i32
    %c0_i32_0 = arith.constant 0 : i32
    %c0_i32_1 = arith.constant 0 : i32
    return %c0_i32, %c0_i32_0 : i32, i32
  }
  func.func @transform_15(%arg0: i32) -> (i32, i32, i32) {
    %c0_i32 = arith.constant 0 : i32
    %c0_i32_0 = arith.constant 0 : i32
    %c0_i32_1 = arith.constant 0 : i32
    return %arg0, %c0_i32, %c0_i32_0 : i32, i32, i32
  }
  func.func @transform_16(%arg0: i32) -> (i32, i32, i32) {
    %c0_i32 = arith.constant 0 : i32
    %c0_i32_0 = arith.constant 0 : i32
    %c0_i32_1 = arith.constant 0 : i32
    return %arg0, %c0_i32, %c0_i32_0 : i32, i32, i32
  }
}

</mosaic_0001>

<bundles_post_ra>
// kernel: _lambda_.1
= control target key start
LH: loop header
LB: loop body
LE: loop exit
PB: predicated region body
PF: predicated region fallthrough
CT: control target
= control target key end

     0   :  { %s17528_s0 = inlined_call_operand.vmem [shape: f32[2,304,64], index: 0, kind: input, shape index: {}]   ;;  %s17529_s1 = inlined_call_operand.vmem [shape: f32[256,1], index: 1, kind: input, shape index: {}]   ;;  %s17530_s2 = inlined_call_operand.vmem [shape: f32[256,1], index: 2, kind: input, shape index: {}]   ;;  %s17531_s3 = inlined_call_operand.hbm [shape: bf16[576,128], index: 3, kind: input, shape index: {}]   ;;  %s17532_s4 = inlined_call_operand.hbm [shape: f32[1,128], index: 4, kind: input, shape index: {}]   ;;  %s17533_s5 = inlined_call_operand.hbm [shape: bf16[1152,64], index: 5, kind: input, shape index: {}]   ;;  %s17534_s6 = inlined_call_operand.hbm [shape: f32[1,64], index: 6, kind: input, shape index: {}]   ;;  %s17535_s7 = inlined_call_operand.hbm [shape: bf16[64,64], index: 7, kind: input, shape index: {}]   ;;  %s17536_s8 = inlined_call_operand.hbm [shape: f32[1,64], index: 8, kind: input, shape index: {}]   ;;  %s17537_s9 = inlined_call_operand.hbm [shape: bf16[64,64], index: 9, kind: input, shape index: {}]   ;;  %s17538_s10 = inlined_call_operand.hbm [shape: f32[1,64], index: 10, kind: input, shape index: {}]   ;;  %s17539_s11 = inlined_call_operand.hbm [shape: bf16[64,64], index: 11, kind: input, shape index: {}]   ;;  %s17540_s12 = inlined_call_operand.hbm [shape: f32[1,64], index: 12, kind: input, shape index: {}]   ;;  %s17541_s13 = inlined_call_operand.<no memory space> [shape: f32[1,1], index: 13, kind: input, shape index: {}, may-alias: {13,14}]   ;;  %s17542_s15 = inlined_call_operand.hbm [shape: f32[2,256,64], index: 15, kind: output, shape index: {0}]   ;;  %s17543_s16 = inlined_call_operand.vmem [shape: f32[2,256,128], index: 16, kind: output, shape index: {1}]   ;;  %s17544_s14 = inlined_call_operand.<no memory space> [shape: f32[1,1], index: 14, kind: input, shape index: {}, may-alias: {13,14}]  }
   0x1   :  { %17948 = sst [smem:[#allocation180_spill]] %s17528_s0  ;;  %v22_v0 = vstv %s17541_s13  ;;  %v24_v1 = vstv %s17544_s14 }
   0x2   :  { %17949 = sst [smem:[#allocation181_spill]] %s17532_s4  ;;  %23 = vst [vmem:[#allocation3] sm:$0x1] %v22_v0  ;;  %25 = vst [vmem:[#allocation4] sm:$0x1] %v24_v1 }
   0x3   :  { %17950 = sst [smem:[#allocation182_spill]] %s17534_s6 }
   0x4   :  { %17951 = sst [smem:[#allocation183_spill]] %s17536_s8 }
   0x5   :  { %17952 = sst [smem:[#allocation184_spill]] %s17538_s10 }
   0x6   :  { %17953 = sst [smem:[#allocation185_spill]] %s17542_s15 }
   0x7   :  { %26 = vsyncpa [#allocation6], 0 }
   0x8   :  { %27 = vsyncpa [#allocation9], 0 }
   0x9   :  { %28 = vsyncpa [#allocation12], 0 }
   0xa   :  { %29 = vsyncpa [#allocation15], 0 }
   0xb   :  { %30 = vsyncpa [#allocation18], 0 }
   0xc   :  { %31 = vsyncpa [#allocation21], 0 }
   0xd   :  { %32 = vsyncpa [#allocation7], 0 }
   0xe   :  { %34 = vsyncpa [#allocation7 + $0x1], 0  ;;  %s13261_s25 = smov 0   ;;  %s13263_s26 = smov 0  }
   0xf   :  { %s13265_s27 = smov 0   ;;  %s13267_s13 = smov 0  }
  0x10 LB: > { %17954 = sst [smem:[#allocation30_spill]] %s13139_s25  ;;  %s13282_s14 = sadd.s32 4294967295, %s13151_s13   ;;  %s13151_s13 = sphi %s13267_s13, %s18796_s13   ;;  %s13147_s27 = sphi %s13265_s27, %s18798_s27   ;;  %s13143_s26 = sphi %s13263_s26, %s18800_s26   ;;  %s13139_s25 = sphi %s13261_s25, %s18799_s25  }
  0x11   : > { %17955 = sst [smem:[#allocation31_spill]] %s13147_s27  ;;  %s9688_s28 = sadd.s32 4294967294, %s13151_s13  }
  0x12   : > { %17956 = sst [smem:[#allocation32_spill]] %s13151_s13  ;;  %s13286_s29 = sadd.s32 1, %s13151_s13  }
  0x13   : > { %17957 = sst [smem:[#allocation33_spill]] %s13286_s29  ;;  %s367_s30 = sadd.s32 1, %s13147_s27 }
  0x14   : > { %s364_s0 = ssub.s32 %s13151_s13, %s13286_s29  ;;  %p377_p0 = scmp.ne.s32.totalorder %s13147_s27, %s13143_s26 }
  0x15   : > { %p365_p1 = scmp.eq.s32.totalorder %s364_s0, 0  ;;  %p378_p2 = scmp.eq.s32.totalorder %s13282_s14, 1 }
  0x16   : > { %p383_p3 = scmp.ne.s32.totalorder %s13143_s26, %s13139_s25  ;;  %p384_p4 = scmp.eq.s32.totalorder %s9688_s28, 1 }
  0x17   : > { %s13297_s17 = scalar_select %p365_p1, %s13147_s27, %s367_s30  }
  0x18   : > { %p13299_p5 = por %p378_p2, %p377_p0  ;;  %p13303_p6 = por %p384_p4, %p383_p3 }
  0x19   : > { %17958 = sst [smem:[#allocation34_spill]] %s13297_s17  ;;  %p9689_p7 = scmp.ge.s32.totalorder %s13151_s13, 1 }
  0x1a   : > { %s17959_s18 = scalar_select %p13299_p5, 1, 0 }
  0x1b   : > { %s17960_s19 = scalar_select %p13303_p6, 1, 0 }
  0x1c   : > { %p417_p8 = scmp.lt.s32.totalorder %s13151_s13, 3  ;;  %p17550_p9 = scmp.eq.s32.totalorder %s13282_s14, 0 }
  0x1d   : > { %17961 = sst [smem:[#allocation35_spill]] %s17960_s19  ;;  %s13153_s21 = smov [#allocation8]  }
  0x1e   : > { %p13310_p10 = pnand %p9689_p7, %p417_p8  ;;  %s449_s22 = sshll.u32 %s13153_s21, 4  ;;  %s450_s22 = int_to_ptr.vmem [resolvable:$true] %s449_s22 }
  0x1f   : > { %s13154_s23 = smov [#allocation11]   ;;  %s13155_s30 = smov [#allocation14]  }
  0x20   : > { %s17962_s20 = scalar_select %p13310_p10, 1, 0 }
  0x21   : > { %p12229_p11 = pneg %p13310_p10  ;;  %s473_s24 = sshll.u32 %s13154_s23, 4  ;;  %s13322_s24 = int_to_ptr.vmem [resolvable:$true] %s473_s24 }
  0x22   : > { %s497_s0 = sshll.u32 %s13155_s30, 4  ;;  %s17964_s4 = sld [smem:[#allocation181_spill]]  ;;  %s13324_s0 = int_to_ptr.vmem [resolvable:$true] %s497_s0 }
  0x23   : > { %p13318_p12 = pnand %p17550_p9, %p12229_p11 }
  0x25   : > { %p13334_p0 = pneg %p13318_p12 }
  0x28   : > { %s12785_s21 = scalar_lea.hbm %s17964_s4, 16 }
  0x29   : > { %p12786_p13 = scmp.ne.s32.totalorder %s17964_s4, %s12785_s21  ;;  %p12792_p3 = scmp.lt.u32.totalorder %s12785_s21, %s17964_s4 }
  0x2b   : > { %p12788_p1 = pnand %p13334_p0, %p12786_p13 }
  0x2d   : > { %p12789_p2 = pneg %p12788_p1 }
  0x2f   : > { %p12794_p4 = pnand %p12792_p3, %p12789_p2 }
  0x31   : > { %12797 = shalt.err (!%p12794_p4)
}
  0x32   : > { %s12798_s27 = scalar_lea.vmem %s450_s22, 16  ;;  %s12805_s29 = scalar_lea.vmem %s450_s22, 32 }
  0x33   : > { %p12799_p7 = scmp.ne.s32.totalorder %s450_s22, %s12798_s27  ;;  %p12806_p9 = scmp.lt.s32.totalorder %s450_s22, %s450_s22 }
  0x34   : > { %p12807_p6 = scmp.lt.s32.totalorder %s12805_s29, %s12798_s27 }
  0x35   : > { %p12801_p8 = pnand %p12799_p7, %p13334_p0 }
  0x36   : > { %p12808_p5 = por %p12807_p6, %p12806_p9 }
  0x37   : > { %p12802_p11 = pneg %p12801_p8 }
  0x39   : > { %p12809_p10 = pnand %p12808_p5, %p12802_p11 }
  0x3b   : > { %12812 = shalt.err (!%p12809_p10)
}
  0x3c   : > { %12235 = dma.hbm_to_vmem [thread:$0]  (!%p13318_p12), %s17964_s4, 16, %s450_s22, [#allocation9]  }
  0x3d   : > { %s17966_s6 = sld [smem:[#allocation182_spill]] }
  0x43   : > { %s12813_s30 = scalar_lea.hbm %s17966_s6, 16 }
  0x44   : > { %p12814_p13 = scmp.ne.s32.totalorder %s17966_s6, %s12813_s30  ;;  %p12820_p5 = scmp.lt.u32.totalorder %s12813_s30, %s17966_s6 }
  0x46   : > { %p12816_p1 = pnand %p12814_p13, %p13334_p0 }
  0x48   : > { %p12817_p6 = pneg %p12816_p1 }
  0x4a   : > { %p12822_p9 = pnand %p12820_p5, %p12817_p6 }
  0x4c   : > { %12825 = shalt.err (!%p12822_p9)
}
  0x4d   : > { %s12826_s22 = scalar_lea.vmem %s13322_s24, 16  ;;  %s12833_s15 = scalar_lea.vmem %s13322_s24, 32 }
  0x4e   : > { %p12827_p10 = scmp.ne.s32.totalorder %s13322_s24, %s12826_s22  ;;  %p12834_p4 = scmp.lt.s32.totalorder %s13322_s24, %s13322_s24 }
  0x4f   : > { %p12835_p7 = scmp.lt.s32.totalorder %s12833_s15, %s12826_s22 }
  0x50   : > { %p12829_p2 = pnand %p12827_p10, %p13334_p0 }
  0x51   : > { %p12836_p8 = por %p12835_p7, %p12834_p4 }
  0x52   : > { %p12830_p3 = pneg %p12829_p2 }
  0x54   : > { %p12837_p11 = pnand %p12836_p8, %p12830_p3 }
  0x56   : > { %12840 = shalt.err (!%p12837_p11)
}
  0x57   : > { %12241 = dma.hbm_to_vmem [thread:$0]  (!%p13318_p12), %s17966_s6, 16, %s13322_s24, [#allocation12]  }
  0x58   : > { %s17967_s8 = sld [smem:[#allocation183_spill]] }
  0x5e   : > { %s12841_s21 = scalar_lea.hbm %s17967_s8, 16 }
  0x5f   : > { %p12842_p13 = scmp.ne.s32.totalorder %s17967_s8, %s12841_s21  ;;  %p12848_p5 = scmp.lt.u32.totalorder %s12841_s21, %s17967_s8 }
  0x61   : > { %p12844_p1 = pnand %p12842_p13, %p13334_p0 }
  0x63   : > { %p12845_p6 = pneg %p12844_p1 }
  0x65   : > { %p12850_p9 = pnand %p12848_p5, %p12845_p6 }
  0x67   : > { %12853 = shalt.err (!%p12850_p9)
}
  0x68   : > { %s12854_s24 = scalar_lea.vmem %s13324_s0, 16  ;;  %s12861_s15 = scalar_lea.vmem %s13324_s0, 32 }
  0x69   : > { %p12855_p10 = scmp.ne.s32.totalorder %s13324_s0, %s12854_s24  ;;  %p12862_p4 = scmp.lt.s32.totalorder %s13324_s0, %s13324_s0 }
  0x6a   : > { %p12863_p7 = scmp.lt.s32.totalorder %s12861_s15, %s12854_s24 }
  0x6b   : > { %p12857_p2 = pnand %p12855_p10, %p13334_p0 }
  0x6c   : > { %p12864_p8 = por %p12863_p7, %p12862_p4 }
  0x6d   : > { %p12858_p3 = pneg %p12857_p2 }
  0x6f   : > { %p12865_p11 = pnand %p12864_p8, %p12858_p3 }
  0x71   : > { %12868 = shalt.err (!%p12865_p11)
}
  0x72   : > { %12247 = dma.hbm_to_vmem [thread:$0]  (!%p13318_p12), %s17967_s8, 16, %s13324_s0, [#allocation15]  }
  0x73   : > { %s13156_s19 = smov [#allocation17]   ;;  %s13157_s21 = smov [#allocation5]  }
  0x74   : > { %s521_s25 = sshll.u32 %s13156_s19, 4  ;;  %s435_s30 = sshll.u32 %s13157_s21, 4  ;;  %s522_s25 = int_to_ptr.vmem [resolvable:$true] %s521_s25  ;;  %s436_s30 = int_to_ptr.vmem [resolvable:$true] %s435_s30 }
  0x75   : > { %s17968_s10 = sld [smem:[#allocation184_spill]] }
  0x7b   : > { %s12869_s22 = scalar_lea.hbm %s17968_s10, 16 }
  0x7c   : > { %p12870_p13 = scmp.ne.s32.totalorder %s17968_s10, %s12869_s22  ;;  %p12876_p5 = scmp.lt.u32.totalorder %s12869_s22, %s17968_s10 }
  0x7e   : > { %p12872_p1 = pnand %p12870_p13, %p13334_p0 }
  0x80   : > { %p12873_p6 = pneg %p12872_p1 }
  0x82   : > { %p12878_p9 = pnand %p12876_p5, %p12873_p6 }
  0x84   : > { %12881 = shalt.err (!%p12878_p9)
}
  0x85   : > { %s12882_s0 = scalar_lea.vmem %s522_s25, 16  ;;  %s12889_s17 = scalar_lea.vmem %s522_s25, 32 }
  0x86   : > { %p12883_p10 = scmp.ne.s32.totalorder %s522_s25, %s12882_s0  ;;  %p12890_p4 = scmp.lt.s32.totalorder %s522_s25, %s522_s25 }
  0x87   : > { %p12891_p7 = scmp.lt.s32.totalorder %s12889_s17, %s12882_s0 }
  0x88   : > { %p12885_p2 = pnand %p12883_p10, %p13334_p0 }
  0x89   : > { %p12892_p8 = por %p12891_p7, %p12890_p4 }
  0x8a   : > { %p12886_p3 = pneg %p12885_p2 }
  0x8c   : > { %p12893_p11 = pnand %p12892_p8, %p12886_p3 }
  0x8e   : > { %12896 = shalt.err (!%p12893_p11)
}
  0x8f   : > { %12253 = dma.hbm_to_vmem [thread:$0]  (!%p13318_p12), %s17968_s10, 16, %s522_s25, [#allocation18]  }
  0x90   : > { %s12897_s29 = scalar_lea.hbm %s17531_s3, 4608 }
  0x91   : > { %p12898_p13 = scmp.ne.s32.totalorder %s17531_s3, %s12897_s29  ;;  %p12904_p5 = scmp.lt.u32.totalorder %s12897_s29, %s17531_s3 }
  0x93   : > { %p12900_p1 = pnand %p12898_p13, %p13334_p0 }
  0x95   : > { %p12901_p6 = pneg %p12900_p1 }
  0x97   : > { %p12906_p9 = pnand %p12904_p5, %p12901_p6 }
  0x99   : > { %12909 = shalt.err (!%p12906_p9)
}
  0x9a   : > { %s12910_s0 = scalar_lea.vmem %s436_s30, 4608  ;;  %p12918_p4 = scmp.lt.s32.totalorder %s436_s30, %s436_s30 }
  0x9b   : > { %p12911_p10 = scmp.ne.s32.totalorder %s436_s30, %s12910_s0  ;;  %p12919_p7 = scmp.lt.s32.totalorder %s12910_s0, %s12910_s0 }
  0x9d   : > { %p12913_p2 = pnand %p12911_p10, %p13334_p0  ;;  %p12920_p8 = por %p12919_p7, %p12918_p4 }
  0x9f   : > { %p12914_p3 = pneg %p12913_p2 }
  0xa1   : > { %p12921_p11 = pnand %p12920_p8, %p12914_p3 }
  0xa3   : > { %12924 = shalt.err (!%p12921_p11)
}
  0xa4   : > { %s13158_s25 = smov 64   ;;  %s13159_s17 = smov 4  }
  0xa5   : > { %12232 = dma.hbm_to_vmem [thread:$0]  (!%p13318_p12), %s17531_s3, 4608, %s436_s30, [#allocation6], %s13158_s25, %s13158_s25, %s13159_s17  }
  0xa6   : > { %s13160_s4 = smov [#allocation10]   ;;  %s13161_s29 = smov [#allocation13]  }
  0xa7   : > { %s459_s27 = sshll.u32 %s13160_s4, 4  ;;  %s483_s22 = sshll.u32 %s13161_s29, 4  ;;  %s460_s27 = int_to_ptr.vmem [resolvable:$true] %s459_s27  ;;  %s484_s22 = int_to_ptr.vmem [resolvable:$true] %s483_s22 }
  0xa8   : > { %s12925_s13 = scalar_lea.hbm %s17533_s5, 9216 }
  0xa9   : > { %p12926_p13 = scmp.ne.s32.totalorder %s17533_s5, %s12925_s13  ;;  %p12932_p5 = scmp.lt.u32.totalorder %s12925_s13, %s17533_s5 }
  0xab   : > { %p12928_p1 = pnand %p12926_p13, %p13334_p0 }
  0xad   : > { %p12929_p6 = pneg %p12928_p1 }
  0xaf   : > { %p12934_p9 = pnand %p12932_p5, %p12929_p6 }
  0xb1   : > { %12937 = shalt.err (!%p12934_p9)
}
  0xb2   : > { %s12938_s30 = scalar_lea.vmem %s460_s27, 9216  ;;  %p12946_p4 = scmp.lt.s32.totalorder %s460_s27, %s460_s27 }
  0xb3   : > { %p12939_p10 = scmp.ne.s32.totalorder %s460_s27, %s12938_s30  ;;  %p12947_p7 = scmp.lt.s32.totalorder %s12938_s30, %s12938_s30 }
  0xb5   : > { %p12941_p2 = pnand %p12939_p10, %p13334_p0  ;;  %p12948_p8 = por %p12947_p7, %p12946_p4 }
  0xb7   : > { %p12942_p3 = pneg %p12941_p2 }
  0xb9   : > { %p12949_p11 = pnand %p12948_p8, %p12942_p3 }
  0xbb   : > { %12952 = shalt.err (!%p12949_p11)
}
  0xbc   : > { %12238 = dma.hbm_to_vmem [thread:$0]  (!%p13318_p12), %s17533_s5, 9216, %s460_s27, [#allocation9], %s13158_s25, %s13158_s25, %s13159_s17  }
  0xbd   : > { %s12953_s21 = scalar_lea.hbm %s17535_s7, 512 }
  0xbe   : > { %p12954_p13 = scmp.ne.s32.totalorder %s17535_s7, %s12953_s21  ;;  %p12960_p5 = scmp.lt.u32.totalorder %s12953_s21, %s17535_s7 }
  0xc0   : > { %p12956_p1 = pnand %p12954_p13, %p13334_p0 }
  0xc2   : > { %p12957_p6 = pneg %p12956_p1 }
  0xc4   : > { %p12962_p9 = pnand %p12960_p5, %p12957_p6 }
  0xc6   : > { %12965 = shalt.err (!%p12962_p9)
}
  0xc7   : > { %s12966_s13 = scalar_lea.vmem %s484_s22, 512  ;;  %p12974_p4 = scmp.lt.s32.totalorder %s484_s22, %s484_s22 }
  0xc8   : > { %p12967_p10 = scmp.ne.s32.totalorder %s484_s22, %s12966_s13  ;;  %p12975_p7 = scmp.lt.s32.totalorder %s12966_s13, %s12966_s13 }
  0xca   : > { %p12969_p2 = pnand %p12967_p10, %p13334_p0  ;;  %p12976_p8 = por %p12975_p7, %p12974_p4 }
  0xcc   : > { %p12970_p3 = pneg %p12969_p2 }
  0xce   : > { %p12977_p11 = pnand %p12976_p8, %p12970_p3 }
  0xd0   : > { %12980 = shalt.err (!%p12977_p11)
}
  0xd1   : > { %12244 = dma.hbm_to_vmem [thread:$0]  (!%p13318_p12), %s17535_s7, 512, %s484_s22, [#allocation12], %s13158_s25, %s13158_s25, %s13159_s17  }
  0xd2   : > { %s13162_s30 = smov [#allocation16]   ;;  %s13163_s8 = smov [#allocation19]  }
  0xd3   : > { %s507_s6 = sshll.u32 %s13162_s30, 4  ;;  %s531_s10 = sshll.u32 %s13163_s8, 4  ;;  %s508_s6 = int_to_ptr.vmem [resolvable:$true] %s507_s6  ;;  %s532_s10 = int_to_ptr.vmem [resolvable:$true] %s531_s10 }
  0xd4   : > { %s12981_s4 = scalar_lea.hbm %s17537_s9, 512 }
  0xd5   : > { %p12982_p13 = scmp.ne.s32.totalorder %s17537_s9, %s12981_s4  ;;  %p12988_p5 = scmp.lt.u32.totalorder %s12981_s4, %s17537_s9 }
  0xd7   : > { %p12984_p1 = pnand %p12982_p13, %p13334_p0 }
  0xd9   : > { %p12985_p6 = pneg %p12984_p1 }
  0xdb   : > { %p12990_p9 = pnand %p12988_p5, %p12985_p6 }
  0xdd   : > { %12993 = shalt.err (!%p12990_p9)
}
  0xde   : > { %s12994_s22 = scalar_lea.vmem %s508_s6, 512  ;;  %p13002_p4 = scmp.lt.s32.totalorder %s508_s6, %s508_s6 }
  0xdf   : > { %p12995_p10 = scmp.ne.s32.totalorder %s508_s6, %s12994_s22  ;;  %p13003_p7 = scmp.lt.s32.totalorder %s12994_s22, %s12994_s22 }
  0xe1   : > { %p12997_p2 = pnand %p12995_p10, %p13334_p0  ;;  %p13004_p8 = por %p13003_p7, %p13002_p4 }
  0xe3   : > { %p12998_p3 = pneg %p12997_p2 }
  0xe5   : > { %p13005_p11 = pnand %p13004_p8, %p12998_p3 }
  0xe7   : > { %13008 = shalt.err (!%p13005_p11)
}
  0xe8   : > { %12250 = dma.hbm_to_vmem [thread:$0]  (!%p13318_p12), %s17537_s9, 512, %s508_s6, [#allocation15], %s13158_s25, %s13158_s25, %s13159_s17  }
  0xe9   : > { %s13009_s19 = scalar_lea.hbm %s17539_s11, 512 }
  0xea   : > { %p13010_p13 = scmp.ne.s32.totalorder %s17539_s11, %s13009_s19  ;;  %p13016_p5 = scmp.lt.u32.totalorder %s13009_s19, %s17539_s11 }
  0xec   : > { %p13012_p1 = pnand %p13010_p13, %p13334_p0 }
  0xee   : > { %p13013_p6 = pneg %p13012_p1 }
  0xf0   : > { %p13018_p9 = pnand %p13016_p5, %p13013_p6 }
  0xf2   : > { %13021 = shalt.err (!%p13018_p9)
}
  0xf3   : > { %s13022_s15 = scalar_lea.vmem %s532_s10, 512  ;;  %p13030_p4 = scmp.lt.s32.totalorder %s532_s10, %s532_s10 }
  0xf4   : > { %p13023_p10 = scmp.ne.s32.totalorder %s532_s10, %s13022_s15  ;;  %p13031_p7 = scmp.lt.s32.totalorder %s13022_s15, %s13022_s15 }
  0xf6   : > { %p13025_p2 = pnand %p13023_p10, %p13334_p0  ;;  %p13032_p8 = por %p13031_p7, %p13030_p4 }
  0xf8   : > { %p13026_p3 = pneg %p13025_p2 }
  0xfa   : > { %p13033_p11 = pnand %p13032_p8, %p13026_p3 }
  0xfc   : > { %13036 = shalt.err (!%p13033_p11)
}
  0xfd   : > { %12256 = dma.hbm_to_vmem [thread:$0]  (!%p13318_p12), %s17539_s11, 512, %s532_s10, [#allocation18], %s13158_s25, %s13158_s25, %s13159_s17  }
  0xfe   : > { %s13164_s22 = smov [#allocation20]   ;;  %s13037_s8 = scalar_lea.hbm %s17540_s12, 16 }
  0xff   : > { %s545_s27 = sshll.u32 %s13164_s22, 4  ;;  %p13038_p13 = scmp.ne.s32.totalorder %s17540_s12, %s13037_s8  ;;  %s546_s27 = int_to_ptr.vmem [resolvable:$true] %s545_s27 }
 0x100   : > { %p13044_p5 = scmp.lt.u32.totalorder %s13037_s8, %s17540_s12 }
 0x101   : > { %p13040_p1 = pnand %p13038_p13, %p13334_p0 }
 0x103   : > { %p13041_p6 = pneg %p13040_p1 }
 0x105   : > { %p13046_p9 = pnand %p13044_p5, %p13041_p6 }
 0x107   : > { %13049 = shalt.err (!%p13046_p9)
}
 0x108   : > { %s13050_s25 = scalar_lea.vmem %s546_s27, 16  ;;  %s13057_s17 = scalar_lea.vmem %s546_s27, 32 }
 0x109   : > { %p13051_p10 = scmp.ne.s32.totalorder %s546_s27, %s13050_s25  ;;  %p13058_p4 = scmp.lt.s32.totalorder %s546_s27, %s546_s27 }
 0x10a   : > { %p13059_p7 = scmp.lt.s32.totalorder %s13057_s17, %s13050_s25 }
 0x10b   : > { %p13053_p2 = pnand %p13051_p10, %p13334_p0 }
 0x10c   : > { %p13060_p8 = por %p13059_p7, %p13058_p4 }
 0x10d   : > { %p13054_p3 = pneg %p13053_p2 }
 0x10f   : > { %p13061_p11 = pnand %p13060_p8, %p13054_p3 }
 0x111   : > { %13064 = shalt.err (!%p13061_p11)
}
 0x112   : > { %12259 = dma.hbm_to_vmem [thread:$0]  (!%p13318_p12), %s17540_s12, 16, %s546_s27, [#allocation21]  }
 0x113   : > { %p17969_p13 = scmp.ne.s32.totalorder %s17962_s20, 0 }
 0x115   : > { %572 = sbr.rel (%p17969_p13) target bundleno = 2917 (0xb65), region = 80 }
 0x11c   : > { %p17970_p1 = scmp.eq.s32.totalorder %s13282_s14, 0 }
 0x11e   : > { %13110 = dma.done.wait (%p17970_p1), [#allocation6], 4608   ;;  %p17971_p0 = pmov %p17970_p1 }
 0x120   : > { %13112 = vsyncadd (%p17971_p0), [#allocation6], 4294962688  ;;  %p17972_p6 = pmov %p17971_p0 }
 0x121   : > { %p17973_p5 = pmov %p17971_p0 }
 0x122   : > { %13114 = dma.done.wait (%p17972_p6), [#allocation9], 9232  }
 0x123   : > { %13116 = vsyncadd (%p17973_p5), [#allocation9], 4294958064  ;;  %p17974_p9 = pmov %p17971_p0 }
 0x124   : > { %p17975_p12 = pmov %p17971_p0 }
 0x125   : > { %13118 = dma.done.wait (%p17974_p9), [#allocation12], 528  }
 0x126   : > { %13120 = vsyncadd (%p17975_p12), [#allocation12], 4294966768  ;;  %p17976_p10 = pmov %p17971_p0 }
 0x127   : > { %p17977_p2 = pmov %p17971_p0 }
 0x128   : > { %13122 = dma.done.wait (%p17976_p10), [#allocation15], 528  }
 0x129   : > { %13124 = vsyncadd (%p17977_p2), [#allocation15], 4294966768  ;;  %p17978_p3 = pmov %p17971_p0 }
 0x12a   : > { %p17979_p4 = pmov %p17971_p0 }
 0x12b   : > { %13126 = dma.done.wait (%p17978_p3), [#allocation18], 528  }
 0x12c   : > { %13128 = vsyncadd (%p17979_p4), [#allocation18], 4294966768  ;;  %p17980_p7 = pmov %p17971_p0 }
 0x12d   : > { %p17981_p8 = pmov %p17971_p0 }
 0x12e   : > { %13130 = dma.done.wait (%p17980_p7), [#allocation21], 16  }
 0x12f   : > { %13132 = vsyncadd (%p17981_p8), [#allocation21], 4294967280  ;;  %v17555_v2 = vmov 0   ;;  %v13166_v3 = vmov 0.0   ;;  %v676_v4 = vld [vmem:[%s17529_s1 + $0x10] sm:$0xff]  ;;  %v674_v5 = vld [vmem:[%s17529_s1] sm:$0xff] }
 0x130   : > { %12334 = vset.pattern.permute.xlu1 %v17555_v2  ;;  %12333 = vset.pattern.permute.xlu0 %v17555_v2  ;;  %4180 = vst [vmem:[#allocation2 + $0x8] sm:$0xff] %v13166_v3  ;;  %4181 = vst [vmem:[#allocation2 + $0x10] sm:$0xff] %v13166_v3  ;;  %p663_p11 = scmp.lt.s32.totalorder %s13282_s14, 1  ;;  %v677_v6 = vld [vmem:[%s17529_s1 + $0x18] sm:$0xff]  ;;  %v675_v7 = vld [vmem:[%s17529_s1 + $0x8] sm:$0xff]  ;;  %s17982_s15 = sld [smem:[#allocation180_spill]] }
 0x131   : > { %4179 = vst [vmem:[#allocation2] sm:$0xff] %v13166_v3  ;;  %4182 = vst [vmem:[#allocation2 + $0x118] sm:$0xff] %v13166_v3  ;;  %782 = vperm.xlu1 %12334, %v676_v4   ;;  %772 = vperm.xlu0 %12333, %v674_v5   ;;  %v679_v8 = vld [vmem:[%s17529_s1 + $0x28] sm:$0xff]  ;;  %v678_v9 = vld [vmem:[%s17529_s1 + $0x20] sm:$0xff]  ;;  %vm1066_vm0 = vcmask 523264   ;;  %s10073_s20 = sshll.u32 %s13282_s14, 12 }
 0x132   : > { %4183 = vst [vmem:[#allocation2 + $0x120] sm:$0xff] %v13166_v3  ;;  %4184 = vst [vmem:[#allocation2 + $0x128] sm:$0xff] %v13166_v3  ;;  %s13581_s0 = scalar_select %p663_p11, %s13282_s14, 1  ;;  %v681_v10 = vld [vmem:[%s17529_s1 + $0x38] sm:$0xff]  ;;  %v680_v11 = vld [vmem:[%s17529_s1 + $0x30] sm:$0xff] }
 0x133   : > { %v12407_v12 = vld [vmem:[#allocation5 + $0x20] sm:$0xff]   ;;  %v12408_v13 = vld [vmem:[#allocation5 + $0x28] sm:$0xff]   ;;  %v683_v14 = vld [vmem:[%s17529_s1 + $0x48] sm:$0xff]  ;;  %s18789_s13 = sld [smem:[#allocation185_spill]]  ;;  %p18791_p1 = scmp.ne.s32.totalorder %s17959_s18, 0 }
 0x134   : > { %s12186_s4 = smul.u32 304, %s13581_s0  ;;  %10702 = vmatprep.subr.bf16.mxu0 %v12407_v12  ;;  %v682_v15 = vld [vmem:[%s17529_s1 + $0x40] sm:$0xff]  ;;  %v685_v20 = vld [vmem:[%s17529_s1 + $0x58] sm:$0xff]  ;;  %v684_v21 = vld [vmem:[%s17529_s1 + $0x50] sm:$0xff]  ;;  %s10072_s29 = sshll.u32 %s13581_s0, 8 }
 0x135   : > { %787 = vperm.xlu1 %12334, %v677_v6   ;;  %777 = vperm.xlu0 %12333, %v675_v7   ;;  %v12409_v16 = vld [vmem:[#allocation5 + $0x30] sm:$0xff]   ;;  %v12410_v22 = vld [vmem:[#allocation5 + $0x38] sm:$0xff]   ;;  %v12411_v25 = vld [vmem:[#allocation5] sm:$0xff]   ;;  %s14855_s10 = scalar_lea.vmem %s17543_s16, %s10072_s29  ;;  %s653_s0 = sand.u32 1, %s13143_s26  }
 0x136   : > { %s13602_s6 = scalar_lea.vmem %s17982_s15, %s12186_s4  ;;  %10703 = vmatpush3.bf16.msra.mxu0 %v12407_v12  ;;  %v687_v23 = vld [vmem:[%s17529_s1 + $0x68] sm:$0xff]  ;;  %v686_v24 = vld [vmem:[%s17529_s1 + $0x60] sm:$0xff]  ;;  %v689_v30 = vld [vmem:[%s17529_s1 + $0x78] sm:$0xff]  ;;  %s9712_s24 = sshll.u32 %s653_s0, 8 }
 0x137   : > { %10704 = vmatprep.subr.bf16.mxu0 %v12408_v13  ;;  %v986_v17 = vld [vmem:[%s13602_s6 + $0x8] sm:$0xff]  ;;  %v987_v18 = vld [vmem:[%s13602_s6 + $0x10] sm:$0xff]  ;;  %v988_v26 = vld [vmem:[%s13602_s6 + $0x18] sm:$0xff]  ;;  %s17487_s14 = scalar_lea.sflag [#allocation7], %s653_s0  ;;  %s13167_s8 = smov [#allocation22]  }
 0x138   : > { %v1026_v19 = vpack.c.bf16 %v987_v18, %v986_v17  ;;  %v989_v27 = vld [vmem:[%s13602_s6 + $0x20] sm:$0xff]  ;;  %v990_v28 = vld [vmem:[%s13602_s6 + $0x28] sm:$0xff]  ;;  %v991_v29 = vld [vmem:[%s13602_s6 + $0x30] sm:$0xff]  ;;  %s13069_s19 = sshll.u32 %s13167_s8, 4  ;;  %s13070_s19 = int_to_ptr.vmem [resolvable:$false] %s13069_s19 }
 0x139   : > { %797 = vperm.xlu1 %12334, %v679_v8   ;;  %792 = vperm.xlu0 %12333, %v678_v9   ;;  %v688_v31 = vld [vmem:[%s17529_s1 + $0x70] sm:$0xff]  ;;  %v1027_v32 = vpack.c.bf16 %v989_v27, %v988_v26  ;;  %v1028_v33 = vpack.c.bf16 %v991_v29, %v990_v28  ;;  %v12412_v34 = vld [vmem:[#allocation5 + $0x8] sm:$0xff]   ;;  %v691_v35 = vld [vmem:[%s17529_s1 + $0x88] sm:$0xff]  ;;  %s18790_s22 = smov %s18789_s13  ;;  %s17474_s27 = scalar_lea.hbm %s18789_s13, %s10073_s20 }
 0x13a   : > { %10705 = vmatpush3.bf16.msra.mxu0 %v12408_v13  ;;  %10710 = vmatprep.mubr.msk.bf16.mxu0 %vm1066_vm0, %v1026_v19  ;;  %v690_v36 = vld [vmem:[%s17529_s1 + $0x80] sm:$0xff]  ;;  %v992_v37 = vld [vmem:[%s13602_s6 + $0x38] sm:$0xff]  ;;  %v994_v39 = vld [vmem:[%s13602_s6 + $0x48] sm:$0xff]  ;;  %s13071_s21 = scalar_lea.vmem %s13070_s19, 8192 }
 0x13b   : > { %10706 = vmatprep.subr.bf16.mxu0 %v12409_v16  ;;  %v993_v38 = vld [vmem:[%s13602_s6 + $0x40] sm:$0xff]  ;;  %v995_v40 = vld [vmem:[%s13602_s6 + $0x50] sm:$0xff]  ;;  %v693_v42 = vld [vmem:[%s17529_s1 + $0x98] sm:$0xff] }
 0x13c   : > { %v12413_v41 = vld [vmem:[#allocation5 + $0x10] sm:$0xff]   ;;  %v692_v43 = vld [vmem:[%s17529_s1 + $0x90] sm:$0xff]  ;;  %v1029_v44 = vpack.c.bf16 %v993_v38, %v992_v37  ;;  %v1030_v45 = vpack.c.bf16 %v995_v40, %v994_v39  ;;  %v996_v49 = vld [vmem:[%s13602_s6 + $0x58] sm:$0xff] }
 0x13d   : > { %807 = vperm.xlu1 %12334, %v681_v10   ;;  %802 = vperm.xlu0 %12333, %v680_v11   ;;  %v12414_v46 = vld [vmem:[#allocation5 + $0x18] sm:$0xff]   ;;  %v694_v48 = vld [vmem:[%s17529_s1 + $0xa0] sm:$0xff]  ;;  %v697_v53 = vld [vmem:[%s17529_s1 + $0xb8] sm:$0xff] }
 0x13e   : > { %10707 = vmatpush3.bf16.msra.mxu0 %v12409_v16  ;;  %v695_v47 = vld [vmem:[%s17529_s1 + $0xa8] sm:$0xff]  ;;  %v997_v50 = vld [vmem:[%s13602_s6 + $0x60] sm:$0xff]  ;;  %v999_v52 = vld [vmem:[%s13602_s6 + $0x70] sm:$0xff] }
 0x13f   : > { %10708 = vmatprep.subr.bf16.mxu0 %v12410_v22  ;;  %v998_v51 = vld [vmem:[%s13602_s6 + $0x68] sm:$0xff]  ;;  %v696_v54 = vld [vmem:[%s17529_s1 + $0xb0] sm:$0xff]  ;;  %v1031_v55 = vpack.c.bf16 %v997_v50, %v996_v49  ;;  %v698_v59 = vld [vmem:[%s17529_s1 + $0xc0] sm:$0xff] }
 0x140   : > { %v1032_v56 = vpack.c.bf16 %v999_v52, %v998_v51  ;;  %v13668_v57 = vld [vmem:[#allocation5 + $0x40] sm:$0xff]   ;;  %v699_v58 = vld [vmem:[%s17529_s1 + $0xc8] sm:$0xff]  ;;  %v1001_v61 = vld [vmem:[%s13602_s6 + $0x80] sm:$0xff] }
 0x141   : > { %817 = vperm.xlu1 %12334, %v683_v14   ;;  %812 = vperm.xlu0 %12333, %v682_v15   ;;  %v1000_v60 = vld [vmem:[%s13602_s6 + $0x78] sm:$0xff]  ;;  %v1002_v62 = vld [vmem:[%s13602_s6 + $0x88] sm:$0xff]  ;;  %v1003_v63 = vld [vmem:[%s13602_s6 + $0x90] sm:$0xff] }
 0x142   : > { %10709 = vmatpush3.bf16.msra.mxu0 %v12410_v22  ;;  %v701_v0 = vld [vmem:[%s17529_s1 + $0xd8] sm:$0xff]  ;;  %v700_v1 = vld [vmem:[%s17529_s1 + $0xd0] sm:$0xff]  ;;  %v1033_v3 = vpack.c.bf16 %v1001_v61, %v1000_v60  ;;  %v1034_v4 = vpack.c.bf16 %v1003_v63, %v1002_v62  ;;  %v703_v5 = vld [vmem:[%s17529_s1 + $0xe8] sm:$0xff] }
 0x143   : > { %10742 = vmatprep.subr.bf16.mxu0 %v12411_v25  ;;  %v702_v6 = vld [vmem:[%s17529_s1 + $0xe0] sm:$0xff]  ;;  %v1004_v7 = vld [vmem:[%s13602_s6 + $0x98] sm:$0xff]  ;;  %v704_v10 = vld [vmem:[%s17529_s1 + $0xf0] sm:$0xff] }
 0x144   : > { %v1005_v8 = vld [vmem:[%s13602_s6 + $0xa0] sm:$0xff]  ;;  %v705_v9 = vld [vmem:[%s17529_s1 + $0xf8] sm:$0xff]  ;;  %v1006_v11 = vld [vmem:[%s13602_s6 + $0xa8] sm:$0xff] }
 0x145   : > { %827 = vperm.xlu1 %12334, %v685_v20   ;;  %822 = vperm.xlu0 %12333, %v684_v21   ;;  %v1007_v12 = vld [vmem:[%s13602_s6 + $0xb0] sm:$0xff]  ;;  %v1035_v13 = vpack.c.bf16 %v1005_v8, %v1004_v7  ;;  %v707_v15 = vld [vmem:[%s17530_s2 + $0x8] sm:$0xff]  ;;  %v706_v16 = vld [vmem:[%s17530_s2] sm:$0xff] }
 0x146   : > { %10711 = vmatmul.mubr.msk.bf16.vlgmr.msra.gmra.mrb[0].mxu0 %vm1066_vm0, %v1027_v32  ;;  %v1036_v14 = vpack.c.bf16 %v1007_v12, %v1006_v11  ;;  %v1008_v17 = vld [vmem:[%s13602_s6 + $0xb8] sm:$0xff]  ;;  %v1009_v18 = vld [vmem:[%s13602_s6 + $0xc0] sm:$0xff]  ;;  %v1010_v19 = vld [vmem:[%s13602_s6 + $0xc8] sm:$0xff] }
 0x147   : > { %10743 = vmatpush3.bf16.msra.mxu0 %v12411_v25  ;;  %10714 = vmatprep.mubr.msk.bf16.mxu0 %vm1066_vm0, %v1028_v33  ;;  %v1011_v20 = vld [vmem:[%s13602_s6 + $0xd0] sm:$0xff]  ;;  %v709_v21 = vld [vmem:[%s17530_s2 + $0x18] sm:$0xff]  ;;  %v711_v25 = vld [vmem:[%s17530_s2 + $0x28] sm:$0xff] }
 0x148   : > { %10744 = vmatprep.subr.bf16.mxu0 %v12412_v34  ;;  %v708_v22 = vld [vmem:[%s17530_s2 + $0x10] sm:$0xff]  ;;  %v710_v26 = vld [vmem:[%s17530_s2 + $0x20] sm:$0xff]  ;;  %v1012_v27 = vld [vmem:[%s13602_s6 + $0xd8] sm:$0xff] }
 0x149   : > { %837 = vperm.xlu1 %12334, %v687_v23   ;;  %832 = vperm.xlu0 %12333, %v686_v24   ;;  %v1037_v23 = vpack.c.bf16 %v1009_v18, %v1008_v17  ;;  %v13725_v24 = vpack.c.bf16 %v1011_v20, %v1010_v19  ;;  %v1013_v28 = vld [vmem:[%s13602_s6 + $0xe0] sm:$0xff]  ;;  %v1014_v29 = vld [vmem:[%s13602_s6 + $0xe8] sm:$0xff]  ;;  %v712_v32 = vld [vmem:[%s17530_s2 + $0x30] sm:$0xff] }
 0x14a   : > { %v13746_v33 = vpack.c.bf16 %v1013_v28, %v1012_v27  ;;  %v1016_v37 = vld [vmem:[%s13602_s6 + $0xf8] sm:$0xff]  ;;  %v1017_v38 = vld [vmem:[%s13602_s6 + $0x100] sm:$0xff]  ;;  %v716_v40 = vld [vmem:[%s17530_s2 + $0x50] sm:$0xff] }
 0x14b   : > { %10745 = vmatpush3.bf16.msra.mxu0 %v12412_v34  ;;  %v717_v39 = vld [vmem:[%s17530_s2 + $0x58] sm:$0xff]  ;;  %v724_v49 = vld [vmem:[%s17530_s2 + $0x90] sm:$0xff]  ;;  %v727_v50 = vld [vmem:[%s17530_s2 + $0xa8] sm:$0xff] }
 0x14c   : > { %10746 = vmatprep.subr.bf16.mxu0 %v12413_v41  ;;  %v726_v51 = vld [vmem:[%s17530_s2 + $0xa0] sm:$0xff]  ;;  %v729_v52 = vld [vmem:[%s17530_s2 + $0xb8] sm:$0xff]  ;;  %v736_v62 = vld [vmem:[%s17530_s2 + $0xf0] sm:$0xff] }
 0x14d   : > { %847 = vperm.xlu1 %12334, %v689_v30   ;;  %842 = vperm.xlu0 %12333, %v688_v31   ;;  %v1015_v30 = vld [vmem:[%s13602_s6 + $0xf0] sm:$0xff]  ;;  %v713_v31 = vld [vmem:[%s17530_s2 + $0x38] sm:$0xff]  ;;  %v734_v60 = vld [vmem:[%s17530_s2 + $0xe0] sm:$0xff] }
 0x14e   : > { %10715 = vmatmul.mubr.msk.bf16.gmra.mrb[4].mxu0 %vm1066_vm0, %v1029_v44  ;;  %v13748_v34 = vpack.c.bf16 %v1015_v30, %v1014_v29  ;;  %v721_v44 = vld [vmem:[%s17530_s2 + $0x78] sm:$0xff]  ;;  %v2025_v7 = vld [vmem:[%s13602_s6 + $0x2f] sm:$0xff]  ;;  %v746_v30 = vld [vmem:[%s13602_s6 + $0x47] sm:$0xff] }
 0x14f   : > { %10718 = vmatprep.mubr.msk.bf16.mxu0 %vm1066_vm0, %v1030_v45  ;;  %10747 = vmatpush3.bf16.msra.mxu0 %v12413_v41  ;;  %v13768_v41 = vpack.c.bf16 %v1017_v38, %v1016_v37  ;;  %v720_v45 = vld [vmem:[%s17530_s2 + $0x70] sm:$0xff]  ;;  %v737_v61 = vld [vmem:[%s17530_s2 + $0xf8] sm:$0xff] }
 0x150   : > { %10748 = vmatprep.subr.bf16.mxu0 %v12414_v46  ;;  %v740_v63 = vld [vmem:[%s13602_s6 + $0x17] sm:$0xff]  ;;  %v3052_v8 = vld [vmem:[%s13602_s6 + $0x3f] sm:$0xff] }
 0x151   : > { %857 = vperm.xlu1 %12334, %v691_v35   ;;  %852 = vperm.xlu0 %12333, %v690_v36   ;;  %v715_v35 = vld [vmem:[%s17530_s2 + $0x48] sm:$0xff]  ;;  %v714_v36 = vld [vmem:[%s17530_s2 + $0x40] sm:$0xff] }
 0x152   : > { %v12416_v20 = vld [vmem:[#allocation5 + $0x48] sm:$0xff]  }
 0x153   : > { %10749 = vmatpush3.bf16.msra.mxu0 %v12414_v46  ;;  %v723_v46 = vld [vmem:[%s17530_s2 + $0x88] sm:$0xff] }
 0x154   : > { %10782 = vmatprep.subr.bf16.mxu0 %v13668_v57 }
 0x155   : > { %867 = vperm.xlu1 %12334, %v693_v42   ;;  %862 = vperm.xlu0 %12333, %v692_v43   ;;  %v719_v42 = vld [vmem:[%s17530_s2 + $0x68] sm:$0xff]  ;;  %v718_v43 = vld [vmem:[%s17530_s2 + $0x60] sm:$0xff] }
 0x156   : > { %10719 = vmatmul.mubr.msk.bf16.gmra.mrb[8].mxu0 %vm1066_vm0, %v1031_v55  ;;  %v730_v55 = vld [vmem:[%s17530_s2 + $0xc0] sm:$0xff] }
 0x157   : > { %10722 = vmatprep.mubr.msk.bf16.mxu0 %vm1066_vm0, %v1032_v56  ;;  %v733_v56 = vld [vmem:[%s17530_s2 + $0xd8] sm:$0xff] }
 0x159   : > { %877 = vperm.xlu1 %12334, %v695_v47   ;;  %872 = vperm.xlu0 %12333, %v694_v48   ;;  %v722_v47 = vld [vmem:[%s17530_s2 + $0x80] sm:$0xff]  ;;  %v725_v48 = vld [vmem:[%s17530_s2 + $0x98] sm:$0xff] }
 0x15d   : > { %887 = vperm.xlu1 %12334, %v697_v53   ;;  %882 = vperm.xlu0 %12333, %v696_v54   ;;  %v728_v53 = vld [vmem:[%s17530_s2 + $0xb0] sm:$0xff]  ;;  %v731_v54 = vld [vmem:[%s17530_s2 + $0xc8] sm:$0xff] }
 0x15e   : > { %10723 = vmatmul.mubr.msk.bf16.gmra.mrb[12].mxu0 %vm1066_vm0, %v1033_v3  ;;  %v738_v3 = vld [vmem:[%s13602_s6 + $0x7] sm:$0xff] }
 0x15f   : > { %10726 = vmatprep.mubr.msk.bf16.mxu0 %vm1066_vm0, %v1034_v4 }
 0x161   : > { %897 = vperm.xlu1 %12334, %v699_v58   ;;  %892 = vperm.xlu0 %12333, %v698_v59   ;;  %v732_v58 = vld [vmem:[%s17530_s2 + $0xd0] sm:$0xff]  ;;  %v735_v59 = vld [vmem:[%s17530_s2 + $0xe8] sm:$0xff] }
 0x165   : > { %907 = vperm.xlu1 %12334, %v701_v0   ;;  %902 = vperm.xlu0 %12333, %v700_v1   ;;  %v2024_v0 = vld [vmem:[%s13602_s6 + $0x27] sm:$0xff]  ;;  %v3051_v1 = vld [vmem:[%s13602_s6 + $0x37] sm:$0xff] }
 0x166   : > { %10727 = vmatmul.mubr.msk.bf16.gmra.mrb[16].mxu0 %vm1066_vm0, %v1035_v13 }
 0x167   : > { %10730 = vmatprep.mubr.msk.bf16.mxu0 %vm1066_vm0, %v1036_v14 }
 0x169   : > { %917 = vperm.xlu1 %12334, %v703_v5   ;;  %912 = vperm.xlu0 %12333, %v702_v6   ;;  %v741_v6 = vld [vmem:[%s13602_s6 + $0x1f] sm:$0xff] }
 0x16d   : > { %927 = vperm.xlu1 %12334, %v705_v9   ;;  %922 = vperm.xlu0 %12333, %v704_v10   ;;  %v739_v9 = vld [vmem:[%s13602_s6 + $0xf] sm:$0xff] }
 0x16e   : > { %10731 = vmatmul.mubr.msk.bf16.gmra.mrb[20].mxu0 %vm1066_vm0, %v1037_v23 }
 0x16f   : > { %10734 = vmatprep.mubr.msk.bf16.mxu0 %vm1066_vm0, %v13725_v24 }
 0x171   : > { %1548 = vperm.xlu1 %12334, %v707_v15   ;;  %1543 = vperm.xlu0 %12333, %v706_v16  }
 0x175   : > { %1558 = vperm.xlu1 %12334, %v709_v21   ;;  %1553 = vperm.xlu0 %12333, %v708_v22  }
 0x176   : > { %10735 = vmatmul.mubr.msk.bf16.gmra.mrb[24].mxu0 %vm1066_vm0, %v13746_v33 }
 0x177   : > { %10738 = vmatprep.mubr.msk.bf16.mxu0 %vm1066_vm0, %v13748_v34 }
 0x179   : > { %1568 = vperm.xlu1 %12334, %v711_v25   ;;  %1563 = vperm.xlu0 %12333, %v710_v26  }
 0x17d   : > { %1578 = vperm.xlu1 %12334, %v713_v31   ;;  %1573 = vperm.xlu0 %12333, %v712_v32   ;;  %v747_v31 = vld [vmem:[%s13602_s6 + $0x4f] sm:$0xff] }
 0x17e   : > { %10739 = vmatmul.mubr.msk.bf16.gmra.mrb[28].mxu0 %vm1066_vm0, %v13768_v41 }
 0x181   : > { %1588 = vperm.xlu1 %12334, %v715_v35   ;;  %1583 = vperm.xlu0 %12333, %v714_v36  }
 0x185   : > { %1598 = vperm.xlu1 %12334, %v717_v39   ;;  %1593 = vperm.xlu0 %12333, %v716_v40   ;;  %v12417_v39 = vld [vmem:[#allocation5 + $0x50] sm:$0xff]  }
 0x189   : > { %1608 = vperm.xlu1 %12334, %v719_v42   ;;  %1603 = vperm.xlu0 %12333, %v718_v43   ;;  %v765_v42 = vld [vmem:[%s13602_s6 + $0xdf] sm:$0xff] }
 0x18d   : > { %1618 = vperm.xlu1 %12334, %v721_v44   ;;  %1613 = vperm.xlu0 %12333, %v720_v45   ;;  %v748_v45 = vld [vmem:[%s13602_s6 + $0x57] sm:$0xff] }
 0x191   : > { %1628 = vperm.xlu1 %12334, %v723_v46   ;;  %1623 = vperm.xlu0 %12333, %v722_v47   ;;  %v749_v46 = vld [vmem:[%s13602_s6 + $0x5f] sm:$0xff] }
 0x195   : > { %1638 = vperm.xlu1 %12334, %v725_v48   ;;  %1633 = vperm.xlu0 %12333, %v724_v49  }
 0x199   : > { %1648 = vperm.xlu1 %12334, %v727_v50   ;;  %1643 = vperm.xlu0 %12333, %v726_v51   ;;  %v12418_v50 = vld [vmem:[#allocation5 + $0x58] sm:$0xff]  }
 0x19d   : > { %1658 = vperm.xlu1 %12334, %v729_v52   ;;  %1653 = vperm.xlu0 %12333, %v728_v53  }
 0x1a1   : > { %1668 = vperm.xlu1 %12334, %v731_v54   ;;  %1663 = vperm.xlu0 %12333, %v730_v55   ;;  %v750_v55 = vld [vmem:[%s13602_s6 + $0x67] sm:$0xff] }
 0x1a5   : > { %1678 = vperm.xlu1 %12334, %v733_v56   ;;  %1673 = vperm.xlu0 %12333, %v732_v58   ;;  %v751_v56 = vld [vmem:[%s13602_s6 + $0x6f] sm:$0xff] }
 0x1a9   : > { %1688 = vperm.xlu1 %12334, %v735_v59   ;;  %1683 = vperm.xlu0 %12333, %v734_v60  }
 0x1ad   : > { %1698 = vperm.xlu1 %12334, %v737_v61   ;;  %1693 = vperm.xlu0 %12333, %v736_v62  }
 0x1b0   : > { %v13836_v4 = vpop.permute.xlu1 %782  ;;  %v13838_v5 = vpop.permute.xlu0 %772 }
 0x1b1   : > { %17983 = vst [vmem:[#allocation36_spill] sm:$0xff] %v13836_v4  ;;  %17984 = vst [vmem:[#allocation37_spill] sm:$0xff] %v13838_v5  ;;  %v932_v10 = vmul.f32 %v13836_v4, %v740_v63  ;;  %v13846_v11 = vmul.f32 %v2024_v0, %v13836_v4  ;;  %v13849_v12 = vmul.f32 %v3051_v1, %v13836_v4 }
 0x1b2   : > { %v930_v15 = vmul.f32 %v13838_v5, %v738_v3  ;;  %v13865_v21 = vmul.f32 %v13838_v5, %v740_v63  ;;  %v13927_v63 = vld [vmem:[#allocation5 + $0x60] sm:$0xff]  }
 0x1b3   : > { %17985 = vst [vmem:[#allocation38_spill] sm:$0xff] %v13849_v12  ;;  %v12420_v12 = vld [vmem:[#allocation5 + $0x68] sm:$0xff]  }
 0x1b4   : > { %v13851_v13 = vpop.permute.xlu1 %787  ;;  %v13853_v14 = vpop.permute.xlu0 %777 }
 0x1b5   : > { %17986 = vst [vmem:[#allocation39_spill] sm:$0xff] %v13851_v13  ;;  %17987 = vst [vmem:[#allocation40_spill] sm:$0xff] %v13853_v14  ;;  %v933_v16 = vmul.f32 %v13851_v13, %v741_v6  ;;  %v13858_v17 = vmul.f32 %v2025_v7, %v13851_v13  ;;  %v13861_v18 = vmul.f32 %v3052_v8, %v13851_v13 }
 0x1b6   : > { %v931_v19 = vmul.f32 %v13853_v14, %v739_v9  ;;  %v13868_v22 = vmul.f32 %v13853_v14, %v741_v6  ;;  %v752_v6 = vld [vmem:[%s13602_s6 + $0x77] sm:$0xff]  ;;  %v753_v9 = vld [vmem:[%s13602_s6 + $0x7f] sm:$0xff] }
 0x1b7   : > { %17988 = vst [vmem:[#allocation41_spill] sm:$0xff] %v13861_v18  ;;  %v971_v25 = vpack.c.bf16 %v933_v16, %v932_v10 }
 0x1b8   : > { %v970_v23 = vpack.c.bf16 %v931_v19, %v930_v15  ;;  %v13874_v28 = vpop.permute.xlu1 %797  ;;  %v13876_v29 = vpop.permute.xlu0 %792 }
 0x1b9   : > { %17989 = vst [vmem:[#allocation42_spill] sm:$0xff] %v13874_v28  ;;  %17990 = vst [vmem:[#allocation43_spill] sm:$0xff] %v13876_v29  ;;  %v934_v35 = vmul.f32 %v2024_v0, %v13876_v29  ;;  %v935_v36 = vmul.f32 %v2025_v7, %v13874_v28  ;;  %v13886_v37 = vmul.f32 %v3051_v1, %v13876_v29 }
 0x1ba   : > { %10750 = vmatprep.mubr.msk.bf16.mxu0 %vm1066_vm0, %v970_v23  ;;  %v13889_v38 = vmul.f32 %v3052_v8, %v13874_v28 }
 0x1bb   : > { %10751 = vmatmul.mubr.msk.bf16.vlgmr.msra.gmra.mrb[0].mxu0 %vm1066_vm0, %v971_v25  ;;  %v972_v40 = vpack.c.bf16 %v935_v36, %v934_v35  ;;  %v754_v25 = vld [vmem:[%s13602_s6 + $0x87] sm:$0xff] }
 0x1bc   : > { %10783 = vmatpush3.bf16.msra.mxu0 %v13668_v57  ;;  %v13895_v43 = vpop.permute.xlu1 %807  ;;  %v13897_v44 = vpop.permute.xlu0 %802 }
 0x1bd   : > { %17991 = vst [vmem:[#allocation44_spill] sm:$0xff] %v13895_v43  ;;  %17992 = vst [vmem:[#allocation45_spill] sm:$0xff] %v13897_v44  ;;  %10784 = vmatprep.subr.bf16.mxu0 %v12416_v20  ;;  %10754 = vmatprep.mubr.msk.bf16.mxu0 %vm1066_vm0, %v972_v40  ;;  %v936_v47 = vmul.f32 %v3051_v1, %v13897_v44  ;;  %v937_v48 = vmul.f32 %v3052_v8, %v13895_v43 }
 0x1be   : > { %v13905_v57 = vmul.f32 %v13897_v44, %v746_v30  ;;  %v13908_v49 = vmul.f32 %v13895_v43, %v747_v31 }
 0x1bf   : > { %v973_v51 = vpack.c.bf16 %v937_v48, %v936_v47  ;;  %v756_v48 = vld [vmem:[%s13602_s6 + $0x97] sm:$0xff] }
 0x1c0   : > { %10785 = vmatpush3.bf16.msra.mxu0 %v12416_v20  ;;  %v13912_v53 = vpop.permute.xlu1 %817  ;;  %v13914_v54 = vpop.permute.xlu0 %812 }
 0x1c1   : > { %17993 = vst [vmem:[#allocation46_spill] sm:$0xff] %v13912_v53  ;;  %17994 = vst [vmem:[#allocation47_spill] sm:$0xff] %v13914_v54  ;;  %10786 = vmatprep.subr.bf16.mxu0 %v12417_v39  ;;  %v938_v58 = vmul.f32 %v13914_v54, %v746_v30  ;;  %v939_v59 = vmul.f32 %v13912_v53, %v747_v31  ;;  %v13921_v60 = vmul.f32 %v13914_v54, %v748_v45  ;;  %v755_v30 = vld [vmem:[%s13602_s6 + $0x8f] sm:$0xff] }
 0x1c2   : > { %v13924_v61 = vmul.f32 %v13912_v53, %v749_v46  ;;  %v2698_v53 = vld [vmem:[%s13602_s6 + $0x29] sm:$0xff] }
 0x1c3   : > { %10755 = vmatmul.mubr.msk.bf16.gmra.mrb[4].mxu0 %vm1066_vm0, %v973_v51  ;;  %v974_v62 = vpack.c.bf16 %v939_v59, %v938_v58 }
 0x1c4   : > { %10787 = vmatpush3.bf16.msra.mxu0 %v12417_v39  ;;  %v13931_v1 = vpop.permute.xlu1 %827  ;;  %v13933_v3 = vpop.permute.xlu0 %822 }
 0x1c5   : > { %17995 = vst [vmem:[#allocation48_spill] sm:$0xff] %v13931_v1  ;;  %17996 = vst [vmem:[#allocation49_spill] sm:$0xff] %v13933_v3  ;;  %10788 = vmatprep.subr.bf16.mxu0 %v12418_v50  ;;  %10758 = vmatprep.mubr.msk.bf16.mxu0 %vm1066_vm0, %v974_v62  ;;  %v940_v7 = vmul.f32 %v13933_v3, %v748_v45  ;;  %v941_v8 = vmul.f32 %v13931_v1, %v749_v46 }
 0x1c6   : > { %v13941_v10 = vmul.f32 %v13933_v3, %v750_v55  ;;  %v13944_v15 = vmul.f32 %v13931_v1, %v751_v56 }
 0x1c7   : > { %v975_v16 = vpack.c.bf16 %v941_v8, %v940_v7 }
 0x1c8   : > { %10789 = vmatpush3.bf16.msra.mxu0 %v12418_v50  ;;  %v13948_v20 = vpop.permute.xlu1 %837  ;;  %v13950_v23 = vpop.permute.xlu0 %832  ;;  %v757_v50 = vld [vmem:[%s13602_s6 + $0x9f] sm:$0xff] }
 0x1c9   : > { %17997 = vst [vmem:[#allocation50_spill] sm:$0xff] %v13948_v20  ;;  %17998 = vst [vmem:[#allocation51_spill] sm:$0xff] %v13950_v23  ;;  %10822 = vmatprep.subr.bf16.mxu0 %v13927_v63  ;;  %v942_v31 = vmul.f32 %v13950_v23, %v750_v55  ;;  %v943_v35 = vmul.f32 %v13948_v20, %v751_v56  ;;  %v13958_v36 = vmul.f32 %v13950_v23, %v752_v6 }
 0x1ca   : > { %v13961_v39 = vmul.f32 %v13948_v20, %v753_v9 }
 0x1cb   : > { %10759 = vmatmul.mubr.msk.bf16.gmra.mrb[8].mxu0 %vm1066_vm0, %v975_v16  ;;  %v976_v40 = vpack.c.bf16 %v943_v35, %v942_v31  ;;  %v758_v35 = vld [vmem:[%s13602_s6 + $0xa7] sm:$0xff] }
 0x1cc   : > { %v13966_v46 = vpop.permute.xlu1 %847  ;;  %v13968_v47 = vpop.permute.xlu0 %842 }
 0x1cd   : > { %17999 = vst [vmem:[#allocation52_spill] sm:$0xff] %v13966_v46  ;;  %18000 = vst [vmem:[#allocation53_spill] sm:$0xff] %v13968_v47  ;;  %10762 = vmatprep.mubr.msk.bf16.mxu0 %vm1066_vm0, %v976_v40  ;;  %v944_v51 = vmul.f32 %v13968_v47, %v752_v6  ;;  %v945_v55 = vmul.f32 %v13966_v46, %v753_v9  ;;  %v13976_v56 = vmul.f32 %v13968_v47, %v754_v25  ;;  %v759_v40 = vld [vmem:[%s13602_s6 + $0xaf] sm:$0xff] }
 0x1ce   : > { %v13979_v58 = vmul.f32 %v13966_v46, %v755_v30 }
 0x1cf   : > { %v977_v59 = vpack.c.bf16 %v945_v55, %v944_v51  ;;  %v761_v55 = vld [vmem:[%s13602_s6 + $0xbf] sm:$0xff] }
 0x1d0   : > { %v13983_v7 = vpop.permute.xlu1 %857  ;;  %v13985_v8 = vpop.permute.xlu0 %852 }
 0x1d1   : > { %18001 = vst [vmem:[#allocation54_spill] sm:$0xff] %v13983_v7  ;;  %18002 = vst [vmem:[#allocation55_spill] sm:$0xff] %v13985_v8  ;;  %v946_v16 = vmul.f32 %v13985_v8, %v754_v25  ;;  %v947_v6 = vmul.f32 %v13983_v7, %v755_v30  ;;  %v13990_v9 = vmul.f32 %v13985_v8, %v756_v48  ;;  %v14089_v8 = vld [vmem:[%s13602_s6 + $0x10f] sm:$0xff] }
 0x1d2   : > { %v13993_v31 = vmul.f32 %v13983_v7, %v757_v50  ;;  %v14086_v7 = vld [vmem:[%s13602_s6 + $0x107] sm:$0xff] }
 0x1d3   : > { %10763 = vmatmul.mubr.msk.bf16.gmra.mrb[12].mxu0 %vm1066_vm0, %v977_v59  ;;  %v978_v51 = vpack.c.bf16 %v947_v6, %v946_v16  ;;  %v760_v6 = vld [vmem:[%s13602_s6 + $0xb7] sm:$0xff] }
 0x1d4   : > { %v14000_v2 = vpop.permute.xlu1 %867  ;;  %v14002_v25 = vpop.permute.xlu0 %862 }
 0x1d5   : > { %18003 = vst [vmem:[#allocation56_spill] sm:$0xff] %v14000_v2  ;;  %18004 = vst [vmem:[#allocation57_spill] sm:$0xff] %v14002_v25  ;;  %10766 = vmatprep.mubr.msk.bf16.mxu0 %vm1066_vm0, %v978_v51  ;;  %v948_v30 = vmul.f32 %v14002_v25, %v756_v48  ;;  %v949_v27 = vmul.f32 %v14000_v2, %v757_v50  ;;  %v14008_v59 = vmul.f32 %v14002_v25, %v758_v35 }
 0x1d6   : > { %v14011_v16 = vmul.f32 %v14000_v2, %v759_v40 }
 0x1d7   : > { %v979_v62 = vpack.c.bf16 %v949_v27, %v948_v30  ;;  %v762_v27 = vld [vmem:[%s13602_s6 + $0xc7] sm:$0xff]  ;;  %v763_v30 = vld [vmem:[%s13602_s6 + $0xcf] sm:$0xff] }
 0x1d8   : > { %v14017_v19 = vpop.permute.xlu1 %877  ;;  %v14019_v51 = vpop.permute.xlu0 %872 }
 0x1d9   : > { %18005 = vst [vmem:[#allocation58_spill] sm:$0xff] %v14017_v19  ;;  %18006 = vst [vmem:[#allocation59_spill] sm:$0xff] %v14019_v51  ;;  %v950_v48 = vmul.f32 %v14019_v51, %v758_v35  ;;  %v951_v50 = vmul.f32 %v14017_v19, %v759_v40  ;;  %v14024_v0 = vmul.f32 %v14019_v51, %v760_v6 }
 0x1da   : > { %v14027_v52 = vmul.f32 %v14017_v19, %v761_v55 }
 0x1db   : > { %10767 = vmatmul.mubr.msk.bf16.gmra.mrb[16].mxu0 %vm1066_vm0, %v979_v62  ;;  %v980_v45 = vpack.c.bf16 %v951_v50, %v950_v48  ;;  %v764_v50 = vld [vmem:[%s13602_s6 + $0xd7] sm:$0xff] }
 0x1dc   : > { %v14034_v26 = vpop.permute.xlu1 %887  ;;  %v14036_v35 = vpop.permute.xlu0 %882 }
 0x1dd   : > { %18007 = vst [vmem:[#allocation60_spill] sm:$0xff] %v14034_v26  ;;  %18008 = vst [vmem:[#allocation61_spill] sm:$0xff] %v14036_v35  ;;  %10770 = vmatprep.mubr.msk.bf16.mxu0 %vm1066_vm0, %v980_v45  ;;  %v952_v40 = vmul.f32 %v14036_v35, %v760_v6  ;;  %v953_v32 = vmul.f32 %v14034_v26, %v761_v55  ;;  %v14042_v62 = vmul.f32 %v14036_v35, %v762_v27 }
 0x1de   : > { %v14045_v48 = vmul.f32 %v14034_v26, %v763_v30 }
 0x1df   : > { %v981_v4 = vpack.c.bf16 %v953_v32, %v952_v40  ;;  %v766_v32 = vld [vmem:[%s13602_s6 + $0xe7] sm:$0xff]  ;;  %v767_v40 = vld [vmem:[%s13602_s6 + $0xef] sm:$0xff] }
 0x1e0   : > { %v14051_v19 = vpop.permute.xlu1 %897  ;;  %v14053_v45 = vpop.permute.xlu0 %892 }
 0x1e1   : > { %18009 = vst [vmem:[#allocation62_spill] sm:$0xff] %v14051_v19  ;;  %18010 = vst [vmem:[#allocation63_spill] sm:$0xff] %v14053_v45  ;;  %v954_v6 = vmul.f32 %v14053_v45, %v762_v27  ;;  %v955_v55 = vmul.f32 %v14051_v19, %v763_v30  ;;  %v14058_v35 = vmul.f32 %v14053_v45, %v764_v50 }
 0x1e2   : > { %v14061_v26 = vmul.f32 %v14051_v19, %v765_v42 }
 0x1e3   : > { %10771 = vmatmul.mubr.msk.bf16.gmra.mrb[20].mxu0 %vm1066_vm0, %v981_v4  ;;  %v982_v13 = vpack.c.bf16 %v955_v55, %v954_v6  ;;  %v768_v6 = vld [vmem:[%s13602_s6 + $0xf7] sm:$0xff]  ;;  %v769_v55 = vld [vmem:[%s13602_s6 + $0xff] sm:$0xff] }
 0x1e4   : > { %v14068_v51 = vpop.permute.xlu1 %907  ;;  %v14070_v30 = vpop.permute.xlu0 %902 }
 0x1e5   : > { %18011 = vst [vmem:[#allocation64_spill] sm:$0xff] %v14068_v51  ;;  %18012 = vst [vmem:[#allocation65_spill] sm:$0xff] %v14070_v30  ;;  %10774 = vmatprep.mubr.msk.bf16.mxu0 %vm1066_vm0, %v982_v13  ;;  %v956_v45 = vmul.f32 %v14070_v30, %v764_v50  ;;  %v957_v19 = vmul.f32 %v14068_v51, %v765_v42  ;;  %v14076_v4 = vmul.f32 %v14070_v30, %v766_v32 }
 0x1e6   : > { %v14079_v2 = vmul.f32 %v14068_v51, %v767_v40 }
 0x1e7   : > { %v983_v25 = vpack.c.bf16 %v957_v19, %v956_v45 }
 0x1e8   : > { %v14091_v13 = vpop.permute.xlu1 %917  ;;  %v14093_v50 = vpop.permute.xlu0 %912 }
 0x1e9   : > { %18013 = vst [vmem:[#allocation66_spill] sm:$0xff] %v14091_v13  ;;  %18014 = vst [vmem:[#allocation67_spill] sm:$0xff] %v14093_v50  ;;  %v958_v42 = vmul.f32 %v14093_v50, %v766_v32  ;;  %v959_v51 = vmul.f32 %v14091_v13, %v767_v40  ;;  %v14098_v19 = vmul.f32 %v14093_v50, %v768_v6  ;;  %v1509_v40 = vld [vmem:[%s13602_s6 + $0x9] sm:$0xff] }
 0x1ea   : > { %v14101_v45 = vmul.f32 %v14091_v13, %v769_v55  ;;  %v14106_v27 = vmul.f32 %v14086_v7, %v14093_v50  ;;  %v14110_v32 = vmul.f32 %v14089_v8, %v14091_v13  ;;  %v1510_v50 = vld [vmem:[%s13602_s6 + $0x11] sm:$0xff] }
 0x1eb   : > { %10775 = vmatmul.mubr.msk.bf16.gmra.mrb[24].mxu0 %vm1066_vm0, %v983_v25  ;;  %v984_v30 = vpack.c.bf16 %v959_v51, %v958_v42  ;;  %v1512_v51 = vld [vmem:[%s13602_s6 + $0x21] sm:$0xff]  ;;  %v1511_v42 = vld [vmem:[%s13602_s6 + $0x19] sm:$0xff] }
 0x1ec   : > { %18015 = vst [vmem:[#allocation68_spill] sm:$0xff] %v14106_v27  ;;  %18016 = vst [vmem:[#allocation69_spill] sm:$0xff] %v14110_v32  ;;  %v14114_v46 = vpop.permute.xlu1 %927  ;;  %v14116_v47 = vpop.permute.xlu0 %922  ;;  %v3726_v32 = vld [vmem:[%s13602_s6 + $0x41] sm:$0xff] }
 0x1ed   : > { %18017 = vst [vmem:[#allocation70_spill] sm:$0xff] %v14114_v46  ;;  %18018 = vst [vmem:[#allocation71_spill] sm:$0xff] %v14116_v47  ;;  %10778 = vmatprep.mubr.msk.bf16.mxu0 %vm1066_vm0, %v984_v30  ;;  %v960_v25 = vmul.f32 %v14116_v47, %v768_v6  ;;  %v961_v13 = vmul.f32 %v14114_v46, %v769_v55  ;;  %v2699_v55 = vld [vmem:[%s13602_s6 + $0x31] sm:$0xff] }
 0x1ef   : > { %v985_v23 = vpack.c.bf16 %v961_v13, %v960_v25  ;;  %v3725_v13 = vld [vmem:[%s13602_s6 + $0x39] sm:$0xff] }
 0x1f0   : > { %v14127_v1 = vpop.permute.xlu1 %1548  ;;  %v14129_v3 = vpop.permute.xlu0 %1543 }
 0x1f1   : > { %18019 = vst [vmem:[#allocation72_spill] sm:$0xff] %v14127_v1  ;;  %18020 = vst [vmem:[#allocation73_spill] sm:$0xff] %v14129_v3  ;;  %v1701_v20 = vmul.f32 %v14129_v3, %v1509_v40  ;;  %v1702_v30 = vmul.f32 %v14127_v1, %v1510_v50  ;;  %v14134_v27 = vmul.f32 %v14129_v3, %v1511_v42 }
 0x1f2   : > { %v14137_v6 = vmul.f32 %v14127_v1, %v1512_v51 }
 0x1f3   : > { %10779 = vmatmul.mubr.msk.bf16.gmra.mrb[28].mxu0 %vm1066_vm0, %v985_v23  ;;  %v1741_v25 = vpack.c.bf16 %v1702_v30, %v1701_v20 }
 0x1f4   : > { %v14146_v43 = vpop.permute.xlu1 %1558  ;;  %v14148_v40 = vpop.permute.xlu0 %1553 }
 0x1f5   : > { %18021 = vst [vmem:[#allocation74_spill] sm:$0xff] %v14146_v43  ;;  %18022 = vst [vmem:[#allocation75_spill] sm:$0xff] %v14148_v40  ;;  %v1704_v50 = vmul.f32 %v14146_v43, %v1512_v51  ;;  %v14152_v3 = vmul.f32 %v2699_v55, %v14146_v43  ;;  %v14155_v1 = vmul.f32 %v3726_v32, %v14146_v43  ;;  %10790 = vmatprep.mubr.msk.bf16.mxu0 %vm1066_vm0, %v1741_v25 }
 0x1f6   : > { %v1703_v23 = vmul.f32 %v14148_v40, %v1511_v42  ;;  %v14160_v20 = vmul.f32 %v2698_v53, %v14148_v40  ;;  %v14163_v30 = vmul.f32 %v3725_v13, %v14148_v40  ;;  %v1518_v40 = vld [vmem:[%s13602_s6 + $0x51] sm:$0xff] }
 0x1f7   : > { %18023 = vst [vmem:[#allocation76_spill] sm:$0xff] %v14155_v1 }
 0x1f8   : > { %18024 = vst [vmem:[#allocation77_spill] sm:$0xff] %v14163_v30  ;;  %v1742_v54 = vpack.c.bf16 %v1704_v50, %v1703_v23  ;;  %v14165_v51 = vpop.permute.xlu1 %1568  ;;  %v14167_v44 = vpop.permute.xlu0 %1563  ;;  %v1517_v23 = vld [vmem:[%s13602_s6 + $0x49] sm:$0xff] }
 0x1f9   : > { %18025 = vst [vmem:[#allocation78_spill] sm:$0xff] %v14165_v51  ;;  %18026 = vst [vmem:[#allocation79_spill] sm:$0xff] %v14167_v44  ;;  %v1705_v25 = vmul.f32 %v2698_v53, %v14167_v44  ;;  %v1706_v18 = vmul.f32 %v2699_v55, %v14165_v51  ;;  %v14176_v28 = vmul.f32 %v3725_v13, %v14167_v44  ;;  %v12421_v30 = vld [vmem:[#allocation5 + $0x70] sm:$0xff]  }
 0x1fa   : > { %v14179_v50 = vmul.f32 %v3726_v32, %v14165_v51 }
 0x1fb   : > { %10791 = vmatmul.mubr.msk.bf16.vlgmr.msra.gmra.mrb[0].mxu0 %vm1066_vm0, %v1742_v54  ;;  %v1743_v43 = vpack.c.bf16 %v1706_v18, %v1705_v25  ;;  %v1519_v18 = vld [vmem:[%s13602_s6 + $0x59] sm:$0xff] }
 0x1fc   : > { %10823 = vmatpush3.bf16.msra.mxu0 %v13927_v63  ;;  %v14187_v42 = vpop.permute.xlu1 %1578  ;;  %v14189_v55 = vpop.permute.xlu0 %1573  ;;  %v1520_v63 = vld [vmem:[%s13602_s6 + $0x61] sm:$0xff] }
 0x1fd   : > { %18027 = vst [vmem:[#allocation80_spill] sm:$0xff] %v14187_v42  ;;  %18028 = vst [vmem:[#allocation81_spill] sm:$0xff] %v14189_v55  ;;  %10824 = vmatprep.subr.bf16.mxu0 %v12420_v12  ;;  %10794 = vmatprep.mubr.msk.bf16.mxu0 %vm1066_vm0, %v1743_v43  ;;  %v1707_v1 = vmul.f32 %v3725_v13, %v14189_v55  ;;  %v1708_v54 = vmul.f32 %v3726_v32, %v14187_v42  ;;  %v12422_v43 = vld [vmem:[#allocation5 + $0x78] sm:$0xff]   ;;  %v1524_v32 = vld [vmem:[%s13602_s6 + $0x81] sm:$0xff] }
 0x1fe   : > { %v14195_v51 = vmul.f32 %v14189_v55, %v1517_v23  ;;  %v14200_v25 = vmul.f32 %v14187_v42, %v1518_v40 }
 0x1ff   : > { %v1744_v53 = vpack.c.bf16 %v1708_v54, %v1707_v1  ;;  %v1522_v1 = vld [vmem:[%s13602_s6 + $0x71] sm:$0xff] }
 0x200   : > { %18029 = vst [vmem:[#allocation82_spill] sm:$0xff] %v14195_v51  ;;  %10825 = vmatpush3.bf16.msra.mxu0 %v12420_v12  ;;  %v14202_v44 = vpop.permute.xlu1 %1588  ;;  %v14204_v29 = vpop.permute.xlu0 %1583  ;;  %v1521_v12 = vld [vmem:[%s13602_s6 + $0x69] sm:$0xff] }
 0x201   : > { %18030 = vst [vmem:[#allocation83_spill] sm:$0xff] %v14202_v44  ;;  %18031 = vst [vmem:[#allocation84_spill] sm:$0xff] %v14204_v29  ;;  %10826 = vmatprep.subr.bf16.mxu0 %v12421_v30  ;;  %v1709_v13 = vmul.f32 %v14204_v29, %v1517_v23  ;;  %v1710_v55 = vmul.f32 %v14202_v44, %v1518_v40  ;;  %v14211_v5 = vmul.f32 %v14204_v29, %v1519_v18  ;;  %v14225_v29 = vld [vmem:[#allocation5 + $0x80] sm:$0xff]  }
 0x202   : > { %v14214_v42 = vmul.f32 %v14202_v44, %v1520_v63 }
 0x203   : > { %18032 = vst [vmem:[#allocation85_spill] sm:$0xff] %v14211_v5  ;;  %10795 = vmatmul.mubr.msk.bf16.gmra.mrb[4].mxu0 %vm1066_vm0, %v1744_v53  ;;  %v1745_v54 = vpack.c.bf16 %v1710_v55, %v1709_v13  ;;  %v1523_v13 = vld [vmem:[%s13602_s6 + $0x79] sm:$0xff] }
 0x204   : > { %18033 = vst [vmem:[#allocation86_spill] sm:$0xff] %v14214_v42  ;;  %10827 = vmatpush3.bf16.msra.mxu0 %v12421_v30  ;;  %v14221_v23 = vpop.permute.xlu1 %1598  ;;  %v14223_v40 = vpop.permute.xlu0 %1593 }
 0x205   : > { %18034 = vst [vmem:[#allocation87_spill] sm:$0xff] %v14221_v23  ;;  %18035 = vst [vmem:[#allocation88_spill] sm:$0xff] %v14223_v40  ;;  %10828 = vmatprep.subr.bf16.mxu0 %v12422_v43  ;;  %10798 = vmatprep.mubr.msk.bf16.mxu0 %vm1066_vm0, %v1745_v54  ;;  %v1711_v44 = vmul.f32 %v14223_v40, %v1519_v18  ;;  %v1712_v53 = vmul.f32 %v14221_v23, %v1520_v63 }
 0x206   : > { %v14231_v55 = vmul.f32 %v14223_v40, %v1521_v12  ;;  %v14234_v30 = vmul.f32 %v14221_v23, %v1522_v1 }
 0x207   : > { %v1746_v14 = vpack.c.bf16 %v1712_v53, %v1711_v44  ;;  %v1526_v53 = vld [vmem:[%s13602_s6 + $0x91] sm:$0xff] }
 0x208   : > { %18036 = vst [vmem:[#allocation89_spill] sm:$0xff] %v14231_v55  ;;  %18037 = vst [vmem:[#allocation90_spill] sm:$0xff] %v14234_v30  ;;  %10829 = vmatpush3.bf16.msra.mxu0 %v12422_v43  ;;  %v14240_v54 = vpop.permute.xlu1 %1608  ;;  %v14242_v18 = vpop.permute.xlu0 %1603  ;;  %v1525_v43 = vld [vmem:[%s13602_s6 + $0x89] sm:$0xff]  ;;  %v1528_v55 = vld [vmem:[%s13602_s6 + $0xa1] sm:$0xff] }
 0x209   : > { %18038 = vst [vmem:[#allocation91_spill] sm:$0xff] %v14240_v54  ;;  %18039 = vst [vmem:[#allocation92_spill] sm:$0xff] %v14242_v18  ;;  %10862 = vmatprep.subr.bf16.mxu0 %v14225_v29  ;;  %v1713_v63 = vmul.f32 %v14242_v18, %v1521_v12  ;;  %v1714_v40 = vmul.f32 %v14240_v54, %v1522_v1  ;;  %v14248_v23 = vmul.f32 %v14242_v18, %v1523_v13 }
 0x20a   : > { %v14251_v44 = vmul.f32 %v14240_v54, %v1524_v32 }
 0x20b   : > { %18040 = vst [vmem:[#allocation93_spill] sm:$0xff] %v14248_v23  ;;  %10799 = vmatmul.mubr.msk.bf16.gmra.mrb[8].mxu0 %vm1066_vm0, %v1746_v14  ;;  %v1747_v5 = vpack.c.bf16 %v1714_v40, %v1713_v63  ;;  %v1527_v63 = vld [vmem:[%s13602_s6 + $0x99] sm:$0xff] }
 0x20c   : > { %18041 = vst [vmem:[#allocation94_spill] sm:$0xff] %v14251_v44  ;;  %v14258_v30 = vpop.permute.xlu1 %1618  ;;  %v14260_v12 = vpop.permute.xlu0 %1613 }
 0x20d   : > { %18042 = vst [vmem:[#allocation95_spill] sm:$0xff] %v14258_v30  ;;  %18043 = vst [vmem:[#allocation96_spill] sm:$0xff] %v14260_v12  ;;  %10802 = vmatprep.mubr.msk.bf16.mxu0 %vm1066_vm0, %v1747_v5  ;;  %v1715_v1 = vmul.f32 %v14260_v12, %v1523_v13  ;;  %v1716_v54 = vmul.f32 %v14258_v30, %v1524_v32  ;;  %v14266_v14 = vmul.f32 %v14260_v12, %v1525_v43 }
 0x20e   : > { %v14269_v40 = vmul.f32 %v14258_v30, %v1526_v53 }
 0x20f   : > { %18044 = vst [vmem:[#allocation97_spill] sm:$0xff] %v14266_v14  ;;  %v1748_v18 = vpack.c.bf16 %v1716_v54, %v1715_v1  ;;  %v1529_v54 = vld [vmem:[%s13602_s6 + $0xa9] sm:$0xff]  ;;  %v1530_v1 = vld [vmem:[%s13602_s6 + $0xb1] sm:$0xff]  ;;  %v1532_v14 = vld [vmem:[%s13602_s6 + $0xc1] sm:$0xff] }
 0x210   : > { %18045 = vst [vmem:[#allocation98_spill] sm:$0xff] %v14269_v40  ;;  %v14275_v44 = vpop.permute.xlu1 %1628  ;;  %v14277_v5 = vpop.permute.xlu0 %1623 }
 0x211   : > { %18046 = vst [vmem:[#allocation99_spill] sm:$0xff] %v14275_v44  ;;  %18047 = vst [vmem:[#allocation100_spill] sm:$0xff] %v14277_v5  ;;  %v1717_v13 = vmul.f32 %v14277_v5, %v1525_v43  ;;  %v1718_v32 = vmul.f32 %v14275_v44, %v1526_v53  ;;  %v14282_v12 = vmul.f32 %v14277_v5, %v1527_v63 }
 0x212   : > { %v14285_v30 = vmul.f32 %v14275_v44, %v1528_v55 }
 0x213   : > { %18048 = vst [vmem:[#allocation101_spill] sm:$0xff] %v14282_v12  ;;  %10803 = vmatmul.mubr.msk.bf16.gmra.mrb[12].mxu0 %vm1066_vm0, %v1748_v18  ;;  %v1749_v23 = vpack.c.bf16 %v1718_v32, %v1717_v13  ;;  %v1531_v32 = vld [vmem:[%s13602_s6 + $0xb9] sm:$0xff] }
 0x214   : > { %18049 = vst [vmem:[#allocation102_spill] sm:$0xff] %v14285_v30  ;;  %v14292_v40 = vpop.permute.xlu1 %1638  ;;  %v14294_v43 = vpop.permute.xlu0 %1633 }
 0x215   : > { %18050 = vst [vmem:[#allocation103_spill] sm:$0xff] %v14292_v40  ;;  %18051 = vst [vmem:[#allocation104_spill] sm:$0xff] %v14294_v43  ;;  %10806 = vmatprep.mubr.msk.bf16.mxu0 %vm1066_vm0, %v1749_v23  ;;  %v1719_v53 = vmul.f32 %v14294_v43, %v1527_v63  ;;  %v1720_v44 = vmul.f32 %v14292_v40, %v1528_v55  ;;  %v14300_v18 = vmul.f32 %v14294_v43, %v1529_v54 }
 0x216   : > { %v14303_v13 = vmul.f32 %v14292_v40, %v1530_v1 }
 0x217   : > { %18052 = vst [vmem:[#allocation105_spill] sm:$0xff] %v14300_v18  ;;  %v1750_v5 = vpack.c.bf16 %v1720_v44, %v1719_v53  ;;  %v1533_v44 = vld [vmem:[%s13602_s6 + $0xc9] sm:$0xff]  ;;  %v1534_v53 = vld [vmem:[%s13602_s6 + $0xd1] sm:$0xff]  ;;  %v1536_v18 = vld [vmem:[%s13602_s6 + $0xe1] sm:$0xff] }
 0x218   : > { %18053 = vst [vmem:[#allocation106_spill] sm:$0xff] %v14303_v13  ;;  %v14309_v30 = vpop.permute.xlu1 %1648  ;;  %v14311_v23 = vpop.permute.xlu0 %1643 }
 0x219   : > { %18054 = vst [vmem:[#allocation107_spill] sm:$0xff] %v14309_v30  ;;  %18055 = vst [vmem:[#allocation108_spill] sm:$0xff] %v14311_v23  ;;  %v1721_v63 = vmul.f32 %v14311_v23, %v1529_v54  ;;  %v1722_v55 = vmul.f32 %v14309_v30, %v1530_v1  ;;  %v14316_v43 = vmul.f32 %v14311_v23, %v1531_v32 }
 0x21a   : > { %v14319_v40 = vmul.f32 %v14309_v30, %v1532_v14 }
 0x21b   : > { %18056 = vst [vmem:[#allocation109_spill] sm:$0xff] %v14316_v43  ;;  %10807 = vmatmul.mubr.msk.bf16.gmra.mrb[16].mxu0 %vm1066_vm0, %v1750_v5  ;;  %v1751_v12 = vpack.c.bf16 %v1722_v55, %v1721_v63  ;;  %v1535_v55 = vld [vmem:[%s13602_s6 + $0xd9] sm:$0xff] }
 0x21c   : > { %18057 = vst [vmem:[#allocation110_spill] sm:$0xff] %v14319_v40  ;;  %v14326_v13 = vpop.permute.xlu1 %1658  ;;  %v14328_v54 = vpop.permute.xlu0 %1653 }
 0x21d   : > { %18058 = vst [vmem:[#allocation111_spill] sm:$0xff] %v14326_v13  ;;  %18059 = vst [vmem:[#allocation112_spill] sm:$0xff] %v14328_v54  ;;  %10810 = vmatprep.mubr.msk.bf16.mxu0 %vm1066_vm0, %v1751_v12  ;;  %v1723_v1 = vmul.f32 %v14328_v54, %v1531_v32  ;;  %v1724_v30 = vmul.f32 %v14326_v13, %v1532_v14  ;;  %v14334_v5 = vmul.f32 %v14328_v54, %v1533_v44 }
 0x21e   : > { %v14337_v63 = vmul.f32 %v14326_v13, %v1534_v53 }
 0x21f   : > { %18060 = vst [vmem:[#allocation113_spill] sm:$0xff] %v14334_v5  ;;  %v1752_v23 = vpack.c.bf16 %v1724_v30, %v1723_v1  ;;  %v1537_v30 = vld [vmem:[%s13602_s6 + $0xe9] sm:$0xff]  ;;  %v1538_v1 = vld [vmem:[%s13602_s6 + $0xf1] sm:$0xff] }
 0x220   : > { %18061 = vst [vmem:[#allocation114_spill] sm:$0xff] %v14337_v63  ;;  %v14343_v40 = vpop.permute.xlu1 %1668  ;;  %v14345_v12 = vpop.permute.xlu0 %1663 }
 0x221   : > { %18062 = vst [vmem:[#allocation115_spill] sm:$0xff] %v14343_v40  ;;  %18063 = vst [vmem:[#allocation116_spill] sm:$0xff] %v14345_v12  ;;  %v1725_v32 = vmul.f32 %v14345_v12, %v1533_v44  ;;  %v1726_v14 = vmul.f32 %v14343_v40, %v1534_v53  ;;  %v14350_v54 = vmul.f32 %v14345_v12, %v1535_v55 }
 0x222   : > { %v14353_v13 = vmul.f32 %v14343_v40, %v1536_v18 }
 0x223   : > { %18064 = vst [vmem:[#allocation117_spill] sm:$0xff] %v14350_v54  ;;  %10811 = vmatmul.mubr.msk.bf16.gmra.mrb[20].mxu0 %vm1066_vm0, %v1752_v23  ;;  %v1753_v43 = vpack.c.bf16 %v1726_v14, %v1725_v32  ;;  %v1539_v32 = vld [vmem:[%s13602_s6 + $0xf9] sm:$0xff]  ;;  %v1540_v14 = vld [vmem:[%s13602_s6 + $0x101] sm:$0xff]  ;;  %v14378_v54 = vld [vmem:[%s13602_s6 + $0x109] sm:$0xff] }
 0x224   : > { %18065 = vst [vmem:[#allocation118_spill] sm:$0xff] %v14353_v13  ;;  %v14360_v5 = vpop.permute.xlu1 %1678  ;;  %v14362_v53 = vpop.permute.xlu0 %1673  ;;  %18070 = vst [vmem:[#allocation123_spill] sm:$0xff] %v14378_v54  ;;  %v14381_v13 = vld [vmem:[%s13602_s6 + $0x111] sm:$0xff] }
 0x225   : > { %18066 = vst [vmem:[#allocation119_spill] sm:$0xff] %v14360_v5  ;;  %18067 = vst [vmem:[#allocation120_spill] sm:$0xff] %v14362_v53  ;;  %10814 = vmatprep.mubr.msk.bf16.mxu0 %vm1066_vm0, %v1753_v43  ;;  %v1727_v12 = vmul.f32 %v14362_v53, %v1535_v55  ;;  %v1728_v40 = vmul.f32 %v14360_v5, %v1536_v18  ;;  %v14368_v23 = vmul.f32 %v14362_v53, %v1537_v30 }
 0x226   : > { %v14371_v63 = vmul.f32 %v14360_v5, %v1538_v1 }
 0x227   : > { %18068 = vst [vmem:[#allocation121_spill] sm:$0xff] %v14368_v23  ;;  %v1754_v42 = vpack.c.bf16 %v1728_v40, %v1727_v12 }
 0x228   : > { %18069 = vst [vmem:[#allocation122_spill] sm:$0xff] %v14371_v63  ;;  %v14383_v43 = vpop.permute.xlu1 %1688  ;;  %v14385_v55 = vpop.permute.xlu0 %1683 }
 0x229   : > { %18071 = vst [vmem:[#allocation124_spill] sm:$0xff] %v14383_v43  ;;  %18072 = vst [vmem:[#allocation125_spill] sm:$0xff] %v14385_v55  ;;  %v1729_v18 = vmul.f32 %v14385_v55, %v1537_v30  ;;  %v1730_v53 = vmul.f32 %v14383_v43, %v1538_v1  ;;  %v14390_v5 = vmul.f32 %v14385_v55, %v1539_v32 }
 0x22a   : > { %v14393_v40 = vmul.f32 %v14383_v43, %v1540_v14  ;;  %v14398_v12 = vmul.f32 %v14378_v54, %v14385_v55  ;;  %v14402_v44 = vmul.f32 %v14381_v13, %v14383_v43  ;;  %v18076_v30 = vpack.c.bf16 %v13858_v17, %v13846_v11  ;;  %v12427_v17 = vld [vmem:[#allocation5 + $0xa0] sm:$0xff]   ;;  %v3746_v43 = vld [vmem:[%s13602_s6 + $0xe1] sm:$0xff] }
 0x22b   : > { %10815 = vmatmul.mubr.msk.bf16.gmra.mrb[24].mxu0 %vm1066_vm0, %v1754_v42  ;;  %v1755_v23 = vpack.c.bf16 %v1730_v53, %v1729_v18  ;;  %v18075_v53 = vpack.c.bf16 %v13868_v22, %v13865_v21  ;;  %v12424_v18 = vld [vmem:[#allocation5 + $0x88] sm:$0xff]   ;;  %v12426_v21 = vld [vmem:[#allocation5 + $0x98] sm:$0xff]   ;;  %v18078_v22 = vpack.c.bf16 %v13908_v49, %v13905_v57  ;;  %v18079_v11 = vpack.c.bf16 %v13924_v61, %v13921_v60 }
 0x22c   : > { %v14406_v1 = vpop.permute.xlu1 %1698  ;;  %v14408_v63 = vpop.permute.xlu0 %1693  ;;  %v18083_v57 = vpack.c.bf16 %v13993_v31, %v13990_v9  ;;  %v18084_v49 = vpack.c.bf16 %v14011_v16, %v14008_v59  ;;  %v18085_v60 = vpack.c.bf16 %v14027_v52, %v14024_v0  ;;  %v18086_v61 = vpack.c.bf16 %v14045_v48, %v14042_v62  ;;  %v2378_v9 = vld [vmem:[%s13602_s6 + $0x30] sm:$0xff]  ;;  %v2379_v31 = vld [vmem:[%s13602_s6 + $0x38] sm:$0xff]  ;;  %v2380_v59 = vld [vmem:[%s13602_s6 + $0x40] sm:$0xff] }
 0x22d   : > { %18073 = vst [vmem:[#allocation126_spill] sm:$0xff] %v14406_v1  ;;  %18074 = vst [vmem:[#allocation127_spill] sm:$0xff] %v14408_v63  ;;  %10818 = vmatprep.mubr.msk.bf16.mxu0 %vm1066_vm0, %v1755_v23  ;;  %v1731_v42 = vmul.f32 %v14408_v63, %v1539_v32  ;;  %v1732_v55 = vmul.f32 %v14406_v1, %v1540_v14  ;;  %v18077_v23 = vpack.c.bf16 %v13889_v38, %v13886_v37  ;;  %v2382_v62 = vld [vmem:[%s13602_s6 + $0x50] sm:$0xff]  ;;  %v2383_v48 = vld [vmem:[%s13602_s6 + $0x58] sm:$0xff] }
 0x22e   : > { %v18081_v37 = vpack.c.bf16 %v13961_v39, %v13958_v36  ;;  %v18082_v38 = vpack.c.bf16 %v13979_v58, %v13976_v56  ;;  %v18089_v52 = vpack.c.bf16 %v14101_v45, %v14098_v19  ;;  %v2084_v0 = vmul.f32 %v14086_v7, %v14116_v47  ;;  %v2375_v39 = vld [vmem:[%s13602_s6 + $0x18] sm:$0xff]  ;;  %v2377_v58 = vld [vmem:[%s13602_s6 + $0x28] sm:$0xff] }
 0x22f   : > { %v1756_v54 = vpack.c.bf16 %v1732_v55, %v1731_v42  ;;  %v2085_v36 = vmul.f32 %v14089_v8, %v14114_v46  ;;  %v14489_v7 = vpack.c.bf16 %v2378_v9, %v2377_v58  ;;  %v14491_v16 = vpack.c.bf16 %v2380_v59, %v2379_v31  ;;  %v12428_v8 = vld [vmem:[#allocation5 + $0xa8] sm:$0xff]   ;;  %v12429_v19 = vld [vmem:[#allocation5 + $0xb0] sm:$0xff]   ;;  %v12430_v14 = vld [vmem:[#allocation5 + $0xb8] sm:$0xff]  }
 0x230   : > { %v2385_v55 = vld [vmem:[%s13602_s6 + $0x68] sm:$0xff]  ;;  %v2387_v42 = vld [vmem:[%s13602_s6 + $0x78] sm:$0xff] }
 0x231   : > { %v18102_v58 = vld [vmem:[#allocation93_spill] sm:$0xff]  ;;  %v18104_v31 = vld [vmem:[#allocation98_spill] sm:$0xff] }
 0x232   : > { %v18105_v59 = vld [vmem:[#allocation97_spill] sm:$0xff] }
 0x233   : > { %10819 = vmatmul.mubr.msk.bf16.gmra.mrb[28].mxu0 %vm1066_vm0, %v1756_v54  ;;  %v12425_v54 = vld [vmem:[#allocation5 + $0x90] sm:$0xff]  }
 0x234   : > { %10830 = vmatprep.mubr.msk.bf16.mxu0 %vm1066_vm0, %v18075_v53  ;;  %v2388_v53 = vld [vmem:[%s13602_s6 + $0x80] sm:$0xff] }
 0x23b   : > { %10831 = vmatmul.mubr.msk.bf16.vlgmr.msra.gmra.mrb[0].mxu0 %vm1066_vm0, %v18076_v30  ;;  %v2386_v30 = vld [vmem:[%s13602_s6 + $0x70] sm:$0xff] }
 0x23c   : > { %10863 = vmatpush3.bf16.msra.mxu0 %v14225_v29  ;;  %10834 = vmatprep.mubr.msk.bf16.mxu0 %vm1066_vm0, %v18077_v23  ;;  %v18080_v29 = vpack.c.bf16 %v13944_v15, %v13941_v10  ;;  %v18087_v10 = vpack.c.bf16 %v14061_v26, %v14058_v35  ;;  %v18088_v15 = vpack.c.bf16 %v14079_v2, %v14076_v4  ;;  %v2376_v26 = vld [vmem:[%s13602_s6 + $0x20] sm:$0xff]  ;;  %v2381_v35 = vld [vmem:[%s13602_s6 + $0x48] sm:$0xff] }
 0x23d   : > { %10864 = vmatprep.subr.bf16.mxu0 %v12424_v18  ;;  %v2415_v56 = vpack.c.bf16 %v2376_v26, %v2375_v39  ;;  %v2109_v2 = vpack.c.bf16 %v2085_v36, %v2084_v0  ;;  %v2384_v4 = vld [vmem:[%s13602_s6 + $0x60] sm:$0xff]  ;;  %v14501_v45 = vpack.c.bf16 %v2382_v62, %v2381_v35  ;;  %v14513_v23 = vpack.c.bf16 %v2386_v30, %v2385_v55  ;;  %v12434_v39 = vld [vmem:[#allocation5 + $0xd8] sm:$0xff]  }
 0x23e   : > { %v14503_v32 = vpack.c.bf16 %v2384_v4, %v2383_v48  ;;  %v18090_v36 = vpack.c.bf16 %v14137_v6, %v14134_v27  ;;  %v18093_v27 = vmov %v14195_v51  ;;  %v18095_v26 = vld [vmem:[#allocation86_spill] sm:$0xff]  ;;  %v18108_v62 = vld [vmem:[#allocation101_spill] sm:$0xff]  ;;  %v18179_v51 = vld [vmem:[#allocation103_spill] sm:$0xff] }
 0x23f   : > { %v18094_v6 = vpack.c.bf16 %v14200_v25, %v18093_v27  ;;  %v18101_v25 = vld [vmem:[#allocation94_spill] sm:$0xff]  ;;  %v18114_v30 = vld [vmem:[#allocation109_spill] sm:$0xff] }
 0x240   : > { %10865 = vmatpush3.bf16.msra.mxu0 %v12424_v18  ;;  %v12431_v18 = vld [vmem:[#allocation5 + $0xc0] sm:$0xff]   ;;  %v18103_v9 = vpack.c.bf16 %v18101_v25, %v18102_v58  ;;  %v3056_v58 = vld [vmem:[%s13602_s6 + $0x5f] sm:$0xff] }
 0x241   : > { %10866 = vmatprep.subr.bf16.mxu0 %v12425_v54  ;;  %v18107_v35 = vld [vmem:[#allocation102_spill] sm:$0xff]  ;;  %v3055_v25 = vld [vmem:[%s13602_s6 + $0x57] sm:$0xff] }
 0x242   : > { %v18109_v48 = vpack.c.bf16 %v18107_v35, %v18108_v62  ;;  %v18110_v4 = vld [vmem:[#allocation106_spill] sm:$0xff]  ;;  %v18134_v62 = vld [vmem:[#allocation45_spill] sm:$0xff] }
 0x243   : > { %10835 = vmatmul.mubr.msk.bf16.gmra.mrb[4].mxu0 %vm1066_vm0, %v18078_v22  ;;  %v2390_v22 = vld [vmem:[%s13602_s6 + $0x90] sm:$0xff] }
 0x244   : > { %10838 = vmatprep.mubr.msk.bf16.mxu0 %vm1066_vm0, %v18079_v11  ;;  %10867 = vmatpush3.bf16.msra.mxu0 %v12425_v54  ;;  %v14515_v54 = vpack.c.bf16 %v2388_v53, %v2387_v42  ;;  %v2391_v11 = vld [vmem:[%s13602_s6 + $0x98] sm:$0xff]  ;;  %v18113_v55 = vld [vmem:[#allocation110_spill] sm:$0xff] }
 0x245   : > { %10868 = vmatprep.subr.bf16.mxu0 %v12426_v21  ;;  %v18115_v42 = vpack.c.bf16 %v18113_v55, %v18114_v30  ;;  %v18116_v53 = vld [vmem:[#allocation114_spill] sm:$0xff]  ;;  %v18136_v55 = vld [vmem:[#allocation47_spill] sm:$0xff] }
 0x246   : > { %v3058_v35 = vld [vmem:[%s13602_s6 + $0x6f] sm:$0xff] }
 0x248   : > { %10869 = vmatpush3.bf16.msra.mxu0 %v12426_v21  ;;  %v2389_v21 = vld [vmem:[%s13602_s6 + $0x88] sm:$0xff] }
 0x249   : > { %10902 = vmatprep.subr.bf16.mxu0 %v12427_v17 }
 0x24b   : > { %10839 = vmatmul.mubr.msk.bf16.gmra.mrb[8].mxu0 %vm1066_vm0, %v18080_v29  ;;  %v14525_v29 = vpack.c.bf16 %v2390_v22, %v2389_v21  ;;  %v18119_v22 = vld [vmem:[#allocation118_spill] sm:$0xff] }
 0x24c   : > { %10842 = vmatprep.mubr.msk.bf16.mxu0 %vm1066_vm0, %v18081_v37 }
 0x253   : > { %10843 = vmatmul.mubr.msk.bf16.gmra.mrb[12].mxu0 %vm1066_vm0, %v18082_v38  ;;  %v2393_v38 = vld [vmem:[%s13602_s6 + $0xa8] sm:$0xff] }
 0x254   : > { %10846 = vmatprep.mubr.msk.bf16.mxu0 %vm1066_vm0, %v18083_v57  ;;  %v2394_v57 = vld [vmem:[%s13602_s6 + $0xb0] sm:$0xff] }
 0x25b   : > { %10847 = vmatmul.mubr.msk.bf16.gmra.mrb[16].mxu0 %vm1066_vm0, %v18084_v49  ;;  %v2395_v49 = vld [vmem:[%s13602_s6 + $0xb8] sm:$0xff] }
 0x25c   : > { %10850 = vmatprep.mubr.msk.bf16.mxu0 %vm1066_vm0, %v18085_v60  ;;  %v2396_v60 = vld [vmem:[%s13602_s6 + $0xc0] sm:$0xff] }
 0x263   : > { %10851 = vmatmul.mubr.msk.bf16.gmra.mrb[20].mxu0 %vm1066_vm0, %v18086_v61  ;;  %v14537_v61 = vpack.c.bf16 %v2394_v57, %v2393_v38  ;;  %v18122_v38 = vld [vmem:[#allocation122_spill] sm:$0xff]  ;;  %v18123_v57 = vld [vmem:[#allocation121_spill] sm:$0xff] }
 0x264   : > { %10854 = vmatprep.mubr.msk.bf16.mxu0 %vm1066_vm0, %v18087_v10  ;;  %v14539_v10 = vpack.c.bf16 %v2396_v60, %v2395_v49  ;;  %v18124_v49 = vpack.c.bf16 %v18122_v38, %v18123_v57  ;;  %v3050_v60 = vld [vmem:[%s13602_s6 + $0x2f] sm:$0xff]  ;;  %v18138_v57 = vld [vmem:[#allocation49_spill] sm:$0xff] }
 0x265   : > { %v3062_v38 = vld [vmem:[%s13602_s6 + $0x8f] sm:$0xff] }
 0x26b   : > { %10855 = vmatmul.mubr.msk.bf16.gmra.mrb[24].mxu0 %vm1066_vm0, %v18088_v15  ;;  %v2405_v15 = vld [vmem:[%s13602_s6 + $0x108] sm:$0xff] }
 0x26c   : > { %10858 = vmatprep.mubr.msk.bf16.mxu0 %vm1066_vm0, %v18089_v52  ;;  %v2406_v52 = vld [vmem:[%s13602_s6 + $0x110] sm:$0xff] }
 0x26d   : > { %v14555_v0 = vpack.c.bf16 %v2406_v52, %v2405_v15  ;;  %v18125_v15 = vpack.c.bf16 %v14393_v40, %v14390_v5  ;;  %v18126_v52 = vld [vmem:[#allocation123_spill] sm:$0xff]  ;;  %v3053_v5 = vld [vmem:[%s13602_s6 + $0x47] sm:$0xff] }
 0x26e   : > { %v3054_v40 = vld [vmem:[%s13602_s6 + $0x4f] sm:$0xff] }
 0x273   : > { %10859 = vmatmul.mubr.msk.bf16.gmra.mrb[28].mxu0 %vm1066_vm0, %v2109_v2 }
 0x274   : > { %10870 = vmatprep.mubr.msk.bf16.mxu0 %vm1066_vm0, %v2415_v56  ;;  %v18099_v56 = vld [vmem:[#allocation89_spill] sm:$0xff] }
 0x27b   : > { %10871 = vmatmul.mubr.msk.bf16.vlgmr.msra.gmra.mrb[0].mxu0 %vm1066_vm0, %v14489_v7 }
 0x27c   : > { %10903 = vmatpush3.bf16.msra.mxu0 %v12427_v17  ;;  %10874 = vmatprep.mubr.msk.bf16.mxu0 %vm1066_vm0, %v14491_v16  ;;  %v2392_v17 = vld [vmem:[%s13602_s6 + $0xa0] sm:$0xff] }
 0x27d   : > { %10904 = vmatprep.subr.bf16.mxu0 %v12428_v8  ;;  %v14527_v37 = vpack.c.bf16 %v2392_v17, %v2391_v11  ;;  %v18120_v11 = vld [vmem:[#allocation117_spill] sm:$0xff] }
 0x27e   : > { %v18121_v17 = vpack.c.bf16 %v18119_v22, %v18120_v11  ;;  %v3060_v11 = vld [vmem:[%s13602_s6 + $0x7f] sm:$0xff] }
 0x280   : > { %10905 = vmatpush3.bf16.msra.mxu0 %v12428_v8  ;;  %v18106_v8 = vpack.c.bf16 %v18104_v31, %v18105_v59  ;;  %v18132_v31 = vld [vmem:[#allocation38_spill] sm:$0xff] }
 0x281   : > { %10906 = vmatprep.subr.bf16.mxu0 %v12429_v19 }
 0x283   : > { %10875 = vmatmul.mubr.msk.bf16.gmra.mrb[4].mxu0 %vm1066_vm0, %v14501_v45 }
 0x284   : > { %10878 = vmatprep.mubr.msk.bf16.mxu0 %vm1066_vm0, %v14503_v32  ;;  %10907 = vmatpush3.bf16.msra.mxu0 %v12429_v19  ;;  %v18111_v19 = vld [vmem:[#allocation105_spill] sm:$0xff] }
 0x285   : > { %10908 = vmatprep.subr.bf16.mxu0 %v12430_v14 }
 0x288   : > { %10909 = vmatpush3.bf16.msra.mxu0 %v12430_v14  ;;  %v18112_v14 = vpack.c.bf16 %v18110_v4, %v18111_v19  ;;  %v18135_v4 = vld [vmem:[#allocation44_spill] sm:$0xff] }
 0x289   : > { %10942 = vmatprep.subr.bf16.mxu0 %v12431_v18  ;;  %v3088_v19 = vmul.f32 %v3056_v58, %v18135_v4  ;;  %v18144_v58 = vld [vmem:[#allocation55_spill] sm:$0xff] }
 0x28b   : > { %10879 = vmatmul.mubr.msk.bf16.gmra.mrb[8].mxu0 %vm1066_vm0, %v14513_v23 }
 0x28c   : > { %10882 = vmatprep.mubr.msk.bf16.mxu0 %vm1066_vm0, %v14515_v54 }
 0x293   : > { %10883 = vmatmul.mubr.msk.bf16.gmra.mrb[12].mxu0 %vm1066_vm0, %v14525_v29 }
 0x294   : > { %10886 = vmatprep.mubr.msk.bf16.mxu0 %vm1066_vm0, %v14527_v37 }
 0x29b   : > { %10887 = vmatmul.mubr.msk.bf16.gmra.mrb[16].mxu0 %vm1066_vm0, %v14537_v61 }
 0x29c   : > { %10890 = vmatprep.mubr.msk.bf16.mxu0 %vm1066_vm0, %v14539_v10 }
 0x2a3   : > { %10891 = vmatmul.mubr.msk.bf16.gmra.mrb[20].mxu0 %vm1066_vm0, %v13725_v24  ;;  %v12432_v24 = vld [vmem:[#allocation5 + $0xc8] sm:$0xff]  }
 0x2a4   : > { %10894 = vmatprep.mubr.msk.bf16.mxu0 %vm1066_vm0, %v13746_v33  ;;  %v18091_v33 = vpack.c.bf16 %v14152_v3, %v14160_v20  ;;  %v18096_v3 = vld [vmem:[#allocation85_spill] sm:$0xff] }
 0x2a5   : > { %v18097_v20 = vpack.c.bf16 %v18095_v26, %v18096_v3  ;;  %v18129_v3 = vld [vmem:[#allocation43_spill] sm:$0xff] }
 0x2ab   : > { %10895 = vmatmul.mubr.msk.bf16.gmra.mrb[24].mxu0 %vm1066_vm0, %v13748_v34  ;;  %v18092_v34 = vpack.c.bf16 %v14179_v50, %v14176_v28  ;;  %v12435_v28 = vld [vmem:[#allocation5 + $0xe0] sm:$0xff]  }
 0x2ac   : > { %10898 = vmatprep.mubr.msk.bf16.mxu0 %vm1066_vm0, %v13768_v41  ;;  %v12433_v41 = vld [vmem:[#allocation5 + $0xd0] sm:$0xff]   ;;  %v18098_v50 = vld [vmem:[#allocation90_spill] sm:$0xff] }
 0x2ad   : > { %v18100_v2 = vpack.c.bf16 %v18098_v50, %v18099_v56  ;;  %v18130_v50 = vld [vmem:[#allocation42_spill] sm:$0xff] }
 0x2ae   : > { %v3086_v56 = vmul.f32 %v3054_v40, %v18130_v50  ;;  %v3065_v40 = vld [vmem:[%s13602_s6 + $0xa7] sm:$0xff] }
 0x2b3   : > { %10899 = vmatmul.mubr.msk.bf16.gmra.mrb[28].mxu0 %vm1066_vm0, %v14555_v0 }
 0x2b4   : > { %10910 = vmatprep.mubr.msk.bf16.mxu0 %vm1066_vm0, %v18090_v36  ;;  %v2758_v36 = vmul.f32 %v18126_v52, %v14408_v63  ;;  %v14654_v52 = vld [vmem:[#allocation5 + $0x100] sm:$0xff]  }
 0x2bb   : > { %10911 = vmatmul.mubr.msk.bf16.vlgmr.msra.gmra.mrb[0].mxu0 %vm1066_vm0, %v18091_v33  ;;  %v3049_v33 = vld [vmem:[%s13602_s6 + $0x27] sm:$0xff] }
 0x2bc   : > { %10943 = vmatpush3.bf16.msra.mxu0 %v12431_v18  ;;  %10914 = vmatprep.mubr.msk.bf16.mxu0 %vm1066_vm0, %v18092_v34  ;;  %v18117_v18 = vld [vmem:[#allocation113_spill] sm:$0xff]  ;;  %v18127_v34 = vld [vmem:[#allocation40_spill] sm:$0xff] }
 0x2bd   : > { %10944 = vmatprep.subr.bf16.mxu0 %v12432_v24  ;;  %v18118_v21 = vpack.c.bf16 %v18116_v53, %v18117_v18 }
 0x2c0   : > { %10945 = vmatpush3.bf16.msra.mxu0 %v12432_v24  ;;  %v2759_v24 = vmul.f32 %v14381_v13, %v14406_v1  ;;  %v12436_v13 = vld [vmem:[#allocation5 + $0xe8] sm:$0xff]  }
 0x2c1   : > { %10946 = vmatprep.subr.bf16.mxu0 %v12433_v41 }
 0x2c3   : > { %10915 = vmatmul.mubr.msk.bf16.gmra.mrb[4].mxu0 %vm1066_vm0, %v18094_v6  ;;  %v2783_v6 = vpack.c.bf16 %v2759_v24, %v2758_v36  ;;  %v18140_v36 = vld [vmem:[#allocation51_spill] sm:$0xff] }
 0x2c4   : > { %10918 = vmatprep.mubr.msk.bf16.mxu0 %vm1066_vm0, %v18097_v20  ;;  %10947 = vmatpush3.bf16.msra.mxu0 %v12433_v41  ;;  %v3082_v41 = vmul.f32 %v3050_v60, %v18127_v34  ;;  %v3085_v20 = vmul.f32 %v3053_v5, %v18129_v3  ;;  %v18139_v60 = vld [vmem:[#allocation48_spill] sm:$0xff] }
 0x2c5   : > { %10948 = vmatprep.subr.bf16.mxu0 %v12434_v39  ;;  %v3064_v5 = vld [vmem:[%s13602_s6 + $0x9f] sm:$0xff] }
 0x2c8   : > { %10949 = vmatpush3.bf16.msra.mxu0 %v12434_v39  ;;  %v18128_v39 = vld [vmem:[#allocation37_spill] sm:$0xff] }
 0x2c9   : > { %10982 = vmatprep.subr.bf16.mxu0 %v12435_v28  ;;  %v3081_v27 = vmul.f32 %v3049_v33, %v18128_v39  ;;  %v18141_v33 = vld [vmem:[#allocation50_spill] sm:$0xff] }
 0x2cb   : > { %10919 = vmatmul.mubr.msk.bf16.gmra.mrb[8].mxu0 %vm1066_vm0, %v18100_v2  ;;  %v3121_v26 = vpack.c.bf16 %v3082_v41, %v3081_v27  ;;  %v3123_v2 = vpack.c.bf16 %v3086_v56, %v3085_v20  ;;  %v3094_v41 = vmul.f32 %v3062_v38, %v18141_v33  ;;  %v3066_v20 = vld [vmem:[%s13602_s6 + $0xaf] sm:$0xff]  ;;  %v18142_v56 = vld [vmem:[#allocation53_spill] sm:$0xff] }
 0x2cc   : > { %10922 = vmatprep.mubr.msk.bf16.mxu0 %vm1066_vm0, %v18103_v9  ;;  %v18131_v9 = vld [vmem:[#allocation41_spill] sm:$0xff] }
 0x2cd   : > { %v18133_v59 = vpack.c.bf16 %v18131_v9, %v18132_v31  ;;  %v3097_v9 = vmul.f32 %v3065_v40, %v18144_v58  ;;  %v18145_v31 = vld [vmem:[#allocation54_spill] sm:$0xff]  ;;  %v18151_v40 = vld [vmem:[#allocation60_spill] sm:$0xff] }
 0x2d3   : > { %10923 = vmatmul.mubr.msk.bf16.gmra.mrb[12].mxu0 %vm1066_vm0, %v18106_v8  ;;  %v3057_v8 = vld [vmem:[%s13602_s6 + $0x67] sm:$0xff] }
 0x2d4   : > { %10926 = vmatprep.mubr.msk.bf16.mxu0 %vm1066_vm0, %v18109_v48  ;;  %v3087_v48 = vmul.f32 %v3055_v25, %v18134_v62  ;;  %v3089_v30 = vmul.f32 %v3057_v8, %v18136_v55 }
 0x2d6   : > { %v3124_v18 = vpack.c.bf16 %v3088_v19, %v3087_v48  ;;  %v3067_v48 = vld [vmem:[%s13602_s6 + $0xb7] sm:$0xff]  ;;  %v3068_v19 = vld [vmem:[%s13602_s6 + $0xbf] sm:$0xff] }
 0x2db   : > { %10927 = vmatmul.mubr.msk.bf16.gmra.mrb[16].mxu0 %vm1066_vm0, %v18112_v14  ;;  %v12437_v14 = vld [vmem:[#allocation5 + $0xf0] sm:$0xff]  }
 0x2dc   : > { %10930 = vmatprep.mubr.msk.bf16.mxu0 %vm1066_vm0, %v18115_v42  ;;  %v18137_v42 = vld [vmem:[#allocation46_spill] sm:$0xff] }
 0x2dd   : > { %v3090_v53 = vmul.f32 %v3058_v35, %v18137_v42 }
 0x2df   : > { %v3125_v22 = vpack.c.bf16 %v3090_v53, %v3089_v30  ;;  %v3070_v30 = vld [vmem:[%s13602_s6 + $0xcf] sm:$0xff]  ;;  %v18146_v53 = vld [vmem:[#allocation57_spill] sm:$0xff] }
 0x2e3   : > { %10931 = vmatmul.mubr.msk.bf16.gmra.mrb[20].mxu0 %vm1066_vm0, %v18118_v21  ;;  %v12438_v21 = vld [vmem:[#allocation5 + $0xf8] sm:$0xff]  }
 0x2e4   : > { %10934 = vmatprep.mubr.msk.bf16.mxu0 %vm1066_vm0, %v18121_v17  ;;  %v3061_v17 = vld [vmem:[%s13602_s6 + $0x87] sm:$0xff] }
 0x2e5   : > { %v3093_v24 = vmul.f32 %v3061_v17, %v18140_v36  ;;  %v18149_v17 = vld [vmem:[#allocation58_spill] sm:$0xff] }
 0x2e6   : > { %v3102_v38 = vmul.f32 %v3070_v30, %v18149_v17 }
 0x2eb   : > { %10935 = vmatmul.mubr.msk.bf16.gmra.mrb[24].mxu0 %vm1066_vm0, %v18124_v49 }
 0x2ec   : > { %10938 = vmatprep.mubr.msk.bf16.mxu0 %vm1066_vm0, %v18125_v15  ;;  %v3092_v15 = vmul.f32 %v3060_v11, %v18139_v60 }
 0x2f3   : > { %10939 = vmatmul.mubr.msk.bf16.gmra.mrb[28].mxu0 %vm1066_vm0, %v2783_v6  ;;  %v3127_v6 = vpack.c.bf16 %v3094_v41, %v3093_v24  ;;  %v3071_v24 = vld [vmem:[%s13602_s6 + $0xd7] sm:$0xff]  ;;  %v3072_v41 = vld [vmem:[%s13602_s6 + $0xdf] sm:$0xff] }
 0x2f4   : > { %10950 = vmatprep.mubr.msk.bf16.mxu0 %vm1066_vm0, %v3121_v26  ;;  %v3063_v26 = vld [vmem:[%s13602_s6 + $0x97] sm:$0xff] }
 0x2fb   : > { %10951 = vmatmul.mubr.msk.bf16.vlgmr.msra.gmra.mrb[0].mxu0 %vm1066_vm0, %v18133_v59  ;;  %v3098_v59 = vmul.f32 %v3066_v20, %v18145_v31  ;;  %v3104_v20 = vmul.f32 %v3072_v41, %v18151_v40 }
 0x2fc   : > { %10983 = vmatpush3.bf16.msra.mxu0 %v12435_v28  ;;  %10954 = vmatprep.mubr.msk.bf16.mxu0 %vm1066_vm0, %v3123_v2  ;;  %v3059_v28 = vld [vmem:[%s13602_s6 + $0x77] sm:$0xff] }
 0x2fd   : > { %10984 = vmatprep.subr.bf16.mxu0 %v12436_v13  ;;  %v3091_v49 = vmul.f32 %v3059_v28, %v18138_v57  ;;  %v18143_v2 = vld [vmem:[#allocation52_spill] sm:$0xff]  ;;  %v3129_v35 = vpack.c.bf16 %v3098_v59, %v3097_v9  ;;  %v18148_v28 = vld [vmem:[#allocation59_spill] sm:$0xff]  ;;  %v18153_v9 = vld [vmem:[#allocation62_spill] sm:$0xff] }
 0x2fe   : > { %v3096_v25 = vmul.f32 %v3064_v5, %v18143_v2 }
 0x2ff   : > { %v3126_v27 = vpack.c.bf16 %v3092_v15, %v3091_v49 }
 0x300   : > { %10985 = vmatpush3.bf16.msra.mxu0 %v12436_v13  ;;  %v3095_v13 = vmul.f32 %v3063_v26, %v18142_v56  ;;  %v18150_v26 = vld [vmem:[#allocation61_spill] sm:$0xff] }
 0x301   : > { %10986 = vmatprep.subr.bf16.mxu0 %v12437_v14  ;;  %v3103_v5 = vmul.f32 %v3071_v24, %v18150_v26  ;;  %v18157_v24 = vld [vmem:[#allocation68_spill] sm:$0xff] }
 0x302   : > { %v3128_v8 = vpack.c.bf16 %v3096_v25, %v3095_v13  ;;  %v18152_v13 = vld [vmem:[#allocation63_spill] sm:$0xff] }
 0x303   : > { %10955 = vmatmul.mubr.msk.bf16.gmra.mrb[4].mxu0 %vm1066_vm0, %v3124_v18  ;;  %v3099_v18 = vmul.f32 %v3067_v48, %v18146_v53  ;;  %v3075_v48 = vld [vmem:[%s13602_s6 + $0xf7] sm:$0xff] }
 0x304   : > { %10958 = vmatprep.mubr.msk.bf16.mxu0 %vm1066_vm0, %v3125_v22  ;;  %10987 = vmatpush3.bf16.msra.mxu0 %v12437_v14  ;;  %v3069_v14 = vld [vmem:[%s13602_s6 + $0xc7] sm:$0xff] }
 0x305   : > { %10988 = vmatprep.subr.bf16.mxu0 %v12438_v21  ;;  %v3101_v11 = vmul.f32 %v3069_v14, %v18148_v28  ;;  %v18154_v14 = vld [vmem:[#allocation65_spill] sm:$0xff] }
 0x306   : > { %v3107_v30 = vmul.f32 %v3075_v48, %v18154_v14 }
 0x307   : > { %v3131_v15 = vpack.c.bf16 %v3102_v38, %v3101_v11  ;;  %v3079_v38 = vld [vmem:[%s13602_s6 + $0x117] sm:$0xff] }
 0x308   : > { %10989 = vmatpush3.bf16.msra.mxu0 %v12438_v21  ;;  %v18147_v21 = vld [vmem:[#allocation56_spill] sm:$0xff] }
 0x309   : > { %11022 = vmatprep.subr.bf16.mxu0 %v14654_v52  ;;  %v3100_v22 = vmul.f32 %v3068_v19, %v18147_v21  ;;  %v3076_v19 = vld [vmem:[%s13602_s6 + $0xff] sm:$0xff] }
 0x30b   : > { %10959 = vmatmul.mubr.msk.bf16.gmra.mrb[8].mxu0 %vm1066_vm0, %v3126_v27  ;;  %v3130_v49 = vpack.c.bf16 %v3100_v22, %v3099_v18  ;;  %v3073_v27 = vld [vmem:[%s13602_s6 + $0xe7] sm:$0xff]  ;;  %v18155_v18 = vld [vmem:[#allocation64_spill] sm:$0xff] }
 0x30c   : > { %10962 = vmatprep.mubr.msk.bf16.mxu0 %vm1066_vm0, %v3127_v6  ;;  %v3074_v6 = vld [vmem:[%s13602_s6 + $0xef] sm:$0xff]  ;;  %v3105_v25 = vmul.f32 %v3073_v27, %v18152_v13  ;;  %v3108_v22 = vmul.f32 %v3076_v19, %v18155_v18  ;;  %v3111_v27 = vmul.f32 %v3079_v38, %v14116_v47  ;;  %v3432_v38 = vld [vmem:[%s13602_s6 + $0x118] sm:$0xff] }
 0x30d   : > { %v3106_v59 = vmul.f32 %v3074_v6, %v18153_v9  ;;  %v18180_v47 = vld [vmem:[#allocation108_spill] sm:$0xff] }
 0x30e   : > { %v3134_v11 = vpack.c.bf16 %v3108_v22, %v3107_v30  ;;  %v3429_v30 = vld [vmem:[%s13602_s6 + $0x100] sm:$0xff] }
 0x313   : > { %10963 = vmatmul.mubr.msk.bf16.gmra.mrb[12].mxu0 %vm1066_vm0, %v3128_v8  ;;  %v3132_v8 = vpack.c.bf16 %v3104_v20, %v3103_v5  ;;  %v14705_v20 = vld [vmem:[#allocation10 + $0x40] sm:$0xff]  }
 0x314   : > { %10966 = vmatprep.mubr.msk.bf16.mxu0 %vm1066_vm0, %v3129_v35  ;;  %v3133_v35 = vpack.c.bf16 %v3106_v59, %v3105_v25  ;;  %v14709_v25 = vld [vmem:[#allocation10 + $0x48] sm:$0xff]   ;;  %11654 = vmatprep.subr.bf16.mxu1 %v14705_v20 }
 0x315   : > { %11662 = vmatpush3.bf16.msra.mxu1 %v14705_v20  ;;  %v12440_v59 = vld [vmem:[#allocation5 + $0x108] sm:$0xff]  }
 0x316   : > { %11655 = vmatprep.subr.bf16.mxu1 %v14709_v25 }
 0x319   : > { %11663 = vmatpush3.bf16.msra.mxu1 %v14709_v25 }
 0x31b   : > { %10967 = vmatmul.mubr.msk.bf16.gmra.mrb[16].mxu0 %vm1066_vm0, %v3130_v49  ;;  %v3080_v49 = vld [vmem:[%s13602_s6 + $0x11f] sm:$0xff] }
 0x31c   : > { %10970 = vmatprep.mubr.msk.bf16.mxu0 %vm1066_vm0, %v3131_v15  ;;  %v18156_v15 = vld [vmem:[#allocation69_spill] sm:$0xff]  ;;  %v3112_v6 = vmul.f32 %v3080_v49, %v14114_v46 }
 0x31d   : > { %v18158_v41 = vpack.c.bf16 %v18156_v15, %v18157_v24  ;;  %v3433_v49 = vld [vmem:[%s13602_s6 + $0x120] sm:$0xff] }
 0x31e   : > { %v3136_v5 = vpack.c.bf16 %v3112_v6, %v3111_v27  ;;  %v18159_v15 = vld [vmem:[#allocation73_spill] sm:$0xff]  ;;  %v3457_v6 = vpack.c.bf16 %v3433_v49, %v3432_v38  ;;  %v18168_v38 = vld [vmem:[#allocation84_spill] sm:$0xff] }
 0x323   : > { %10971 = vmatmul.mubr.msk.bf16.gmra.mrb[20].mxu0 %vm1066_vm0, %v3132_v8  ;;  %v14714_v8 = vld [vmem:[#allocation10 + $0x50] sm:$0xff]  }
 0x324   : > { %10974 = vmatprep.mubr.msk.bf16.mxu0 %vm1066_vm0, %v3133_v35  ;;  %11656 = vmatprep.subr.bf16.mxu1 %v14714_v8  ;;  %v14723_v35 = vld [vmem:[#allocation10 + $0x58] sm:$0xff]  }
 0x325   : > { %11664 = vmatpush3.bf16.msra.mxu1 %v14714_v8 }
 0x326   : > { %11657 = vmatprep.subr.bf16.mxu1 %v14723_v35 }
 0x329   : > { %11665 = vmatpush3.bf16.msra.mxu1 %v14723_v35 }
 0x32b   : > { %10975 = vmatmul.mubr.msk.bf16.gmra.mrb[24].mxu0 %vm1066_vm0, %v3134_v11  ;;  %v3724_v11 = vld [vmem:[%s13602_s6 + $0x31] sm:$0xff] }
 0x32c   : > { %10978 = vmatprep.mubr.msk.bf16.mxu0 %vm1066_vm0, %v18158_v41  ;;  %v18160_v41 = vld [vmem:[#allocation72_spill] sm:$0xff] }
 0x32d   : > { %v3756_v27 = vmul.f32 %v3724_v11, %v18160_v41 }
 0x333   : > { %10979 = vmatmul.mubr.msk.bf16.gmra.mrb[28].mxu0 %vm1066_vm0, %v3136_v5 }
 0x334   : > { %10990 = vmatprep.mubr.msk.bf16.mxu0 %vm1066_vm0, %v14489_v7  ;;  %v12441_v7 = vld [vmem:[#allocation5 + $0x110] sm:$0xff]  }
 0x33b   : > { %10991 = vmatmul.mubr.msk.bf16.vlgmr.msra.gmra.mrb[0].mxu0 %vm1066_vm0, %v14491_v16  ;;  %v12442_v16 = vld [vmem:[#allocation5 + $0x118] sm:$0xff]  }
 0x33c   : > { %11023 = vmatpush3.bf16.msra.mxu0 %v14654_v52  ;;  %10994 = vmatprep.mubr.msk.bf16.mxu0 %vm1066_vm0, %v14501_v45  ;;  %v3422_v45 = vld [vmem:[%s13602_s6 + $0xc8] sm:$0xff] }
 0x33d   : > { %11024 = vmatprep.subr.bf16.mxu0 %v12440_v59  ;;  %v3426_v52 = vld [vmem:[%s13602_s6 + $0xe8] sm:$0xff] }
 0x340   : > { %11025 = vmatpush3.bf16.msra.mxu0 %v12440_v59  ;;  %v3727_v59 = vld [vmem:[%s13602_s6 + $0x49] sm:$0xff] }
 0x341   : > { %11026 = vmatprep.subr.bf16.mxu0 %v12441_v7 }
 0x343   : > { %10995 = vmatmul.mubr.msk.bf16.gmra.mrb[4].mxu0 %vm1066_vm0, %v14503_v32  ;;  %v3423_v32 = vld [vmem:[%s13602_s6 + $0xd0] sm:$0xff] }
 0x344   : > { %10998 = vmatprep.mubr.msk.bf16.mxu0 %vm1066_vm0, %v14513_v23  ;;  %11027 = vmatpush3.bf16.msra.mxu0 %v12441_v7  ;;  %v3452_v23 = vpack.c.bf16 %v3423_v32, %v3422_v45  ;;  %v3728_v7 = vld [vmem:[%s13602_s6 + $0x51] sm:$0xff] }
 0x345   : > { %11028 = vmatprep.subr.bf16.mxu0 %v12442_v16  ;;  %v18162_v32 = vld [vmem:[#allocation78_spill] sm:$0xff] }
 0x348   : > { %11029 = vmatpush3.bf16.msra.mxu0 %v12442_v16  ;;  %v18161_v16 = vld [vmem:[#allocation79_spill] sm:$0xff] }
 0x349   : > { %11062 = vmatprep.subr.bf16.mxu0 %v14705_v20  ;;  %v3759_v45 = vmul.f32 %v3727_v59, %v18161_v16  ;;  %v3733_v59 = vld [vmem:[%s13602_s6 + $0x79] sm:$0xff] }
 0x34b   : > { %10999 = vmatmul.mubr.msk.bf16.gmra.mrb[8].mxu0 %vm1066_vm0, %v14515_v54  ;;  %v3424_v54 = vld [vmem:[%s13602_s6 + $0xd8] sm:$0xff] }
 0x34c   : > { %11002 = vmatprep.mubr.msk.bf16.mxu0 %vm1066_vm0, %v14525_v29  ;;  %v3425_v29 = vld [vmem:[%s13602_s6 + $0xe0] sm:$0xff] }
 0x34d   : > { %v3453_v48 = vpack.c.bf16 %v3425_v29, %v3424_v54  ;;  %v3729_v54 = vld [vmem:[%s13602_s6 + $0x59] sm:$0xff]  ;;  %v3730_v29 = vld [vmem:[%s13602_s6 + $0x61] sm:$0xff] }
 0x353   : > { %11003 = vmatmul.mubr.msk.bf16.gmra.mrb[12].mxu0 %vm1066_vm0, %v14527_v37  ;;  %v3427_v37 = vld [vmem:[%s13602_s6 + $0xf0] sm:$0xff] }
 0x354   : > { %11006 = vmatprep.mubr.msk.bf16.mxu0 %vm1066_vm0, %v14537_v61  ;;  %v3454_v19 = vpack.c.bf16 %v3427_v37, %v3426_v52  ;;  %v3428_v61 = vld [vmem:[%s13602_s6 + $0xf8] sm:$0xff]  ;;  %v18164_v37 = vld [vmem:[#allocation77_spill] sm:$0xff] }
 0x355   : > { %v3455_v22 = vpack.c.bf16 %v3429_v30, %v3428_v61  ;;  %v18163_v52 = vld [vmem:[#allocation76_spill] sm:$0xff]  ;;  %v3732_v61 = vld [vmem:[%s13602_s6 + $0x71] sm:$0xff]  ;;  %v18166_v30 = vld [vmem:[#allocation81_spill] sm:$0xff] }
 0x35b   : > { %11007 = vmatmul.mubr.msk.bf16.gmra.mrb[16].mxu0 %vm1066_vm0, %v14539_v10  ;;  %v3723_v10 = vld [vmem:[%s13602_s6 + $0x29] sm:$0xff] }
 0x35c   : > { %11010 = vmatprep.mubr.msk.bf16.mxu0 %vm1066_vm0, %v3452_v23  ;;  %v3755_v24 = vmul.f32 %v3723_v10, %v18159_v15  ;;  %v18167_v10 = vld [vmem:[#allocation80_spill] sm:$0xff] }
 0x35d   : > { %v3762_v11 = vmul.f32 %v3730_v29, %v18167_v10  ;;  %v18172_v29 = vld [vmem:[#allocation92_spill] sm:$0xff] }
 0x35e   : > { %v3795_v5 = vpack.c.bf16 %v3756_v27, %v3755_v24  ;;  %v18169_v24 = vld [vmem:[#allocation83_spill] sm:$0xff] }
 0x35f   : > { %v3764_v27 = vmul.f32 %v3732_v61, %v18169_v24 }
 0x363   : > { %11011 = vmatmul.mubr.msk.bf16.gmra.mrb[20].mxu0 %vm1066_vm0, %v3453_v48  ;;  %v18165_v48 = vpack.c.bf16 %v18163_v52, %v18164_v37  ;;  %v18173_v37 = vld [vmem:[#allocation91_spill] sm:$0xff] }
 0x364   : > { %11014 = vmatprep.mubr.msk.bf16.mxu0 %vm1066_vm0, %v3454_v19  ;;  %v3731_v19 = vld [vmem:[%s13602_s6 + $0x69] sm:$0xff] }
 0x365   : > { %v3763_v49 = vmul.f32 %v3731_v19, %v18168_v38 }
 0x36b   : > { %11015 = vmatmul.mubr.msk.bf16.gmra.mrb[24].mxu0 %vm1066_vm0, %v3455_v22  ;;  %v3761_v22 = vmul.f32 %v3729_v54, %v18166_v30 }
 0x36c   : > { %11018 = vmatprep.mubr.msk.bf16.mxu0 %vm1066_vm0, %v14555_v0  ;;  %v3760_v0 = vmul.f32 %v3728_v7, %v18162_v32  ;;  %v3735_v7 = vld [vmem:[%s13602_s6 + $0x89] sm:$0xff] }
 0x36d   : > { %v3767_v52 = vmul.f32 %v3735_v7, %v18172_v29 }
 0x36e   : > { %v3797_v23 = vpack.c.bf16 %v3760_v0, %v3759_v45  ;;  %v3736_v45 = vld [vmem:[%s13602_s6 + $0x91] sm:$0xff]  ;;  %v18170_v0 = vld [vmem:[#allocation88_spill] sm:$0xff] }
 0x373   : > { %11019 = vmatmul.mubr.msk.bf16.gmra.mrb[28].mxu0 %vm1066_vm0, %v3457_v6  ;;  %v3798_v6 = vpack.c.bf16 %v3762_v11, %v3761_v22  ;;  %v3737_v22 = vld [vmem:[%s13602_s6 + $0x99] sm:$0xff]  ;;  %v3739_v11 = vld [vmem:[%s13602_s6 + $0xa9] sm:$0xff] }
 0x374   : > { %11030 = vmatprep.mubr.msk.bf16.mxu0 %vm1066_vm0, %v3795_v5  ;;  %v3799_v5 = vpack.c.bf16 %v3764_v27, %v3763_v49  ;;  %v3740_v49 = vld [vmem:[%s13602_s6 + $0xb1] sm:$0xff]  ;;  %v18174_v27 = vld [vmem:[#allocation96_spill] sm:$0xff] }
 0x37b   : > { %11031 = vmatmul.mubr.msk.bf16.vlgmr.msra.gmra.mrb[0].mxu0 %vm1066_vm0, %v18165_v48  ;;  %v3768_v48 = vmul.f32 %v3736_v45, %v18173_v37 }
 0x37c   : > { %11034 = vmatprep.mubr.msk.bf16.mxu0 %vm1066_vm0, %v3797_v23  ;;  %11063 = vmatpush3.bf16.msra.mxu0 %v14705_v20  ;;  %v3734_v20 = vld [vmem:[%s13602_s6 + $0x81] sm:$0xff]  ;;  %v18171_v23 = vld [vmem:[#allocation87_spill] sm:$0xff] }
 0x37d   : > { %11064 = vmatprep.subr.bf16.mxu0 %v14709_v25  ;;  %v3766_v54 = vmul.f32 %v3734_v20, %v18171_v23  ;;  %v3801_v61 = vpack.c.bf16 %v3768_v48, %v3767_v52  ;;  %v18176_v20 = vld [vmem:[#allocation100_spill] sm:$0xff] }
 0x37e   : > { %v3771_v7 = vmul.f32 %v3739_v11, %v18176_v20  ;;  %v3741_v52 = vld [vmem:[%s13602_s6 + $0xb9] sm:$0xff]  ;;  %v3742_v48 = vld [vmem:[%s13602_s6 + $0xc1] sm:$0xff] }
 0x37f   : > { %v3774_v11 = vmul.f32 %v3742_v48, %v18179_v51  ;;  %v18183_v48 = vld [vmem:[#allocation111_spill] sm:$0xff] }
 0x380   : > { %11065 = vmatpush3.bf16.msra.mxu0 %v14709_v25  ;;  %v3765_v25 = vmul.f32 %v3733_v59, %v18170_v0  ;;  %v18187_v20 = vld [vmem:[#allocation119_spill] sm:$0xff] }
 0x381   : > { %11066 = vmatprep.subr.bf16.mxu0 %v14714_v8 }
 0x382   : > { %v3800_v19 = vpack.c.bf16 %v3766_v54, %v3765_v25 }
 0x383   : > { %11035 = vmatmul.mubr.msk.bf16.gmra.mrb[4].mxu0 %vm1066_vm0, %v3798_v6  ;;  %v3769_v6 = vmul.f32 %v3737_v22, %v18174_v27  ;;  %v18178_v22 = vld [vmem:[#allocation104_spill] sm:$0xff] }
 0x384   : > { %11038 = vmatprep.mubr.msk.bf16.mxu0 %vm1066_vm0, %v3799_v5  ;;  %11067 = vmatpush3.bf16.msra.mxu0 %v14714_v8  ;;  %v3738_v8 = vld [vmem:[%s13602_s6 + $0xa1] sm:$0xff]  ;;  %v18175_v5 = vld [vmem:[#allocation95_spill] sm:$0xff] }
 0x385   : > { %11068 = vmatprep.subr.bf16.mxu0 %v14723_v35  ;;  %v3770_v59 = vmul.f32 %v3738_v8, %v18175_v5  ;;  %v3773_v8 = vmul.f32 %v3741_v52, %v18178_v22 }
 0x387   : > { %v3802_v25 = vpack.c.bf16 %v3770_v59, %v3769_v6  ;;  %v3804_v59 = vpack.c.bf16 %v3774_v11, %v3773_v8  ;;  %v3749_v11 = vld [vmem:[%s13602_s6 + $0xf9] sm:$0xff] }
 0x388   : > { %11069 = vmatpush3.bf16.msra.mxu0 %v14723_v35  ;;  %v18177_v35 = vld [vmem:[#allocation99_spill] sm:$0xff] }
 0x389   : > { %v3772_v45 = vmul.f32 %v3740_v49, %v18177_v35  ;;  %v18181_v49 = vld [vmem:[#allocation107_spill] sm:$0xff] }
 0x38a   : > { %v3748_v35 = vld [vmem:[%s13602_s6 + $0xf1] sm:$0xff] }
 0x38b   : > { %11039 = vmatmul.mubr.msk.bf16.gmra.mrb[8].mxu0 %vm1066_vm0, %v3800_v19  ;;  %v3803_v54 = vpack.c.bf16 %v3772_v45, %v3771_v7  ;;  %v3743_v19 = vld [vmem:[%s13602_s6 + $0xc9] sm:$0xff]  ;;  %v3745_v45 = vld [vmem:[%s13602_s6 + $0xd9] sm:$0xff] }
 0x38c   : > { %11042 = vmatprep.mubr.msk.bf16.mxu0 %vm1066_vm0, %v3801_v61  ;;  %v3744_v61 = vld [vmem:[%s13602_s6 + $0xd1] sm:$0xff]  ;;  %v3775_v46 = vmul.f32 %v3743_v19, %v18180_v47  ;;  %v3778_v19 = vmul.f32 %v3746_v43, %v18183_v48  ;;  %v18184_v47 = vld [vmem:[#allocation116_spill] sm:$0xff]  ;;  %v18188_v43 = vpack.c.bf16 %v14402_v44, %v14398_v12  ;;  %v12449_v44 = vld [vmem:[#allocation10 + $0x70] sm:$0xff]  }
 0x38d   : > { %v3776_v6 = vmul.f32 %v3744_v61, %v18181_v49  ;;  %v18185_v61 = vld [vmem:[#allocation115_spill] sm:$0xff]  ;;  %v12450_v12 = vld [vmem:[#allocation10 + $0x78] sm:$0xff]  }
 0x38e   : > { %v3780_v49 = vmul.f32 %v3748_v35, %v18185_v61 }
 0x38f   : > { %v3805_v7 = vpack.c.bf16 %v3776_v6, %v3775_v46  ;;  %v3750_v6 = vld [vmem:[%s13602_s6 + $0x101] sm:$0xff] }
 0x393   : > { %11043 = vmatmul.mubr.msk.bf16.gmra.mrb[12].mxu0 %vm1066_vm0, %v3802_v25  ;;  %v3747_v25 = vld [vmem:[%s13602_s6 + $0xe9] sm:$0xff] }
 0x394   : > { %11046 = vmatprep.mubr.msk.bf16.mxu0 %vm1066_vm0, %v3803_v54  ;;  %v18182_v54 = vld [vmem:[#allocation112_spill] sm:$0xff]  ;;  %v3779_v51 = vmul.f32 %v3747_v25, %v18184_v47  ;;  %v12447_v25 = vld [vmem:[#allocation10 + $0x60] sm:$0xff]  }
 0x395   : > { %v3777_v52 = vmul.f32 %v3745_v45, %v18182_v54  ;;  %v3753_v45 = vld [vmem:[%s13602_s6 + $0x119] sm:$0xff]  ;;  %v3754_v54 = vld [vmem:[%s13602_s6 + $0x121] sm:$0xff]  ;;  %11070 = vmatprep.subr.bf16.mxu0 %v12447_v25  ;;  %11658 = vmatprep.subr.bf16.mxu1 %v12447_v25 }
 0x396   : > { %v3807_v46 = vpack.c.bf16 %v3780_v49, %v3779_v51  ;;  %v3785_v51 = vmul.f32 %v3753_v45, %v14408_v63  ;;  %v3786_v35 = vmul.f32 %v3754_v54, %v14406_v1  ;;  %11071 = vmatpush3.bf16.msra.mxu0 %v12447_v25  ;;  %11666 = vmatpush3.bf16.msra.mxu1 %v12447_v25 }
 0x397   : > { %v3806_v8 = vpack.c.bf16 %v3778_v19, %v3777_v52  ;;  %v14845_v52 = vld [vmem:[#allocation10] sm:$0xff]   ;;  %v14848_v19 = vld [vmem:[#allocation8] ss:$0 sm:$0xff] }
 0x398   : > { %v3810_v49 = vpack.c.bf16 %v3786_v35, %v3785_v51 }
 0x39b   : > { %11047 = vmatmul.mubr.msk.bf16.gmra.mrb[16].mxu0 %vm1066_vm0, %v3804_v59  ;;  %v18186_v59 = vld [vmem:[#allocation120_spill] sm:$0xff] }
 0x39c   : > { %11050 = vmatprep.mubr.msk.bf16.mxu0 %vm1066_vm0, %v3805_v7  ;;  %v3781_v22 = vmul.f32 %v3749_v11, %v18186_v59  ;;  %v3782_v7 = vmul.f32 %v3750_v6, %v18187_v20 }
 0x39e   : > { %v3808_v5 = vpack.c.bf16 %v3782_v7, %v3781_v22  ;;  %v12448_v22 = vld [vmem:[#allocation10 + $0x68] sm:$0xff]  }
 0x39f   : > { %11072 = vmatprep.subr.bf16.mxu0 %v12448_v22  ;;  %11659 = vmatprep.subr.bf16.mxu1 %v12448_v22 }
 0x3a0   : > { %11073 = vmatpush3.bf16.msra.mxu0 %v12448_v22  ;;  %11667 = vmatpush3.bf16.msra.mxu1 %v12448_v22 }
 0x3a1   : > { %11074 = vmatprep.subr.bf16.mxu0 %v12449_v44  ;;  %11660 = vmatprep.subr.bf16.mxu1 %v12449_v44 }
 0x3a3   : > { %11051 = vmatmul.mubr.msk.bf16.gmra.mrb[20].mxu0 %vm1066_vm0, %v3806_v8 }
 0x3a4   : > { %11054 = vmatprep.mubr.msk.bf16.mxu0 %vm1066_vm0, %v3807_v46  ;;  %11075 = vmatpush3.bf16.msra.mxu0 %v12449_v44 }
 0x3a5   : > { %11668 = vmatpush3.bf16.msra.mxu1 %v12449_v44  ;;  %11076 = vmatprep.subr.bf16.mxu0 %v12450_v12 }
 0x3a6   : > { %11661 = vmatprep.subr.bf16.mxu1 %v12450_v12 }
 0x3a8   : > { %11077 = vmatpush3.bf16.msra.mxu0 %v12450_v12 }
 0x3a9   : > { %11669 = vmatpush3.bf16.msra.mxu1 %v12450_v12 }
 0x3aa   : > { %11110 = vmatprep.subr.bf16.mxu1 %v14845_v52 }
 0x3ab   : > { %11055 = vmatmul.mubr.msk.bf16.gmra.mrb[24].mxu0 %vm1066_vm0, %v3808_v5  ;;  %v12751_v5 = vld [vmem:[#allocation2 + $0x8] sm:$0xff] }
 0x3ac   : > { %11058 = vmatprep.mubr.msk.bf16.mxu0 %vm1066_vm0, %v18188_v43  ;;  %v4361_v54 = vpack.c.bf16 %v12751_v5, %v12751_v5 }
 0x3b3   : > { %11059 = vmatmul.mubr.msk.bf16.gmra.mrb[28].mxu0 %vm1066_vm0, %v3810_v49 }
 0x3b4   : > { %11078 = vmatprep.mubr.bf16.mxu0 %v4361_v54 }
 0x44e   : > { %v11032_v8 = vpop.f32.mrb[0].mxu0 }
 0x44f   : > { %v4085_v46 = vadd.f32 %v11032_v8, %v14848_v19  ;;  %v3917_v11 = vpop.f32.mrb[1].mxu0 }
 0x450   : > { %v4083_v6 = vadd.f32 %v14848_v19, %v3917_v11  ;;  %v11033_v7 = vpop.f32.mrb[2].mxu0 }
 0x451   : > { %v4117_v45 = vmax.f32 %v4085_v46, 0.0  ;;  %v4086_v43 = vadd.f32 %v11033_v7, %v14848_v19  ;;  %v3920_v51 = vpop.f32.mrb[3].mxu0 }
 0x452   : > { %v4115_v35 = vmax.f32 %v4083_v6, 0.0  ;;  %v4084_v49 = vadd.f32 %v14848_v19, %v3920_v51 }
 0x453   : > { %4149 = vst [vmem:[%s14855_s10 + $0x10] sm:$0xff] %v4117_v45  ;;  %4187 = vst [vmem:[#allocation2 + $0x28] sm:$0xff] %v4117_v45  ;;  %v4118_v25 = vmax.f32 %v4086_v43, 0.0 }
 0x454   : > { %4147 = vst [vmem:[%s14855_s10] sm:$0xff] %v4115_v35  ;;  %4185 = vst [vmem:[#allocation2 + $0x18] sm:$0xff] %v4115_v35  ;;  %v4116_v22 = vmax.f32 %v4084_v49, 0.0 }
 0x455   : > { %4150 = vst [vmem:[%s14855_s10 + $0x18] sm:$0xff] %v4118_v25  ;;  %4188 = vst [vmem:[#allocation2 + $0x30] sm:$0xff] %v4118_v25  ;;  %v4363_v44 = vpack.c.bf16 %v4118_v25, %v4117_v45 }
 0x456   : > { %4148 = vst [vmem:[%s14855_s10 + $0x8] sm:$0xff] %v4116_v22  ;;  %4186 = vst [vmem:[#allocation2 + $0x20] sm:$0xff] %v4116_v22  ;;  %v11036_v12 = vpop.f32.mrb[4].mxu0  ;;  %v4362_v5 = vpack.c.bf16 %v4116_v22, %v4115_v35 }
 0x457   : > { %v4089_v54 = vadd.f32 %v11036_v12, %v14848_v19  ;;  %v3933_v8 = vpop.f32.mrb[5].mxu0 }
 0x458   : > { %v4087_v46 = vadd.f32 %v14848_v19, %v3933_v8  ;;  %v11037_v11 = vpop.f32.mrb[6].mxu0  ;;  %11079 = vmatmul.mubr.bf16.vlgmr.msra.gmra.mrb[32].mxu0 %v4362_v5 }
 0x459   : > { %v4121_v6 = vmax.f32 %v4089_v54, 0.0  ;;  %v4090_v7 = vadd.f32 %v11037_v11, %v14848_v19  ;;  %v3936_v43 = vpop.f32.mrb[7].mxu0  ;;  %11082 = vmatprep.mubr.bf16.mxu0 %v4363_v44 }
 0x45a   : > { %v4119_v45 = vmax.f32 %v4087_v46, 0.0  ;;  %v4088_v51 = vadd.f32 %v14848_v19, %v3936_v43  ;;  %v18189_v46 = vld [vmem:[#allocation39_spill] sm:$0xff] }
 0x45b   : > { %4153 = vst [vmem:[%s14855_s10 + $0x30] sm:$0xff] %v4121_v6  ;;  %4191 = vst [vmem:[#allocation2 + $0x48] sm:$0xff] %v4121_v6  ;;  %v4122_v35 = vmax.f32 %v4090_v7, 0.0  ;;  %v14870_v25 = vld [vmem:[#allocation2 + $0x17] sm:$0xff] }
 0x45c   : > { %4151 = vst [vmem:[%s14855_s10 + $0x20] sm:$0xff] %v4119_v45  ;;  %4189 = vst [vmem:[#allocation2 + $0x38] sm:$0xff] %v4119_v45  ;;  %v4120_v49 = vmax.f32 %v4088_v51, 0.0  ;;  %v14872_v22 = vld [vmem:[#allocation2 + $0x2f] sm:$0xff]  ;;  %v14887_v51 = vmul.f32 %v14870_v25, %v18128_v39 }
 0x45d   : > { %4154 = vst [vmem:[%s14855_s10 + $0x38] sm:$0xff] %v4122_v35  ;;  %4192 = vst [vmem:[#allocation2 + $0x50] sm:$0xff] %v4122_v35  ;;  %v4365_v12 = vpack.c.bf16 %v4122_v35, %v4121_v6  ;;  %v14875_v5 = vld [vmem:[#allocation2 + $0x1f] sm:$0xff]  ;;  %v14877_v44 = vld [vmem:[#allocation2 + $0x27] sm:$0xff]  ;;  %v14882_v11 = vmul.f32 %v14872_v22, %v18189_v46 }
 0x45e   : > { %4152 = vst [vmem:[%s14855_s10 + $0x28] sm:$0xff] %v4120_v49  ;;  %4190 = vst [vmem:[#allocation2 + $0x40] sm:$0xff] %v4120_v49  ;;  %v11040_v54 = vpop.f32.mrb[8].mxu0  ;;  %v4364_v8 = vpack.c.bf16 %v4120_v49, %v4119_v45  ;;  %v14891_v6 = vmul.f32 %v14875_v5, %v18127_v34  ;;  %v18193_v49 = vld [vmem:[#allocation36_spill] sm:$0xff] }
 0x45f   : > { %18190 = vst [vmem:[#allocation82_spill] sm:$0xff] %v14882_v11  ;;  %v4093_v7 = vadd.f32 %v11040_v54, %v14848_v19  ;;  %v3949_v43 = vpop.f32.mrb[9].mxu0  ;;  %18191 = vst [vmem:[#allocation86_spill] sm:$0xff] %v14887_v51  ;;  %v14896_v1 = vmul.f32 %v14877_v44, %v18193_v49  ;;  %v14905_v48 = vld [vmem:[#allocation2 + $0x19] sm:$0xff]  ;;  %v14912_v59 = vld [vmem:[#allocation2 + $0x21] sm:$0xff] }
 0x460   : > { %18192 = vst [vmem:[#allocation85_spill] sm:$0xff] %v14891_v6  ;;  %v4091_v35 = vadd.f32 %v14848_v19, %v3949_v43  ;;  %v11041_v45 = vpop.f32.mrb[10].mxu0  ;;  %11083 = vmatmul.mubr.bf16.gmra.mrb[36].mxu0 %v4364_v8  ;;  %18195 = vst [vmem:[#allocation89_spill] sm:$0xff] %v14905_v48  ;;  %v14926_v11 = vmul.f32 %v14905_v48, %v18159_v15 }
 0x461   : > { %18194 = vst [vmem:[#allocation90_spill] sm:$0xff] %v14896_v1  ;;  %v4125_v54 = vmax.f32 %v4093_v7, 0.0  ;;  %v4094_v63 = vadd.f32 %v11041_v45, %v14848_v19  ;;  %v3952_v20 = vpop.f32.mrb[11].mxu0  ;;  %11086 = vmatprep.mubr.bf16.mxu0 %v4365_v12  ;;  %18197 = vst [vmem:[#allocation93_spill] sm:$0xff] %v14912_v59 }
 0x462   : > { %v4123_v61 = vmax.f32 %v4091_v35, 0.0  ;;  %v4092_v47 = vadd.f32 %v14848_v19, %v3952_v20  ;;  %18201 = vst [vmem:[#allocation101_spill] sm:$0xff] %v14926_v11 }
 0x463   : > { %4157 = vst [vmem:[%s14855_s10 + $0x50] sm:$0xff] %v4125_v54  ;;  %4195 = vst [vmem:[#allocation2 + $0x68] sm:$0xff] %v4125_v54  ;;  %v4126_v8 = vmax.f32 %v4094_v63, 0.0  ;;  %v14908_v45 = vld [vmem:[#allocation2 + $0x37] sm:$0xff] }
 0x464   : > { %4155 = vst [vmem:[%s14855_s10 + $0x40] sm:$0xff] %v4123_v61  ;;  %4193 = vst [vmem:[#allocation2 + $0x58] sm:$0xff] %v4123_v61  ;;  %v4124_v7 = vmax.f32 %v4092_v47, 0.0  ;;  %v14910_v12 = vld [vmem:[#allocation2 + $0x4f] sm:$0xff] }
 0x465   : > { %18196 = vst [vmem:[#allocation94_spill] sm:$0xff] %v14910_v12  ;;  %4158 = vst [vmem:[%s14855_s10 + $0x58] sm:$0xff] %v4126_v8  ;;  %v4367_v20 = vpack.c.bf16 %v4126_v8, %v4125_v54  ;;  %v14915_v35 = vld [vmem:[#allocation2 + $0x3f] sm:$0xff]  ;;  %v14917_v43 = vld [vmem:[#allocation2 + $0x47] sm:$0xff]  ;;  %v14922_v47 = vmul.f32 %v14910_v12, %v18135_v4  ;;  %v14931_v54 = vmul.f32 %v14908_v45, %v18129_v3 }
 0x466   : > { %4196 = vst [vmem:[#allocation2 + $0x70] sm:$0xff] %v4126_v8  ;;  %18198 = vst [vmem:[#allocation98_spill] sm:$0xff] %v14915_v35  ;;  %v11044_v63 = vpop.f32.mrb[12].mxu0  ;;  %v4366_v1 = vpack.c.bf16 %v4124_v7, %v4123_v61  ;;  %v14935_v61 = vmul.f32 %v14915_v35, %v18130_v50  ;;  %v14939_v8 = vmul.f32 %v14912_v59, %v18160_v41 }
 0x467   : > { %18199 = vst [vmem:[#allocation97_spill] sm:$0xff] %v14917_v43  ;;  %4156 = vst [vmem:[%s14855_s10 + $0x48] sm:$0xff] %v4124_v7  ;;  %v4097_v51 = vadd.f32 %v11044_v63, %v14848_v19  ;;  %v3965_v6 = vpop.f32.mrb[13].mxu0  ;;  %11090 = vmatprep.mubr.bf16.mxu1 %v4367_v20  ;;  %v14944_v20 = vmul.f32 %v14917_v43, %v18134_v62 }
 0x468   : > { %4194 = vst [vmem:[#allocation2 + $0x60] sm:$0xff] %v4124_v7  ;;  %18200 = vst [vmem:[#allocation102_spill] sm:$0xff] %v14922_v47  ;;  %v4095_v7 = vadd.f32 %v14848_v19, %v3965_v6  ;;  %v11045_v48 = vpop.f32.mrb[14].mxu0  ;;  %11087 = vmatmul.mubr.bf16.gmra.mrb[40].mxu0 %v4366_v1 }
 0x469   : > { %18202 = vst [vmem:[#allocation106_spill] sm:$0xff] %v14931_v54  ;;  %18203 = vst [vmem:[#allocation105_spill] sm:$0xff] %v14935_v61  ;;  %v4129_v63 = vmax.f32 %v4097_v51, 0.0  ;;  %v4098_v15 = vadd.f32 %v11045_v48, %v14848_v19  ;;  %v3968_v12 = vpop.f32.mrb[15].mxu0  ;;  %v14997_v61 = vld [vmem:[#allocation2 + $0x31] sm:$0xff] }
 0x46a   : > { %18204 = vst [vmem:[#allocation110_spill] sm:$0xff] %v14939_v8  ;;  %18205 = vst [vmem:[#allocation109_spill] sm:$0xff] %v14944_v20  ;;  %v4127_v4 = vmax.f32 %v4095_v7, 0.0  ;;  %v4096_v59 = vadd.f32 %v14848_v19, %v3968_v12  ;;  %v12452_v20 = vld [vmem:[#allocation10 + $0x8] sm:$0xff]  }
 0x46b   : > { %4161 = vst [vmem:[%s14855_s10 + $0x70] sm:$0xff] %v4129_v63  ;;  %4199 = vst [vmem:[#allocation2 + $0x88] sm:$0xff] %v4129_v63  ;;  %v4130_v1 = vmax.f32 %v4098_v15, 0.0  ;;  %v14956_v41 = vld [vmem:[#allocation2 + $0x57] sm:$0xff] }
 0x46c   : > { %4159 = vst [vmem:[%s14855_s10 + $0x60] sm:$0xff] %v4127_v4  ;;  %4197 = vst [vmem:[#allocation2 + $0x78] sm:$0xff] %v4127_v4  ;;  %v4128_v48 = vmax.f32 %v4096_v59, 0.0  ;;  %v14973_v8 = vmul.f32 %v14956_v41, %v18136_v55 }
 0x46d   : > { %18206 = vst [vmem:[#allocation114_spill] sm:$0xff] %v14956_v41  ;;  %v14958_v43 = vld [vmem:[#allocation2 + $0x6f] sm:$0xff]  ;;  %4162 = vst [vmem:[%s14855_s10 + $0x78] sm:$0xff] %v4130_v1  ;;  %v4369_v12 = vpack.c.bf16 %v4130_v1, %v4129_v63 }
 0x46e   : > { %18207 = vst [vmem:[#allocation113_spill] sm:$0xff] %v14958_v43  ;;  %4200 = vst [vmem:[#allocation2 + $0x90] sm:$0xff] %v4130_v1  ;;  %v11048_v15 = vpop.f32.mrb[16].mxu0  ;;  %v4368_v6 = vpack.c.bf16 %v4128_v48, %v4127_v4  ;;  %v14968_v51 = vmul.f32 %v14958_v43, %v18139_v60 }
 0x46f   : > { %v14961_v7 = vld [vmem:[#allocation2 + $0x5f] sm:$0xff]  ;;  %v14963_v35 = vld [vmem:[#allocation2 + $0x67] sm:$0xff]  ;;  %4160 = vst [vmem:[%s14855_s10 + $0x68] sm:$0xff] %v4128_v48  ;;  %4198 = vst [vmem:[#allocation2 + $0x80] sm:$0xff] %v4128_v48  ;;  %v4101_v59 = vadd.f32 %v11048_v15, %v14848_v19  ;;  %v3981_v11 = vpop.f32.mrb[17].mxu0 }
 0x470   : > { %18208 = vst [vmem:[#allocation118_spill] sm:$0xff] %v14963_v35  ;;  %18209 = vst [vmem:[#allocation117_spill] sm:$0xff] %v14968_v51  ;;  %v14977_v63 = vmul.f32 %v14961_v7, %v18137_v42  ;;  %v4099_v1 = vadd.f32 %v14848_v19, %v3981_v11  ;;  %v11049_v4 = vpop.f32.mrb[18].mxu0  ;;  %11091 = vmatmul.mubr.bf16.vlgmr.msra.gmra.mrb[0].mxu1 %v4368_v6  ;;  %v14982_v48 = vmul.f32 %v14963_v35, %v18138_v57  ;;  %v12453_v6 = vld [vmem:[#allocation10 + $0x10] sm:$0xff]  }
 0x471   : > { %18210 = vst [vmem:[#allocation122_spill] sm:$0xff] %v14973_v8  ;;  %v4133_v15 = vmax.f32 %v4101_v59, 0.0  ;;  %v4102_v47 = vadd.f32 %v11049_v4, %v14848_v19  ;;  %v3984_v54 = vpop.f32.mrb[19].mxu0  ;;  %11111 = vmatpush3.bf16.msra.mxu1 %v14845_v52  ;;  %11094 = vmatprep.mubr.bf16.mxu1 %v4369_v12  ;;  %18215 = vst [vmem:[#allocation48_spill] sm:$0xff] %v14997_v61  ;;  %v15005_v51 = vld [vmem:[#allocation2 + $0x29] sm:$0xff] }
 0x472   : > { %18211 = vst [vmem:[#allocation121_spill] sm:$0xff] %v14977_v63  ;;  %18212 = vst [vmem:[#allocation123_spill] sm:$0xff] %v14982_v48  ;;  %v4131_v41 = vmax.f32 %v4099_v1, 0.0  ;;  %v4100_v11 = vadd.f32 %v14848_v19, %v3984_v54  ;;  %11112 = vmatprep.subr.bf16.mxu1 %v12452_v20 }
 0x473   : > { %4165 = vst [vmem:[%s14855_s10 + $0x90] sm:$0xff] %v4133_v15  ;;  %4203 = vst [vmem:[#allocation2 + $0xa8] sm:$0xff] %v4133_v15  ;;  %v4134_v59 = vmax.f32 %v4102_v47, 0.0  ;;  %v14993_v12 = vld [vmem:[#allocation2 + $0x77] sm:$0xff] }
 0x474   : > { %4163 = vst [vmem:[%s14855_s10 + $0x80] sm:$0xff] %v4131_v41  ;;  %4201 = vst [vmem:[#allocation2 + $0x98] sm:$0xff] %v4131_v41  ;;  %v4132_v52 = vmax.f32 %v4100_v11, 0.0  ;;  %v12454_v11 = vld [vmem:[#allocation10 + $0x18] sm:$0xff]  }
 0x475   : > { %18213 = vst [vmem:[#allocation41_spill] sm:$0xff] %v14993_v12  ;;  %v14995_v4 = vld [vmem:[#allocation2 + $0x8f] sm:$0xff]  ;;  %4166 = vst [vmem:[%s14855_s10 + $0x98] sm:$0xff] %v4134_v59  ;;  %11113 = vmatpush3.bf16.msra.mxu1 %v12452_v20  ;;  %v4371_v54 = vpack.c.bf16 %v4134_v59, %v4133_v15  ;;  %v15014_v15 = vmul.f32 %v14993_v12, %v18140_v36 }
 0x476   : > { %18214 = vst [vmem:[#allocation38_spill] sm:$0xff] %v14995_v4  ;;  %4204 = vst [vmem:[#allocation2 + $0xb0] sm:$0xff] %v4134_v59  ;;  %v15000_v1 = vld [vmem:[#allocation2 + $0x7f] sm:$0xff]  ;;  %v15002_v57 = vld [vmem:[#allocation2 + $0x87] sm:$0xff]  ;;  %v11052_v47 = vpop.f32.mrb[20].mxu0  ;;  %v4370_v48 = vpack.c.bf16 %v4132_v52, %v4131_v41  ;;  %11114 = vmatprep.subr.bf16.mxu1 %v12453_v6  ;;  %v15009_v8 = vmul.f32 %v14995_v4, %v18143_v2 }
 0x477   : > { %18216 = vst [vmem:[#allocation55_spill] sm:$0xff] %v15000_v1  ;;  %4164 = vst [vmem:[%s14855_s10 + $0x88] sm:$0xff] %v4132_v52  ;;  %v4105_v63 = vadd.f32 %v11052_v47, %v14848_v19  ;;  %v3997_v20 = vpop.f32.mrb[21].mxu0  ;;  %v15018_v59 = vmul.f32 %v15000_v1, %v18141_v33  ;;  %v18221_v41 = vld [vmem:[#allocation74_spill] sm:$0xff]  ;;  %v15027_v47 = vmul.f32 %v15002_v57, %v18142_v56  ;;  %v12455_v56 = vld [vmem:[#allocation10 + $0x20] sm:$0xff]  }
 0x478   : > { %4202 = vst [vmem:[#allocation2 + $0xa0] sm:$0xff] %v4132_v52  ;;  %18217 = vst [vmem:[#allocation57_spill] sm:$0xff] %v15005_v51  ;;  %v15022_v52 = vmul.f32 %v14997_v61, %v18221_v41  ;;  %v4103_v43 = vadd.f32 %v14848_v19, %v3997_v20  ;;  %v11053_v4 = vpop.f32.mrb[22].mxu0  ;;  %11095 = vmatmul.mubr.bf16.gmra.mrb[4].mxu1 %v4370_v48  ;;  %v18224_v41 = vld [vmem:[#allocation75_spill] sm:$0xff] }
 0x479   : > { %18218 = vst [vmem:[#allocation56_spill] sm:$0xff] %v15009_v8  ;;  %18219 = vst [vmem:[#allocation59_spill] sm:$0xff] %v15014_v15  ;;  %v4137_v2 = vmax.f32 %v4105_v63, 0.0  ;;  %v4106_v12 = vadd.f32 %v11053_v4, %v14848_v19  ;;  %v4000_v35 = vpop.f32.mrb[23].mxu0  ;;  %11098 = vmatprep.mubr.bf16.mxu1 %v4371_v54  ;;  %11115 = vmatpush3.bf16.msra.mxu1 %v12453_v6  ;;  %v15034_v20 = vmul.f32 %v15005_v51, %v18224_v41  ;;  %v15040_v4 = vld [vmem:[#allocation2 + $0x39] sm:$0xff]  ;;  %v15049_v15 = vld [vmem:[#allocation2 + $0x41] sm:$0xff] }
 0x47a   : > { %18220 = vst [vmem:[#allocation58_spill] sm:$0xff] %v15018_v59  ;;  %18222 = vst [vmem:[#allocation61_spill] sm:$0xff] %v15022_v52  ;;  %v4135_v1 = vmax.f32 %v4103_v43, 0.0  ;;  %v4104_v48 = vadd.f32 %v14848_v19, %v4000_v35  ;;  %11116 = vmatprep.subr.bf16.mxu1 %v12454_v11  ;;  %v15063_v8 = vmul.f32 %v15040_v4, %v18161_v16 }
 0x47b   : > { %18223 = vst [vmem:[#allocation63_spill] sm:$0xff] %v15027_v47  ;;  %18225 = vst [vmem:[#allocation62_spill] sm:$0xff] %v15034_v20  ;;  %v4138_v6 = vmax.f32 %v4106_v12, 0.0  ;;  %v15045_v61 = vld [vmem:[#allocation2 + $0x97] sm:$0xff] }
 0x47c   : > { %4169 = vst [vmem:[%s14855_s10 + $0xb0] sm:$0xff] %v4137_v2  ;;  %4207 = vst [vmem:[#allocation2 + $0xc8] sm:$0xff] %v4137_v2  ;;  %v4136_v43 = vmax.f32 %v4104_v48, 0.0  ;;  %v12456_v48 = vld [vmem:[#allocation10 + $0x28] sm:$0xff]  }
 0x47d   : > { %18226 = vst [vmem:[#allocation64_spill] sm:$0xff] %v15040_v4  ;;  %4167 = vst [vmem:[%s14855_s10 + $0xa0] sm:$0xff] %v4135_v1  ;;  %v15047_v35 = vld [vmem:[#allocation2 + $0xaf] sm:$0xff]  ;;  %11117 = vmatpush3.bf16.msra.mxu1 %v12454_v11  ;;  %v4373_v63 = vpack.c.bf16 %v4138_v6, %v4137_v2 }
 0x47e   : > { %4205 = vst [vmem:[#allocation2 + $0xb8] sm:$0xff] %v4135_v1  ;;  %18227 = vst [vmem:[#allocation69_spill] sm:$0xff] %v15045_v61  ;;  %v11056_v54 = vpop.f32.mrb[24].mxu0  ;;  %v4372_v20 = vpack.c.bf16 %v4136_v43, %v4135_v1  ;;  %11118 = vmatprep.subr.bf16.mxu1 %v12455_v56  ;;  %v15059_v52 = vmul.f32 %v15047_v35, %v18147_v21 }
 0x47f   : > { %18228 = vst [vmem:[#allocation68_spill] sm:$0xff] %v15049_v15  ;;  %4170 = vst [vmem:[%s14855_s10 + $0xb8] sm:$0xff] %v4138_v6  ;;  %v15052_v47 = vld [vmem:[#allocation2 + $0x9f] sm:$0xff]  ;;  %v15054_v12 = vld [vmem:[#allocation2 + $0xa7] sm:$0xff]  ;;  %v4109_v2 = vadd.f32 %v11056_v54, %v14848_v19  ;;  %v4013_v11 = vpop.f32.mrb[25].mxu0 }
 0x480   : > { %4208 = vst [vmem:[#allocation2 + $0xd0] sm:$0xff] %v4138_v6  ;;  %4168 = vst [vmem:[%s14855_s10 + $0xa8] sm:$0xff] %v4136_v43  ;;  %v15068_v6 = vmul.f32 %v15045_v61, %v18144_v58  ;;  %v15072_v1 = vmul.f32 %v15052_v47, %v18145_v31  ;;  %v4107_v59 = vadd.f32 %v14848_v19, %v4013_v11  ;;  %v11057_v4 = vpop.f32.mrb[26].mxu0  ;;  %11099 = vmatmul.mubr.bf16.gmra.mrb[8].mxu1 %v4372_v20  ;;  %v12457_v20 = vld [vmem:[#allocation10 + $0x30] sm:$0xff]  }
 0x481   : > { %4206 = vst [vmem:[#allocation2 + $0xc0] sm:$0xff] %v4136_v43  ;;  %18229 = vst [vmem:[#allocation76_spill] sm:$0xff] %v15059_v52  ;;  %v15076_v43 = vmul.f32 %v15049_v15, %v18162_v32  ;;  %v15081_v54 = vmul.f32 %v15054_v12, %v18146_v53  ;;  %v4141_v51 = vmax.f32 %v4109_v2, 0.0  ;;  %v4110_v16 = vadd.f32 %v11057_v4, %v14848_v19  ;;  %v4016_v41 = vpop.f32.mrb[27].mxu0  ;;  %v4218_v52 = vld [vmem:[#allocation2 + $0xf] sm:$0xff] }
 0x482   : > { %18230 = vst [vmem:[#allocation77_spill] sm:$0xff] %v15063_v8  ;;  %18231 = vst [vmem:[#allocation128_spill] sm:$0xff] %v15068_v6  ;;  %11102 = vmatprep.mubr.bf16.mxu1 %v4373_v63  ;;  %11119 = vmatpush3.bf16.msra.mxu1 %v12455_v56  ;;  %v4139_v32 = vmax.f32 %v4107_v59, 0.0  ;;  %v4108_v11 = vadd.f32 %v14848_v19, %v4016_v41  ;;  %v12458_v63 = vld [vmem:[#allocation10 + $0x38] sm:$0xff]  }
 0x483   : > { %18232 = vst [vmem:[#allocation129_spill] sm:$0xff] %v15072_v1  ;;  %18233 = vst [vmem:[#allocation130_spill] sm:$0xff] %v15076_v43  ;;  %11120 = vmatprep.subr.bf16.mxu1 %v12456_v48  ;;  %v4142_v2 = vmax.f32 %v4110_v16, 0.0 }
 0x484   : > { %18234 = vst [vmem:[#allocation131_spill] sm:$0xff] %v15081_v54  ;;  %4173 = vst [vmem:[%s14855_s10 + $0xd0] sm:$0xff] %v4141_v51  ;;  %v4140_v56 = vmax.f32 %v4108_v11, 0.0 }
 0x485   : > { %4211 = vst [vmem:[#allocation2 + $0xe8] sm:$0xff] %v4141_v51  ;;  %4171 = vst [vmem:[%s14855_s10 + $0xc0] sm:$0xff] %v4139_v32  ;;  %v15093_v4 = vld [vmem:[#allocation2 + $0xb7] sm:$0xff]  ;;  %v4375_v41 = vpack.c.bf16 %v4142_v2, %v4141_v51 }
 0x486   : > { %4209 = vst [vmem:[#allocation2 + $0xd8] sm:$0xff] %v4139_v32  ;;  %18235 = vst [vmem:[#allocation132_spill] sm:$0xff] %v15093_v4  ;;  %11121 = vmatpush3.bf16.msra.mxu1 %v12456_v48  ;;  %v11060_v16 = vpop.f32.mrb[28].mxu0  ;;  %v4374_v54 = vpack.c.bf16 %v4140_v56, %v4139_v32  ;;  %v15110_v51 = vmul.f32 %v15093_v4, %v18148_v28  ;;  %v4217_v4 = vld [vmem:[#allocation2 + $0x7] sm:$0xff] }
 0x487   : > { %v15095_v59 = vld [vmem:[#allocation2 + $0xcf] sm:$0xff]  ;;  %4174 = vst [vmem:[%s14855_s10 + $0xd8] sm:$0xff] %v4142_v2  ;;  %4212 = vst [vmem:[#allocation2 + $0xf0] sm:$0xff] %v4142_v2  ;;  %11122 = vmatprep.subr.bf16.mxu1 %v12457_v20  ;;  %v4113_v8 = vadd.f32 %v11060_v16, %v14848_v19  ;;  %v4029_v43 = vpop.f32.mrb[29].mxu0 }
 0x488   : > { %18236 = vst [vmem:[#allocation133_spill] sm:$0xff] %v15095_v59  ;;  %v15098_v15 = vld [vmem:[#allocation2 + $0xbf] sm:$0xff]  ;;  %v15100_v61 = vld [vmem:[#allocation2 + $0xc7] sm:$0xff]  ;;  %4172 = vst [vmem:[%s14855_s10 + $0xc8] sm:$0xff] %v4140_v56  ;;  %v15105_v11 = vmul.f32 %v15095_v59, %v18151_v40  ;;  %v4111_v32 = vadd.f32 %v14848_v19, %v4029_v43  ;;  %v11061_v2 = vpop.f32.mrb[30].mxu0  ;;  %11103 = vmatmul.mubr.bf16.gmra.mrb[12].mxu1 %v4374_v54  ;;  %v4250_v40 = vmul.f32 %v4218_v52, %v18127_v34 }
 0x489   : > { %18237 = vst [vmem:[#allocation134_spill] sm:$0xff] %v15098_v15  ;;  %4210 = vst [vmem:[#allocation2 + $0xe0] sm:$0xff] %v4140_v56  ;;  %v15114_v48 = vmul.f32 %v15098_v15, %v18149_v17  ;;  %v15119_v56 = vmul.f32 %v15100_v61, %v18150_v26  ;;  %v4145_v16 = vmax.f32 %v4113_v8, 0.0  ;;  %v4114_v6 = vadd.f32 %v11061_v2, %v14848_v19  ;;  %v4032_v1 = vpop.f32.mrb[31].mxu0  ;;  %v15122_v59 = vld [vmem:[#allocation2 + $0x51] sm:$0xff]  ;;  %v15141_v43 = vld [vmem:[#allocation2 + $0x59] sm:$0xff] }
 0x48a   : > { %18238 = vst [vmem:[#allocation135_spill] sm:$0xff] %v15105_v11  ;;  %18239 = vst [vmem:[#allocation136_spill] sm:$0xff] %v15110_v51  ;;  %11106 = vmatprep.mubr.bf16.mxu1 %v4375_v41  ;;  %11123 = vmatpush3.bf16.msra.mxu1 %v12457_v20  ;;  %v4143_v15 = vmax.f32 %v4111_v32, 0.0  ;;  %v4112_v54 = vadd.f32 %v14848_v19, %v4032_v1  ;;  %v15128_v8 = vld [vmem:[#allocation10 + $0x80] sm:$0xff]   ;;  %v15133_v41 = vld [vmem:[#allocation2 + $0x49] sm:$0xff]  ;;  %v4249_v19 = vmul.f32 %v4217_v4, %v18128_v39 }
 0x48b   : > { %18240 = vst [vmem:[#allocation137_spill] sm:$0xff] %v15114_v48  ;;  %18241 = vst [vmem:[#allocation138_spill] sm:$0xff] %v15119_v56  ;;  %11124 = vmatprep.subr.bf16.mxu1 %v12458_v63  ;;  %v4146_v20 = vmax.f32 %v4114_v6, 0.0  ;;  %v15145_v2 = vmul.f32 %v15122_v59, %v18167_v10  ;;  %v15158_v39 = vld [vmem:[#allocation2 + $0x61] sm:$0xff]  ;;  %v15160_v56 = vld [vmem:[#allocation2 + $0x69] sm:$0xff]  ;;  %v4252_v48 = vmul.f32 %v14875_v5, %v18189_v46 }
 0x48c   : > { %18242 = vst [vmem:[#allocation139_spill] sm:$0xff] %v15122_v59  ;;  %4177 = vst [vmem:[%s14855_s10 + $0xf0] sm:$0xff] %v4145_v16  ;;  %v4144_v32 = vmax.f32 %v4112_v54, 0.0  ;;  %v4297_v34 = vpack.c.bf16 %v4250_v40, %v4249_v19  ;;  %v15168_v11 = vld [vmem:[#allocation2 + $0x79] sm:$0xff]  ;;  %v15170_v51 = vld [vmem:[#allocation2 + $0x81] sm:$0xff]  ;;  %v15186_v19 = vmul.f32 %v15141_v43, %v18168_v38  ;;  %v15212_v46 = vmul.f32 %v15160_v56, %v18170_v0 }
 0x48d   : > { %4215 = vst [vmem:[#allocation2 + $0x108] sm:$0xff] %v4145_v16  ;;  %18243 = vst [vmem:[#allocation140_spill] sm:$0xff] %v15133_v41  ;;  %v15137_v1 = vld [vmem:[#allocation2 + $0xd7] sm:$0xff]  ;;  %v15192_v59 = vld [vmem:[#allocation2 + $0x89] sm:$0xff] }
 0x48e   : > { %4175 = vst [vmem:[%s14855_s10 + $0xe0] sm:$0xff] %v4143_v15  ;;  %4213 = vst [vmem:[#allocation2 + $0xf8] sm:$0xff] %v4143_v15  ;;  %v15139_v52 = vld [vmem:[#allocation2 + $0xef] sm:$0xff]  ;;  %11125 = vmatpush3.bf16.msra.mxu1 %v12458_v63  ;;  %v4376_v54 = vpack.c.bf16 %v4144_v32, %v4143_v15  ;;  %v15164_v63 = vmul.f32 %v15133_v41, %v18166_v30  ;;  %v15174_v15 = vmul.f32 %v15137_v1, %v18152_v13 }
 0x48f   : > { %18244 = vst [vmem:[#allocation141_spill] sm:$0xff] %v15137_v1  ;;  %18245 = vst [vmem:[#allocation142_spill] sm:$0xff] %v15145_v2  ;;  %v15154_v4 = vmul.f32 %v15139_v52, %v18155_v18  ;;  %11158 = vmatprep.subr.bf16.mxu1 %v15128_v8  ;;  %v4254_v41 = vmul.f32 %v14872_v22, %v18130_v50  ;;  %v15194_v10 = vld [vmem:[#allocation2 + $0x91] sm:$0xff]  ;;  %v4253_v1 = vmul.f32 %v14877_v44, %v18129_v3  ;;  %v15208_v50 = vld [vmem:[#allocation2 + $0x99] sm:$0xff] }
 0x490   : > { %4178 = vst [vmem:[%s14855_s10 + $0xf8] sm:$0xff] %v4146_v20  ;;  %4216 = vst [vmem:[#allocation2 + $0x110] sm:$0xff] %v4146_v20  ;;  %v15148_v6 = vld [vmem:[#allocation2 + $0xdf] sm:$0xff]  ;;  %v15150_v16 = vld [vmem:[#allocation2 + $0xe7] sm:$0xff]  ;;  %11107 = vmatmul.mubr.bf16.gmra.mrb[16].mxu1 %v4376_v54  ;;  %v15206_v22 = vmul.f32 %v15158_v39, %v18169_v24  ;;  %v15220_v44 = vmul.f32 %v15168_v11, %v18172_v29  ;;  %v15224_v30 = vmul.f32 %v15170_v51, %v18173_v37 }
 0x491   : > { %18246 = vst [vmem:[#allocation143_spill] sm:$0xff] %v15154_v4  ;;  %4176 = vst [vmem:[%s14855_s10 + $0xe8] sm:$0xff] %v4144_v32  ;;  %v15166_v20 = vld [vmem:[#allocation2 + $0x71] sm:$0xff]  ;;  %v15178_v40 = vmul.f32 %v15148_v6, %v18153_v9  ;;  %11126 = vmatprep.mubr.bf16.mxu1 %v4297_v34  ;;  %v15230_v54 = vmul.f32 %v15192_v59, %v18174_v27  ;;  %v4251_v2 = vmul.f32 %v14870_v25, %v18193_v49  ;;  %v15240_v4 = vld [vmem:[#allocation2 + $0xa1] sm:$0xff] }
 0x492   : > { %4214 = vst [vmem:[#allocation2 + $0x100] sm:$0xff] %v4144_v32  ;;  %18247 = vst [vmem:[#allocation144_spill] sm:$0xff] %v15160_v56  ;;  %v15182_v32 = vmul.f32 %v15150_v16, %v18154_v14  ;;  %v15216_v34 = vmul.f32 %v15166_v20, %v18171_v23  ;;  %v18265_v3 = vld [vmem:[#allocation95_spill] sm:$0xff]  ;;  %v15246_v5 = vld [vmem:[#allocation2 + $0xa9] sm:$0xff] }
 0x493   : > { %18248 = vst [vmem:[#allocation145_spill] sm:$0xff] %v15164_v63  ;;  %18249 = vst [vmem:[#allocation146_spill] sm:$0xff] %v15166_v20  ;;  %v15234_v63 = vmul.f32 %v15194_v10, %v18265_v3  ;;  %v18270_v25 = vld [vmem:[#allocation100_spill] sm:$0xff]  ;;  %v15288_v27 = vld [vmem:[#allocation2 + $0xe9] sm:$0xff] }
 0x494   : > { %18250 = vst [vmem:[#allocation147_spill] sm:$0xff] %v15168_v11  ;;  %18251 = vst [vmem:[#allocation148_spill] sm:$0xff] %v15170_v51  ;;  %v15256_v49 = vmul.f32 %v15208_v50, %v18270_v25  ;;  %v4299_v51 = vpack.c.bf16 %v4254_v41, %v4253_v1  ;;  %v12460_v3 = vld [vmem:[#allocation10 + $0x88] sm:$0xff]   ;;  %v18282_v1 = vld [vmem:[#allocation98_spill] sm:$0xff] }
 0x495   : > { %18252 = vst [vmem:[#allocation149_spill] sm:$0xff] %v15174_v15  ;;  %18253 = vst [vmem:[#allocation150_spill] sm:$0xff] %v15178_v40  ;;  %v15258_v15 = vld [vmem:[#allocation2 + $0xc9] sm:$0xff]  ;;  %v15264_v11 = vld [vmem:[#allocation2 + $0xc1] sm:$0xff] }
 0x496   : > { %18254 = vst [vmem:[#allocation151_spill] sm:$0xff] %v15182_v32  ;;  %18255 = vst [vmem:[#allocation152_spill] sm:$0xff] %v15186_v19  ;;  %v15238_v32 = vld [vmem:[#allocation2 + $0xf7] sm:$0xff]  ;;  %v15286_v25 = vld [vmem:[#allocation2 + $0xe1] sm:$0xff] }
 0x497   : > { %18256 = vst [vmem:[#allocation153_spill] sm:$0xff] %v15192_v59  ;;  %18257 = vst [vmem:[#allocation154_spill] sm:$0xff] %v15194_v10  ;;  %v15248_v19 = vld [vmem:[#allocation2 + $0xb1] sm:$0xff]  ;;  %v4298_v10 = vpack.c.bf16 %v4252_v48, %v4251_v2  ;;  %v18287_v56 = vld [vmem:[#allocation104_spill] sm:$0xff] }
 0x498   : > { %18258 = vst [vmem:[#allocation155_spill] sm:$0xff] %v15206_v22  ;;  %18259 = vst [vmem:[#allocation156_spill] sm:$0xff] %v15208_v50  ;;  %v15266_v22 = vld [vmem:[#allocation2 + $0xd1] sm:$0xff]  ;;  %v15284_v50 = vld [vmem:[#allocation2 + $0xd9] sm:$0xff]  ;;  %v15292_v29 = vmul.f32 %v15246_v5, %v18287_v56 }
 0x499   : > { %18260 = vst [vmem:[#allocation157_spill] sm:$0xff] %v15212_v46  ;;  %18261 = vst [vmem:[#allocation158_spill] sm:$0xff] %v15216_v34  ;;  %v15244_v40 = vld [vmem:[#allocation2 + $0xff] sm:$0xff]  ;;  %v4255_v46 = vmul.f32 %v14908_v45, %v18134_v62  ;;  %v18279_v2 = vld [vmem:[#allocation99_spill] sm:$0xff]  ;;  %11127 = vmatmul.mubr.bf16.vlgmr.msra.gmra.mrb[20].mxu1 %v4298_v10 }
 0x49a   : > { %18262 = vst [vmem:[#allocation159_spill] sm:$0xff] %v15220_v44  ;;  %18263 = vst [vmem:[#allocation160_spill] sm:$0xff] %v15224_v30  ;;  %v15262_v34 = vld [vmem:[#allocation2 + $0xb9] sm:$0xff]  ;;  %v15278_v41 = vmul.f32 %v15240_v4, %v18279_v2  ;;  %11159 = vmatpush3.bf16.msra.mxu1 %v15128_v8  ;;  %11130 = vmatprep.mubr.bf16.mxu1 %v4299_v51  ;;  %v18291_v10 = vld [vmem:[#allocation97_spill] sm:$0xff] }
 0x49b   : > { %18264 = vst [vmem:[#allocation161_spill] sm:$0xff] %v15230_v54  ;;  %18266 = vst [vmem:[#allocation162_spill] sm:$0xff] %v15234_v63  ;;  %v18275_v44 = vld [vmem:[#allocation67_spill] sm:$0xff]  ;;  %v18277_v54 = vld [vmem:[#allocation66_spill] sm:$0xff]  ;;  %11160 = vmatprep.subr.bf16.mxu1 %v12460_v3 }
 0x49c   : > { %18267 = vst [vmem:[#allocation163_spill] sm:$0xff] %v15240_v4  ;;  %18268 = vst [vmem:[#allocation164_spill] sm:$0xff] %v15246_v5  ;;  %v15270_v59 = vmul.f32 %v15238_v32, %v18275_v44  ;;  %v15274_v48 = vmul.f32 %v15244_v40, %v18277_v54  ;;  %v18281_v45 = vld [vmem:[#allocation44_spill] sm:$0xff]  ;;  %v18283_v63 = vld [vmem:[#allocation94_spill] sm:$0xff] }
 0x49d   : > { %18269 = vst [vmem:[#allocation165_spill] sm:$0xff] %v15248_v19  ;;  %18271 = vst [vmem:[#allocation166_spill] sm:$0xff] %v15256_v49  ;;  %v4256_v62 = vmul.f32 %v18282_v1, %v18281_v45  ;;  %v4258_v30 = vmul.f32 %v18283_v63, %v18137_v42  ;;  %v18289_v20 = vld [vmem:[#allocation103_spill] sm:$0xff]  ;;  %v4257_v63 = vmul.f32 %v18291_v10, %v18136_v55  ;;  %v15305_v45 = vld [vmem:[#allocation2 + $0x101] sm:$0xff] }
 0x49e   : > { %18272 = vst [vmem:[#allocation167_spill] sm:$0xff] %v15258_v15  ;;  %18273 = vst [vmem:[#allocation168_spill] sm:$0xff] %v15264_v11  ;;  %v15296_v4 = vmul.f32 %v15248_v19, %v18289_v20  ;;  %v15301_v1 = vld [vmem:[#allocation2 + $0xf1] sm:$0xff]  ;;  %v15303_v42 = vld [vmem:[#allocation2 + $0xf9] sm:$0xff]  ;;  %11161 = vmatpush3.bf16.msra.mxu1 %v12460_v3  ;;  %v4260_v3 = vmul.f32 %v14961_v7, %v18139_v60 }
 0x49f   : > { %18274 = vst [vmem:[#allocation169_spill] sm:$0xff] %v15266_v22  ;;  %18276 = vst [vmem:[#allocation67_spill] sm:$0xff] %v15270_v59  ;;  %v12461_v19 = vld [vmem:[#allocation10 + $0x90] sm:$0xff]   ;;  %v18294_v8 = vld [vmem:[#allocation108_spill] sm:$0xff] }
 0x4a0   : > { %18278 = vst [vmem:[#allocation66_spill] sm:$0xff] %v15274_v48  ;;  %18280 = vst [vmem:[#allocation170_spill] sm:$0xff] %v15278_v41  ;;  %v15315_v10 = vmul.f32 %v15262_v34, %v18294_v8  ;;  %v18296_v55 = vld [vmem:[#allocation107_spill] sm:$0xff]  ;;  %v18298_v2 = vld [vmem:[#allocation112_spill] sm:$0xff]  ;;  %v4300_v48 = vpack.c.bf16 %v4256_v62, %v4255_v46  ;;  %11162 = vmatprep.subr.bf16.mxu1 %v12461_v19 }
 0x4a1   : > { %18284 = vst [vmem:[#allocation98_spill] sm:$0xff] %v15284_v50  ;;  %18285 = vst [vmem:[#allocation94_spill] sm:$0xff] %v15286_v25  ;;  %v15319_v20 = vmul.f32 %v15264_v11, %v18296_v55  ;;  %v15323_v37 = vmul.f32 %v15258_v15, %v18298_v2  ;;  %v18299_v5 = vld [vmem:[#allocation111_spill] sm:$0xff]  ;;  %v18300_v49 = vld [vmem:[#allocation116_spill] sm:$0xff] }
 0x4a2   : > { %18286 = vst [vmem:[#allocation171_spill] sm:$0xff] %v15288_v27  ;;  %18288 = vst [vmem:[#allocation172_spill] sm:$0xff] %v15292_v29  ;;  %v15327_v56 = vmul.f32 %v15266_v22, %v18299_v5  ;;  %v15331_v41 = vmul.f32 %v15284_v50, %v18300_v49  ;;  %v18302_v51 = vld [vmem:[#allocation115_spill] sm:$0xff]  ;;  %v18307_v22 = vld [vmem:[#allocation125_spill] sm:$0xff]  ;;  %11131 = vmatmul.mubr.bf16.gmra.mrb[24].mxu1 %v4300_v48 }
 0x4a3   : > { %18290 = vst [vmem:[#allocation173_spill] sm:$0xff] %v15296_v4  ;;  %18292 = vst [vmem:[#allocation97_spill] sm:$0xff] %v15301_v1  ;;  %v15335_v29 = vmul.f32 %v15286_v25, %v18302_v51  ;;  %v18304_v4 = vld [vmem:[#allocation120_spill] sm:$0xff]  ;;  %v18306_v15 = vld [vmem:[#allocation119_spill] sm:$0xff]  ;;  %v15349_v5 = vmul.f32 %v15303_v42, %v18307_v22  ;;  %11163 = vmatpush3.bf16.msra.mxu1 %v12461_v19 }
 0x4a4   : > { %18293 = vst [vmem:[#allocation174_spill] sm:$0xff] %v15303_v42  ;;  %18295 = vst [vmem:[#allocation175_spill] sm:$0xff] %v15315_v10  ;;  %v15339_v59 = vmul.f32 %v15288_v27, %v18304_v4  ;;  %v15345_v11 = vmul.f32 %v15301_v1, %v18306_v15  ;;  %v18308_v50 = vld [vmem:[#allocation124_spill] sm:$0xff]  ;;  %v12462_v10 = vld [vmem:[#allocation10 + $0x98] sm:$0xff]   ;;  %v4301_v1 = vpack.c.bf16 %v4258_v30, %v4257_v63 }
 0x4a5   : > { %18297 = vst [vmem:[#allocation176_spill] sm:$0xff] %v15319_v20  ;;  %18301 = vst [vmem:[#allocation177_spill] sm:$0xff] %v15331_v41  ;;  %v15353_v49 = vmul.f32 %v15305_v45, %v18308_v50  ;;  %11164 = vmatprep.subr.bf16.mxu1 %v12462_v10  ;;  %v12463_v27 = vld [vmem:[#allocation10 + $0xa0] sm:$0xff]   ;;  %v18309_v25 = vld [vmem:[#allocation118_spill] sm:$0xff] }
 0x4a6   : > { %18303 = vst [vmem:[#allocation178_spill] sm:$0xff] %v15335_v29  ;;  %18305 = vst [vmem:[#allocation179_spill] sm:$0xff] %v15339_v59  ;;  %11134 = vmatprep.mubr.bf16.mxu1 %v4301_v1  ;;  %v4261_v62 = vmul.f32 %v18309_v25, %v18140_v36  ;;  %v18310_v46 = vld [vmem:[#allocation113_spill] sm:$0xff]  ;;  %v18312_v20 = vld [vmem:[#allocation114_spill] sm:$0xff] }
 0x4a7   : > { %v4262_v41 = vmul.f32 %v18310_v46, %v18141_v33  ;;  %v18311_v29 = vld [vmem:[#allocation49_spill] sm:$0xff]  ;;  %11165 = vmatpush3.bf16.msra.mxu1 %v12462_v10  ;;  %v12464_v19 = vld [vmem:[#allocation10 + $0xa8] sm:$0xff]   ;;  %v15373_v48 = vld [vmem:[#allocation2 + $0x10f] sm:$0xff] }
 0x4a8   : > { %v4259_v59 = vmul.f32 %v18312_v20, %v18311_v29  ;;  %v15371_v42 = vld [vmem:[#allocation2 + $0x107] sm:$0xff]  ;;  %11166 = vmatprep.subr.bf16.mxu1 %v12463_v27  ;;  %v15381_v25 = vmul.f32 %v15373_v48, %v18277_v54  ;;  %v18315_v20 = vld [vmem:[#allocation52_spill] sm:$0xff]  ;;  %v18316_v1 = vld [vmem:[#allocation55_spill] sm:$0xff] }
 0x4a9   : > { %v4303_v7 = vpack.c.bf16 %v4262_v41, %v4261_v62  ;;  %v15377_v63 = vmul.f32 %v15371_v42, %v18275_v44  ;;  %v4264_v10 = vmul.f32 %v18316_v1, %v18315_v20  ;;  %v18317_v41 = vld [vmem:[#allocation38_spill] sm:$0xff]  ;;  %v12467_v1 = vld [vmem:[#allocation10 + $0xc0] sm:$0xff]  }
 0x4aa   : > { %v4302_v30 = vpack.c.bf16 %v4260_v3, %v4259_v59  ;;  %18314 = vst [vmem:[#allocation124_spill] sm:$0xff] %v15381_v25  ;;  %v12465_v59 = vld [vmem:[#allocation10 + $0xb0] sm:$0xff]   ;;  %v4265_v3 = vmul.f32 %v15002_v57, %v18144_v58  ;;  %v4266_v62 = vmul.f32 %v18317_v41, %v18145_v31  ;;  %v12466_v33 = vld [vmem:[#allocation10 + $0xb8] sm:$0xff]   ;;  %v4268_v57 = vmul.f32 %v15052_v47, %v18147_v21 }
 0x4ab   : > { %18313 = vst [vmem:[#allocation125_spill] sm:$0xff] %v15377_v63  ;;  %11167 = vmatpush3.bf16.msra.mxu1 %v12463_v27  ;;  %v18319_v27 = vld [vmem:[#allocation41_spill] sm:$0xff]  ;;  %v15397_v31 = vld [vmem:[#allocation2 + $0x111] sm:$0xff]  ;;  %v18326_v63 = vld [vmem:[#allocation132_spill] sm:$0xff] }
 0x4ac   : > { %11135 = vmatmul.mubr.bf16.gmra.mrb[28].mxu1 %v4302_v30  ;;  %11168 = vmatprep.subr.bf16.mxu1 %v12464_v19  ;;  %v18318_v30 = vld [vmem:[#allocation53_spill] sm:$0xff]  ;;  %v4305_v36 = vpack.c.bf16 %v4266_v62, %v4265_v3  ;;  %v15411_v47 = vmul.f32 %v15397_v31, %v18308_v50  ;;  %v18324_v62 = vld [vmem:[#allocation134_spill] sm:$0xff]  ;;  %v4271_v25 = vmul.f32 %v18326_v63, %v18150_v26 }
 0x4ad   : > { %11138 = vmatprep.mubr.bf16.mxu1 %v4303_v7  ;;  %v4263_v7 = vmul.f32 %v18319_v27, %v18318_v30  ;;  %v15395_v41 = vld [vmem:[#allocation2 + $0x109] sm:$0xff]  ;;  %v4269_v27 = vmul.f32 %v15054_v12, %v18148_v28  ;;  %v4796_v63 = vld [vmem:[#allocation2 + $0x11] sm:$0xff] }
 0x4ae   : > { %18322 = vst [vmem:[#allocation113_spill] sm:$0xff] %v15411_v47 }
 0x4af   : > { %11169 = vmatpush3.bf16.msra.mxu1 %v12464_v19  ;;  %v4304_v29 = vpack.c.bf16 %v4264_v10, %v4263_v7  ;;  %v4270_v19 = vmul.f32 %v15047_v35, %v18149_v17  ;;  %v18320_v10 = vld [vmem:[#allocation69_spill] sm:$0xff]  ;;  %v18323_v35 = vld [vmem:[#allocation60_spill] sm:$0xff] }
 0x4b0   : > { %11170 = vmatprep.subr.bf16.mxu1 %v12465_v59  ;;  %v4272_v7 = vmul.f32 %v18324_v62, %v18323_v35 }
 0x4b1   : > { %v4307_v3 = vpack.c.bf16 %v4270_v19, %v4269_v27  ;;  %v4276_v27 = vmul.f32 %v15148_v6, %v18155_v18  ;;  %v4277_v19 = vmul.f32 %v15150_v16, %v18275_v44  ;;  %v18331_v44 = vld [vmem:[#allocation73_spill] sm:$0xff] }
 0x4b3   : > { %11171 = vmatpush3.bf16.msra.mxu1 %v12465_v59 }
 0x4b4   : > { %11139 = vmatmul.mubr.bf16.gmra.mrb[0].mxu1 %v4304_v29  ;;  %11172 = vmatprep.subr.bf16.mxu1 %v12466_v33  ;;  %v4267_v29 = vmul.f32 %v18320_v10, %v18146_v53  ;;  %v18325_v10 = vld [vmem:[#allocation133_spill] sm:$0xff] }
 0x4b5   : > { %11142 = vmatprep.mubr.bf16.mxu1 %v4305_v36  ;;  %v15407_v36 = vmul.f32 %v15395_v41, %v18307_v22  ;;  %v4274_v46 = vmul.f32 %v18325_v10, %v18153_v9 }
 0x4b6   : > { %v4306_v59 = vpack.c.bf16 %v4268_v57, %v4267_v29  ;;  %v4308_v57 = vpack.c.bf16 %v4272_v7, %v4271_v25  ;;  %v18328_v25 = vld [vmem:[#allocation70_spill] sm:$0xff] }
 0x4b7   : > { %11173 = vmatpush3.bf16.msra.mxu1 %v12466_v33  ;;  %18321 = vst [vmem:[#allocation118_spill] sm:$0xff] %v15407_v36  ;;  %v4273_v33 = vmul.f32 %v15100_v61, %v18152_v13  ;;  %v18327_v61 = vld [vmem:[#allocation141_spill] sm:$0xff]  ;;  %v18338_v36 = vld [vmem:[#allocation79_spill] sm:$0xff] }
 0x4b8   : > { %11206 = vmatprep.subr.bf16.mxu1 %v12467_v1  ;;  %v4795_v7 = vld [vmem:[#allocation2 + $0x9] sm:$0xff] }
 0x4b9   : > { %v4309_v29 = vpack.c.bf16 %v4274_v46, %v4273_v33  ;;  %v4280_v46 = vmul.f32 %v15244_v40, %v18328_v25  ;;  %v18329_v33 = vld [vmem:[#allocation72_spill] sm:$0xff] }
 0x4ba   : > { %v4828_v6 = vmul.f32 %v4796_v63, %v18329_v33  ;;  %v18337_v40 = vld [vmem:[#allocation48_spill] sm:$0xff]  ;;  %v18339_v63 = vld [vmem:[#allocation57_spill] sm:$0xff] }
 0x4bb   : > { %v4831_v47 = vmul.f32 %v18339_v63, %v18338_v36  ;;  %v18346_v63 = vld [vmem:[#allocation91_spill] sm:$0xff]  ;;  %v12490_v36 = vld [vmem:[#allocation10 + $0x178] sm:$0xff]  }
 0x4bc   : > { %11143 = vmatmul.mubr.bf16.gmra.mrb[4].mxu1 %v4306_v59  ;;  %v4278_v59 = vmul.f32 %v15139_v52, %v18277_v54 }
 0x4bd   : > { %11146 = vmatprep.mubr.bf16.mxu1 %v4307_v3  ;;  %v4275_v3 = vmul.f32 %v18327_v61, %v18154_v14  ;;  %v18334_v61 = vld [vmem:[#allocation74_spill] sm:$0xff] }
 0x4be   : > { %v4311_v10 = vpack.c.bf16 %v4278_v59, %v4277_v19  ;;  %v18333_v19 = vld [vmem:[#allocation89_spill] sm:$0xff] }
 0x4bf   : > { %v4310_v62 = vpack.c.bf16 %v4276_v27, %v4275_v3  ;;  %v18332_v27 = vld [vmem:[#allocation75_spill] sm:$0xff]  ;;  %v18335_v3 = vld [vmem:[#allocation93_spill] sm:$0xff] }
 0x4c0   : > { %v4829_v59 = vmul.f32 %v18333_v19, %v18332_v27  ;;  %v18344_v19 = vld [vmem:[#allocation139_spill] sm:$0xff] }
 0x4c4   : > { %11147 = vmatmul.mubr.bf16.gmra.mrb[8].mxu1 %v4308_v57  ;;  %v18330_v57 = vld [vmem:[#allocation71_spill] sm:$0xff] }
 0x4c5   : > { %11150 = vmatprep.mubr.bf16.mxu1 %v4309_v29  ;;  %v4279_v16 = vmul.f32 %v15238_v32, %v18330_v57  ;;  %v4827_v29 = vmul.f32 %v4795_v7, %v18331_v44  ;;  %v12468_v32 = vld [vmem:[#allocation10 + $0xc8] sm:$0xff]  }
 0x4c6   : > { %v18341_v7 = vld [vmem:[#allocation64_spill] sm:$0xff] }
 0x4c7   : > { %v4312_v52 = vpack.c.bf16 %v4280_v46, %v4279_v16  ;;  %v4875_v54 = vpack.c.bf16 %v4828_v6, %v4827_v29  ;;  %v18340_v46 = vld [vmem:[#allocation81_spill] sm:$0xff]  ;;  %v18342_v16 = vld [vmem:[#allocation80_spill] sm:$0xff] }
 0x4c8   : > { %v4833_v6 = vmul.f32 %v18341_v7, %v18340_v46  ;;  %v18343_v29 = vld [vmem:[#allocation68_spill] sm:$0xff] }
 0x4c9   : > { %v5485_v46 = vld [vmem:[#allocation2 + $0x98] sm:$0xff] }
 0x4cc   : > { %11151 = vmatmul.mubr.bf16.gmra.mrb[12].mxu1 %v4310_v62  ;;  %v4830_v62 = vmul.f32 %v18335_v3, %v18334_v61  ;;  %v4836_v3 = vmul.f32 %v18344_v19, %v18169_v24  ;;  %v18349_v19 = vld [vmem:[#allocation144_spill] sm:$0xff]  ;;  %v5496_v61 = vld [vmem:[#allocation2 + $0xf0] sm:$0xff] }
 0x4cd   : > { %11154 = vmatprep.mubr.bf16.mxu1 %v4311_v10  ;;  %v18336_v10 = vld [vmem:[#allocation78_spill] sm:$0xff]  ;;  %v5486_v24 = vld [vmem:[#allocation2 + $0xa0] sm:$0xff] }
 0x4ce   : > { %v4832_v12 = vmul.f32 %v18337_v40, %v18336_v10  ;;  %v4876_v33 = vpack.c.bf16 %v4830_v62, %v4829_v59  ;;  %v18345_v40 = vld [vmem:[#allocation140_spill] sm:$0xff]  ;;  %v15703_v10 = vpack.c.bf16 %v5486_v24, %v5485_v46 }
 0x4cf   : > { %v4835_v59 = vmul.f32 %v18345_v40, %v18168_v38  ;;  %v15687_v38 = vld [vmem:[%s13602_s6 + $0x90] sm:$0xff]  ;;  %v5490_v24 = vld [vmem:[#allocation2 + $0xc0] sm:$0xff] }
 0x4d0   : > { %v4877_v14 = vpack.c.bf16 %v4832_v12, %v4831_v47  ;;  %v12470_v47 = vld [vmem:[#allocation10 + $0xd8] sm:$0xff]   ;;  %v4838_v12 = vmul.f32 %v15158_v39, %v18171_v23  ;;  %v18352_v39 = vld [vmem:[#allocation95_spill] sm:$0xff]  ;;  %v12473_v23 = vld [vmem:[#allocation10 + $0xf0] sm:$0xff]  }
 0x4d4   : > { %11155 = vmatmul.mubr.bf16.gmra.mrb[16].mxu1 %v4312_v52  ;;  %v4834_v52 = vmul.f32 %v18343_v29, %v18342_v16  ;;  %v18348_v29 = vld [vmem:[#allocation92_spill] sm:$0xff] }
 0x4d5   : > { %11174 = vmatprep.mubr.bf16.mxu1 %v4875_v54  ;;  %v12469_v54 = vld [vmem:[#allocation10 + $0xd0] sm:$0xff]  }
 0x4d6   : > { %v4878_v62 = vpack.c.bf16 %v4834_v52, %v4833_v6  ;;  %v4839_v6 = vmul.f32 %v18349_v19, %v18348_v29  ;;  %v18356_v19 = vld [vmem:[#allocation100_spill] sm:$0xff]  ;;  %v7143_v29 = vld [vmem:[%s13602_s6 + $0x88] sm:$0xff] }
 0x4dc   : > { %11175 = vmatmul.mubr.bf16.vlgmr.msra.gmra.mrb[20].mxu1 %v4876_v33  ;;  %v12471_v33 = vld [vmem:[#allocation10 + $0xe0] sm:$0xff]  }
 0x4dd   : > { %11207 = vmatpush3.bf16.msra.mxu1 %v12467_v1  ;;  %11178 = vmatprep.mubr.bf16.mxu1 %v4877_v14  ;;  %v4879_v1 = vpack.c.bf16 %v4836_v3, %v4835_v59  ;;  %v4837_v14 = vmul.f32 %v15141_v43, %v18170_v0  ;;  %v12472_v3 = vld [vmem:[#allocation10 + $0xe8] sm:$0xff]  }
 0x4de   : > { %11208 = vmatprep.subr.bf16.mxu1 %v12468_v32  ;;  %v18350_v43 = vld [vmem:[#allocation96_spill] sm:$0xff] }
 0x4df   : > { %v4880_v52 = vpack.c.bf16 %v4838_v12, %v4837_v14 }
 0x4e1   : > { %11209 = vmatpush3.bf16.msra.mxu1 %v12468_v32  ;;  %v18347_v32 = vld [vmem:[#allocation146_spill] sm:$0xff] }
 0x4e2   : > { %11210 = vmatprep.subr.bf16.mxu1 %v12469_v54  ;;  %v4840_v7 = vmul.f32 %v18347_v32, %v18346_v63  ;;  %v18354_v32 = vld [vmem:[#allocation99_spill] sm:$0xff]  ;;  %v18355_v63 = vld [vmem:[#allocation154_spill] sm:$0xff] }
 0x4e3   : > { %v4844_v0 = vmul.f32 %v18355_v63, %v18354_v32  ;;  %v18362_v63 = vld [vmem:[#allocation165_spill] sm:$0xff] }
 0x4e4   : > { %11179 = vmatmul.mubr.bf16.gmra.mrb[24].mxu1 %v4878_v62  ;;  %v4881_v40 = vpack.c.bf16 %v4840_v7, %v4839_v6  ;;  %v18353_v62 = vld [vmem:[#allocation148_spill] sm:$0xff]  ;;  %v12474_v7 = vld [vmem:[#allocation10 + $0xf8] sm:$0xff]   ;;  %v4848_v32 = vmul.f32 %v18362_v63, %v18296_v55  ;;  %v18368_v63 = vld [vmem:[#allocation167_spill] sm:$0xff] }
 0x4e5   : > { %11182 = vmatprep.mubr.bf16.mxu1 %v4879_v1  ;;  %11211 = vmatpush3.bf16.msra.mxu1 %v12469_v54  ;;  %v18351_v54 = vld [vmem:[#allocation147_spill] sm:$0xff]  ;;  %v4842_v1 = vmul.f32 %v18353_v62, %v18352_v39 }
 0x4e6   : > { %11212 = vmatprep.subr.bf16.mxu1 %v12470_v47  ;;  %v4841_v59 = vmul.f32 %v18351_v54, %v18350_v43  ;;  %v18360_v54 = vld [vmem:[#allocation103_spill] sm:$0xff] }
 0x4e7   : > { %v18361_v62 = vld [vmem:[#allocation163_spill] sm:$0xff] }
 0x4e8   : > { %v4882_v12 = vpack.c.bf16 %v4842_v1, %v4841_v59  ;;  %v4846_v39 = vmul.f32 %v18361_v62, %v18360_v54  ;;  %v12475_v43 = vld [vmem:[#allocation10 + $0x100] sm:$0xff]   ;;  %v18367_v62 = vld [vmem:[#allocation116_spill] sm:$0xff] }
 0x4e9   : > { %11213 = vmatpush3.bf16.msra.mxu1 %v12470_v47  ;;  %v18357_v47 = vld [vmem:[#allocation153_spill] sm:$0xff]  ;;  %v4851_v55 = vmul.f32 %v18368_v63, %v18367_v62  ;;  %v15584_v62 = vld [vmem:[%s13602_s6 + $0x98] sm:$0xff] }
 0x4ea   : > { %11214 = vmatprep.subr.bf16.mxu1 %v12471_v33  ;;  %v4843_v14 = vmul.f32 %v18357_v47, %v18356_v19  ;;  %v18364_v47 = vld [vmem:[#allocation111_spill] sm:$0xff]  ;;  %v12489_v19 = vld [vmem:[#allocation10 + $0x170] sm:$0xff]  }
 0x4ec   : > { %11183 = vmatmul.mubr.bf16.gmra.mrb[28].mxu1 %v4880_v52  ;;  %v4883_v6 = vpack.c.bf16 %v4844_v0, %v4843_v14  ;;  %v18359_v52 = vld [vmem:[#allocation156_spill] sm:$0xff] }
 0x4ed   : > { %11186 = vmatprep.mubr.bf16.mxu1 %v4881_v40  ;;  %11215 = vmatpush3.bf16.msra.mxu1 %v12471_v33  ;;  %v18358_v33 = vld [vmem:[#allocation104_spill] sm:$0xff] }
 0x4ee   : > { %11216 = vmatprep.subr.bf16.mxu1 %v12472_v3  ;;  %v4845_v40 = vmul.f32 %v18359_v52, %v18358_v33  ;;  %v18365_v14 = vld [vmem:[#allocation168_spill] sm:$0xff] }
 0x4f0   : > { %v4884_v1 = vpack.c.bf16 %v4846_v39, %v4845_v40  ;;  %v18369_v39 = vld [vmem:[#allocation98_spill] sm:$0xff] }
 0x4f1   : > { %11217 = vmatpush3.bf16.msra.mxu1 %v12472_v3  ;;  %v18363_v3 = vld [vmem:[#allocation164_spill] sm:$0xff] }
 0x4f2   : > { %11218 = vmatprep.subr.bf16.mxu1 %v12473_v23  ;;  %v4847_v59 = vmul.f32 %v18363_v3, %v18294_v8  ;;  %v12486_v8 = vld [vmem:[#allocation10 + $0x158] sm:$0xff]  }
 0x4f4   : > { %11187 = vmatmul.mubr.bf16.gmra.mrb[0].mxu1 %v4882_v12  ;;  %v4885_v0 = vpack.c.bf16 %v4848_v32, %v4847_v59  ;;  %v4850_v12 = vmul.f32 %v18365_v14, %v18364_v47  ;;  %v4853_v32 = vmul.f32 %v18369_v39, %v18304_v4  ;;  %v18377_v39 = vld [vmem:[#allocation86_spill] sm:$0xff]  ;;  %v7133_v4 = vld [vmem:[%s13602_s6 + $0x38] sm:$0xff] }
 0x4f5   : > { %11190 = vmatprep.mubr.bf16.mxu1 %v4883_v6  ;;  %11219 = vmatpush3.bf16.msra.mxu1 %v12473_v23  ;;  %v4849_v23 = vmul.f32 %v15262_v34, %v18298_v2  ;;  %v18366_v6 = vld [vmem:[#allocation169_spill] sm:$0xff]  ;;  %v5477_v2 = vld [vmem:[#allocation2 + $0x58] sm:$0xff] }
 0x4f6   : > { %11220 = vmatprep.subr.bf16.mxu1 %v12474_v7  ;;  %v4852_v52 = vmul.f32 %v18366_v6, %v18302_v51  ;;  %v18371_v34 = vld [vmem:[#allocation97_spill] sm:$0xff] }
 0x4f7   : > { %v4886_v54 = vpack.c.bf16 %v4850_v12, %v4849_v23  ;;  %v4856_v59 = vmul.f32 %v18371_v34, %v18308_v50  ;;  %v18373_v23 = vld [vmem:[#allocation127_spill] sm:$0xff]  ;;  %v18375_v12 = vld [vmem:[#allocation126_spill] sm:$0xff]  ;;  %v12476_v50 = vld [vmem:[#allocation10 + $0x108] sm:$0xff]  }
 0x4f8   : > { %v4887_v3 = vpack.c.bf16 %v4852_v52, %v4851_v55  ;;  %v18374_v55 = vld [vmem:[#allocation174_spill] sm:$0xff]  ;;  %v4858_v52 = vmul.f32 %v15305_v45, %v18375_v12 }
 0x4f9   : > { %11221 = vmatpush3.bf16.msra.mxu1 %v12474_v7  ;;  %v18370_v7 = vld [vmem:[#allocation94_spill] sm:$0xff] }
 0x4fa   : > { %11254 = vmatprep.subr.bf16.mxu1 %v12475_v43  ;;  %v4854_v40 = vmul.f32 %v18370_v7, %v18306_v15  ;;  %v18379_v34 = vld [vmem:[#allocation82_spill] sm:$0xff] }
 0x4fb   : > { %v18380_v15 = vld [vmem:[#allocation90_spill] sm:$0xff] }
 0x4fc   : > { %11191 = vmatmul.mubr.bf16.gmra.mrb[4].mxu1 %v4884_v1  ;;  %v18372_v1 = vld [vmem:[#allocation171_spill] sm:$0xff]  ;;  %v4888_v14 = vpack.c.bf16 %v4854_v40, %v4853_v32  ;;  %v18382_v32 = vld [vmem:[#allocation105_spill] sm:$0xff]  ;;  %v18383_v40 = vld [vmem:[#allocation106_spill] sm:$0xff] }
 0x4fd   : > { %11194 = vmatprep.mubr.bf16.mxu1 %v4885_v0  ;;  %v4855_v0 = vmul.f32 %v18372_v1, %v18307_v22  ;;  %v18381_v22 = vpack.c.bf16 %v18379_v34, %v18380_v15  ;;  %v12477_v1 = vld [vmem:[#allocation10 + $0x110] sm:$0xff]   ;;  %v12478_v45 = vld [vmem:[#allocation10 + $0x118] sm:$0xff]   ;;  %v12493_v15 = vld [vmem:[#allocation13] sm:$0xff]  }
 0x4fe   : > { %11494 = vmatprep.subr.bf16.mxu0 %v12493_v15  ;;  %v18395_v34 = vld [vmem:[#allocation59_spill] sm:$0xff]  ;;  %v5475_v51 = vld [vmem:[#allocation2 + $0x48] sm:$0xff] }
 0x4ff   : > { %v4889_v6 = vpack.c.bf16 %v4856_v59, %v4855_v0  ;;  %v18384_v59 = vpack.c.bf16 %v18382_v32, %v18383_v40  ;;  %v18385_v0 = vld [vmem:[#allocation102_spill] sm:$0xff]  ;;  %11495 = vmatpush3.bf16.msra.mxu0 %v12493_v15  ;;  %v12495_v32 = vld [vmem:[#allocation13 + $0x8] sm:$0xff]  }
 0x500   : > { %v12481_v40 = vld [vmem:[#allocation10 + $0x130] sm:$0xff]   ;;  %11496 = vmatprep.subr.bf16.mxu0 %v12495_v32 }
 0x501   : > { %v18404_v15 = vld [vmem:[#allocation129_spill] sm:$0xff] }
 0x503   : > { %11497 = vmatpush3.bf16.msra.mxu0 %v12495_v32  ;;  %v18411_v32 = vld [vmem:[#allocation76_spill] sm:$0xff] }
 0x504   : > { %11195 = vmatmul.mubr.bf16.gmra.mrb[8].mxu1 %v4886_v54  ;;  %v4857_v54 = vmul.f32 %v18374_v55, %v18373_v23  ;;  %v18388_v55 = vld [vmem:[#allocation121_spill] sm:$0xff] }
 0x505   : > { %11198 = vmatprep.mubr.bf16.mxu1 %v4887_v3  ;;  %v18376_v3 = vld [vmem:[#allocation85_spill] sm:$0xff] }
 0x506   : > { %v4890_v63 = vpack.c.bf16 %v4858_v52, %v4857_v54  ;;  %v18378_v7 = vpack.c.bf16 %v18376_v3, %v18377_v39  ;;  %v18389_v54 = vld [vmem:[#allocation122_spill] sm:$0xff]  ;;  %v18391_v3 = vld [vmem:[#allocation117_spill] sm:$0xff]  ;;  %v18392_v39 = vld [vmem:[#allocation123_spill] sm:$0xff] }
 0x507   : > { %v18390_v52 = vpack.c.bf16 %v18388_v55, %v18389_v54  ;;  %v18402_v55 = vld [vmem:[#allocation63_spill] sm:$0xff] }
 0x50c   : > { %11199 = vmatmul.mubr.bf16.gmra.mrb[12].mxu1 %v4888_v14  ;;  %v18386_v14 = vld [vmem:[#allocation109_spill] sm:$0xff] }
 0x50d   : > { %11202 = vmatprep.mubr.bf16.mxu1 %v4889_v6  ;;  %v18387_v6 = vpack.c.bf16 %v18385_v0, %v18386_v14  ;;  %v12482_v14 = vld [vmem:[#allocation10 + $0x138] sm:$0xff]  }
 0x514   : > { %11203 = vmatmul.mubr.bf16.gmra.mrb[16].mxu1 %v4890_v63  ;;  %v12480_v63 = vld [vmem:[#allocation10 + $0x128] sm:$0xff]  }
 0x515   : > { %11222 = vmatprep.mubr.bf16.mxu1 %v18378_v7  ;;  %v18393_v7 = vpack.c.bf16 %v18391_v3, %v18392_v39  ;;  %v12498_v39 = vld [vmem:[#allocation13 + $0x18] sm:$0xff]  }
 0x51c   : > { %11223 = vmatmul.mubr.bf16.vlgmr.msra.gmra.mrb[20].mxu1 %v18381_v22 }
 0x51d   : > { %11255 = vmatpush3.bf16.msra.mxu1 %v12475_v43  ;;  %11226 = vmatprep.mubr.bf16.mxu1 %v18384_v59  ;;  %v12479_v43 = vld [vmem:[#allocation10 + $0x120] sm:$0xff]  }
 0x51e   : > { %11256 = vmatprep.subr.bf16.mxu1 %v12476_v50 }
 0x521   : > { %11257 = vmatpush3.bf16.msra.mxu1 %v12476_v50  ;;  %v18394_v50 = vld [vmem:[#allocation58_spill] sm:$0xff] }
 0x522   : > { %11258 = vmatprep.subr.bf16.mxu1 %v12477_v1  ;;  %v18396_v22 = vpack.c.bf16 %v18394_v50, %v18395_v34 }
 0x524   : > { %11227 = vmatmul.mubr.bf16.gmra.mrb[24].mxu1 %v18387_v6  ;;  %v18401_v6 = vld [vmem:[#allocation56_spill] sm:$0xff] }
 0x525   : > { %11230 = vmatprep.mubr.bf16.mxu1 %v18390_v52  ;;  %11259 = vmatpush3.bf16.msra.mxu1 %v12477_v1  ;;  %v18403_v54 = vpack.c.bf16 %v18401_v6, %v18402_v55  ;;  %v12497_v52 = vld [vmem:[#allocation13 + $0x10] sm:$0xff]  }
 0x526   : > { %11260 = vmatprep.subr.bf16.mxu1 %v12478_v45  ;;  %11498 = vmatprep.subr.bf16.mxu0 %v12497_v52  ;;  %v18414_v55 = vld [vmem:[#allocation137_spill] sm:$0xff] }
 0x527   : > { %11499 = vmatpush3.bf16.msra.mxu0 %v12497_v52  ;;  %v7129_v52 = vld [vmem:[%s13602_s6 + $0x18] sm:$0xff] }
 0x528   : > { %11500 = vmatprep.subr.bf16.mxu0 %v12498_v39 }
 0x529   : > { %11261 = vmatpush3.bf16.msra.mxu1 %v12478_v45 }
 0x52a   : > { %11262 = vmatprep.subr.bf16.mxu1 %v12479_v43 }
 0x52b   : > { %v15518_v59 = vpop.f32.mrb[32].mxu0  ;;  %11501 = vmatpush3.bf16.msra.mxu0 %v12498_v39 }
 0x52c   : > { %11231 = vmatmul.mubr.bf16.gmra.mrb[28].mxu1 %v18393_v7  ;;  %18397 = vst [vmem:[#allocation114_spill] sm:$0xff] %v15518_v59  ;;  %v15520_v1 = vpop.f32.mrb[33].mxu0 }
 0x52d   : > { %11234 = vmatprep.mubr.bf16.mxu1 %v18396_v22  ;;  %11263 = vmatpush3.bf16.msra.mxu1 %v12479_v43  ;;  %18398 = vst [vmem:[#allocation52_spill] sm:$0xff] %v15520_v1  ;;  %v15522_v45 = vpop.f32.mrb[34].mxu0  ;;  %v18405_v43 = vld [vmem:[#allocation128_spill] sm:$0xff]  ;;  %v18431_v1 = vld [vmem:[#allocation66_spill] sm:$0xff] }
 0x52e   : > { %11264 = vmatprep.subr.bf16.mxu1 %v12480_v63  ;;  %18399 = vst [vmem:[#allocation55_spill] sm:$0xff] %v15522_v45  ;;  %v15524_v0 = vpop.f32.mrb[35].mxu0  ;;  %v18406_v3 = vpack.c.bf16 %v18404_v15, %v18405_v43  ;;  %v7130_v43 = vld [vmem:[%s13602_s6 + $0x20] sm:$0xff] }
 0x52f   : > { %18400 = vst [vmem:[#allocation38_spill] sm:$0xff] %v15524_v0  ;;  %v18429_v0 = vld [vmem:[#allocation151_spill] sm:$0xff] }
 0x531   : > { %11265 = vmatpush3.bf16.msra.mxu1 %v12480_v63  ;;  %v15532_v63 = vld [vmem:[#allocation10 + $0x140] sm:$0xff]  }
 0x532   : > { %11266 = vmatprep.subr.bf16.mxu1 %v12481_v40 }
 0x533   : > { %v15534_v7 = vpop.f32.mrb[36].mxu0 }
 0x534   : > { %11235 = vmatmul.mubr.bf16.gmra.mrb[0].mxu1 %v18403_v54  ;;  %18407 = vst [vmem:[#allocation53_spill] sm:$0xff] %v15534_v7  ;;  %v15536_v50 = vpop.f32.mrb[37].mxu0  ;;  %v18415_v54 = vld [vmem:[#allocation136_spill] sm:$0xff]  ;;  %v18428_v7 = vld [vmem:[#allocation143_spill] sm:$0xff] }
 0x535   : > { %11238 = vmatprep.mubr.bf16.mxu1 %v18406_v3  ;;  %11267 = vmatpush3.bf16.msra.mxu1 %v12481_v40  ;;  %18408 = vst [vmem:[#allocation41_spill] sm:$0xff] %v15536_v50  ;;  %v15538_v34 = vpop.f32.mrb[38].mxu0  ;;  %v18412_v40 = vld [vmem:[#allocation131_spill] sm:$0xff]  ;;  %v18416_v15 = vpack.c.bf16 %v18414_v55, %v18415_v54  ;;  %v7131_v3 = vld [vmem:[%s13602_s6 + $0x28] sm:$0xff]  ;;  %v18430_v45 = vpack.c.bf16 %v18428_v7, %v18429_v0 }
 0x536   : > { %11268 = vmatprep.subr.bf16.mxu1 %v12482_v14  ;;  %18409 = vst [vmem:[#allocation69_spill] sm:$0xff] %v15538_v34  ;;  %v15540_v22 = vpop.f32.mrb[39].mxu0  ;;  %v18413_v6 = vpack.c.bf16 %v18411_v32, %v18412_v40  ;;  %v18423_v55 = vld [vmem:[#allocation138_spill] sm:$0xff] }
 0x537   : > { %18410 = vst [vmem:[#allocation60_spill] sm:$0xff] %v15540_v22  ;;  %v7132_v22 = vld [vmem:[%s13602_s6 + $0x30] sm:$0xff] }
 0x538   : > { %v15557_v39 = vpack.c.bf16 %v7132_v22, %v7131_v3 }
 0x539   : > { %11269 = vmatpush3.bf16.msra.mxu1 %v12482_v14  ;;  %v15552_v14 = vpack.c.bf16 %v7130_v43, %v7129_v52 }
 0x53a   : > { %11302 = vmatprep.subr.bf16.mxu1 %v15532_v63  ;;  %18418 = vst [vmem:[#allocation133_spill] sm:$0xff] %v15557_v39 }
 0x53b   : > { %v15555_v34 = vpop.f32.mrb[40].mxu0  ;;  %11502 = vmatprep.mubr.msk.bf16.mxu0 %vm1066_vm0, %v15552_v14 }
 0x53c   : > { %11239 = vmatmul.mubr.bf16.gmra.mrb[4].mxu1 %v18413_v6  ;;  %18417 = vst [vmem:[#allocation134_spill] sm:$0xff] %v15555_v34  ;;  %v15559_v50 = vpop.f32.mrb[41].mxu0  ;;  %11503 = vmatmul.mubr.msk.bf16.vlgmr.msra.gmra.mrb[44].mxu0 %vm1066_vm0, %v15557_v39  ;;  %v18422_v6 = vld [vmem:[#allocation135_spill] sm:$0xff]  ;;  %v18426_v34 = vld [vmem:[#allocation149_spill] sm:$0xff] }
 0x53d   : > { %11242 = vmatprep.mubr.bf16.mxu1 %v18416_v15  ;;  %18419 = vst [vmem:[#allocation132_spill] sm:$0xff] %v15559_v50  ;;  %v15563_v32 = vpop.f32.mrb[42].mxu0  ;;  %v18424_v54 = vpack.c.bf16 %v18422_v6, %v18423_v55  ;;  %v18425_v15 = vld [vmem:[#allocation150_spill] sm:$0xff]  ;;  %v7134_v39 = vld [vmem:[%s13602_s6 + $0x40] sm:$0xff]  ;;  %v5194_v6 = vmul.f32 %v15371_v42, %v18330_v57  ;;  %v5195_v55 = vmul.f32 %v15373_v48, %v18328_v25 }
 0x53e   : > { %18420 = vst [vmem:[#allocation141_spill] sm:$0xff] %v15563_v32  ;;  %v15567_v40 = vpop.f32.mrb[43].mxu0  ;;  %v18427_v50 = vpack.c.bf16 %v18425_v15, %v18426_v34  ;;  %v18432_v32 = vld [vmem:[#allocation67_spill] sm:$0xff]  ;;  %v15590_v34 = vpack.c.bf16 %v7134_v39, %v7133_v4  ;;  %v5470_v42 = vld [vmem:[#allocation2 + $0x20] sm:$0xff] }
 0x53f   : > { %18421 = vst [vmem:[#allocation70_spill] sm:$0xff] %v15567_v40  ;;  %v18433_v59 = vpack.c.bf16 %v18431_v1, %v18432_v32  ;;  %v15597_v1 = vld [vmem:[%s13602_s6 + $0x50] sm:$0xff]  ;;  %v5227_v7 = vpack.c.bf16 %v5195_v55, %v5194_v6  ;;  %v5471_v6 = vld [vmem:[#allocation2 + $0x28] sm:$0xff] }
 0x540   : > { %18434 = vst [vmem:[#allocation71_spill] sm:$0xff] %v15590_v34  ;;  %11506 = vmatprep.mubr.msk.bf16.mxu0 %vm1066_vm0, %v15590_v34  ;;  %v15615_v15 = vld [vmem:[%s13602_s6 + $0xb0] sm:$0xff]  ;;  %v5478_v34 = vld [vmem:[#allocation2 + $0x60] sm:$0xff] }
 0x541   : > { %v15657_v33 = vpack.c.bf16 %v5478_v34, %v5477_v2  ;;  %v5479_v34 = vld [vmem:[#allocation2 + $0x68] sm:$0xff] }
 0x544   : > { %11243 = vmatmul.mubr.bf16.gmra.mrb[8].mxu1 %v18424_v54  ;;  %v15612_v54 = vld [vmem:[%s13602_s6 + $0xa8] sm:$0xff] }
 0x545   : > { %11246 = vmatprep.mubr.bf16.mxu1 %v18427_v50  ;;  %v12335_v50 = vpack.i.bf16 %v7129_v52, %v15584_v62  ;;  %v5469_v52 = vld [vmem:[#allocation2 + $0x18] sm:$0xff]  ;;  %v12339_v40 = vpack.i.bf16 %v7131_v3, %v15612_v54  ;;  %v12485_v3 = vld [vmem:[#allocation10 + $0x150] sm:$0xff]  }
 0x546   : > { %v5517_v32 = vpack.c.bf16 %v5470_v42, %v5469_v52  ;;  %v5473_v42 = vld [vmem:[#allocation2 + $0x38] sm:$0xff] }
 0x547   : > { %12336 = vxpose.xlu0.b32.start [1/16] (narrow) %v12335_v50, 64  ;;  %v5472_v50 = vld [vmem:[#allocation2 + $0x30] sm:$0xff]  ;;  %v15631_v52 = vld [vmem:[%s13602_s6 + $0xb8] sm:$0xff] }
 0x548   : > { %v15619_v55 = vpack.c.bf16 %v5472_v50, %v5471_v6  ;;  %v12343_v50 = vpack.i.bf16 %v7133_v4, %v15631_v52  ;;  %v15641_v6 = vld [vmem:[%s13602_s6 + $0x70] sm:$0xff] }
 0x54c   : > { %11247 = vmatmul.mubr.bf16.gmra.mrb[12].mxu1 %v18430_v45  ;;  %v15594_v45 = vld [vmem:[%s13602_s6 + $0x48] sm:$0xff] }
 0x54d   : > { %11250 = vmatprep.mubr.bf16.mxu1 %v18433_v59  ;;  %v15600_v59 = vld [vmem:[%s13602_s6 + $0xa0] sm:$0xff]  ;;  %v15604_v0 = vpack.c.bf16 %v15597_v1, %v15594_v45 }
 0x54e   : > { %v12337_v48 = vpack.i.bf16 %v7130_v43, %v15600_v59  ;;  %v5474_v43 = vld [vmem:[#allocation2 + $0x40] sm:$0xff] }
 0x54f   : > { %18435 = vst [vmem:[#allocation73_spill] sm:$0xff] %v15604_v0  ;;  %11507 = vmatmul.mubr.msk.bf16.gmra.mrb[48].mxu0 %vm1066_vm0, %v15604_v0  ;;  %v12341_v0 = vpack.i.bf16 %v7132_v22, %v15615_v15  ;;  %v15628_v22 = vld [vmem:[%s13602_s6 + $0x60] sm:$0xff] }
 0x550   : > { %12338 = vxpose.xlu0.b32.cont [2/16] (narrow) %v12337_v48, 64  ;;  %v12484_v48 = vld [vmem:[#allocation10 + $0x148] sm:$0xff]  }
 0x554   : > { %11251 = vmatmul.mubr.bf16.gmra.mrb[16].mxu1 %v5227_v7  ;;  %12340 = vxpose.xlu0.b32.cont [3/16] (narrow) %v12339_v40, 64  ;;  %v15621_v7 = vpack.c.bf16 %v5474_v43, %v5473_v42  ;;  %v7137_v40 = vld [vmem:[%s13602_s6 + $0x58] sm:$0xff]  ;;  %v15638_v43 = vld [vmem:[%s13602_s6 + $0x68] sm:$0xff] }
 0x555   : > { %11270 = vmatprep.mubr.bf16.mxu1 %v5517_v32  ;;  %v15634_v32 = vpack.c.bf16 %v15628_v22, %v7137_v40  ;;  %v15648_v42 = vpack.c.bf16 %v15641_v6, %v15638_v43 }
 0x557   : > { %18436 = vst [vmem:[#allocation89_spill] sm:$0xff] %v15634_v32  ;;  %18437 = vst [vmem:[#allocation93_spill] sm:$0xff] %v15648_v42  ;;  %11510 = vmatprep.mubr.msk.bf16.mxu0 %vm1066_vm0, %v15634_v32  ;;  %v12488_v32 = vld [vmem:[#allocation10 + $0x168] sm:$0xff]  }
 0x558   : > { %12342 = vxpose.xlu0.b32.cont [4/16] (narrow) %v12341_v0, 64  ;;  %v15644_v0 = vld [vmem:[%s13602_s6 + $0xc0] sm:$0xff]  ;;  %11511 = vmatmul.mubr.msk.bf16.gmra.mrb[52].mxu0 %vm1066_vm0, %v15648_v42 }
 0x559   : > { %v12345_v4 = vpack.i.bf16 %v7134_v39, %v15644_v0  ;;  %v15665_v39 = vld [vmem:[%s13602_s6 + $0xd0] sm:$0xff]  ;;  %v5482_v42 = vld [vmem:[#allocation2 + $0x80] sm:$0xff] }
 0x55a   : > { %v12349_v2 = vpack.i.bf16 %v15597_v1, %v15665_v39  ;;  %v7141_v1 = vld [vmem:[%s13602_s6 + $0x78] sm:$0xff] }
 0x55c   : > { %11271 = vmatmul.mubr.bf16.vlgmr.msra.gmra.mrb[20].mxu1 %v15619_v55  ;;  %12344 = vxpose.xlu0.b32.cont [5/16] (narrow) %v12343_v50, 64  ;;  %v15662_v50 = vld [vmem:[%s13602_s6 + $0xc8] sm:$0xff] }
 0x55d   : > { %11303 = vmatpush3.bf16.msra.mxu1 %v15532_v63  ;;  %11274 = vmatprep.mubr.bf16.mxu1 %v15621_v7  ;;  %v5476_v63 = vld [vmem:[#allocation2 + $0x50] sm:$0xff] }
 0x55e   : > { %11304 = vmatprep.subr.bf16.mxu1 %v12484_v48  ;;  %v15655_v47 = vpack.c.bf16 %v5476_v63, %v5475_v51  ;;  %v12347_v51 = vpack.i.bf16 %v15594_v45, %v15662_v50  ;;  %v5480_v63 = vld [vmem:[#allocation2 + $0x70] sm:$0xff] }
 0x560   : > { %12346 = vxpose.xlu0.b32.cont [6/16] (narrow) %v12345_v4, 64  ;;  %v5481_v4 = vld [vmem:[#allocation2 + $0x78] sm:$0xff] }
 0x561   : > { %11305 = vmatpush3.bf16.msra.mxu1 %v12484_v48  ;;  %v12487_v48 = vld [vmem:[#allocation10 + $0x160] sm:$0xff]   ;;  %v15673_v45 = vpack.c.bf16 %v5482_v42, %v5481_v4  ;;  %v15690_v42 = vld [vmem:[%s13602_s6 + $0xe0] sm:$0xff] }
 0x562   : > { %11306 = vmatprep.subr.bf16.mxu1 %v12485_v3  ;;  %v5484_v4 = vld [vmem:[#allocation2 + $0x90] sm:$0xff] }
 0x564   : > { %11275 = vmatmul.mubr.bf16.gmra.mrb[24].mxu1 %v15655_v47  ;;  %12348 = vxpose.xlu0.b32.cont [7/16] (narrow) %v12347_v51, 64  ;;  %v7142_v51 = vld [vmem:[%s13602_s6 + $0x80] sm:$0xff] }
 0x565   : > { %11278 = vmatprep.mubr.bf16.mxu1 %v15657_v33  ;;  %11307 = vmatpush3.bf16.msra.mxu1 %v12485_v3  ;;  %v15671_v3 = vpack.c.bf16 %v5480_v63, %v5479_v34  ;;  %v15682_v63 = vpack.c.bf16 %v7142_v51, %v7141_v1 }
 0x566   : > { %11308 = vmatprep.subr.bf16.mxu1 %v12486_v8 }
 0x567   : > { %18438 = vst [vmem:[#allocation48_spill] sm:$0xff] %v15682_v63  ;;  %11514 = vmatprep.mubr.msk.bf16.mxu0 %vm1066_vm0, %v15682_v63 }
 0x568   : > { %12350 = vxpose.xlu0.b32.cont [8/16] (narrow) %v12349_v2, 64  ;;  %v15693_v2 = vpack.c.bf16 %v15687_v38, %v7143_v29 }
 0x569   : > { %11309 = vmatpush3.bf16.msra.mxu1 %v12486_v8  ;;  %v15680_v8 = vld [vmem:[%s13602_s6 + $0xd8] sm:$0xff] }
 0x56a   : > { %11310 = vmatprep.subr.bf16.mxu1 %v12487_v48  ;;  %v12351_v34 = vpack.i.bf16 %v7137_v40, %v15680_v8  ;;  %18439 = vst [vmem:[#allocation57_spill] sm:$0xff] %v15693_v2  ;;  %v5483_v40 = vld [vmem:[#allocation2 + $0x88] sm:$0xff]  ;;  %11515 = vmatmul.mubr.msk.bf16.gmra.mrb[56].mxu0 %vm1066_vm0, %v15693_v2  ;;  %v5489_v2 = vld [vmem:[#allocation2 + $0xb8] sm:$0xff] }
 0x56b   : > { %v15701_v16 = vpack.c.bf16 %v5484_v4, %v5483_v40  ;;  %v5488_v40 = vld [vmem:[#allocation2 + $0xb0] sm:$0xff]  ;;  %v15719_v63 = vpack.c.bf16 %v5490_v24, %v5489_v2  ;;  %v5494_v24 = vld [vmem:[#allocation2 + $0xe0] sm:$0xff] }
 0x56c   : > { %11279 = vmatmul.mubr.bf16.gmra.mrb[28].mxu1 %v15671_v3  ;;  %12352 = vxpose.xlu0.b32.cont [9/16] (narrow) %v12351_v34, 64  ;;  %v15708_v34 = vld [vmem:[%s13602_s6 + $0xe8] sm:$0xff] }
 0x56d   : > { %11282 = vmatprep.mubr.bf16.mxu1 %v15673_v45  ;;  %11311 = vmatpush3.bf16.msra.mxu1 %v12487_v48  ;;  %v12353_v48 = vpack.i.bf16 %v15628_v22, %v15690_v42  ;;  %v15711_v22 = vld [vmem:[%s13602_s6 + $0xf0] sm:$0xff]  ;;  %v12355_v4 = vpack.i.bf16 %v15638_v43, %v15708_v34  ;;  %v15725_v43 = vpack.c.bf16 %v15600_v59, %v15584_v62  ;;  %v5491_v59 = vld [vmem:[#allocation2 + $0xc8] sm:$0xff] }
 0x56e   : > { %11312 = vmatprep.subr.bf16.mxu1 %v12488_v32  ;;  %v12357_v46 = vpack.i.bf16 %v15641_v6, %v15711_v22  ;;  %v7158_v6 = vld [vmem:[%s13602_s6 + $0x100] sm:$0xff] }
 0x56f   : > { %18440 = vst [vmem:[#allocation64_spill] sm:$0xff] %v15725_v43  ;;  %11518 = vmatprep.mubr.msk.bf16.mxu0 %vm1066_vm0, %v15725_v43  ;;  %v12361_v62 = vpack.i.bf16 %v7142_v51, %v7158_v6  ;;  %v5495_v51 = vld [vmem:[#allocation2 + $0xe8] sm:$0xff] }
 0x570   : > { %12354 = vxpose.xlu0.b32.cont [10/16] (narrow) %v12353_v48, 64  ;;  %v5487_v48 = vld [vmem:[#allocation2 + $0xa8] sm:$0xff]  ;;  %v15749_v27 = vpack.c.bf16 %v5496_v61, %v5495_v51 }
 0x571   : > { %11313 = vmatpush3.bf16.msra.mxu1 %v12488_v32  ;;  %v12491_v32 = vld [vmem:[#allocation10 + $0x180] sm:$0xff]   ;;  %v5499_v61 = vld [vmem:[#allocation2 + $0x108] sm:$0xff] }
 0x572   : > { %11314 = vmatprep.subr.bf16.mxu1 %v12489_v19  ;;  %v18451_v51 = vld [vmem:[#allocation77_spill] sm:$0xff] }
 0x574   : > { %11283 = vmatmul.mubr.bf16.gmra.mrb[0].mxu1 %v15701_v16  ;;  %12356 = vxpose.xlu0.b32.cont [11/16] (narrow) %v12355_v4, 64  ;;  %v15728_v4 = vld [vmem:[%s13602_s6 + $0xf8] sm:$0xff] }
 0x575   : > { %11286 = vmatprep.mubr.bf16.mxu1 %v15703_v10  ;;  %11315 = vmatpush3.bf16.msra.mxu1 %v12489_v19  ;;  %v15717_v19 = vpack.c.bf16 %v5488_v40, %v5487_v48  ;;  %v12359_v2 = vpack.i.bf16 %v7141_v1, %v15728_v4  ;;  %v5492_v40 = vld [vmem:[#allocation2 + $0xd0] sm:$0xff]  ;;  %v7159_v1 = vld [vmem:[%s13602_s6 + $0x108] sm:$0xff] }
 0x576   : > { %11316 = vmatprep.subr.bf16.mxu1 %v12490_v36  ;;  %v7160_v48 = vld [vmem:[%s13602_s6 + $0x110] sm:$0xff]  ;;  %v12363_v43 = vpack.i.bf16 %v7143_v29, %v7159_v1  ;;  %v15761_v29 = vpack.c.bf16 %v15665_v39, %v15662_v50 }
 0x577   : > { %v18448_v50 = vld [vmem:[#allocation62_spill] sm:$0xff] }
 0x578   : > { %12358 = vxpose.xlu0.b32.cont [12/16] (narrow) %v12357_v46, 64  ;;  %v15740_v46 = vpack.c.bf16 %v5492_v40, %v5491_v59  ;;  %v5497_v40 = vld [vmem:[#allocation2 + $0xf8] sm:$0xff]  ;;  %18443 = vst [vmem:[#allocation140_spill] sm:$0xff] %v15761_v29 }
 0x579   : > { %11317 = vmatpush3.bf16.msra.mxu1 %v12490_v36  ;;  %v15732_v36 = vpack.c.bf16 %v15615_v15, %v15612_v54  ;;  %v5493_v54 = vld [vmem:[#allocation2 + $0xd8] sm:$0xff] }
 0x57a   : > { %11350 = vmatprep.subr.bf16.mxu1 %v12491_v32  ;;  %v15742_v15 = vpack.c.bf16 %v5494_v24, %v5493_v54  ;;  %v15757_v24 = vpack.c.bf16 %v15644_v0, %v15631_v52  ;;  %v12492_v0 = vld [vmem:[#allocation10 + $0x188] sm:$0xff]   ;;  %v18447_v54 = vld [vmem:[#allocation61_spill] sm:$0xff] }
 0x57b   : > { %18441 = vst [vmem:[#allocation68_spill] sm:$0xff] %v15732_v36  ;;  %11519 = vmatmul.mubr.msk.bf16.gmra.mrb[60].mxu0 %vm1066_vm0, %v15732_v36  ;;  %v12365_v36 = vpack.i.bf16 %v15687_v38, %v7160_v48  ;;  %v5500_v38 = vld [vmem:[#allocation2 + $0x110] sm:$0xff]  ;;  %v18449_v39 = vpack.c.bf16 %v18447_v54, %v18448_v50 }
 0x57c   : > { %11287 = vmatmul.mubr.bf16.gmra.mrb[4].mxu1 %v15717_v19  ;;  %12360 = vxpose.xlu0.b32.cont [13/16] (narrow) %v12359_v2, 64  ;;  %v5498_v2 = vld [vmem:[#allocation2 + $0x100] sm:$0xff]  ;;  %18442 = vst [vmem:[#allocation139_spill] sm:$0xff] %v15757_v24 }
 0x57d   : > { %11290 = vmatprep.mubr.bf16.mxu1 %v15719_v63  ;;  %v15751_v59 = vpack.c.bf16 %v5498_v2, %v5497_v40  ;;  %11522 = vmatprep.mubr.msk.bf16.mxu0 %vm1066_vm0, %v15757_v24  ;;  %v18450_v2 = vld [vmem:[#allocation130_spill] sm:$0xff] }
 0x57e   : > { %v18452_v40 = vpack.c.bf16 %v18450_v2, %v18451_v51  ;;  %v18462_v2 = vld [vmem:[#allocation157_spill] sm:$0xff] }
 0x580   : > { %12362 = vxpose.xlu0.b32.cont [14/16] (narrow) %v12361_v62, 64  ;;  %v18445_v62 = vld [vmem:[#allocation101_spill] sm:$0xff] }
 0x583   : > { %11523 = vmatmul.mubr.msk.bf16.gmra.mrb[64].mxu0 %vm1066_vm0, %v15761_v29 }
 0x584   : > { %11291 = vmatmul.mubr.bf16.gmra.mrb[8].mxu1 %v15740_v46  ;;  %12364 = vxpose.xlu0.b32.cont [15/16] (narrow) %v12363_v43, 64  ;;  %v15767_v43 = vpack.c.bf16 %v5500_v38, %v5499_v61  ;;  %v15781_v38 = vpack.c.bf16 %v15690_v42, %v15680_v8  ;;  %v15785_v61 = vpack.c.bf16 %v15711_v22, %v15708_v34  ;;  %v18458_v8 = vld [vmem:[#allocation155_spill] sm:$0xff]  ;;  %v18459_v42 = vld [vmem:[#allocation152_spill] sm:$0xff] }
 0x585   : > { %11294 = vmatprep.mubr.bf16.mxu1 %v15742_v15  ;;  %v18460_v50 = vpack.c.bf16 %v18458_v8, %v18459_v42  ;;  %v12499_v34 = vld [vmem:[#allocation10 + $0x1a0] sm:$0xff]   ;;  %v12500_v22 = vld [vmem:[#allocation10 + $0x1a8] sm:$0xff]   ;;  %v18475_v42 = vld [vmem:[#allocation173_spill] sm:$0xff] }
 0x586   : > { %18453 = vst [vmem:[#allocation146_spill] sm:$0xff] %v15781_v38  ;;  %18454 = vst [vmem:[#allocation144_spill] sm:$0xff] %v15785_v61  ;;  %11526 = vmatprep.mubr.msk.bf16.mxu0 %vm1066_vm0, %v15781_v38  ;;  %v12503_v8 = vld [vmem:[#allocation10 + $0x1c0] sm:$0xff]  }
 0x588   : > { %12366 = vxpose.xlu0.b32.end [16/16] (narrow) %v12365_v36, 64  ;;  %v18444_v36 = vld [vmem:[#allocation110_spill] sm:$0xff] }
 0x589   : > { %v18446_v52 = vpack.c.bf16 %v18444_v36, %v18445_v62  ;;  %v12494_v36 = vld [vmem:[#allocation10 + $0x190] sm:$0xff]   ;;  %v18455_v62 = vld [vmem:[#allocation142_spill] sm:$0xff] }
 0x58b   : > { %11527 = vmatmul.mubr.msk.bf16.gmra.mrb[68].mxu0 %vm1066_vm0, %v15785_v61 }
 0x58c   : > { %11295 = vmatmul.mubr.bf16.gmra.mrb[12].mxu1 %v15749_v27 }
 0x58d   : > { %11298 = vmatprep.mubr.bf16.mxu1 %v15751_v59 }
 0x594   : > { %11299 = vmatmul.mubr.bf16.gmra.mrb[16].mxu1 %v15767_v43 }
 0x595   : > { %11318 = vmatprep.mubr.bf16.mxu1 %v18446_v52  ;;  %v18456_v52 = vld [vmem:[#allocation145_spill] sm:$0xff] }
 0x596   : > { %v18457_v54 = vpack.c.bf16 %v18455_v62, %v18456_v52  ;;  %v15804_v62 = vpack.c.bf16 %v7158_v6, %v15728_v4  ;;  %v15806_v52 = vpack.c.bf16 %v7160_v48, %v7159_v1  ;;  %v18472_v6 = vld [vmem:[#allocation170_spill] sm:$0xff] }
 0x597   : > { %v18473_v1 = vld [vmem:[#allocation166_spill] sm:$0xff] }
 0x598   : > { %18467 = vst [vmem:[#allocation147_spill] sm:$0xff] %v15804_v62  ;;  %18468 = vst [vmem:[#allocation148_spill] sm:$0xff] %v15806_v52  ;;  %11530 = vmatprep.mubr.msk.bf16.mxu0 %vm1066_vm0, %v15804_v62  ;;  %v18474_v48 = vpack.c.bf16 %v18472_v6, %v18473_v1  ;;  %v18487_v6 = vpack.c.bf16 %v15353_v49, %v15349_v5  ;;  %v5836_v1 = vmul.f32 %v15395_v41, %v18373_v23  ;;  %v6113_v5 = vld [vmem:[#allocation2 + $0x37] sm:$0xff]  ;;  %v6120_v62 = vld [vmem:[#allocation2 + $0x6f] sm:$0xff] }
 0x599   : > { %11531 = vmatmul.mubr.msk.bf16.gmra.mrb[72].mxu0 %vm1066_vm0, %v15806_v52  ;;  %v18490_v41 = vld [vmem:[#allocation39_spill] sm:$0xff]  ;;  %v6119_v52 = vld [vmem:[#allocation2 + $0x67] sm:$0xff] }
 0x59a   : > { %11542 = vmatprep.mubr.msk.bf16.mxu0 %vm1066_vm0, %v15552_v14 }
 0x59c   : > { %11319 = vmatmul.mubr.bf16.vlgmr.msra.gmra.mrb[20].mxu1 %v18449_v39  ;;  %v18461_v39 = vld [vmem:[#allocation158_spill] sm:$0xff] }
 0x59d   : > { %11351 = vmatpush3.bf16.msra.mxu1 %v12491_v32  ;;  %11322 = vmatprep.mubr.bf16.mxu1 %v18452_v40  ;;  %v12496_v32 = vld [vmem:[#allocation10 + $0x198] sm:$0xff]   ;;  %v18463_v51 = vpack.c.bf16 %v18461_v39, %v18462_v2  ;;  %v18465_v40 = vld [vmem:[#allocation159_spill] sm:$0xff] }
 0x59e   : > { %11352 = vmatprep.subr.bf16.mxu1 %v12492_v0  ;;  %v18479_v39 = vld [vmem:[#allocation175_spill] sm:$0xff] }
 0x5a1   : > { %11353 = vmatpush3.bf16.msra.mxu1 %v12492_v0  ;;  %v18464_v0 = vld [vmem:[#allocation160_spill] sm:$0xff] }
 0x5a2   : > { %11354 = vmatprep.subr.bf16.mxu1 %v12494_v36  ;;  %v18466_v61 = vpack.c.bf16 %v18464_v0, %v18465_v40  ;;  %v18482_v0 = vld [vmem:[#allocation178_spill] sm:$0xff]  ;;  %v18483_v40 = vld [vmem:[#allocation177_spill] sm:$0xff] }
 0x5a4   : > { %11323 = vmatmul.mubr.bf16.gmra.mrb[24].mxu1 %v18457_v54  ;;  %v18470_v54 = vld [vmem:[#allocation161_spill] sm:$0xff] }
 0x5a5   : > { %11326 = vmatprep.mubr.bf16.mxu1 %v18460_v50  ;;  %11355 = vmatpush3.bf16.msra.mxu1 %v12494_v36  ;;  %v12501_v36 = vld [vmem:[#allocation10 + $0x1b0] sm:$0xff]   ;;  %v18476_v50 = vld [vmem:[#allocation172_spill] sm:$0xff] }
 0x5a6   : > { %11356 = vmatprep.subr.bf16.mxu1 %v12496_v32 }
 0x5a9   : > { %11357 = vmatpush3.bf16.msra.mxu1 %v12496_v32  ;;  %v18469_v32 = vld [vmem:[#allocation162_spill] sm:$0xff] }
 0x5aa   : > { %11358 = vmatprep.subr.bf16.mxu1 %v12499_v34  ;;  %v18471_v4 = vpack.c.bf16 %v18469_v32, %v18470_v54  ;;  %v18484_v32 = vpack.c.bf16 %v18482_v0, %v18483_v40  ;;  %v6111_v54 = vld [vmem:[#allocation2 + $0x27] sm:$0xff]  ;;  %v6116_v0 = vld [vmem:[#allocation2 + $0x4f] sm:$0xff] }
 0x5ac   : > { %11327 = vmatmul.mubr.bf16.gmra.mrb[28].mxu1 %v18463_v51  ;;  %v18481_v51 = vpack.c.bf16 %v15327_v56, %v15323_v37  ;;  %v5837_v37 = vmul.f32 %v15397_v31, %v18375_v12  ;;  %v18488_v56 = vld [vmem:[#allocation37_spill] sm:$0xff] }
 0x5ad   : > { %11330 = vmatprep.mubr.bf16.mxu1 %v18466_v61  ;;  %11359 = vmatpush3.bf16.msra.mxu1 %v12499_v34  ;;  %v12502_v61 = vld [vmem:[#allocation10 + $0x1b8] sm:$0xff]   ;;  %v18477_v34 = vpack.c.bf16 %v18475_v42, %v18476_v50  ;;  %v18489_v42 = vld [vmem:[#allocation40_spill] sm:$0xff] }
 0x5ae   : > { %11360 = vmatprep.subr.bf16.mxu1 %v12500_v22 }
 0x5b1   : > { %11361 = vmatpush3.bf16.msra.mxu1 %v12500_v22  ;;  %v18478_v22 = vld [vmem:[#allocation176_spill] sm:$0xff] }
 0x5b2   : > { %11362 = vmatprep.subr.bf16.mxu1 %v12501_v36  ;;  %v18480_v2 = vpack.c.bf16 %v18478_v22, %v18479_v39  ;;  %v5869_v22 = vpack.c.bf16 %v5837_v37, %v5836_v1  ;;  %v6114_v39 = vld [vmem:[#allocation2 + $0x3f] sm:$0xff] }
 0x5b4   : > { %11331 = vmatmul.mubr.bf16.gmra.mrb[0].mxu1 %v18471_v4  ;;  %v6112_v4 = vld [vmem:[#allocation2 + $0x2f] sm:$0xff] }
 0x5b5   : > { %11334 = vmatprep.mubr.bf16.mxu1 %v18474_v48  ;;  %11363 = vmatpush3.bf16.msra.mxu1 %v12501_v36  ;;  %v18485_v36 = vld [vmem:[#allocation179_spill] sm:$0xff]  ;;  %v6143_v48 = vmul.f32 %v6111_v54, %v18488_v56  ;;  %v6144_v50 = vmul.f32 %v6112_v4, %v18489_v42  ;;  %v18493_v4 = vld [vmem:[#allocation36_spill] sm:$0xff] }
 0x5b6   : > { %11364 = vmatprep.subr.bf16.mxu1 %v12502_v61  ;;  %v6145_v1 = vmul.f32 %v6113_v5, %v18493_v4  ;;  %v12504_v42 = vld [vmem:[#allocation10 + $0x1c8] sm:$0xff]   ;;  %v18495_v5 = vld [vmem:[#allocation45_spill] sm:$0xff]  ;;  %v12506_v4 = vld [vmem:[#allocation10 + $0x1d8] sm:$0xff]  }
 0x5b9   : > { %11365 = vmatpush3.bf16.msra.mxu1 %v12502_v61  ;;  %v18486_v61 = vpack.c.bf16 %v15345_v11, %v18485_v36  ;;  %v6191_v11 = vpack.c.bf16 %v6144_v50, %v6143_v48  ;;  %v18491_v36 = vld [vmem:[#allocation43_spill] sm:$0xff]  ;;  %v6118_v50 = vld [vmem:[#allocation2 + $0x5f] sm:$0xff] }
 0x5ba   : > { %11398 = vmatprep.subr.bf16.mxu1 %v12503_v8 }
 0x5bc   : > { %11335 = vmatmul.mubr.bf16.gmra.mrb[4].mxu1 %v18477_v34 }
 0x5bd   : > { %11338 = vmatprep.mubr.bf16.mxu1 %v18480_v2 }
 0x5c4   : > { %11339 = vmatmul.mubr.bf16.gmra.mrb[8].mxu1 %v18481_v51  ;;  %v6115_v51 = vld [vmem:[#allocation2 + $0x47] sm:$0xff] }
 0x5c5   : > { %11342 = vmatprep.mubr.bf16.mxu1 %v18484_v32  ;;  %v6146_v32 = vmul.f32 %v6114_v39, %v18490_v41  ;;  %v6147_v31 = vmul.f32 %v6115_v51, %v18491_v36  ;;  %v18494_v39 = vld [vmem:[#allocation44_spill] sm:$0xff]  ;;  %v18497_v41 = vld [vmem:[#allocation46_spill] sm:$0xff] }
 0x5c6   : > { %v6150_v51 = vmul.f32 %v6118_v50, %v18494_v39  ;;  %v6124_v50 = vld [vmem:[#allocation2 + $0x8f] sm:$0xff] }
 0x5c7   : > { %v6192_v48 = vpack.c.bf16 %v6146_v32, %v6145_v1  ;;  %v6152_v32 = vmul.f32 %v6120_v62, %v18497_v41  ;;  %v18498_v39 = vld [vmem:[#allocation51_spill] sm:$0xff]  ;;  %v6126_v41 = vld [vmem:[#allocation2 + $0x9f] sm:$0xff] }
 0x5cc   : > { %11343 = vmatmul.mubr.bf16.gmra.mrb[12].mxu1 %v18486_v61  ;;  %v12367_v34 = vpop.trf.xlu0  ;;  %v18492_v61 = vld [vmem:[#allocation42_spill] sm:$0xff] }
 0x5cd   : > { %11346 = vmatprep.mubr.bf16.mxu1 %v18487_v6  ;;  %v12368_v2 = vunpack.i.l.bf16 %v12367_v34  ;;  %v6148_v54 = vmul.f32 %v6116_v0, %v18492_v61  ;;  %v12371_v37 = vunpack.i.h.bf16 %v12367_v34  ;;  %v12505_v0 = vld [vmem:[#allocation10 + $0x1d0] sm:$0xff]  }
 0x5d0   : > { %v12372_v49 = vpop.trf.xlu0 }
 0x5d1   : > { %v12373_v40 = vunpack.i.l.bf16 %v12372_v49  ;;  %v12376_v56 = vunpack.i.h.bf16 %v12372_v49  ;;  %v18496_v49 = vld [vmem:[#allocation47_spill] sm:$0xff] }
 0x5d3   : > { %v15847_v6 = vpack.c.bf16 %v12373_v40, %v12368_v2  ;;  %v15850_v38 = vpack.c.bf16 %v12376_v56, %v12371_v37  ;;  %v6151_v40 = vmul.f32 %v6119_v52, %v18496_v49  ;;  %v6122_v56 = vld [vmem:[#allocation2 + $0x7f] sm:$0xff] }
 0x5d4   : > { %11347 = vmatmul.mubr.bf16.gmra.mrb[16].mxu1 %v5869_v22  ;;  %v6193_v22 = vpack.c.bf16 %v6148_v54, %v6147_v31  ;;  %v12377_v2 = vpop.trf.xlu0 }
 0x5d5   : > { %11366 = vmatprep.mubr.bf16.mxu1 %v6191_v11  ;;  %v6117_v11 = vld [vmem:[#allocation2 + $0x57] sm:$0xff]  ;;  %v12381_v31 = vunpack.i.h.bf16 %v12377_v2  ;;  %v12378_v61 = vunpack.i.l.bf16 %v12377_v2  ;;  %v6195_v37 = vpack.c.bf16 %v6152_v32, %v6151_v40  ;;  %v18499_v2 = vld [vmem:[#allocation50_spill] sm:$0xff] }
 0x5d6   : > { %v6149_v34 = vmul.f32 %v6117_v11, %v18495_v5  ;;  %v12507_v11 = vld [vmem:[#allocation10 + $0x1e0] sm:$0xff]   ;;  %v6156_v5 = vmul.f32 %v6124_v50, %v18499_v2  ;;  %v12508_v32 = vld [vmem:[#allocation10 + $0x1e8] sm:$0xff]  }
 0x5d8   : > { %v6194_v36 = vpack.c.bf16 %v6150_v51, %v6149_v34  ;;  %v12382_v54 = vpop.trf.xlu0  ;;  %v18500_v34 = vld [vmem:[#allocation49_spill] sm:$0xff] }
 0x5d9   : > { %v12383_v1 = vunpack.i.l.bf16 %v12382_v54 }
 0x5db   : > { %v15856_v52 = vpack.c.bf16 %v12383_v1, %v12378_v61  ;;  %v6128_v61 = vld [vmem:[#allocation2 + $0xaf] sm:$0xff] }
 0x5dc   : > { %11367 = vmatmul.mubr.bf16.vlgmr.msra.gmra.mrb[20].mxu1 %v6192_v48  ;;  %v6123_v48 = vld [vmem:[#allocation2 + $0x87] sm:$0xff] }
 0x5dd   : > { %11399 = vmatpush3.bf16.msra.mxu1 %v12503_v8  ;;  %11370 = vmatprep.mubr.bf16.mxu1 %v6193_v22  ;;  %v12386_v8 = vunpack.i.h.bf16 %v12382_v54  ;;  %v6121_v22 = vld [vmem:[#allocation2 + $0x77] sm:$0xff]  ;;  %v6155_v51 = vmul.f32 %v6123_v48, %v18498_v39  ;;  %v12387_v54 = vpop.trf.xlu0  ;;  %v12510_v39 = vld [vmem:[#allocation10 + $0x1f8] sm:$0xff]  }
 0x5de   : > { %11400 = vmatprep.subr.bf16.mxu1 %v12504_v42  ;;  %v6153_v49 = vmul.f32 %v6121_v22, %v18500_v34  ;;  %v12391_v50 = vunpack.i.h.bf16 %v12387_v54  ;;  %v12388_v22 = vunpack.i.l.bf16 %v12387_v54  ;;  %v6132_v34 = vld [vmem:[#allocation2 + $0xcf] sm:$0xff]  ;;  %v6135_v54 = vld [vmem:[#allocation2 + $0xe7] sm:$0xff] }
 0x5df   : > { %v15858_v62 = vpack.c.bf16 %v12386_v8, %v12381_v31  ;;  %v6127_v31 = vld [vmem:[#allocation2 + $0xa7] sm:$0xff] }
 0x5e0   : > { %v12509_v8 = vld [vmem:[#allocation10 + $0x1f0] sm:$0xff]  }
 0x5e1   : > { %11401 = vmatpush3.bf16.msra.mxu1 %v12504_v42  ;;  %v6154_v42 = vmul.f32 %v6122_v56, %v18139_v60  ;;  %v6158_v60 = vmul.f32 %v6126_v41, %v18315_v20  ;;  %v12511_v41 = vld [vmem:[#allocation10 + $0x200] sm:$0xff]  }
 0x5e2   : > { %11402 = vmatprep.subr.bf16.mxu1 %v12505_v0 }
 0x5e3   : > { %v6196_v40 = vpack.c.bf16 %v6154_v42, %v6153_v49  ;;  %v12392_v42 = vpop.trf.xlu0 }
 0x5e4   : > { %11371 = vmatmul.mubr.bf16.gmra.mrb[24].mxu1 %v6194_v36  ;;  %v6125_v36 = vld [vmem:[#allocation2 + $0x97] sm:$0xff]  ;;  %v12393_v2 = vunpack.i.l.bf16 %v12392_v42 }
 0x5e5   : > { %11374 = vmatprep.mubr.bf16.mxu1 %v6195_v37  ;;  %11403 = vmatpush3.bf16.msra.mxu1 %v12505_v0  ;;  %v6197_v0 = vpack.c.bf16 %v6156_v5, %v6155_v51  ;;  %v6157_v1 = vmul.f32 %v6125_v36, %v18318_v30  ;;  %v18501_v37 = vld [vmem:[#allocation54_spill] sm:$0xff]  ;;  %v12396_v51 = vunpack.i.h.bf16 %v12392_v42  ;;  %v6129_v30 = vld [vmem:[#allocation2 + $0xb7] sm:$0xff] }
 0x5e6   : > { %11404 = vmatprep.subr.bf16.mxu1 %v12506_v4  ;;  %v6160_v56 = vmul.f32 %v6128_v61, %v18501_v37  ;;  %v6131_v5 = vld [vmem:[#allocation2 + $0xc7] sm:$0xff]  ;;  %v6161_v36 = vmul.f32 %v6129_v30, %v18146_v53  ;;  %v15891_v30 = vld [vmem:[#allocation14] ss:$0 sm:$0xff] }
 0x5e7   : > { %v6198_v48 = vpack.c.bf16 %v6158_v60, %v6157_v1  ;;  %v15870_v49 = vpack.c.bf16 %v12396_v51, %v12391_v50  ;;  %v6134_v60 = vld [vmem:[#allocation2 + $0xdf] sm:$0xff]  ;;  %v6133_v1 = vld [vmem:[#allocation2 + $0xd7] sm:$0xff] }
 0x5e8   : > { %v6165_v53 = vmul.f32 %v6133_v1, %v18150_v26  ;;  %v6138_v50 = vld [vmem:[#allocation2 + $0xff] sm:$0xff] }
 0x5e9   : > { %11405 = vmatpush3.bf16.msra.mxu1 %v12506_v4  ;;  %v6159_v4 = vmul.f32 %v6127_v31, %v18144_v58  ;;  %v15868_v58 = vpack.c.bf16 %v12393_v2, %v12388_v22  ;;  %v6137_v22 = vld [vmem:[#allocation2 + $0xf7] sm:$0xff]  ;;  %v6170_v42 = vmul.f32 %v6138_v50, %v18155_v18  ;;  %v6142_v26 = vld [vmem:[#allocation2 + $0x11f] sm:$0xff] }
 0x5ea   : > { %11406 = vmatprep.subr.bf16.mxu1 %v12507_v11  ;;  %v12517_v50 = vld [vmem:[#allocation10 + $0x230] sm:$0xff]  }
 0x5eb   : > { %v6199_v20 = vpack.c.bf16 %v6160_v56, %v6159_v4  ;;  %v15876_v4 = vpop.trf.xlu0 }
 0x5ec   : > { %11375 = vmatmul.mubr.bf16.gmra.mrb[28].mxu1 %v6196_v40 }
 0x5ed   : > { %11378 = vmatprep.mubr.bf16.mxu1 %v6197_v0  ;;  %11407 = vmatpush3.bf16.msra.mxu1 %v12507_v11  ;;  %v6130_v11 = vld [vmem:[#allocation2 + $0xbf] sm:$0xff]  ;;  %v6164_v0 = vmul.f32 %v6132_v34, %v18149_v17 }
 0x5ee   : > { %11408 = vmatprep.subr.bf16.mxu1 %v12508_v32  ;;  %v6162_v40 = vmul.f32 %v6130_v11, %v18147_v21  ;;  %v6166_v21 = vmul.f32 %v6134_v60, %v18323_v35  ;;  %v6141_v35 = vld [vmem:[#allocation2 + $0x117] sm:$0xff] }
 0x5ef   : > { %v15882_v37 = vpop.trf.xlu0  ;;  %v6173_v11 = vmul.f32 %v6141_v35, %v18330_v57  ;;  %v12512_v60 = vld [vmem:[#allocation10 + $0x208] sm:$0xff]  }
 0x5f0   : > { %v6200_v31 = vpack.c.bf16 %v6162_v40, %v6161_v36  ;;  %v6202_v56 = vpack.c.bf16 %v6166_v21, %v6165_v53 }
 0x5f1   : > { %11409 = vmatpush3.bf16.msra.mxu1 %v12508_v32  ;;  %v6163_v32 = vmul.f32 %v6131_v5, %v18148_v28  ;;  %v6167_v28 = vmul.f32 %v6135_v54, %v18152_v13  ;;  %v18503_v13 = vld [vmem:[#allocation124_spill] sm:$0xff]  ;;  %v6174_v5 = vmul.f32 %v6142_v26, %v18328_v25  ;;  %v12513_v54 = vld [vmem:[#allocation10 + $0x210] sm:$0xff]  }
 0x5f2   : > { %11410 = vmatprep.subr.bf16.mxu1 %v12509_v8 }
 0x5f3   : > { %v6201_v61 = vpack.c.bf16 %v6164_v0, %v6163_v32  ;;  %v6206_v34 = vpack.c.bf16 %v6174_v5, %v6173_v11 }
 0x5f4   : > { %11379 = vmatmul.mubr.bf16.gmra.mrb[0].mxu1 %v6198_v48 }
 0x5f5   : > { %11382 = vmatprep.mubr.bf16.mxu1 %v6199_v20  ;;  %11411 = vmatpush3.bf16.msra.mxu1 %v12509_v8  ;;  %v6136_v8 = vld [vmem:[#allocation2 + $0xef] sm:$0xff]  ;;  %v18504_v20 = vld [vmem:[#allocation125_spill] sm:$0xff] }
 0x5f6   : > { %11412 = vmatprep.subr.bf16.mxu1 %v12510_v39  ;;  %v6168_v17 = vmul.f32 %v6136_v8, %v18153_v9  ;;  %v18505_v9 = vpack.c.bf16 %v18503_v13, %v18504_v20  ;;  %v12514_v8 = vld [vmem:[#allocation10 + $0x218] sm:$0xff]  }
 0x5f8   : > { %v6203_v48 = vpack.c.bf16 %v6168_v17, %v6167_v28 }
 0x5f9   : > { %11413 = vmatpush3.bf16.msra.mxu1 %v12510_v39  ;;  %v18502_v39 = vld [vmem:[#allocation65_spill] sm:$0xff] }
 0x5fa   : > { %11446 = vmatprep.subr.bf16.mxu1 %v12511_v41  ;;  %v6169_v51 = vmul.f32 %v6137_v22, %v18502_v39  ;;  %v12518_v22 = vld [vmem:[#allocation10 + $0x238] sm:$0xff]  }
 0x5fc   : > { %11383 = vmatmul.mubr.bf16.gmra.mrb[4].mxu1 %v6200_v31  ;;  %v6204_v2 = vpack.c.bf16 %v6170_v42, %v6169_v51 }
 0x5fd   : > { %11386 = vmatprep.mubr.bf16.mxu1 %v6201_v61 }
 0x604   : > { %11387 = vmatmul.mubr.bf16.gmra.mrb[8].mxu1 %v6202_v56  ;;  %v12516_v56 = vld [vmem:[#allocation10 + $0x228] sm:$0xff]  }
 0x605   : > { %11390 = vmatprep.mubr.bf16.mxu1 %v6203_v48  ;;  %v18530_v48 = vld [vmem:[#allocation115_spill] sm:$0xff] }
 0x60c   : > { %11391 = vmatmul.mubr.bf16.gmra.mrb[12].mxu1 %v6204_v2 }
 0x60d   : > { %11394 = vmatprep.mubr.bf16.mxu1 %v18505_v9 }
 0x60f   : > { %v11504_v40 = vpop.f32.mrb[44].mxu0 }
 0x610   : > { %v15895_v18 = vadd.f32 %v11504_v40, %v15891_v30  ;;  %v7370_v32 = vpop.f32.mrb[45].mxu0 }
 0x611   : > { %v15898_v0 = vadd.f32 %v15891_v30, %v7370_v32  ;;  %v11505_v36 = vpop.f32.mrb[46].mxu0  ;;  %v6753_v32 = vld [vmem:[#allocation2 + $0x29] sm:$0xff] }
 0x612   : > { %v15901_v31 = vadd.f32 %v11505_v36, %v15891_v30  ;;  %v7373_v57 = vpop.f32.mrb[47].mxu0  ;;  %v18506_v36 = vld [vmem:[#allocation72_spill] sm:$0xff] }
 0x613   : > { %v15904_v25 = vadd.f32 %v15891_v30, %v7373_v57 }
 0x614   : > { %11395 = vmatmul.mubr.bf16.gmra.mrb[16].mxu1 %v6206_v34 }
 0x615   : > { %11414 = vmatprep.mubr.bf16.mxu1 %v15619_v55 }
 0x61c   : > { %11415 = vmatmul.mubr.bf16.vlgmr.msra.gmra.mrb[20].mxu1 %v15621_v7  ;;  %v12515_v7 = vld [vmem:[#allocation10 + $0x220] sm:$0xff]  }
 0x61d   : > { %11447 = vmatpush3.bf16.msra.mxu1 %v12511_v41  ;;  %11418 = vmatprep.mubr.bf16.mxu1 %v15655_v47 }
 0x61e   : > { %11448 = vmatprep.subr.bf16.mxu1 %v12512_v60 }
 0x621   : > { %11449 = vmatpush3.bf16.msra.mxu1 %v12512_v60  ;;  %v12752_v60 = vld [vmem:[#allocation2 + $0x8] sm:$0xff] }
 0x622   : > { %11450 = vmatprep.subr.bf16.mxu1 %v12513_v54  ;;  %v11508_v1 = vpop.f32.mrb[48].mxu0 }
 0x623   : > { %v15915_v21 = vadd.f32 %v11508_v1, %v15891_v30  ;;  %v7386_v28 = vpop.f32.mrb[49].mxu0 }
 0x624   : > { %11419 = vmatmul.mubr.bf16.gmra.mrb[24].mxu1 %v15657_v33  ;;  %v15918_v41 = vadd.f32 %v15891_v30, %v7386_v28  ;;  %v11509_v47 = vpop.f32.mrb[50].mxu0  ;;  %v6755_v28 = vld [vmem:[#allocation2 + $0x39] sm:$0xff] }
 0x625   : > { %11422 = vmatprep.mubr.bf16.mxu1 %v15671_v3  ;;  %11451 = vmatpush3.bf16.msra.mxu1 %v12513_v54  ;;  %v15921_v17 = vadd.f32 %v11509_v47, %v15891_v30  ;;  %v7389_v53 = vpop.f32.mrb[51].mxu0  ;;  %v6511_v54 = vpack.c.bf16 %v12752_v60, %v12752_v60  ;;  %v6777_v3 = vld [vmem:[#allocation2 + $0xe9] sm:$0xff] }
 0x626   : > { %11452 = vmatprep.subr.bf16.mxu1 %v12514_v8  ;;  %v15924_v33 = vadd.f32 %v15891_v30, %v7389_v53  ;;  %v6758_v53 = vld [vmem:[#allocation2 + $0x51] sm:$0xff] }
 0x629   : > { %11453 = vmatpush3.bf16.msra.mxu1 %v12514_v8  ;;  %v6785_v8 = vmul.f32 %v6753_v32, %v18331_v44  ;;  %v6757_v44 = vld [vmem:[#allocation2 + $0x49] sm:$0xff]  ;;  %v18510_v32 = vld [vmem:[#allocation79_spill] sm:$0xff] }
 0x62a   : > { %11454 = vmatprep.subr.bf16.mxu1 %v12515_v7 }
 0x62b   : > { %v11512_v42 = vpop.f32.mrb[52].mxu0 }
 0x62c   : > { %11423 = vmatmul.mubr.bf16.gmra.mrb[28].mxu1 %v15673_v45  ;;  %v15935_v39 = vadd.f32 %v11512_v42, %v15891_v30  ;;  %v7402_v51 = vpop.f32.mrb[53].mxu0 }
 0x62d   : > { %11426 = vmatprep.mubr.bf16.mxu1 %v15701_v16  ;;  %11455 = vmatpush3.bf16.msra.mxu1 %v12515_v7  ;;  %v15938_v45 = vadd.f32 %v15891_v30, %v7402_v51  ;;  %v11513_v16 = vpop.f32.mrb[54].mxu0  ;;  %v6756_v7 = vld [vmem:[#allocation2 + $0x41] sm:$0xff]  ;;  %v18508_v51 = vld [vmem:[#allocation74_spill] sm:$0xff] }
 0x62e   : > { %11456 = vmatprep.subr.bf16.mxu1 %v12516_v56  ;;  %v15941_v2 = vadd.f32 %v11513_v16, %v15891_v30  ;;  %v7405_v35 = vpop.f32.mrb[55].mxu0  ;;  %v6788_v16 = vmul.f32 %v6756_v7, %v18508_v51  ;;  %v18511_v7 = vld [vmem:[#allocation81_spill] sm:$0xff]  ;;  %v12403_v51 = vunpack.i.l.bf16 %v15882_v37 }
 0x62f   : > { %v15944_v13 = vadd.f32 %v15891_v30, %v7405_v35 }
 0x631   : > { %11457 = vmatpush3.bf16.msra.mxu1 %v12516_v56 }
 0x632   : > { %11458 = vmatprep.subr.bf16.mxu1 %v12517_v50 }
 0x634   : > { %11427 = vmatmul.mubr.bf16.gmra.mrb[0].mxu1 %v15703_v10 }
 0x635   : > { %11430 = vmatprep.mubr.bf16.mxu1 %v15717_v19  ;;  %11459 = vmatpush3.bf16.msra.mxu1 %v12517_v50 }
 0x636   : > { %11460 = vmatprep.subr.bf16.mxu1 %v12518_v22 }
 0x639   : > { %11461 = vmatpush3.bf16.msra.mxu1 %v12518_v22  ;;  %v18507_v22 = vld [vmem:[#allocation75_spill] sm:$0xff] }
 0x63a   : > { %7561 = vmatprep.subr.bf16.mxu1 %v15847_v6  ;;  %v6787_v42 = vmul.f32 %v6755_v28, %v18507_v22  ;;  %v6762_v28 = vld [vmem:[#allocation2 + $0x71] sm:$0xff]  ;;  %v12398_v22 = vunpack.i.l.bf16 %v15876_v4 }
 0x63c   : > { %11431 = vmatmul.mubr.bf16.gmra.mrb[4].mxu1 %v15719_v63  ;;  %v6834_v60 = vpack.c.bf16 %v6788_v16, %v6787_v42  ;;  %v18513_v42 = vld [vmem:[#allocation83_spill] sm:$0xff] }
 0x63d   : > { %11434 = vmatprep.mubr.bf16.mxu1 %v15740_v46  ;;  %v11516_v20 = vpop.f32.mrb[56].mxu0  ;;  %v6794_v16 = vmul.f32 %v6762_v28, %v18513_v42  ;;  %v6765_v42 = vld [vmem:[#allocation2 + $0x89] sm:$0xff]  ;;  %v18523_v46 = vld [vmem:[#allocation100_spill] sm:$0xff] }
 0x63e   : > { %v15956_v9 = vadd.f32 %v11516_v20, %v15891_v30  ;;  %v7418_v26 = vpop.f32.mrb[57].mxu0 }
 0x63f   : > { %v15959_v11 = vadd.f32 %v15891_v30, %v7418_v26  ;;  %v11517_v5 = vpop.f32.mrb[58].mxu0  ;;  %v18509_v26 = vld [vmem:[#allocation78_spill] sm:$0xff] }
 0x640   : > { %v15962_v34 = vadd.f32 %v11517_v5, %v15891_v30  ;;  %v7421_v40 = vpop.f32.mrb[59].mxu0  ;;  %v6790_v5 = vmul.f32 %v6758_v53, %v18509_v26  ;;  %v18512_v53 = vld [vmem:[#allocation80_spill] sm:$0xff]  ;;  %v12401_v26 = vunpack.i.h.bf16 %v15876_v4 }
 0x641   : > { %v15965_v63 = vadd.f32 %v15891_v30, %v7421_v40 }
 0x644   : > { %11435 = vmatmul.mubr.bf16.gmra.mrb[8].mxu1 %v15742_v15  ;;  %v6754_v15 = vld [vmem:[#allocation2 + $0x31] sm:$0xff] }
 0x645   : > { %11438 = vmatprep.mubr.bf16.mxu1 %v15749_v27  ;;  %v6786_v57 = vmul.f32 %v6754_v15, %v18506_v36  ;;  %v6789_v36 = vmul.f32 %v6757_v44, %v18510_v32  ;;  %v18514_v44 = vld [vmem:[#allocation84_spill] sm:$0xff]  ;;  %v18521_v15 = vld [vmem:[#allocation95_spill] sm:$0xff] }
 0x647   : > { %v6833_v1 = vpack.c.bf16 %v6786_v57, %v6785_v8  ;;  %v6759_v8 = vld [vmem:[#allocation2 + $0x59] sm:$0xff]  ;;  %v6769_v57 = vld [vmem:[#allocation2 + $0xa9] sm:$0xff] }
 0x648   : > { %v6801_v27 = vmul.f32 %v6769_v57, %v18523_v46  ;;  %v6773_v57 = vld [vmem:[#allocation2 + $0xc9] sm:$0xff] }
 0x64c   : > { %11439 = vmatmul.mubr.bf16.gmra.mrb[12].mxu1 %v15751_v59 }
 0x64d   : > { %11442 = vmatprep.mubr.bf16.mxu1 %v15767_v43 }
 0x64e   : > { %v11520_v47 = vpop.f32.mrb[60].mxu0 }
 0x64f   : > { %v15976_v56 = vadd.f32 %v11520_v47, %v15891_v30  ;;  %v7434_v59 = vpop.f32.mrb[61].mxu0  ;;  %v6791_v47 = vmul.f32 %v6759_v8, %v18511_v7  ;;  %v6764_v8 = vld [vmem:[#allocation2 + $0x81] sm:$0xff]  ;;  %v6766_v7 = vld [vmem:[#allocation2 + $0x91] sm:$0xff] }
 0x650   : > { %v15979_v43 = vadd.f32 %v15891_v30, %v7434_v59  ;;  %v11521_v50 = vpop.f32.mrb[62].mxu0 }
 0x651   : > { %v15984_v35 = vadd.f32 %v11521_v50, %v15891_v30  ;;  %v7437_v20 = vpop.f32.mrb[63].mxu0  ;;  %v6761_v50 = vld [vmem:[#allocation2 + $0x69] sm:$0xff] }
 0x652   : > { %v15988_v40 = vadd.f32 %v15891_v30, %v7437_v20  ;;  %v6793_v20 = vmul.f32 %v6761_v50, %v18514_v44 }
 0x654   : > { %11443 = vmatmul.mubr.bf16.gmra.mrb[16].mxu1 %v6511_v54  ;;  %v6835_v54 = vpack.c.bf16 %v6790_v5, %v6789_v36  ;;  %v12406_v5 = vunpack.i.h.bf16 %v15882_v37  ;;  %v16007_v36 = vpack.c.bf16 %v12403_v51, %v12398_v22  ;;  %v18516_v22 = vld [vmem:[#allocation87_spill] sm:$0xff] }
 0x655   : > { %11462 = vmatprep.mubr.bf16.mxu1 %v6833_v1  ;;  %v6760_v1 = vld [vmem:[#allocation2 + $0x61] sm:$0xff]  ;;  %v6796_v51 = vmul.f32 %v6764_v8, %v18516_v22 }
 0x656   : > { %v6792_v59 = vmul.f32 %v6760_v1, %v18512_v53  ;;  %v11524_v1 = vpop.f32.mrb[64].mxu0  ;;  %v16013_v4 = vpack.c.bf16 %v12406_v5, %v12401_v26  ;;  %v6768_v22 = vld [vmem:[#allocation2 + $0xa1] sm:$0xff] }
 0x657   : > { %v16010_v28 = vadd.f32 %v11524_v1, %v15891_v30  ;;  %v7450_v53 = vpop.f32.mrb[65].mxu0  ;;  %v6800_v5 = vmul.f32 %v6768_v22, %v18521_v15 }
 0x658   : > { %v6836_v32 = vpack.c.bf16 %v6792_v59, %v6791_v47  ;;  %v16016_v37 = vadd.f32 %v15891_v30, %v7450_v53  ;;  %v11525_v47 = vpop.f32.mrb[66].mxu0  ;;  %v18515_v59 = vld [vmem:[#allocation88_spill] sm:$0xff] }
 0x659   : > { %v7453_v44 = vpop.f32.mrb[67].mxu0  ;;  %v18519_v53 = vld [vmem:[#allocation64_spill] sm:$0xff] }
 0x65a   : > { %v16026_v26 = vadd.f32 %v15891_v30, %v7453_v44  ;;  %v18520_v44 = vld [vmem:[#allocation96_spill] sm:$0xff] }
 0x65c   : > { %11463 = vmatmul.mubr.bf16.vlgmr.msra.gmra.mrb[20].mxu1 %v6834_v60  ;;  %v6837_v60 = vpack.c.bf16 %v6794_v16, %v6793_v20  ;;  %v16022_v16 = vadd.f32 %v11525_v47, %v15891_v30  ;;  %v18517_v20 = vld [vmem:[#allocation91_spill] sm:$0xff] }
 0x65d   : > { %7562 = vmatpush1.bf16.msra.mxu1 %v15850_v38  ;;  %11466 = vmatprep.mubr.bf16.mxu1 %v6835_v54  ;;  %v6763_v54 = vld [vmem:[#allocation2 + $0x79] sm:$0xff] }
 0x65e   : > { %7563 = vmatprep.subr.bf16.mxu1 %v15856_v52  ;;  %v6795_v50 = vmul.f32 %v6763_v54, %v18515_v59  ;;  %v6767_v59 = vld [vmem:[#allocation2 + $0x99] sm:$0xff]  ;;  %v11528_v19 = vpop.f32.mrb[68].mxu0 }
 0x660   : > { %v6838_v8 = vpack.c.bf16 %v6796_v51, %v6795_v50  ;;  %v6771_v50 = vld [vmem:[#allocation2 + $0xb9] sm:$0xff]  ;;  %v6772_v51 = vld [vmem:[#allocation2 + $0xc1] sm:$0xff] }
 0x661   : > { %7564 = vmatpush1.bf16.msra.mxu1 %v15858_v62 }
 0x662   : > { %7565 = vmatprep.subr.bf16.mxu1 %v15868_v58 }
 0x664   : > { %11467 = vmatmul.mubr.bf16.gmra.mrb[24].mxu1 %v6836_v32  ;;  %v6798_v32 = vmul.f32 %v6766_v7, %v18517_v20  ;;  %v6770_v7 = vld [vmem:[#allocation2 + $0xb1] sm:$0xff]  ;;  %v6799_v20 = vmul.f32 %v6767_v59, %v18520_v44  ;;  %v18524_v59 = vld [vmem:[#allocation104_spill] sm:$0xff] }
 0x665   : > { %11470 = vmatprep.mubr.bf16.mxu1 %v6837_v60  ;;  %7566 = vmatpush1.bf16.msra.mxu1 %v15870_v49  ;;  %v18518_v60 = vld [vmem:[#allocation92_spill] sm:$0xff]  ;;  %v6803_v22 = vmul.f32 %v6771_v50, %v18524_v59 }
 0x666   : > { %7567 = vmatprep.subr.bf16.mxu1 %v16007_v36  ;;  %v6797_v1 = vmul.f32 %v6765_v42, %v18518_v60  ;;  %v18522_v42 = vld [vmem:[#allocation99_spill] sm:$0xff]  ;;  %v6840_v10 = vpack.c.bf16 %v6800_v5, %v6799_v20  ;;  %v18527_v20 = vld [vmem:[#allocation108_spill] sm:$0xff] }
 0x667   : > { %v6802_v60 = vmul.f32 %v6770_v7, %v18522_v42  ;;  %v18525_v7 = vld [vmem:[#allocation103_spill] sm:$0xff]  ;;  %v6805_v42 = vmul.f32 %v6773_v57, %v18527_v20  ;;  %v6776_v59 = vld [vmem:[#allocation2 + $0xe1] sm:$0xff] }
 0x668   : > { %v6839_v47 = vpack.c.bf16 %v6798_v32, %v6797_v1  ;;  %v6774_v32 = vld [vmem:[#allocation2 + $0xd1] sm:$0xff]  ;;  %v16040_v1 = vadd.f32 %v11528_v19, %v15891_v30  ;;  %v6804_v46 = vmul.f32 %v6772_v51, %v18525_v7  ;;  %v18528_v7 = vld [vmem:[#allocation112_spill] sm:$0xff] }
 0x669   : > { %7568 = vmatpush1.bf16.msra.mxu1 %v16013_v4  ;;  %v6841_v54 = vpack.c.bf16 %v6802_v60, %v6801_v27  ;;  %v6780_v60 = vld [vmem:[#allocation2 + $0x101] sm:$0xff] }
 0x66a   : > { %10622 = vmatprep.subr.bf16.mxu1 %v18519_v53  ;;  %v6842_v50 = vpack.c.bf16 %v6804_v46, %v6803_v22  ;;  %v6779_v53 = vld [vmem:[#allocation2 + $0xf9] sm:$0xff] }
 0x66c   : > { %11471 = vmatmul.mubr.bf16.gmra.mrb[28].mxu1 %v6838_v8  ;;  %v7466_v8 = vpop.f32.mrb[69].mxu0 }
 0x66d   : > { %11474 = vmatprep.mubr.bf16.mxu1 %v6839_v47  ;;  %v16043_v47 = vadd.f32 %v15891_v30, %v7466_v8  ;;  %v11529_v15 = vpop.f32.mrb[70].mxu0  ;;  %v6775_v8 = vld [vmem:[#allocation2 + $0xd9] sm:$0xff] }
 0x66e   : > { %v16048_v27 = vadd.f32 %v11529_v15, %v15891_v30  ;;  %v7469_v5 = vpop.f32.mrb[71].mxu0  ;;  %v6778_v15 = vld [vmem:[#allocation2 + $0xf1] sm:$0xff] }
 0x66f   : > { %v16052_v19 = vadd.f32 %v15891_v30, %v7469_v5  ;;  %v6810_v61 = vmul.f32 %v6778_v15, %v18530_v48  ;;  %v11532_v22 = vpop.f32.mrb[72].mxu0  ;;  %v18533_v48 = vld [vmem:[#allocation119_spill] sm:$0xff] }
 0x670   : > { %v16064_v46 = vadd.f32 %v11532_v22, %v15891_v30 }
 0x674   : > { %11475 = vmatmul.mubr.bf16.gmra.mrb[0].mxu1 %v6840_v10  ;;  %v18526_v10 = vld [vmem:[#allocation107_spill] sm:$0xff] }
 0x675   : > { %11478 = vmatprep.mubr.bf16.mxu1 %v6841_v54  ;;  %v6806_v44 = vmul.f32 %v6774_v32, %v18526_v10  ;;  %v6807_v32 = vmul.f32 %v6775_v8, %v18528_v7  ;;  %v18529_v10 = vld [vmem:[#allocation111_spill] sm:$0xff]  ;;  %v18531_v54 = vld [vmem:[#allocation116_spill] sm:$0xff] }
 0x676   : > { %v6808_v5 = vmul.f32 %v6776_v59, %v18529_v10  ;;  %v6809_v55 = vmul.f32 %v6777_v3, %v18531_v54  ;;  %v6812_v59 = vmul.f32 %v6780_v60, %v18533_v48  ;;  %v6784_v10 = vld [vmem:[#allocation2 + $0x121] sm:$0xff]  ;;  %v18550_v48 = vpack.c.bf16 %v15921_v17, %v15915_v21 }
 0x677   : > { %v6843_v51 = vpack.c.bf16 %v6806_v44, %v6805_v42  ;;  %v7482_v44 = vpop.f32.mrb[73].mxu0  ;;  %v6816_v60 = vmul.f32 %v6784_v10, %v18375_v12  ;;  %v18542_v12 = vld [vmem:[#allocation71_spill] sm:$0xff]  ;;  %v18555_v21 = vpack.c.bf16 %v15941_v2, %v15935_v39  ;;  %v18556_v17 = vpack.c.bf16 %v15965_v63, %v15959_v11 }
 0x678   : > { %v6844_v57 = vpack.c.bf16 %v6808_v5, %v6807_v32  ;;  %v6845_v20 = vpack.c.bf16 %v6810_v61, %v6809_v55  ;;  %v16067_v42 = vadd.f32 %v15891_v30, %v7482_v44  ;;  %v6783_v32 = vld [vmem:[#allocation2 + $0x119] sm:$0xff]  ;;  %v18534_v5 = vld [vmem:[#allocation113_spill] sm:$0xff]  ;;  %v18537_v44 = vmov 0  }
 0x679   : > { %v18558_v39 = vpack.c.bf16 %v15988_v40, %v15979_v43  ;;  %v18559_v2 = vpack.c.bf16 %v15984_v35, %v15976_v56  ;;  %v18562_v11 = vpack.c.bf16 %v16052_v19, %v16043_v47  ;;  %v12519_v63 = vld [vmem:[#allocation16] sm:$0xff]   ;;  %v12520_v56 = vld [vmem:[#allocation16 + $0x8] sm:$0xff]   ;;  %v18564_v35 = vld [vmem:[#allocation114_spill] sm:$0xff] }
 0x67a   : > { %11534 = vmatprep.subr.bf16.mxu0 %v12519_v63  ;;  %v18566_v40 = vld [vmem:[#allocation52_spill] sm:$0xff]  ;;  %v18572_v47 = vld [vmem:[#allocation53_spill] sm:$0xff] }
 0x67b   : > { %11535 = vmatpush3.bf16.msra.mxu0 %v12519_v63 }
 0x67c   : > { %11479 = vmatmul.mubr.bf16.gmra.mrb[4].mxu1 %v6842_v50  ;;  %v11533_v50 = vpop.f32.mrb[74].mxu0  ;;  %11536 = vmatprep.subr.bf16.mxu0 %v12520_v56 }
 0x67d   : > { %11482 = vmatprep.mubr.bf16.mxu1 %v6843_v51  ;;  %v18532_v51 = vld [vmem:[#allocation120_spill] sm:$0xff]  ;;  %v7494_v3 = vadd.f32 %v11533_v50, %v15891_v30  ;;  %v7485_v61 = vpop.f32.mrb[75].mxu0  ;;  %v18545_v50 = vpack.c.bf16 %v15924_v33, %v15918_v41 }
 0x67e   : > { %v6811_v8 = vmul.f32 %v6779_v53, %v18532_v51  ;;  %v7486_v55 = vadd.f32 %v15891_v30, %v7485_v61  ;;  %v6815_v53 = vmul.f32 %v6783_v32, %v18373_v23  ;;  %v18538_v30 = vpack.c.bf16 %v15904_v25, %v15898_v0  ;;  %v18543_v0 = vld [vmem:[#allocation73_spill] sm:$0xff]  ;;  %v18544_v25 = vld [vmem:[#allocation146_spill] sm:$0xff]  ;;  %v18551_v41 = vld [vmem:[#allocation48_spill] sm:$0xff] }
 0x67f   : > { %v7512_v54 = vpack.c.bf16 %v7494_v3, %v16064_v46  ;;  %v18539_v46 = vld [vmem:[#allocation68_spill] sm:$0xff]  ;;  %v18541_v23 = vpack.c.bf16 %v15901_v31, %v15895_v18  ;;  %v18546_v18 = vld [vmem:[#allocation89_spill] sm:$0xff]  ;;  %v18554_v3 = vpack.c.bf16 %v15944_v13, %v15938_v45  ;;  %v18557_v45 = vpack.c.bf16 %v15962_v34, %v15956_v9  ;;  %11537 = vmatpush3.bf16.msra.mxu0 %v12520_v56 }
 0x680   : > { %v7511_v15 = vpack.c.bf16 %v7486_v55, %v16067_v42  ;;  %v6846_v7 = vpack.c.bf16 %v6812_v59, %v6811_v8  ;;  %v6848_v22 = vpack.c.bf16 %v6816_v60, %v6815_v53  ;;  %v18540_v42 = vld [vmem:[#allocation133_spill] sm:$0xff]  ;;  %v18547_v31 = vld [vmem:[#allocation144_spill] sm:$0xff]  ;;  %v18549_v8 = vld [vmem:[#allocation147_spill] sm:$0xff]  ;;  %v18560_v13 = vpack.c.bf16 %v16026_v26, %v16016_v37 }
 0x681   : > { %v18548_v51 = vld [vmem:[#allocation93_spill] sm:$0xff]  ;;  %v18552_v33 = vld [vmem:[#allocation148_spill] sm:$0xff]  ;;  %v18561_v9 = vpack.c.bf16 %v16022_v16, %v16010_v28  ;;  %v18563_v34 = vpack.c.bf16 %v16048_v27, %v16040_v1  ;;  %v18568_v28 = vld [vmem:[#allocation55_spill] sm:$0xff] }
 0x682   : > { %v18553_v59 = vld [vmem:[#allocation57_spill] sm:$0xff]  ;;  %v12522_v26 = vld [vmem:[#allocation16 + $0x18] sm:$0xff]   ;;  %v18582_v53 = vld [vmem:[#allocation132_spill] sm:$0xff] }
 0x683   : > { %v18574_v61 = vld [vmem:[#allocation41_spill] sm:$0xff] }
 0x684   : > { %11483 = vmatmul.mubr.bf16.gmra.mrb[8].mxu1 %v6844_v57  ;;  %v18535_v57 = vld [vmem:[#allocation118_spill] sm:$0xff] }
 0x685   : > { %11486 = vmatprep.mubr.bf16.mxu1 %v6845_v20  ;;  %v18536_v20 = vpack.c.bf16 %v18534_v5, %v18535_v57  ;;  %v18580_v5 = vld [vmem:[#allocation134_spill] sm:$0xff] }
 0x68c   : > { %11487 = vmatmul.mubr.bf16.gmra.mrb[12].mxu1 %v6846_v7 }
 0x68d   : > { %11490 = vmatprep.mubr.bf16.mxu1 %v18536_v20 }
 0x694   : > { %11491 = vmatmul.mubr.bf16.gmra.mrb[16].mxu1 %v6848_v22 }
 0x695   : > { %7593 = vmatprep.mubr.bf16.mxu1 %v18537_v44 }
 0x69c   : > { %9991 = vmatmul.mubr.msk.bf16.vlgmr.msra.gmra.mrb[32].mxu1 %vm1066_vm0, %v18538_v30 }
 0x69d   : > { %10623 = vmatpush3.bf16.msra.mxu1 %v15552_v14  ;;  %7603 = vmatprep.mubr.bf16.mxu1 %v18537_v44 }
 0x69e   : > { %10624 = vmatprep.subr.bf16.mxu1 %v18539_v46 }
 0x6a1   : > { %10625 = vmatpush3.bf16.msra.mxu1 %v18540_v42 }
 0x6a2   : > { %10626 = vmatprep.subr.bf16.mxu1 %v15757_v24 }
 0x6a4   : > { %9992 = vmatmul.mubr.msk.bf16.gmra.mrb[36].mxu1 %vm1066_vm0, %v18541_v23 }
 0x6a5   : > { %7613 = vmatprep.mubr.bf16.mxu1 %v18537_v44  ;;  %10627 = vmatpush3.bf16.msra.mxu1 %v18542_v12 }
 0x6a6   : > { %10628 = vmatprep.subr.bf16.mxu1 %v15761_v29 }
 0x6a9   : > { %10629 = vmatpush3.bf16.msra.mxu1 %v18543_v0 }
 0x6aa   : > { %10630 = vmatprep.subr.bf16.mxu1 %v18544_v25 }
 0x6ac   : > { %9993 = vmatmul.mubr.msk.bf16.gmra.mrb[40].mxu1 %vm1066_vm0, %v18545_v50  ;;  %v18586_v50 = vld [vmem:[#allocation70_spill] sm:$0xff] }
 0x6ad   : > { %7623 = vmatprep.mubr.bf16.mxu1 %v18537_v44  ;;  %10631 = vmatpush3.bf16.msra.mxu1 %v18546_v18 }
 0x6ae   : > { %10632 = vmatprep.subr.bf16.mxu1 %v18547_v31 }
 0x6b1   : > { %10633 = vmatpush3.bf16.msra.mxu1 %v18548_v51 }
 0x6b2   : > { %10634 = vmatprep.subr.bf16.mxu1 %v18549_v8 }
 0x6b4   : > { %9994 = vmatmul.mubr.msk.bf16.gmra.mrb[44].mxu1 %vm1066_vm0, %v18550_v48 }
 0x6b5   : > { %7633 = vmatprep.mubr.bf16.mxu1 %v18537_v44  ;;  %10635 = vmatpush3.bf16.msra.mxu1 %v18551_v41 }
 0x6b6   : > { %10636 = vmatprep.subr.bf16.mxu1 %v18552_v33 }
 0x6b9   : > { %10637 = vmatpush3.bf16.msra.mxu1 %v18553_v59 }
 0x6bc   : > { %9995 = vmatmul.mubr.msk.bf16.gmra.mrb[48].mxu1 %vm1066_vm0, %v18554_v3 }
 0x6bd   : > { %7643 = vmatprep.mubr.bf16.mxu1 %v18537_v44 }
 0x6c4   : > { %9996 = vmatmul.mubr.msk.bf16.gmra.mrb[52].mxu1 %vm1066_vm0, %v18555_v21 }
 0x6c5   : > { %7653 = vmatprep.mubr.bf16.mxu1 %v18537_v44 }
 0x6cc   : > { %9997 = vmatmul.mubr.msk.bf16.gmra.mrb[56].mxu1 %vm1066_vm0, %v18556_v17 }
 0x6cd   : > { %7663 = vmatprep.mubr.bf16.mxu1 %v18537_v44 }
 0x6d4   : > { %9998 = vmatmul.mubr.msk.bf16.gmra.mrb[60].mxu1 %vm1066_vm0, %v18557_v45 }
 0x6d5   : > { %7673 = vmatprep.mubr.bf16.mxu1 %v18537_v44 }
 0x6dc   : > { %9999 = vmatmul.mubr.msk.bf16.gmra.mrb[64].mxu1 %vm1066_vm0, %v18558_v39 }
 0x6dd   : > { %7683 = vmatprep.mubr.bf16.mxu1 %v18537_v44 }
 0x6e4   : > { %10000 = vmatmul.mubr.msk.bf16.gmra.mrb[68].mxu1 %vm1066_vm0, %v18559_v2 }
 0x6e5   : > { %7693 = vmatprep.mubr.bf16.mxu1 %v18537_v44 }
 0x6ec   : > { %10001 = vmatmul.mubr.msk.bf16.gmra.mrb[72].mxu1 %vm1066_vm0, %v18560_v13 }
 0x6ed   : > { %7703 = vmatprep.mubr.bf16.mxu1 %v18537_v44 }
 0x6f4   : > { %10002 = vmatmul.mubr.msk.bf16.gmra.mrb[76].mxu1 %vm1066_vm0, %v18561_v9 }
 0x6f5   : > { %7713 = vmatprep.mubr.bf16.mxu1 %v18537_v44 }
 0x6fc   : > { %10003 = vmatmul.mubr.msk.bf16.gmra.mrb[80].mxu1 %vm1066_vm0, %v18562_v11  ;;  %v18596_v11 = vld [vmem:[#allocation64_spill] sm:$0xff] }
 0x6fd   : > { %7723 = vmatprep.mubr.bf16.mxu1 %v18537_v44 }
 0x704   : > { %10004 = vmatmul.mubr.msk.bf16.gmra.mrb[84].mxu1 %vm1066_vm0, %v18563_v34 }
 0x705   : > { %7733 = vmatprep.mubr.bf16.mxu1 %v18537_v44 }
 0x70c   : > { %10005 = vmatmul.mubr.msk.bf16.gmra.mrb[88].mxu1 %vm1066_vm0, %v7511_v15  ;;  %v18576_v15 = vld [vmem:[#allocation69_spill] sm:$0xff] }
 0x70d   : > { %7743 = vmatprep.mubr.bf16.mxu1 %v18537_v44  ;;  %v18584_v44 = vld [vmem:[#allocation141_spill] sm:$0xff] }
 0x714   : > { %10006 = vmatmul.mubr.msk.bf16.gmra.mrb[92].mxu1 %vm1066_vm0, %v7512_v54 }
 0x715   : > { %8749 = vmatprep.mubr.bf16.mxu1 %v15847_v6  ;;  %v12521_v6 = vld [vmem:[#allocation16 + $0x10] sm:$0xff]  }
 0x716   : > { %11538 = vmatprep.subr.bf16.mxu0 %v12521_v6 }
 0x717   : > { %11539 = vmatpush3.bf16.msra.mxu0 %v12521_v6 }
 0x718   : > { %11540 = vmatprep.subr.bf16.mxu0 %v12522_v26 }
 0x71b   : > { %11541 = vmatpush3.bf16.msra.mxu0 %v12522_v26 }
 0x71c   : > { %8750 = vmatmul.mubr.bf16.vlgmr.msra.gmra.mrb[96].mxu1 %v15850_v38 }
 0x71d   : > { %8757 = vmatprep.mubr.bf16.mxu1 %v15856_v52 }
 0x71e   : > { %11543 = vmatmul.mubr.msk.bf16.vlgmr.msra.gmra.mrb[76].mxu0 %vm1066_vm0, %v18540_v42 }
 0x71f   : > { %11546 = vmatprep.mubr.msk.bf16.mxu0 %vm1066_vm0, %v18542_v12 }
 0x724   : > { %8758 = vmatmul.mubr.bf16.gmra.mrb[100].mxu1 %v15858_v62 }
 0x725   : > { %8765 = vmatprep.mubr.bf16.mxu1 %v15868_v58 }
 0x726   : > { %11547 = vmatmul.mubr.msk.bf16.gmra.mrb[80].mxu0 %vm1066_vm0, %v18543_v0 }
 0x727   : > { %11550 = vmatprep.mubr.msk.bf16.mxu0 %vm1066_vm0, %v18546_v18 }
 0x72c   : > { %8766 = vmatmul.mubr.bf16.gmra.mrb[104].mxu1 %v15870_v49  ;;  %v18570_v49 = vld [vmem:[#allocation38_spill] sm:$0xff] }
 0x72d   : > { %8773 = vmatprep.mubr.bf16.mxu1 %v16007_v36 }
 0x72e   : > { %11551 = vmatmul.mubr.msk.bf16.gmra.mrb[84].mxu0 %vm1066_vm0, %v18548_v51 }
 0x72f   : > { %v11464_v43 = vpop.f32.mrb[20].mxu1  ;;  %11554 = vmatprep.mubr.msk.bf16.mxu0 %vm1066_vm0, %v18551_v41 }
 0x730   : > { %v16177_v38 = vadd.f32 %v11464_v43, %v18564_v35  ;;  %v6931_v52 = vpop.f32.mrb[21].mxu1 }
 0x731   : > { %v16180_v62 = vadd.f32 %v6931_v52, %v18566_v40  ;;  %v11465_v58 = vpop.f32.mrb[22].mxu1 }
 0x732   : > { %18565 = vst [vmem:[#allocation154_spill] sm:$0xff] %v16177_v38  ;;  %v16183_v37 = vadd.f32 %v11465_v58, %v18568_v28  ;;  %v6934_v16 = vpop.f32.mrb[23].mxu1 }
 0x733   : > { %18567 = vst [vmem:[#allocation153_spill] sm:$0xff] %v16180_v62  ;;  %v16186_v36 = vadd.f32 %v6934_v16, %v18570_v49 }
 0x734   : > { %18569 = vst [vmem:[#allocation156_spill] sm:$0xff] %v16183_v37  ;;  %8774 = vmatmul.mubr.bf16.gmra.mrb[108].mxu1 %v16013_v4 }
 0x735   : > { %18571 = vst [vmem:[#allocation163_spill] sm:$0xff] %v16186_v36  ;;  %11582 = vmatprep.mubr.msk.bf16.mxu1 %vm1066_vm0, %v15552_v14  ;;  %v18578_v14 = vld [vmem:[#allocation60_spill] sm:$0xff] }
 0x736   : > { %11555 = vmatmul.mubr.msk.bf16.gmra.mrb[88].mxu0 %vm1066_vm0, %v18553_v59 }
 0x737   : > { %v11468_v1 = vpop.f32.mrb[24].mxu1  ;;  %11558 = vmatprep.mubr.msk.bf16.mxu0 %vm1066_vm0, %v18596_v11 }
 0x738   : > { %v16192_v27 = vadd.f32 %v11468_v1, %v18572_v47  ;;  %v6947_v19 = vpop.f32.mrb[25].mxu1 }
 0x739   : > { %v16195_v55 = vadd.f32 %v6947_v19, %v18574_v61  ;;  %v11469_v54 = vpop.f32.mrb[26].mxu1 }
 0x73a   : > { %18573 = vst [vmem:[#allocation165_spill] sm:$0xff] %v16192_v27  ;;  %v16200_v7 = vadd.f32 %v11469_v54, %v18576_v15  ;;  %v6950_v4 = vpop.f32.mrb[27].mxu1 }
 0x73b   : > { %18575 = vst [vmem:[#allocation164_spill] sm:$0xff] %v16195_v55  ;;  %v16205_v32 = vadd.f32 %v6950_v4, %v18578_v14 }
 0x73c   : > { %18577 = vst [vmem:[#allocation168_spill] sm:$0xff] %v16200_v7 }
 0x73d   : > { %18579 = vst [vmem:[#allocation169_spill] sm:$0xff] %v16205_v32 }
 0x73e   : > { %11559 = vmatmul.mubr.msk.bf16.gmra.mrb[92].mxu0 %vm1066_vm0, %v18539_v46 }
 0x73f   : > { %v11472_v10 = vpop.f32.mrb[28].mxu1  ;;  %11562 = vmatprep.mubr.msk.bf16.mxu0 %vm1066_vm0, %v15757_v24 }
 0x740   : > { %v16208_v57 = vadd.f32 %v11472_v10, %v18580_v5  ;;  %v6963_v20 = vpop.f32.mrb[29].mxu1 }
 0x741   : > { %v16211_v60 = vadd.f32 %v6963_v20, %v18582_v53  ;;  %v11473_v22 = vpop.f32.mrb[30].mxu1 }
 0x742   : > { %18581 = vst [vmem:[#allocation167_spill] sm:$0xff] %v16208_v57  ;;  %v16216_v30 = vadd.f32 %v11473_v22, %v18584_v44  ;;  %v6966_v23 = vpop.f32.mrb[31].mxu1 }
 0x743   : > { %18583 = vst [vmem:[#allocation98_spill] sm:$0xff] %v16211_v60  ;;  %v16221_v48 = vadd.f32 %v6966_v23, %v18586_v50 }
 0x744   : > { %18585 = vst [vmem:[#allocation94_spill] sm:$0xff] %v16216_v30 }
 0x745   : > { %18587 = vst [vmem:[#allocation97_spill] sm:$0xff] %v16221_v48 }
 0x746   : > { %11563 = vmatmul.mubr.msk.bf16.gmra.mrb[96].mxu0 %vm1066_vm0, %v15761_v29 }
 0x747   : > { %v16223_v3 = vpop.f32.mrb[0].mxu1  ;;  %11566 = vmatprep.mubr.msk.bf16.mxu0 %vm1066_vm0, %v18544_v25 }
 0x748   : > { %18588 = vst [vmem:[#allocation171_spill] sm:$0xff] %v16223_v3  ;;  %v16225_v21 = vpop.f32.mrb[1].mxu1 }
 0x749   : > { %18589 = vst [vmem:[#allocation127_spill] sm:$0xff] %v16225_v21  ;;  %v16227_v17 = vpop.f32.mrb[2].mxu1 }
 0x74a   : > { %18590 = vst [vmem:[#allocation174_spill] sm:$0xff] %v16227_v17  ;;  %v16231_v45 = vpop.f32.mrb[3].mxu1 }
 0x74b   : > { %18591 = vst [vmem:[#allocation126_spill] sm:$0xff] %v16231_v45 }
 0x74e   : > { %11567 = vmatmul.mubr.msk.bf16.gmra.mrb[100].mxu0 %vm1066_vm0, %v18547_v31 }
 0x74f   : > { %v16235_v39 = vpop.f32.mrb[4].mxu1  ;;  %11570 = vmatprep.mubr.msk.bf16.mxu0 %vm1066_vm0, %v18549_v8 }
 0x750   : > { %18592 = vst [vmem:[#allocation85_spill] sm:$0xff] %v16235_v39  ;;  %v16237_v2 = vpop.f32.mrb[5].mxu1 }
 0x751   : > { %18593 = vst [vmem:[#allocation86_spill] sm:$0xff] %v16237_v2  ;;  %v16239_v13 = vpop.f32.mrb[6].mxu1 }
 0x752   : > { %18594 = vst [vmem:[#allocation82_spill] sm:$0xff] %v16239_v13  ;;  %v16243_v9 = vpop.f32.mrb[7].mxu1 }
 0x753   : > { %18595 = vst [vmem:[#allocation90_spill] sm:$0xff] %v16243_v9 }
 0x756   : > { %11571 = vmatmul.mubr.msk.bf16.gmra.mrb[104].mxu0 %vm1066_vm0, %v18552_v33 }
 0x757   : > { %v16247_v34 = vpop.f32.mrb[8].mxu1 }
 0x758   : > { %18597 = vst [vmem:[#allocation105_spill] sm:$0xff] %v16247_v34  ;;  %v16249_v63 = vpop.f32.mrb[9].mxu1 }
 0x759   : > { %18598 = vst [vmem:[#allocation106_spill] sm:$0xff] %v16249_v63  ;;  %v16251_v56 = vpop.f32.mrb[10].mxu1 }
 0x75a   : > { %18599 = vst [vmem:[#allocation102_spill] sm:$0xff] %v16251_v56  ;;  %v16255_v43 = vpop.f32.mrb[11].mxu1 }
 0x75b   : > { %18600 = vst [vmem:[#allocation109_spill] sm:$0xff] %v16255_v43 }
 0x75f   : > { %v16259_v6 = vpop.f32.mrb[12].mxu1 }
 0x760   : > { %18601 = vst [vmem:[#allocation121_spill] sm:$0xff] %v16259_v6  ;;  %v16261_v35 = vpop.f32.mrb[13].mxu1 }
 0x761   : > { %18602 = vst [vmem:[#allocation122_spill] sm:$0xff] %v16261_v35  ;;  %v16263_v52 = vpop.f32.mrb[14].mxu1 }
 0x762   : > { %18603 = vst [vmem:[#allocation117_spill] sm:$0xff] %v16263_v52  ;;  %v16267_v40 = vpop.f32.mrb[15].mxu1 }
 0x763   : > { %18604 = vst [vmem:[#allocation123_spill] sm:$0xff] %v16267_v40 }
 0x767   : > { %v16271_v58 = vpop.f32.mrb[16].mxu1 }
 0x768   : > { %18605 = vst [vmem:[#allocation58_spill] sm:$0xff] %v16271_v58  ;;  %v16273_v28 = vpop.f32.mrb[17].mxu1 }
 0x769   : > { %18606 = vst [vmem:[#allocation59_spill] sm:$0xff] %v16273_v28  ;;  %v16275_v16 = vpop.f32.mrb[18].mxu1 }
 0x76a   : > { %18607 = vst [vmem:[#allocation56_spill] sm:$0xff] %v16275_v16  ;;  %v16279_v49 = vpop.f32.mrb[19].mxu1 }
 0x76b   : > { %18608 = vst [vmem:[#allocation63_spill] sm:$0xff] %v16279_v49 }
 0x76f   : > { %v16283_v26 = vpop.f32.mrb[32].mxu1 }
 0x770   : > { %v16285_v1 = vpop.f32.mrb[33].mxu1 }
 0x771   : > { %v16287_v47 = vpop.f32.mrb[34].mxu1  ;;  %v7754_v19 = vmax.f32 %v16283_v26, %v16285_v1 }
 0x772   : > { %v16293_v61 = vpop.f32.mrb[35].mxu1 }
 0x773   : > { %7755 = vmax.xlane.f32.xlu1 %v7754_v19  ;;  %v7757_v54 = vmax.f32 %v16287_v47, %v16293_v61 }
 0x777   : > { %7758 = vmax.xlane.f32.xlu1 %v7757_v54  ;;  %v16297_v15 = vpop.f32.mrb[36].mxu1 }
 0x778   : > { %v16299_v4 = vpop.f32.mrb[37].mxu1 }
 0x779   : > { %v16301_v14 = vpop.f32.mrb[38].mxu1  ;;  %v7760_v10 = vmax.f32 %v16297_v15, %v16299_v4 }
 0x77a   : > { %v16305_v5 = vpop.f32.mrb[39].mxu1 }
 0x77b   : > { %7761 = vmax.xlane.f32.xlu1 %v7760_v10  ;;  %v7763_v20 = vmax.f32 %v16301_v14, %v16305_v5 }
 0x77f   : > { %7764 = vmax.xlane.f32.xlu1 %v7763_v20  ;;  %v16309_v53 = vpop.f32.mrb[40].mxu1 }
 0x780   : > { %v16311_v22 = vpop.f32.mrb[41].mxu1 }
 0x781   : > { %v16313_v44 = vpop.f32.mrb[42].mxu1  ;;  %v7766_v23 = vmax.f32 %v16309_v53, %v16311_v22 }
 0x782   : > { %v16317_v50 = vpop.f32.mrb[43].mxu1 }
 0x783   : > { %7767 = vmax.xlane.f32.xlu1 %v7766_v23  ;;  %v7769_v19 = vmax.f32 %v16313_v44, %v16317_v50 }
 0x787   : > { %7770 = vmax.xlane.f32.xlu1 %v7769_v19  ;;  %v16321_v54 = vpop.f32.mrb[44].mxu1 }
 0x788   : > { %v16323_v10 = vpop.f32.mrb[45].mxu1 }
 0x789   : > { %v16325_v20 = vpop.f32.mrb[46].mxu1  ;;  %v7772_v16 = vmax.f32 %v16321_v54, %v16323_v10 }
 0x78a   : > { %v16329_v58 = vpop.f32.mrb[47].mxu1 }
 0x78b   : > { %7773 = vmax.xlane.f32.xlu1 %v7772_v16  ;;  %v7775_v49 = vmax.f32 %v16325_v20, %v16329_v58 }
 0x78f   : > { %7776 = vmax.xlane.f32.xlu1 %v7775_v49  ;;  %v16333_v23 = vpop.f32.mrb[48].mxu1 }
 0x790   : > { %18609 = vst [vmem:[#allocation129_spill] sm:$0xff] %v16333_v23  ;;  %v16335_v28 = vpop.f32.mrb[49].mxu1 }
 0x791   : > { %18610 = vst [vmem:[#allocation128_spill] sm:$0xff] %v16335_v28  ;;  %v16337_v19 = vpop.f32.mrb[50].mxu1  ;;  %v7778_v40 = vmax.f32 %v16333_v23, %v16335_v28 }
 0x792   : > { %v16341_v52 = vpop.f32.mrb[51].mxu1 }
 0x793   : > { %7779 = vmax.xlane.f32.xlu1 %v7778_v40  ;;  %v7781_v35 = vmax.f32 %v16337_v19, %v16341_v52 }
 0x797   : > { %7782 = vmax.xlane.f32.xlu1 %v7781_v35  ;;  %v16345_v16 = vpop.f32.mrb[52].mxu1 }
 0x798   : > { %18611 = vst [vmem:[#allocation76_spill] sm:$0xff] %v16345_v16  ;;  %v16347_v6 = vpop.f32.mrb[53].mxu1 }
 0x799   : > { %18612 = vst [vmem:[#allocation131_spill] sm:$0xff] %v16347_v6  ;;  %v16349_v49 = vpop.f32.mrb[54].mxu1  ;;  %v7784_v43 = vmax.f32 %v16345_v16, %v16347_v6 }
 0x79a   : > { %18613 = vst [vmem:[#allocation137_spill] sm:$0xff] %v16349_v49  ;;  %v16353_v56 = vpop.f32.mrb[55].mxu1 }
 0x79b   : > { %18614 = vst [vmem:[#allocation136_spill] sm:$0xff] %v16353_v56  ;;  %7785 = vmax.xlane.f32.xlu1 %v7784_v43  ;;  %v7787_v63 = vmax.f32 %v16349_v49, %v16353_v56 }
 0x79f   : > { %7788 = vmax.xlane.f32.xlu1 %v7787_v63  ;;  %v16357_v40 = vpop.f32.mrb[56].mxu1 }
 0x7a0   : > { %18615 = vst [vmem:[#allocation135_spill] sm:$0xff] %v16357_v40  ;;  %v16359_v34 = vpop.f32.mrb[57].mxu1 }
 0x7a1   : > { %18616 = vst [vmem:[#allocation138_spill] sm:$0xff] %v16359_v34  ;;  %v16361_v35 = vpop.f32.mrb[58].mxu1 }
 0x7a2   : > { %v16365_v13 = vpop.f32.mrb[59].mxu1 }
 0x7a7   : > { %v16369_v39 = vpop.f32.mrb[60].mxu1 }
 0x7a8   : > { %v16371_v43 = vpop.f32.mrb[61].mxu1 }
 0x7a9   : > { %v16375_v45 = vpop.f32.mrb[62].mxu1 }
 0x7aa   : > { %v16377_v17 = vpop.f32.mrb[63].mxu1 }
 0x7af   : > { %v16381_v9 = vpop.f32.mrb[64].mxu1 }
 0x7b0   : > { %v16383_v3 = vpop.f32.mrb[65].mxu1 }
 0x7b1   : > { %v16387_v48 = vpop.f32.mrb[66].mxu1 }
 0x7b2   : > { %v16389_v30 = vpop.f32.mrb[67].mxu1 }
 0x7b7   : > { %v16393_v60 = vpop.f32.mrb[68].mxu1 }
 0x7b8   : > { %v16395_v57 = vpop.f32.mrb[69].mxu1 }
 0x7b9   : > { %v16399_v32 = vpop.f32.mrb[70].mxu1 }
 0x7ba   : > { %v16401_v7 = vpop.f32.mrb[71].mxu1 }
 0x7bb   : > { %18617 = vst [vmem:[#allocation150_spill] sm:$0xff] %v16401_v7 }
 0x7bf   : > { %v16405_v55 = vpop.f32.mrb[72].mxu1 }
 0x7c0   : > { %v16407_v27 = vpop.f32.mrb[73].mxu1 }
 0x7c1   : > { %v16411_v36 = vpop.f32.mrb[74].mxu1 }
 0x7c2   : > { %v16413_v37 = vpop.f32.mrb[75].mxu1 }
 0x7c7   : > { %v16417_v62 = vpop.f32.mrb[76].mxu1 }
 0x7c8   : > { %18618 = vst [vmem:[#allocation149_spill] sm:$0xff] %v16417_v62  ;;  %v16419_v38 = vpop.f32.mrb[77].mxu1 }
 0x7c9   : > { %18619 = vst [vmem:[#allocation143_spill] sm:$0xff] %v16419_v38  ;;  %v16423_v33 = vpop.f32.mrb[78].mxu1 }
 0x7ca   : > { %v16425_v8 = vpop.f32.mrb[79].mxu1 }
 0x7cf   : > { %v16429_v31 = vpop.f32.mrb[80].mxu1 }
 0x7d0   : > { %18620 = vst [vmem:[#allocation151_spill] sm:$0xff] %v16429_v31  ;;  %v16431_v25 = vpop.f32.mrb[81].mxu1 }
 0x7d1   : > { %18621 = vst [vmem:[#allocation66_spill] sm:$0xff] %v16431_v25  ;;  %v16435_v29 = vpop.f32.mrb[82].mxu1 }
 0x7d2   : > { %v16437_v24 = vpop.f32.mrb[83].mxu1 }
 0x7d3   : > { %18622 = vst [vmem:[#allocation67_spill] sm:$0xff] %v16437_v24 }
 0x7d7   : > { %v16441_v46 = vpop.f32.mrb[84].mxu1 }
 0x7d8   : > { %18623 = vst [vmem:[#allocation110_spill] sm:$0xff] %v16441_v46  ;;  %v16443_v11 = vpop.f32.mrb[85].mxu1 }
 0x7d9   : > { %18624 = vst [vmem:[#allocation101_spill] sm:$0xff] %v16443_v11  ;;  %v16447_v59 = vpop.f32.mrb[86].mxu1 }
 0x7da   : > { %18625 = vst [vmem:[#allocation61_spill] sm:$0xff] %v16447_v59  ;;  %v16449_v41 = vpop.f32.mrb[87].mxu1 }
 0x7db   : > { %18626 = vst [vmem:[#allocation62_spill] sm:$0xff] %v16449_v41 }
 0x7df   : > { %v16453_v51 = vpop.f32.mrb[88].mxu1 }
 0x7e0   : > { %18627 = vst [vmem:[#allocation130_spill] sm:$0xff] %v16453_v51  ;;  %v16455_v18 = vpop.f32.mrb[89].mxu1 }
 0x7e1   : > { %18628 = vst [vmem:[#allocation77_spill] sm:$0xff] %v16455_v18  ;;  %v16459_v0 = vpop.f32.mrb[90].mxu1 }
 0x7e2   : > { %18629 = vst [vmem:[#allocation142_spill] sm:$0xff] %v16459_v0  ;;  %v16461_v12 = vpop.f32.mrb[91].mxu1 }
 0x7e3   : > { %18630 = vst [vmem:[#allocation145_spill] sm:$0xff] %v16461_v12 }
 0x7e7   : > { %v16465_v42 = vpop.f32.mrb[92].mxu1 }
 0x7e8   : > { %18631 = vst [vmem:[#allocation155_spill] sm:$0xff] %v16465_v42  ;;  %v16467_v56 = vpop.f32.mrb[93].mxu1 }
 0x7e9   : > { %18632 = vst [vmem:[#allocation152_spill] sm:$0xff] %v16467_v56  ;;  %v16471_v49 = vpop.f32.mrb[94].mxu1 }
 0x7ea   : > { %18633 = vst [vmem:[#allocation158_spill] sm:$0xff] %v16471_v49  ;;  %v16473_v6 = vpop.f32.mrb[95].mxu1 }
 0x7eb   : > { %18634 = vst [vmem:[#allocation157_spill] sm:$0xff] %v16473_v6 }
 0x7ef   : > { %v10638_v16 = vpop.f32.mrb[96].mxu1 }
 0x7f0   : > { %v10639_v18 = vpop.f32.mrb[97].mxu1 }
 0x7f1   : > { %v16477_v51 = vadd.f32 %v10639_v18, %v10638_v16  ;;  %v10641_v11 = vpop.f32.mrb[98].mxu1 }
 0x7f2   : > { %v10642_v63 = vpop.f32.mrb[99].mxu1 }
 0x7f3   : > { %v16479_v46 = vadd.f32 %v10642_v63, %v10641_v11  ;;  %v8782_v28 = vsel %vm1066_vm0, %v16477_v51, inf }
 0x7f4   : > { %8783 = vmin.xlane.f32.xlu1 %v8782_v28 }
 0x7f5   : > { %18635 = vst [vmem:[#allocation160_spill] sm:$0xff] %v16479_v46  ;;  %v8785_v56 = vsel %vm1066_vm0, %v16479_v46, inf }
 0x7f7   : > { %v10644_v21 = vpop.f32.mrb[100].mxu1 }
 0x7f8   : > { %v10645_v42 = vpop.f32.mrb[101].mxu1  ;;  %8786 = vmin.xlane.f32.xlu1 %v8785_v56  ;;  %v18639_v56 = vmax.f32 %v16399_v32, %v16401_v7 }
 0x7f9   : > { %v16485_v23 = vadd.f32 %v10645_v42, %v10644_v21  ;;  %v10647_v2 = vpop.f32.mrb[102].mxu1  ;;  %v18638_v42 = vmax.f32 %v16357_v40, %v16359_v34 }
 0x7fa   : > { %v10648_v25 = vpop.f32.mrb[103].mxu1 }
 0x7fb   : > { %18636 = vst [vmem:[#allocation159_spill] sm:$0xff] %v16485_v23  ;;  %v16487_v18 = vadd.f32 %v10648_v25, %v10647_v2  ;;  %v8788_v11 = vsel %vm1066_vm0, %v16485_v23, inf }
 0x7fc   : > { %8789 = vmin.xlane.f32.xlu1 %v8788_v11 }
 0x7fd   : > { %18637 = vst [vmem:[#allocation162_spill] sm:$0xff] %v16487_v18  ;;  %v8791_v16 = vsel %vm1066_vm0, %v16487_v18, inf }
 0x7fe   : > { %8792 = vmin.xlane.f32.xlu0 %v8791_v16  ;;  %v18640_v16 = vmax.f32 %v16361_v35, %v16365_v13 }
 0x7ff   : > { %v10650_v28 = vpop.f32.mrb[104].mxu1 }
 0x800   : > { %v16493_v63 = vpop.xlane.xlu1 %7755  ;;  %v10651_v46 = vpop.f32.mrb[105].mxu1  ;;  %7791 = vmax.xlane.f32.xlu1 %v18638_v42 }
 0x801   : > { %v16498_v21 = vadd.f32 %v10651_v46, %v10650_v28  ;;  %v10653_v25 = vpop.f32.mrb[106].mxu1  ;;  %v18641_v46 = vmax.f32 %v16411_v36, %v16413_v37 }
 0x802   : > { %v10654_v2 = vpop.f32.mrb[107].mxu1  ;;  %7812 = vmax.xlane.f32.xlu0 %v18639_v56 }
 0x803   : > { %v16503_v11 = vadd.f32 %v10654_v2, %v10653_v25  ;;  %v18642_v2 = vmax.f32 %v16369_v39, %v16371_v43 }
 0x804   : > { %v7759_v18 = vpop.xlane.xlu1 %7758  ;;  %7794 = vmax.xlane.f32.xlu1 %v18640_v16  ;;  %v18644_v16 = vmax.f32 %v16375_v45, %v16377_v17 }
 0x805   : > { %v7852_v23 = vsub.f32 %v16287_v47, %v7759_v18  ;;  %v7853_v34 = vsub.f32 %v16293_v61, %v7759_v18  ;;  %v18643_v18 = vmax.f32 %v16423_v33, %v16425_v8 }
 0x806   : > { %7818 = vmax.xlane.f32.xlu0 %v18641_v46 }
 0x807   : > { %v7918_v28 = vmul.f32 1.442695, %v7852_v23  ;;  %v7920_v42 = vmul.f32 1.442695, %v7853_v34  ;;  %v10656_v40 = vpop.f32.mrb[108].mxu1 }
 0x808   : > { %v16513_v7 = vpop.xlane.xlu1 %7761  ;;  %v10657_v25 = vpop.f32.mrb[109].mxu1  ;;  %7797 = vmax.xlane.f32.xlu1 %v18642_v2 }
 0x809   : > { %12527 = vpow2.f32 %v7918_v28  ;;  %v16518_v56 = vadd.f32 %v10657_v25, %v10656_v40  ;;  %v10659_v47 = vpop.f32.mrb[110].mxu1 }
 0x80a   : > { %12529 = vpow2.f32 %v7920_v42  ;;  %v10660_v61 = vpop.f32.mrb[111].mxu1  ;;  %7824 = vmax.xlane.f32.xlu0 %v18643_v18  ;;  %v8794_v42 = vsel %vm1066_vm0, %v16498_v21, inf }
 0x80b   : > { %v16523_v23 = vadd.f32 %v10660_v61, %v10659_v47  ;;  %v8797_v61 = vsel %vm1066_vm0, %v16503_v11, inf }
 0x80c   : > { %v7765_v34 = vpop.xlane.xlu1 %7764  ;;  %7800 = vmax.xlane.f32.xlu1 %v18644_v16 }
 0x80d   : > { %v7856_v46 = vsub.f32 %v16301_v14, %v7765_v34  ;;  %v7857_v28 = vsub.f32 %v16305_v5, %v7765_v34 }
 0x80f   : > { %v7926_v40 = vmul.f32 1.442695, %v7856_v46  ;;  %v7928_v25 = vmul.f32 1.442695, %v7857_v28 }
 0x810   : > { %v16532_v2 = vpop.xlane.xlu1 %7767  ;;  %8795 = vmin.xlane.f32.xlu1 %v8794_v42  ;;  %v7850_v42 = vsub.f32 %v16283_v26, %v16493_v63 }
 0x811   : > { %12531 = vpow2.f32 %v7926_v40  ;;  %v8800_v40 = vsel %vm1066_vm0, %v16518_v56, inf }
 0x812   : > { %12533 = vpow2.f32 %v7928_v25 }
 0x813   : > { %v16534_v47 = vpop.eup %12527 }
 0x814   : > { %18645 = vst [vmem:[#allocation161_spill] sm:$0xff] %v16534_v47  ;;  %v16538_v18 = vpop.eup %12529  ;;  %v7771_v14 = vpop.xlane.xlu1 %7770  ;;  %8798 = vmin.xlane.f32.xlu1 %v8797_v61  ;;  %v8803_v61 = vsel %vm1066_vm0, %v16523_v23, inf }
 0x815   : > { %18646 = vst [vmem:[#allocation170_spill] sm:$0xff] %v16538_v18  ;;  %v7860_v5 = vsub.f32 %v16313_v44, %v7771_v14  ;;  %v7861_v34 = vsub.f32 %v16317_v50, %v7771_v14  ;;  %v8045_v16 = vadd.f32 %v16538_v18, %v16534_v47  ;;  %v18648_v50 = vmax.f32 %v16435_v29, %v16437_v24  ;;  %v11544_v18 = vpop.f32.mrb[76].mxu0 }
 0x817   : > { %v7934_v46 = vmul.f32 1.442695, %v7860_v5  ;;  %v7936_v28 = vmul.f32 1.442695, %v7861_v34  ;;  %8046 = vadd.xlane.f32.xlu0 %v8045_v16  ;;  %v7851_v5 = vsub.f32 %v16285_v1, %v16493_v63  ;;  %v18650_v1 = vmax.f32 %v16381_v9, %v16383_v3  ;;  %v16570_v63 = vld [vmem:[#allocation17] ss:$0 sm:$0xff] }
 0x818   : > { %v16546_v25 = vpop.xlane.xlu1 %7773  ;;  %8801 = vmin.xlane.f32.xlu1 %v8800_v40 }
 0x819   : > { %12535 = vpow2.f32 %v7934_v46  ;;  %v7916_v47 = vmul.f32 1.442695, %v7851_v5 }
 0x81a   : > { %12537 = vpow2.f32 %v7936_v28  ;;  %v7914_v28 = vmul.f32 1.442695, %v7850_v42 }
 0x81b   : > { %v16550_v44 = vpop.eup %12531  ;;  %7830 = vmax.xlane.f32.xlu0 %v18648_v50 }
 0x81c   : > { %18647 = vst [vmem:[#allocation166_spill] sm:$0xff] %v16550_v44  ;;  %v16557_v14 = vpop.eup %12533  ;;  %v7777_v34 = vpop.xlane.xlu1 %7776  ;;  %8804 = vmin.xlane.f32.xlu1 %v8803_v61  ;;  %v16573_v61 = vadd.f32 %v11544_v18, %v16570_v63 }
 0x81d   : > { %18649 = vst [vmem:[#allocation173_spill] sm:$0xff] %v16557_v14  ;;  %v7864_v16 = vsub.f32 %v16325_v20, %v7777_v34  ;;  %v7865_v26 = vsub.f32 %v16329_v58, %v7777_v34  ;;  %v8051_v46 = vadd.f32 %v16557_v14, %v16550_v44  ;;  %v8307_v20 = vpop.f32.mrb[77].mxu0 }
 0x81e   : > { %v11545_v58 = vpop.f32.mrb[78].mxu0  ;;  %v16576_v42 = vadd.f32 %v16570_v63, %v8307_v20  ;;  %v18654_v20 = vmax.f32 %v16387_v48, %v16389_v30 }
 0x81f   : > { %v7942_v40 = vmul.f32 1.442695, %v7864_v16  ;;  %v7944_v50 = vmul.f32 1.442695, %v7865_v26  ;;  %8052 = vadd.xlane.f32.xlu0 %v8051_v46  ;;  %v16579_v5 = vadd.f32 %v11545_v58, %v16570_v63  ;;  %v8310_v34 = vpop.f32.mrb[79].mxu0  ;;  %v18652_v26 = vmax.f32 %v16447_v59, %v16449_v41 }
 0x820   : > { %v16565_v24 = vpop.xlane.xlu1 %7779  ;;  %7803 = vmax.xlane.f32.xlu1 %v18650_v1  ;;  %v16587_v46 = vadd.f32 %v16570_v63, %v8310_v34 }
 0x821   : > { %12539 = vpow2.f32 %v7942_v40  ;;  %v11548_v40 = vpop.f32.mrb[80].mxu0 }
 0x822   : > { %12541 = vpow2.f32 %v7944_v50  ;;  %v7854_v50 = vsub.f32 %v16297_v15, %v16513_v7  ;;  %v16599_v58 = vadd.f32 %v11548_v40, %v16570_v63  ;;  %v8323_v34 = vpop.f32.mrb[81].mxu0 }
 0x823   : > { %v16581_v16 = vpop.eup %12535  ;;  %12543 = vpow2.f32 %v7914_v28  ;;  %7836 = vmax.xlane.f32.xlu0 %v18652_v26  ;;  %v7855_v26 = vsub.f32 %v16299_v4, %v16513_v7  ;;  %v11549_v14 = vpop.f32.mrb[82].mxu0  ;;  %v16610_v28 = vadd.f32 %v16570_v63, %v8323_v34 }
 0x824   : > { %18651 = vst [vmem:[#allocation172_spill] sm:$0xff] %v16581_v16  ;;  %v16589_v18 = vpop.eup %12537  ;;  %12545 = vpow2.f32 %v7916_v47  ;;  %v7783_v1 = vpop.xlane.xlu1 %7782  ;;  %7806 = vmax.xlane.f32.xlu1 %v18654_v20  ;;  %v16613_v40 = vadd.f32 %v11549_v14, %v16570_v63 }
 0x825   : > { %18653 = vst [vmem:[#allocation176_spill] sm:$0xff] %v16589_v18  ;;  %v7868_v47 = vsub.f32 %v16337_v19, %v7783_v1  ;;  %v7869_v44 = vsub.f32 %v16341_v52, %v7783_v1  ;;  %v8057_v15 = vadd.f32 %v16589_v18, %v16581_v16  ;;  %v8326_v41 = vpop.f32.mrb[83].mxu0  ;;  %v7922_v19 = vmul.f32 1.442695, %v7854_v50 }
 0x826   : > { %v16616_v4 = vadd.f32 %v16570_v63, %v8326_v41  ;;  %v11552_v52 = vpop.f32.mrb[84].mxu0  ;;  %v18655_v1 = vmax.f32 %v16393_v60, %v16395_v57  ;;  %v7924_v16 = vmul.f32 1.442695, %v7855_v26  ;;  %v18657_v41 = vmax.f32 %v16459_v0, %v16461_v12 }
 0x827   : > { %v7950_v59 = vmul.f32 1.442695, %v7868_v47  ;;  %v7952_v7 = vmul.f32 1.442695, %v7869_v44  ;;  %8058 = vadd.xlane.f32.xlu0 %v8057_v15  ;;  %v8339_v20 = vpop.f32.mrb[85].mxu0  ;;  %v7858_v47 = vsub.f32 %v16309_v53, %v16532_v2  ;;  %v18659_v26 = vmax.f32 %v16405_v55, %v16407_v27 }
 0x828   : > { %7809 = vmax.xlane.f32.xlu1 %v18655_v1  ;;  %v7859_v15 = vsub.f32 %v16311_v22, %v16532_v2 }
 0x829   : > { %12547 = vpow2.f32 %v7950_v59  ;;  %v7930_v53 = vmul.f32 1.442695, %v7858_v47 }
 0x82a   : > { %12549 = vpow2.f32 %v7952_v7  ;;  %v7932_v34 = vmul.f32 1.442695, %v7859_v15 }
 0x82b   : > { %v16625_v14 = vpop.eup %12539  ;;  %7842 = vmax.xlane.f32.xlu0 %v18657_v41  ;;  %12551 = vpow2.f32 %v7922_v19  ;;  %v16646_v19 = vadd.f32 %v11552_v52, %v16570_v63  ;;  %v18662_v41 = vmax.f32 %v16417_v62, %v16419_v38  ;;  %v18671_v38 = vld [vmem:[#allocation128_spill] sm:$0xff] }
 0x82c   : > { %18656 = vst [vmem:[#allocation175_spill] sm:$0xff] %v16625_v14  ;;  %v16630_v50 = vpop.eup %12541  ;;  %7815 = vmax.xlane.f32.xlu1 %v18659_v26  ;;  %12553 = vpow2.f32 %v7924_v16  ;;  %v16652_v26 = vadd.f32 %v16570_v63, %v8339_v20  ;;  %v11553_v16 = vpop.f32.mrb[86].mxu0 }
 0x82d   : > { %18658 = vst [vmem:[#allocation178_spill] sm:$0xff] %v16630_v50  ;;  %v16637_v59 = vpop.eup %12543  ;;  %v8063_v7 = vadd.f32 %v16630_v50, %v16625_v14  ;;  %v16655_v22 = vadd.f32 %v11553_v16, %v16570_v63  ;;  %v8342_v2 = vpop.f32.mrb[87].mxu0  ;;  %12555 = vpow2.f32 %v7930_v53 }
 0x82e   : > { %18660 = vst [vmem:[#allocation177_spill] sm:$0xff] %v16637_v59  ;;  %v16643_v1 = vpop.eup %12545  ;;  %v16660_v52 = vadd.f32 %v16570_v63, %v8342_v2  ;;  %v11556_v47 = vpop.f32.mrb[88].mxu0  ;;  %v7862_v2 = vsub.f32 %v16321_v54, %v16546_v25  ;;  %12557 = vpow2.f32 %v7932_v34 }
 0x82f   : > { %18661 = vst [vmem:[#allocation179_spill] sm:$0xff] %v16643_v1  ;;  %8064 = vadd.xlane.f32.xlu0 %v8063_v7  ;;  %v8042_v7 = vadd.f32 %v16643_v1, %v16637_v59  ;;  %v16670_v15 = vadd.f32 %v11556_v47, %v16570_v63  ;;  %v8355_v16 = vpop.f32.mrb[89].mxu0  ;;  %v7863_v47 = vsub.f32 %v16323_v10, %v16546_v25  ;;  %v18670_v59 = vld [vmem:[#allocation129_spill] sm:$0xff] }
 0x830   : > { %7821 = vmax.xlane.f32.xlu1 %v18662_v41  ;;  %v18664_v41 = vmax.f32 %v16471_v49, %v16473_v6  ;;  %v16679_v18 = vadd.f32 %v16570_v63, %v8355_v16 }
 0x831   : > { %v7940_v49 = vmul.f32 1.442695, %v7863_v47 }
 0x833   : > { %v16662_v44 = vpop.eup %12547  ;;  %7848 = vmax.xlane.f32.xlu0 %v18664_v41  ;;  %v11557_v41 = vpop.f32.mrb[90].mxu0 }
 0x834   : > { %18663 = vst [vmem:[#allocation37_spill] sm:$0xff] %v16662_v44  ;;  %v16672_v14 = vpop.eup %12549  ;;  %8043 = vadd.xlane.f32.xlu1 %v8042_v7  ;;  %v16686_v53 = vadd.f32 %v11557_v41, %v16570_v63  ;;  %v8358_v1 = vpop.f32.mrb[91].mxu0  ;;  %v18668_v41 = vld [vmem:[#allocation66_spill] sm:$0xff] }
 0x835   : > { %18665 = vst [vmem:[#allocation40_spill] sm:$0xff] %v16672_v14  ;;  %v8069_v20 = vadd.f32 %v16672_v14, %v16662_v44  ;;  %v16688_v54 = vpop.eup %12551  ;;  %v16691_v7 = vadd.f32 %v16570_v63, %v8358_v1  ;;  %v11560_v50 = vpop.f32.mrb[92].mxu0  ;;  %v7938_v44 = vmul.f32 1.442695, %v7862_v2  ;;  %v18669_v14 = vmax.f32 %v16429_v31, %v18668_v41 }
 0x836   : > { %18666 = vst [vmem:[#allocation39_spill] sm:$0xff] %v16688_v54  ;;  %v16693_v16 = vpop.eup %12553  ;;  %v8380_v10 = vadd.f32 %v11560_v50, %v16570_v63  ;;  %v8371_v25 = vpop.f32.mrb[93].mxu0  ;;  %v7866_v31 = vsub.f32 %v18670_v59, %v16565_v24  ;;  %v18672_v59 = vpack.c.bf16 %v16587_v46, %v16576_v42 }
 0x837   : > { %18667 = vst [vmem:[#allocation43_spill] sm:$0xff] %v16693_v16  ;;  %8070 = vadd.xlane.f32.xlu0 %v8069_v20  ;;  %v8372_v1 = vadd.f32 %v16570_v63, %v8371_v25  ;;  %v11561_v6 = vpop.f32.mrb[94].mxu0  ;;  %v8048_v34 = vadd.f32 %v16693_v16, %v16688_v54  ;;  %12559 = vpow2.f32 %v7938_v44  ;;  %v7867_v54 = vsub.f32 %v18671_v38, %v16565_v24 }
 0x838   : > { %7827 = vmax.xlane.f32.xlu1 %v18669_v14  ;;  %v8383_v20 = vadd.f32 %v11561_v6, %v16570_v63  ;;  %v8374_v12 = vpop.f32.mrb[95].mxu0  ;;  %12561 = vpow2.f32 %v7940_v49  ;;  %v18673_v49 = vld [vmem:[#allocation110_spill] sm:$0xff] }
 0x839   : > { %v8375_v50 = vadd.f32 %v16570_v63, %v8374_v12  ;;  %v11564_v2 = vpop.f32.mrb[96].mxu0 }
 0x83a   : > { %v8475_v0 = vpack.c.bf16 %v8383_v20, %v8380_v10  ;;  %v8396_v41 = vadd.f32 %v11564_v2, %v16570_v63  ;;  %v8387_v14 = vpop.f32.mrb[97].mxu0  ;;  %v16715_v10 = vpop.eup %12555 }
 0x83b   : > { %v8474_v25 = vpack.c.bf16 %v8375_v50, %v8372_v1  ;;  %v8388_v47 = vadd.f32 %v16570_v63, %v8387_v14  ;;  %v11565_v6 = vpop.f32.mrb[98].mxu0  ;;  %v16718_v20 = vpop.eup %12557  ;;  %v7946_v1 = vmul.f32 1.442695, %v7866_v31  ;;  %v18674_v50 = vld [vmem:[#allocation101_spill] sm:$0xff]  ;;  %v7948_v14 = vmul.f32 1.442695, %v7867_v54 }
 0x83c   : > { %8049 = vadd.xlane.f32.xlu1 %v8048_v34  ;;  %v8399_v12 = vadd.f32 %v11565_v6, %v16570_v63  ;;  %v8390_v16 = vpop.f32.mrb[99].mxu0  ;;  %v18675_v2 = vmax.f32 %v18673_v49, %v18674_v50  ;;  %v18676_v31 = vpack.c.bf16 %v16579_v5, %v16573_v61  ;;  %v18678_v61 = vld [vmem:[#allocation130_spill] sm:$0xff]  ;;  %v18679_v5 = vld [vmem:[#allocation77_spill] sm:$0xff] }
 0x83d   : > { %10510 = vmatprep.subr.bf16.mxu0 %v8474_v25  ;;  %v8391_v44 = vadd.f32 %v16570_v63, %v8390_v16  ;;  %v11568_v38 = vpop.f32.mrb[100].mxu0  ;;  %v8054_v16 = vadd.f32 %v16718_v20, %v16715_v10  ;;  %12563 = vpow2.f32 %v7946_v1 }
 0x83e   : > { %10511 = vmatpush3.bf16.msra.mxu0 %v18672_v59  ;;  %v8477_v34 = vpack.c.bf16 %v8399_v12, %v8396_v41  ;;  %v8412_v25 = vadd.f32 %v11568_v38, %v16570_v63  ;;  %v8403_v6 = vpop.f32.mrb[101].mxu0  ;;  %12565 = vpow2.f32 %v7948_v14  ;;  %v18677_v59 = vpack.c.bf16 %v16616_v4, %v16610_v28  ;;  %v18683_v14 = vld [vmem:[#allocation155_spill] sm:$0xff] }
 0x83f   : > { %v8476_v24 = vpack.c.bf16 %v8391_v44, %v8388_v47  ;;  %10512 = vmatprep.subr.bf16.mxu0 %v8475_v0  ;;  %v8404_v62 = vadd.f32 %v16570_v63, %v8403_v6  ;;  %v11569_v42 = vpop.f32.mrb[102].mxu0  ;;  %v18682_v4 = vpack.c.bf16 %v16660_v52, %v16652_v26  ;;  %v18686_v52 = vpack.c.bf16 %v16655_v22, %v16646_v19 }
 0x840   : > { %7833 = vmax.xlane.f32.xlu1 %v18675_v2  ;;  %v8415_v46 = vadd.f32 %v11569_v42, %v16570_v63  ;;  %v8406_v41 = vpop.f32.mrb[103].mxu0  ;;  %v18680_v2 = vmax.f32 %v18678_v61, %v18679_v5 }
 0x841   : > { %v8407_v0 = vadd.f32 %v16570_v63, %v8406_v41  ;;  %v16735_v47 = vpop.eup %12559  ;;  %v11572_v28 = vpop.f32.mrb[104].mxu0 }
 0x842   : > { %10513 = vmatpush3.bf16.msra.mxu0 %v18676_v31  ;;  %v8479_v54 = vpack.c.bf16 %v8415_v46, %v8412_v25  ;;  %v16737_v44 = vpop.eup %12561  ;;  %v8428_v6 = vadd.f32 %v11572_v28, %v16570_v63  ;;  %v18691_v28 = vld [vmem:[#allocation137_spill] sm:$0xff] }
 0x843   : > { %10514 = vmatprep.subr.bf16.mxu0 %v8476_v24  ;;  %v8478_v12 = vpack.c.bf16 %v8407_v0, %v8404_v62  ;;  %v8060_v1 = vadd.f32 %v16737_v44, %v16735_v47  ;;  %v18681_v24 = vpack.c.bf16 %v16613_v40, %v16599_v58 }
 0x844   : > { %8055 = vadd.xlane.f32.xlu1 %v8054_v16  ;;  %v8419_v16 = vpop.f32.mrb[105].mxu0 }
 0x845   : > { %v8420_v58 = vadd.f32 %v16570_v63, %v8419_v16  ;;  %v11573_v40 = vpop.f32.mrb[106].mxu0 }
 0x846   : > { %10515 = vmatpush3.bf16.msra.mxu0 %v18677_v59  ;;  %v8431_v31 = vadd.f32 %v11573_v40, %v16570_v63  ;;  %v8422_v46 = vpop.f32.mrb[107].mxu0  ;;  %v7786_v59 = vpop.xlane.xlu1 %7785 }
 0x847   : > { %10516 = vmatprep.subr.bf16.mxu0 %v8477_v34  ;;  %v16750_v62 = vpop.eup %12563  ;;  %v18684_v34 = vld [vmem:[#allocation152_spill] sm:$0xff]  ;;  %v8423_v26 = vadd.f32 %v16570_v63, %v8422_v46 }
 0x848   : > { %7839 = vmax.xlane.f32.xlu1 %v18680_v2  ;;  %v16752_v38 = vpop.eup %12565  ;;  %v18685_v25 = vmax.f32 %v18683_v14, %v18684_v34  ;;  %v8481_v41 = vpack.c.bf16 %v8431_v31, %v8428_v6  ;;  %v18689_v2 = vld [vmem:[#allocation76_spill] sm:$0xff] }
 0x849   : > { %v8066_v42 = vadd.f32 %v16752_v38, %v16750_v62  ;;  %v8480_v0 = vpack.c.bf16 %v8423_v26, %v8420_v58  ;;  %v7870_v63 = vsub.f32 %v18689_v2, %v7786_v59 }
 0x84a   : > { %10517 = vmatpush3.bf16.msra.mxu0 %v18681_v24  ;;  %v18690_v24 = vld [vmem:[#allocation131_spill] sm:$0xff] }
 0x84b   : > { %10518 = vmatprep.subr.bf16.mxu0 %v8478_v12  ;;  %v18688_v12 = vpack.c.bf16 %v16686_v53, %v16670_v15  ;;  %v7871_v19 = vsub.f32 %v18690_v24, %v7786_v59  ;;  %v7954_v22 = vmul.f32 1.442695, %v7870_v63  ;;  %v18693_v53 = vld [vmem:[#allocation160_spill] sm:$0xff]  ;;  %v18696_v63 = vld [vmem:[#allocation135_spill] sm:$0xff]  ;;  %v18697_v24 = vld [vmem:[#allocation138_spill] sm:$0xff] }
 0x84c   : > { %8061 = vadd.xlane.f32.xlu1 %v8060_v1  ;;  %v7789_v1 = vpop.xlane.xlu1 %7788 }
 0x84d   : > { %v7956_v16 = vmul.f32 1.442695, %v7871_v19  ;;  %12567 = vpow2.f32 %v7954_v22 }
 0x84e   : > { %10519 = vmatpush3.bf16.msra.mxu0 %v18682_v4  ;;  %v7872_v4 = vsub.f32 %v18691_v28, %v7789_v1 }
 0x84f   : > { %10520 = vmatprep.subr.bf16.mxu0 %v8479_v54  ;;  %v18687_v54 = vpack.c.bf16 %v16691_v7, %v16679_v18  ;;  %v18692_v18 = vld [vmem:[#allocation136_spill] sm:$0xff] }
 0x850   : > { %7845 = vmax.xlane.f32.xlu1 %v18685_v25  ;;  %v7873_v7 = vsub.f32 %v18692_v18, %v7789_v1  ;;  %v7958_v40 = vmul.f32 1.442695, %v7872_v4 }
 0x852   : > { %10521 = vmatpush3.bf16.msra.mxu0 %v18686_v52  ;;  %v7960_v31 = vmul.f32 1.442695, %v7873_v7  ;;  %v18694_v52 = vld [vmem:[#allocation159_spill] sm:$0xff] }
 0x853   : > { %10522 = vmatprep.subr.bf16.mxu0 %v8480_v0 }
 0x854   : > { %8067 = vadd.xlane.f32.xlu1 %v8066_v42 }
 0x856   : > { %10523 = vmatpush3.bf16.msra.mxu0 %v18687_v54  ;;  %v18695_v54 = vld [vmem:[#allocation162_spill] sm:$0xff] }
 0x857   : > { %10524 = vmatprep.subr.bf16.mxu0 %v8481_v41  ;;  %v16785_v22 = vpop.eup %12567 }
 0x85a   : > { %10525 = vmatpush3.bf16.msra.mxu0 %v18688_v12 }
 0x881   : > { %v8784_v25 = vpop.xlane.xlu1 %8783 }
 0x882   : > { %v8806_v6 = vsub.f32 %v8784_v25, %v16477_v51 }
 0x884   : > { %v8814_v58 = vmul.f32 1.442695, %v8806_v6 }
 0x885   : > { %v8787_v15 = vpop.xlane.xlu1 %8786 }
 0x886   : > { %12569 = vpow2.f32 %v8814_v58  ;;  %v8807_v42 = vsub.f32 %v8787_v15, %v18693_v53 }
 0x887   : > { %12571 = vpow2.f32 %v7956_v16 }
 0x888   : > { %v8816_v46 = vmul.f32 1.442695, %v8807_v42  ;;  %12573 = vpow2.f32 %v7958_v40 }
 0x889   : > { %v8790_v26 = vpop.xlane.xlu1 %8789 }
 0x88a   : > { %12575 = vpow2.f32 %v8816_v46  ;;  %v8808_v41 = vsub.f32 %v8790_v26, %v18694_v52 }
 0x88b   : > { %12577 = vpow2.f32 %v7960_v31  ;;  %v8793_v51 = vpop.xlane.xlu0 %8792 }
 0x88c   : > { %v8818_v0 = vmul.f32 1.442695, %v8808_v41  ;;  %v8809_v12 = vsub.f32 %v8793_v51, %v18695_v54 }
 0x88d   : > { %v7792_v59 = vpop.xlane.xlu1 %7791 }
 0x88e   : > { %12579 = vpow2.f32 %v8818_v0  ;;  %v8820_v2 = vmul.f32 1.442695, %v8809_v12  ;;  %v7874_v1 = vsub.f32 %v18696_v63, %v7792_v59  ;;  %v7875_v19 = vsub.f32 %v18697_v24, %v7792_v59 }
 0x88f   : > { %v16799_v53 = vpop.xlane.xlu0 %7812 }
 0x890   : > { %v16787_v28 = vpop.eup %12569  ;;  %12581 = vpow2.f32 %v8820_v2  ;;  %v7962_v4 = vmul.f32 1.442695, %v7874_v1  ;;  %v7964_v25 = vmul.f32 1.442695, %v7875_v19 }
 0x891   : > { %v16789_v6 = vpop.eup %12571  ;;  %v7795_v16 = vpop.xlane.xlu1 %7794  ;;  %v8830_v18 = vsel %vm1066_vm0, %v16787_v28, 0.0 }
 0x892   : > { %12583 = vpow2.f32 %v7962_v4  ;;  %v7876_v7 = vsub.f32 %v16361_v35, %v7795_v16  ;;  %v7877_v58 = vsub.f32 %v16365_v13, %v7795_v16  ;;  %8831 = vadd.xlane.f32.xlu1 %v8830_v18  ;;  %v16795_v40 = vpop.eup %12573  ;;  %v8072_v46 = vadd.f32 %v16789_v6, %v16785_v22 }
 0x893   : > { %12585 = vpow2.f32 %v7964_v25  ;;  %v16816_v59 = vpop.xlane.xlu0 %7818 }
 0x894   : > { %v16797_v15 = vpop.eup %12575  ;;  %v7966_v42 = vmul.f32 1.442695, %v7876_v7  ;;  %v7968_v31 = vmul.f32 1.442695, %v7877_v58 }
 0x895   : > { %v16803_v26 = vpop.eup %12577  ;;  %v7798_v52 = vpop.xlane.xlu1 %7797  ;;  %v8833_v35 = vsel %vm1066_vm0, %v16797_v15, 0.0 }
 0x896   : > { %12587 = vpow2.f32 %v7966_v42  ;;  %8073 = vadd.xlane.f32.xlu1 %v8072_v46  ;;  %8834 = vadd.xlane.f32.xlu0 %v8833_v35  ;;  %v8075_v41 = vadd.f32 %v16803_v26, %v16795_v40  ;;  %v7878_v51 = vsub.f32 %v16369_v39, %v7798_v52  ;;  %v7879_v2 = vsub.f32 %v16371_v43, %v7798_v52 }
 0x897   : > { %12589 = vpow2.f32 %v7968_v31  ;;  %v16832_v58 = vpop.xlane.xlu0 %7824 }
 0x898   : > { %v16807_v13 = vpop.eup %12579  ;;  %v7970_v24 = vmul.f32 1.442695, %v7878_v51  ;;  %v7972_v18 = vmul.f32 1.442695, %v7879_v2 }
 0x899   : > { %v7801_v0 = vpop.xlane.xlu1 %7800  ;;  %v8836_v54 = vsel %vm1066_vm0, %v16807_v13, 0.0 }
 0x89a   : > { %v16814_v12 = vpop.eup %12581  ;;  %8837 = vadd.xlane.f32.xlu1 %v8836_v54  ;;  %8076 = vadd.xlane.f32.xlu0 %v8075_v41  ;;  %v7880_v19 = vsub.f32 %v16375_v45, %v7801_v0  ;;  %v7881_v43 = vsub.f32 %v16377_v17, %v7801_v0  ;;  %12591 = vpow2.f32 %v7970_v24 }
 0x89b   : > { %v8839_v4 = vsel %vm1066_vm0, %v16814_v12, 0.0 }
 0x89c   : > { %v16819_v63 = vpop.eup %12583  ;;  %v7974_v31 = vmul.f32 1.442695, %v7880_v19  ;;  %v7976_v35 = vmul.f32 1.442695, %v7881_v43 }
 0x89d   : > { %v16821_v1 = vpop.eup %12585  ;;  %v8796_v39 = vpop.xlane.xlu1 %8795 }
 0x89e   : > { %v8810_v25 = vsub.f32 %v8796_v39, %v16498_v21  ;;  %8840 = vadd.xlane.f32.xlu0 %v8839_v4  ;;  %v8078_v16 = vadd.f32 %v16821_v1, %v16819_v63 }
 0x8a0   : > { %v16830_v7 = vpop.eup %12587  ;;  %v8822_v42 = vmul.f32 1.442695, %v8810_v25  ;;  %8079 = vadd.xlane.f32.xlu1 %v8078_v16 }
 0x8a1   : > { %v16834_v45 = vpop.eup %12589  ;;  %v8799_v46 = vpop.xlane.xlu1 %8798 }
 0x8a2   : > { %12593 = vpow2.f32 %v8822_v42  ;;  %v8811_v21 = vsub.f32 %v8799_v46, %v16503_v11  ;;  %v8081_v52 = vadd.f32 %v16834_v45, %v16830_v7  ;;  %v7888_v11 = vsub.f32 %v16399_v32, %v16799_v53 }
 0x8a3   : > { %12595 = vpow2.f32 %v7972_v18 }
 0x8a4   : > { %v8824_v17 = vmul.f32 1.442695, %v8811_v21  ;;  %v16839_v41 = vpop.xlane.xlu0 %8046  ;;  %8082 = vadd.xlane.f32.xlu0 %v8081_v52  ;;  %12597 = vpow2.f32 %v7974_v31  ;;  %v16847_v39 = vpop.eup %12591  ;;  %v7990_v42 = vmul.f32 1.442695, %v7888_v11 }
 0x8a5   : > { %v8802_v51 = vpop.xlane.xlu1 %8801 }
 0x8a6   : > { %12599 = vpow2.f32 %v8824_v17  ;;  %v8812_v0 = vsub.f32 %v8802_v51, %v16518_v56  ;;  %v18698_v56 = vld [vmem:[#allocation150_spill] sm:$0xff] }
 0x8a7   : > { %12601 = vpow2.f32 %v7976_v35  ;;  %v7889_v43 = vsub.f32 %v18698_v56, %v16799_v53 }
 0x8a8   : > { %v8826_v54 = vmul.f32 1.442695, %v8812_v0  ;;  %v16842_v2 = vpop.xlane.xlu0 %7830 }
 0x8a9   : > { %v8805_v24 = vpop.xlane.xlu1 %8804 }
 0x8aa   : > { %12603 = vpow2.f32 %v8826_v54  ;;  %v8813_v19 = vsub.f32 %v8805_v24, %v16523_v23  ;;  %v7892_v23 = vsub.f32 %v16411_v36, %v16816_v59  ;;  %v7992_v36 = vmul.f32 1.442695, %v7889_v43 }
 0x8ab   : > { %v7896_v43 = vsub.f32 %v16423_v33, %v16832_v58 }
 0x8ac   : > { %v16849_v4 = vpop.eup %12593  ;;  %v8828_v25 = vmul.f32 1.442695, %v8813_v19  ;;  %v16851_v16 = vpop.xlane.xlu0 %8052  ;;  %v7998_v24 = vmul.f32 1.442695, %v7892_v23 }
 0x8ad   : > { %v16853_v18 = vpop.eup %12595  ;;  %v7804_v31 = vpop.xlane.xlu1 %7803  ;;  %v8842_v32 = vsel %vm1066_vm0, %v16849_v4, 0.0 }
 0x8ae   : > { %v7882_v46 = vsub.f32 %v16381_v9, %v7804_v31  ;;  %v7883_v21 = vsub.f32 %v16383_v3, %v7804_v31  ;;  %8843 = vadd.xlane.f32.xlu1 %v8842_v32  ;;  %v16863_v52 = vpop.eup %12597  ;;  %12605 = vpow2.f32 %v8828_v25  ;;  %v8084_v0 = vadd.f32 %v16853_v18, %v16847_v39 }
 0x8af   : > { %12607 = vpow2.f32 %v7990_v42  ;;  %v7893_v3 = vsub.f32 %v16413_v37, %v16816_v59 }
 0x8b0   : > { %v16865_v35 = vpop.eup %12599  ;;  %v7978_v17 = vmul.f32 1.442695, %v7882_v46  ;;  %v7980_v53 = vmul.f32 1.442695, %v7883_v21  ;;  %v16867_v51 = vpop.xlane.xlu0 %7836  ;;  %v8006_v21 = vmul.f32 1.442695, %v7896_v43 }
 0x8b1   : > { %v16871_v54 = vpop.eup %12601  ;;  %v7807_v9 = vpop.xlane.xlu1 %7806  ;;  %v8845_v11 = vsel %vm1066_vm0, %v16865_v35, 0.0  ;;  %v8000_v32 = vmul.f32 1.442695, %v7893_v3  ;;  %v18700_v43 = vld [vmem:[#allocation67_spill] sm:$0xff] }
 0x8b2   : > { %12609 = vpow2.f32 %v7978_v17  ;;  %v7884_v19 = vsub.f32 %v16387_v48, %v7807_v9  ;;  %v7885_v25 = vsub.f32 %v16389_v30, %v7807_v9  ;;  %8085 = vadd.xlane.f32.xlu1 %v8084_v0  ;;  %8846 = vadd.xlane.f32.xlu0 %v8845_v11  ;;  %v8087_v31 = vadd.f32 %v16871_v54, %v16863_v52 }
 0x8b3   : > { %12611 = vpow2.f32 %v7980_v53  ;;  %v7897_v30 = vsub.f32 %v16425_v8, %v16832_v58  ;;  %v7900_v58 = vsub.f32 %v16435_v29, %v16842_v2 }
 0x8b4   : > { %v16879_v56 = vpop.eup %12603  ;;  %v7982_v42 = vmul.f32 1.442695, %v7884_v19  ;;  %v7984_v37 = vmul.f32 1.442695, %v7885_v25  ;;  %v16883_v59 = vpop.xlane.xlu0 %8058  ;;  %12613 = vpow2.f32 %v7992_v36 }
 0x8b5   : > { %v7810_v48 = vpop.xlane.xlu1 %7809  ;;  %v8848_v23 = vsel %vm1066_vm0, %v16879_v56, 0.0  ;;  %12615 = vpow2.f32 %v7998_v24  ;;  %v8008_v8 = vmul.f32 1.442695, %v7897_v30 }
 0x8b6   : > { %v7886_v46 = vsub.f32 %v16393_v60, %v7810_v48  ;;  %v7887_v33 = vsub.f32 %v16395_v57, %v7810_v48  ;;  %8849 = vadd.xlane.f32.xlu1 %v8848_v23  ;;  %8088 = vadd.xlane.f32.xlu0 %v8087_v31  ;;  %12617 = vpow2.f32 %v7982_v42  ;;  %v8014_v42 = vmul.f32 1.442695, %v7900_v58  ;;  %v18706_v58 = vld [vmem:[#allocation62_spill] sm:$0xff] }
 0x8b7   : > { %12619 = vpow2.f32 %v7984_v37  ;;  %v18701_v37 = vld [vmem:[#allocation149_spill] sm:$0xff] }
 0x8b8   : > { %v7986_v17 = vmul.f32 1.442695, %v7886_v46  ;;  %v7988_v53 = vmul.f32 1.442695, %v7887_v33  ;;  %v16893_v0 = vpop.eup %12605  ;;  %12621 = vpow2.f32 %v8000_v32  ;;  %v16897_v36 = vpop.xlane.xlu0 %7842  ;;  %v18702_v32 = vld [vmem:[#allocation143_spill] sm:$0xff] }
 0x8b9   : > { %v7816_v3 = vpop.xlane.xlu1 %7815  ;;  %v8851_v9 = vsel %vm1066_vm0, %v16893_v0, 0.0  ;;  %v16903_v11 = vpop.eup %12607 }
 0x8ba   : > { %12623 = vpow2.f32 %v7986_v17  ;;  %v7890_v57 = vsub.f32 %v16405_v55, %v7816_v3  ;;  %v7891_v60 = vsub.f32 %v16407_v27, %v7816_v3  ;;  %18699 = vst [vmem:[#allocation42_spill] sm:$0xff] %v16903_v11  ;;  %8852 = vadd.xlane.f32.xlu0 %v8851_v9  ;;  %v7901_v55 = vsub.f32 %v18700_v43, %v16842_v2  ;;  %v18704_v2 = vld [vmem:[#allocation61_spill] sm:$0xff] }
 0x8bb   : > { %12625 = vpow2.f32 %v7988_v53  ;;  %v7905_v3 = vsub.f32 %v18706_v58, %v16867_v51 }
 0x8bc   : > { %v16905_v24 = vpop.eup %12609  ;;  %12627 = vpow2.f32 %v8006_v21  ;;  %v7994_v19 = vmul.f32 1.442695, %v7890_v57  ;;  %v7996_v29 = vmul.f32 1.442695, %v7891_v60  ;;  %v16918_v46 = vpop.xlane.xlu0 %8064  ;;  %v7904_v21 = vsub.f32 %v18704_v2, %v16867_v51  ;;  %v18709_v51 = vld [vmem:[#allocation142_spill] sm:$0xff]  ;;  %v18712_v2 = vld [vmem:[#allocation151_spill] sm:$0xff] }
 0x8bd   : > { %v16907_v25 = vpop.eup %12611  ;;  %12629 = vpow2.f32 %v8008_v8  ;;  %v7822_v27 = vpop.xlane.xlu1 %7821  ;;  %v8016_v8 = vmul.f32 1.442695, %v7901_v55  ;;  %v8024_v55 = vmul.f32 1.442695, %v7905_v3 }
 0x8be   : > { %12631 = vrcp.f32 %v16839_v41  ;;  %v7894_v31 = vsub.f32 %v18701_v37, %v7822_v27  ;;  %v7895_v30 = vsub.f32 %v18702_v32, %v7822_v27  ;;  %v8090_v48 = vadd.f32 %v16907_v25, %v16905_v24  ;;  %v16916_v23 = vpop.eup %12613 }
 0x8bf   : > { %12633 = vpow2.f32 %v7994_v19  ;;  %v16920_v33 = vpop.eup %12615  ;;  %v8022_v43 = vmul.f32 1.442695, %v7904_v21  ;;  %v8099_v3 = vadd.f32 %v16916_v23, %v16903_v11 }
 0x8c0   : > { %18703 = vst [vmem:[#allocation36_spill] sm:$0xff] %v16920_v33  ;;  %12635 = vpow2.f32 %v7996_v29  ;;  %v8002_v17 = vmul.f32 1.442695, %v7894_v31  ;;  %v8004_v41 = vmul.f32 1.442695, %v7895_v30  ;;  %8091 = vadd.xlane.f32.xlu1 %v8090_v48  ;;  %v16924_v53 = vpop.eup %12617  ;;  %v7849_v37 = vpop.xlane.xlu0 %7848  ;;  %v18711_v30 = vld [vmem:[#allocation145_spill] sm:$0xff] }
 0x8c1   : > { %18705 = vst [vmem:[#allocation44_spill] sm:$0xff] %v16924_v53  ;;  %12637 = vpow2.f32 %v8014_v42  ;;  %v8044_v57 = vpop.xlane.xlu1 %8043  ;;  %v16928_v60 = vpop.eup %12619  ;;  %v7908_v42 = vsub.f32 %v18709_v51, %v16897_v36  ;;  %v7909_v48 = vsub.f32 %v18711_v30, %v16897_v36 }
 0x8c2   : > { %12639 = vpow2.f32 %v8002_v17  ;;  %v16930_v9 = vpop.eup %12621  ;;  %v8093_v19 = vadd.f32 %v16928_v60, %v16924_v53 }
 0x8c3   : > { %12641 = vpow2.f32 %v8004_v41  ;;  %v18713_v41 = vld [vmem:[#allocation66_spill] sm:$0xff] }
 0x8c4   : > { %v16934_v29 = vpop.eup %12623  ;;  %12643 = vrcp.f32 %v8044_v57  ;;  %8094 = vadd.xlane.f32.xlu0 %v8093_v19  ;;  %v18715_v19 = vld [vmem:[#allocation158_spill] sm:$0xff] }
 0x8c5   : > { %18707 = vst [vmem:[#allocation45_spill] sm:$0xff] %v16934_v29  ;;  %v16936_v27 = vpop.eup %12625  ;;  %12645 = vpow2.f32 %v8016_v8  ;;  %v7828_v31 = vpop.xlane.xlu1 %7827  ;;  %v7912_v51 = vsub.f32 %v18715_v19, %v7849_v37 }
 0x8c6   : > { %18708 = vst [vmem:[#allocation47_spill] sm:$0xff] %v16936_v27  ;;  %v16940_v32 = vpop.eup %12627  ;;  %v7898_v17 = vsub.f32 %v18712_v2, %v7828_v31  ;;  %v7899_v21 = vsub.f32 %v18713_v41, %v7828_v31  ;;  %v8096_v58 = vadd.f32 %v16936_v27, %v16934_v29  ;;  %12647 = vrcp.f32 %v16851_v16  ;;  %v18716_v2 = vld [vmem:[#allocation157_spill] sm:$0xff] }
 0x8c7   : > { %18710 = vst [vmem:[#allocation46_spill] sm:$0xff] %v16940_v32  ;;  %v16948_v8 = vpop.eup %12629  ;;  %12649 = vpow2.f32 %v8022_v43  ;;  %v8030_v31 = vmul.f32 1.442695, %v7908_v42  ;;  %v7913_v41 = vsub.f32 %v18716_v2, %v7849_v37  ;;  %v8032_v16 = vmul.f32 1.442695, %v7909_v48  ;;  %v18719_v37 = vld [vmem:[#allocation161_spill] sm:$0xff] }
 0x8c8   : > { %18714 = vst [vmem:[#allocation51_spill] sm:$0xff] %v16948_v8  ;;  %v12632_v57 = vpop.eup %12631  ;;  %v8010_v53 = vmul.f32 1.442695, %v7898_v17  ;;  %v8012_v36 = vmul.f32 1.442695, %v7899_v21  ;;  %8097 = vadd.xlane.f32.xlu1 %v8096_v58  ;;  %12651 = vpow2.f32 %v8024_v55  ;;  %8100 = vadd.xlane.f32.xlu0 %v8099_v3  ;;  %v8105_v17 = vadd.f32 %v16930_v9, %v16920_v33 }
 0x8c9   : > { %v16954_v30 = vpop.eup %12633  ;;  %v8050_v29 = vpop.xlane.xlu1 %8049  ;;  %v8038_v55 = vmul.f32 1.442695, %v7912_v51  ;;  %v8172_v58 = vmul.f32 %v12632_v57, %v18719_v37  ;;  %v8040_v48 = vmul.f32 1.442695, %v7913_v41  ;;  %v8111_v3 = vadd.f32 %v16948_v8, %v16940_v32  ;;  %v18722_v37 = vld [vmem:[#allocation170_spill] sm:$0xff] }
 0x8ca   : > { %v16957_v27 = vpop.eup %12635  ;;  %12653 = vpow2.f32 %v8010_v53  ;;  %v8173_v33 = vmul.f32 %v12632_v57, %v18722_v37 }
 0x8cb   : > { %v16959_v11 = vpop.eup %12637  ;;  %12655 = vpow2.f32 %v8012_v36  ;;  %v8102_v43 = vadd.f32 %v16957_v27, %v16954_v30 }
 0x8cc   : > { %18717 = vst [vmem:[#allocation50_spill] sm:$0xff] %v16959_v11  ;;  %v16965_v21 = vpop.eup %12639  ;;  %12657 = vrcp.f32 %v8050_v29  ;;  %8106 = vadd.xlane.f32.xlu0 %v8105_v17 }
 0x8cd   : > { %18718 = vst [vmem:[#allocation49_spill] sm:$0xff] %v16965_v21  ;;  %v16967_v42 = vpop.eup %12641  ;;  %12659 = vpow2.f32 %v8030_v31  ;;  %8103 = vadd.xlane.f32.xlu1 %v8102_v43  ;;  %v7834_v53 = vpop.xlane.xlu1 %7833  ;;  %v18720_v31 = vld [vmem:[#allocation177_spill] sm:$0xff]  ;;  %v18721_v43 = vld [vmem:[#allocation179_spill] sm:$0xff] }
 0x8ce   : > { %v12644_v19 = vpop.eup %12643  ;;  %12661 = vpow2.f32 %v8032_v16  ;;  %v7902_v36 = vsub.f32 %v18673_v49, %v7834_v53  ;;  %v7903_v2 = vsub.f32 %v18674_v50, %v7834_v53  ;;  %v8108_v29 = vadd.f32 %v16967_v42, %v16965_v21 }
 0x8cf   : > { %v16976_v51 = vpop.eup %12645  ;;  %12663 = vrcp.f32 %v16883_v59  ;;  %v8170_v41 = vmul.f32 %v12644_v19, %v18720_v31  ;;  %v8171_v17 = vmul.f32 %v12644_v19, %v18721_v43 }
 0x8d0   : > { %12665 = vpow2.f32 %v8038_v55  ;;  %v8018_v32 = vmul.f32 1.442695, %v7902_v36  ;;  %v8020_v16 = vmul.f32 1.442695, %v7903_v2  ;;  %v12648_v8 = vpop.eup %12647  ;;  %8112 = vadd.xlane.f32.xlu0 %v8111_v3  ;;  %v8117_v57 = vadd.f32 %v16976_v51, %v16959_v11  ;;  %v18723_v36 = vld [vmem:[#allocation173_spill] sm:$0xff] }
 0x8d1   : > { %12667 = vpow2.f32 %v8040_v48  ;;  %8109 = vadd.xlane.f32.xlu1 %v8108_v29  ;;  %v8435_v49 = vpack.c.bf16 %v8173_v33, %v8171_v17  ;;  %v8056_v50 = vpop.xlane.xlu1 %8055  ;;  %v8434_v53 = vpack.c.bf16 %v8172_v58, %v8170_v41  ;;  %v16982_v21 = vpop.eup %12649  ;;  %v8177_v2 = vmul.f32 %v12648_v8, %v18723_v36  ;;  %v18724_v41 = vld [vmem:[#allocation43_spill] sm:$0xff] }
 0x8d2   : > { %12669 = vpow2.f32 %v8018_v32  ;;  %v16984_v59 = vpop.eup %12651  ;;  %v18725_v17 = vld [vmem:[#allocation39_spill] sm:$0xff] }
 0x8d3   : > { %12671 = vpow2.f32 %v8020_v16  ;;  %8514 = vmatprep.mubr.bf16.mxu0 %v8435_v49  ;;  %v8123_v31 = vadd.f32 %v16984_v59, %v16982_v21  ;;  %v18726_v16 = vld [vmem:[#allocation166_spill] sm:$0xff] }
 0x8d4   : > { %v16988_v55 = vpop.eup %12653  ;;  %12673 = vrcp.f32 %v8056_v50  ;;  %8515 = vmatmul.mubr.bf16.vlgmr.msra.gmra.mrb[108].mxu0 %v8434_v53  ;;  %8118 = vadd.xlane.f32.xlu0 %v8117_v57  ;;  %v8176_v49 = vmul.f32 %v12648_v8, %v18726_v16 }
 0x8d5   : > { %v16990_v48 = vpop.eup %12655  ;;  %v7840_v33 = vpop.xlane.xlu1 %7839  ;;  %12675 = vrcp.f32 %v16918_v46 }
 0x8d6   : > { %v12658_v3 = vpop.eup %12657  ;;  %v7906_v58 = vsub.f32 %v18678_v61, %v7840_v33  ;;  %v7907_v32 = vsub.f32 %v18679_v5, %v7840_v33  ;;  %v8114_v19 = vadd.f32 %v16990_v48, %v16988_v55 }
 0x8d7   : > { %v16997_v29 = vpop.eup %12659  ;;  %v8175_v43 = vmul.f32 %v12658_v3, %v18724_v41  ;;  %v8174_v37 = vmul.f32 %v12658_v3, %v18725_v17  ;;  %v18727_v17 = vld [vmem:[#allocation176_spill] sm:$0xff] }
 0x8d8   : > { %v17004_v50 = vpop.eup %12661  ;;  %v8026_v61 = vmul.f32 1.442695, %v7906_v58  ;;  %v8028_v5 = vmul.f32 1.442695, %v7907_v32  ;;  %8115 = vadd.xlane.f32.xlu1 %v8114_v19  ;;  %8124 = vadd.xlane.f32.xlu0 %v8123_v31  ;;  %v8071_v19 = vpop.xlane.xlu0 %8070 }
 0x8d9   : > { %v12664_v53 = vpop.eup %12663  ;;  %v8437_v57 = vpack.c.bf16 %v8177_v2, %v8175_v43  ;;  %v8062_v33 = vpop.xlane.xlu1 %8061  ;;  %v8436_v36 = vpack.c.bf16 %v8176_v49, %v8174_v37  ;;  %v8129_v8 = vadd.f32 %v17004_v50, %v16997_v29 }
 0x8da   : > { %v17007_v11 = vpop.eup %12665  ;;  %12677 = vpow2.f32 %v8026_v61  ;;  %v8181_v37 = vmul.f32 %v12664_v53, %v18727_v17 }
 0x8db   : > { %v17009_v41 = vpop.eup %12667  ;;  %12679 = vpow2.f32 %v8028_v5  ;;  %8522 = vmatprep.mubr.bf16.mxu0 %v8437_v57  ;;  %v18728_v5 = vld [vmem:[#allocation172_spill] sm:$0xff] }
 0x8dc   : > { %v17013_v3 = vpop.eup %12669  ;;  %12681 = vrcp.f32 %v8062_v33  ;;  %8523 = vmatmul.mubr.bf16.gmra.mrb[112].mxu0 %v8436_v36  ;;  %8130 = vadd.xlane.f32.xlu0 %v8129_v8  ;;  %v8135_v16 = vadd.f32 %v17009_v41, %v17007_v11  ;;  %v8180_v57 = vmul.f32 %v12664_v53, %v18728_v5 }
 0x8dd   : > { %v17015_v58 = vpop.eup %12671  ;;  %v7846_v46 = vpop.xlane.xlu1 %7845  ;;  %12683 = vrcp.f32 %v8071_v19  ;;  %v18729_v19 = vld [vmem:[#allocation178_spill] sm:$0xff] }
 0x8de   : > { %v12674_v32 = vpop.eup %12673  ;;  %v7910_v2 = vsub.f32 %v18683_v14, %v7846_v46  ;;  %v7911_v31 = vsub.f32 %v18684_v34, %v7846_v46  ;;  %v8120_v43 = vadd.f32 %v17015_v58, %v17013_v3 }
 0x8df   : > { %v8179_v49 = vmul.f32 %v12674_v32, %v16718_v20  ;;  %v8178_v61 = vmul.f32 %v12674_v32, %v16715_v10  ;;  %v12676_v46 = vpop.eup %12675 }
 0x8e0   : > { %v8034_v33 = vmul.f32 1.442695, %v7910_v2  ;;  %v8036_v36 = vmul.f32 1.442695, %v7911_v31  ;;  %8121 = vadd.xlane.f32.xlu1 %v8120_v43  ;;  %8136 = vadd.xlane.f32.xlu0 %v8135_v16  ;;  %v8185_v2 = vmul.f32 %v12676_v46, %v18729_v19  ;;  %v18730_v43 = vld [vmem:[#allocation175_spill] sm:$0xff] }
 0x8e1   : > { %v8439_v14 = vpack.c.bf16 %v8181_v37, %v8179_v49  ;;  %v8068_v34 = vpop.xlane.xlu1 %8067  ;;  %v8438_v8 = vpack.c.bf16 %v8180_v57, %v8178_v61  ;;  %v8184_v37 = vmul.f32 %v12676_v46, %v18730_v43  ;;  %v10028_v19 = vld [vmem:[#allocation3] ss:$0 sm:$0xff] }
 0x8e2   : > { %12685 = vpow2.f32 %v8034_v33 }
 0x8e3   : > { %12687 = vpow2.f32 %v8036_v36  ;;  %8530 = vmatprep.mubr.bf16.mxu0 %v8439_v14  ;;  %v18731_v14 = vld [vmem:[#allocation40_spill] sm:$0xff] }
 0x8e4   : > { %v17027_v17 = vpop.eup %12677  ;;  %12689 = vrcp.f32 %v8068_v34  ;;  %8531 = vmatmul.mubr.bf16.gmra.mrb[116].mxu0 %v8438_v8  ;;  %v18732_v8 = vld [vmem:[#allocation37_spill] sm:$0xff] }
 0x8e5   : > { %v17029_v20 = vpop.eup %12679 }
 0x8e6   : > { %v12682_v10 = vpop.eup %12681  ;;  %v8126_v53 = vadd.f32 %v17029_v20, %v17027_v17 }
 0x8e7   : > { %v8183_v32 = vmul.f32 %v12682_v10, %v16737_v44  ;;  %v8182_v31 = vmul.f32 %v12682_v10, %v16735_v47  ;;  %v12684_v61 = vpop.eup %12683 }
 0x8e8   : > { %8127 = vadd.xlane.f32.xlu1 %v8126_v53  ;;  %v8189_v47 = vmul.f32 %v12684_v61, %v18731_v14  ;;  %v8188_v46 = vmul.f32 %v12684_v61, %v18732_v8 }
 0x8e9   : > { %v8441_v16 = vpack.c.bf16 %v8185_v2, %v8183_v32  ;;  %v8440_v49 = vpack.c.bf16 %v8184_v37, %v8182_v31  ;;  %v10045_v32 = vld [vmem:[#allocation4] ss:$0 sm:$0xff] }
 0x8eb   : > { %8538 = vmatprep.mubr.bf16.mxu0 %v8441_v16 }
 0x8ec   : > { %v17037_v5 = vpop.eup %12685  ;;  %8539 = vmatmul.mubr.bf16.gmra.mrb[120].mxu0 %v8440_v49 }
 0x8ed   : > { %v17039_v57 = vpop.eup %12687 }
 0x8ee   : > { %v12690_v33 = vpop.eup %12689  ;;  %v8132_v44 = vadd.f32 %v17039_v57, %v17037_v5 }
 0x8ef   : > { %v8187_v36 = vmul.f32 %v12690_v33, %v16752_v38  ;;  %v8186_v34 = vmul.f32 %v12690_v33, %v16750_v62 }
 0x8f0   : > { %8133 = vadd.xlane.f32.xlu1 %v8132_v44 }
 0x8f1   : > { %v8443_v10 = vpack.c.bf16 %v8189_v47, %v8187_v36  ;;  %v8442_v53 = vpack.c.bf16 %v8188_v46, %v8186_v34 }
 0x8f3   : > { %8546 = vmatprep.mubr.bf16.mxu0 %v8443_v10 }
 0x8f4   : > { %8547 = vmatmul.mubr.bf16.gmra.mrb[124].mxu0 %v8442_v53 }
 0x8f6   : > { %9054 = vperm.xlu0 %12333, %v10045_v32  }
 0x901   : > { %8650 = vperm.xlu1 %12334, %v10028_v19  }
 0x91f   : > { %v8832_v2 = vpop.xlane.xlu1 %8831 }
 0x920   : > { %12691 = vrcp.f32 %v8832_v2 }
 0x923   : > { %v8074_v31 = vpop.xlane.xlu1 %8073  ;;  %v8835_v43 = vpop.xlane.xlu0 %8834 }
 0x924   : > { %12693 = vrcp.f32 %v8835_v43 }
 0x925   : > { %12695 = vrcp.f32 %v8074_v31 }
 0x927   : > { %v8838_v38 = vpop.xlane.xlu1 %8837  ;;  %v8077_v37 = vpop.xlane.xlu0 %8076 }
 0x928   : > { %12697 = vrcp.f32 %v8077_v37 }
 0x929   : > { %12699 = vrcp.f32 %v8838_v38 }
 0x92a   : > { %v12692_v16 = vpop.eup %12691 }
 0x92b   : > { %v8841_v62 = vpop.xlane.xlu0 %8840  ;;  %v8862_v44 = vmul.f32 %v12692_v16, %v16787_v28 }
 0x92c   : > { %12701 = vrcp.f32 %v8841_v62 }
 0x92d   : > { %v8080_v49 = vpop.xlane.xlu1 %8079 }
 0x92e   : > { %v12694_v61 = vpop.eup %12693  ;;  %12703 = vrcp.f32 %v8080_v49 }
 0x92f   : > { %v12696_v33 = vpop.eup %12695  ;;  %v8863_v36 = vmul.f32 %v12694_v61, %v16797_v15 }
 0x930   : > { %v8191_v8 = vmul.f32 %v12696_v33, %v16789_v6  ;;  %v8190_v32 = vmul.f32 %v12696_v33, %v16785_v22 }
 0x931   : > { %v8083_v14 = vpop.xlane.xlu0 %8082  ;;  %v8870_v47 = vpack.c.bf16 %v8863_v36, %v8862_v44 }
 0x932   : > { %12705 = vrcp.f32 %v8083_v14  ;;  %v12698_v34 = vpop.eup %12697 }
 0x933   : > { %v12700_v46 = vpop.eup %12699  ;;  %12182 = vmatprep.subr.msk.bf16.mxu1 %vm1066_vm0, %v8870_v47  ;;  %v8875_v10 = vsel %vm1066_vm0, %v8870_v47, 0  ;;  %v8193_v53 = vmul.f32 %v12698_v34, %v16803_v26  ;;  %v8192_v19 = vmul.f32 %v12698_v34, %v16795_v40 }
 0x934   : > { %11575 = vmatpush3.bf16.xpose.msra.mxu1 %v8875_v10  ;;  %v8864_v31 = vmul.f32 %v12700_v46, %v16807_v13 }
 0x935   : > { %v8445_v15 = vpack.c.bf16 %v8193_v53, %v8191_v8  ;;  %v8444_v2 = vpack.c.bf16 %v8192_v19, %v8190_v32 }
 0x936   : > { %v12702_v28 = vpop.eup %12701 }
 0x937   : > { %v8865_v43 = vmul.f32 %v12702_v28, %v16814_v12  ;;  %8554 = vmatprep.mubr.bf16.mxu0 %v8445_v15 }
 0x938   : > { %8555 = vmatmul.mubr.bf16.gmra.mrb[128].mxu0 %v8444_v2  ;;  %v12704_v38 = vpop.eup %12703 }
 0x939   : > { %v8871_v6 = vpack.c.bf16 %v8865_v43, %v8864_v31  ;;  %v8195_v40 = vmul.f32 %v12704_v38, %v16821_v1  ;;  %v8194_v16 = vmul.f32 %v12704_v38, %v16819_v63  ;;  %v12523_v38 = vld [vmem:[#allocation19] sm:$0xff]  }
 0x93b   : > { %v8844_v37 = vpop.xlane.xlu1 %8843  ;;  %12183 = vmatprep.subr.msk.bf16.mxu1 %vm1066_vm0, %v8871_v6  ;;  %v8878_v26 = vsel %vm1066_vm0, %v8871_v6, 0 }
 0x93c   : > { %v12706_v22 = vpop.eup %12705  ;;  %11577 = vmatpush3.bf16.xpose.msra.mxu1 %v8878_v26  ;;  %12707 = vrcp.f32 %v8844_v37 }
 0x93d   : > { %v8197_v62 = vmul.f32 %v12706_v22, %v16834_v45  ;;  %v8196_v13 = vmul.f32 %v12706_v22, %v16830_v7 }
 0x93f   : > { %v8086_v12 = vpop.xlane.xlu1 %8085  ;;  %v8847_v49 = vpop.xlane.xlu0 %8846  ;;  %v8447_v61 = vpack.c.bf16 %v8197_v62, %v8195_v40  ;;  %v8446_v33 = vpack.c.bf16 %v8196_v13, %v8194_v16 }
 0x940   : > { %12709 = vrcp.f32 %v8847_v49 }
 0x941   : > { %8562 = vmatprep.mubr.bf16.mxu0 %v8447_v61  ;;  %12711 = vrcp.f32 %v8086_v12  ;;  %v18733_v12 = vld [vmem:[#allocation44_spill] sm:$0xff] }
 0x942   : > { %8563 = vmatmul.mubr.bf16.gmra.mrb[132].mxu0 %v8446_v33  ;;  %v18734_v33 = vld [vmem:[#allocation133_spill] sm:$0xff] }
 0x943   : > { %v8089_v44 = vpop.xlane.xlu0 %8088  ;;  %v8850_v36 = vpop.xlane.xlu1 %8849 }
 0x944   : > { %12713 = vrcp.f32 %v8089_v44 }
 0x945   : > { %12715 = vrcp.f32 %v8850_v36 }
 0x946   : > { %v12708_v14 = vpop.eup %12707 }
 0x947   : > { %v8853_v1 = vpop.xlane.xlu0 %8852  ;;  %v8866_v7 = vmul.f32 %v12708_v14, %v16849_v4  ;;  %v18735_v14 = vld [vmem:[#allocation47_spill] sm:$0xff] }
 0x948   : > { %12717 = vrcp.f32 %v8853_v1 }
 0x94a   : > { %v12710_v45 = vpop.eup %12709 }
 0x94b   : > { %v12712_v63 = vpop.eup %12711  ;;  %v8867_v47 = vmul.f32 %v12710_v45, %v16865_v35 }
 0x94c   : > { %v8199_v10 = vmul.f32 %v12712_v63, %v16853_v18  ;;  %v8198_v19 = vmul.f32 %v12712_v63, %v16847_v39  ;;  %v18736_v63 = vld [vmem:[#allocation71_spill] sm:$0xff] }
 0x94d   : > { %v8092_v34 = vpop.xlane.xlu1 %8091  ;;  %v8872_v8 = vpack.c.bf16 %v8867_v47, %v8866_v7  ;;  %v18737_v7 = vld [vmem:[#allocation45_spill] sm:$0xff] }
 0x94e   : > { %v12714_v46 = vpop.eup %12713  ;;  %12719 = vrcp.f32 %v8092_v34  ;;  %v18738_v34 = vld [vmem:[#allocation42_spill] sm:$0xff] }
 0x94f   : > { %12184 = vmatprep.subr.msk.bf16.mxu1 %vm1066_vm0, %v8872_v8  ;;  %v8881_v53 = vsel %vm1066_vm0, %v8872_v8, 0  ;;  %v8201_v32 = vmul.f32 %v12714_v46, %v16871_v54  ;;  %v8200_v28 = vmul.f32 %v12714_v46, %v16863_v52  ;;  %v12716_v15 = vpop.eup %12715 }
 0x950   : > { %11579 = vmatpush3.bf16.xpose.msra.mxu1 %v8881_v53  ;;  %v8868_v18 = vmul.f32 %v12716_v15, %v16879_v56  ;;  %v18740_v15 = vld [vmem:[#allocation89_spill] sm:$0xff] }
 0x951   : > { %v8095_v4 = vpop.xlane.xlu0 %8094  ;;  %v8449_v35 = vpack.c.bf16 %v8201_v32, %v8199_v10  ;;  %v8448_v2 = vpack.c.bf16 %v8200_v28, %v8198_v19  ;;  %v18739_v28 = vld [vmem:[#allocation73_spill] sm:$0xff] }
 0x952   : > { %v12718_v31 = vpop.eup %12717  ;;  %12721 = vrcp.f32 %v8095_v4 }
 0x953   : > { %8570 = vmatprep.mubr.bf16.mxu0 %v8449_v35  ;;  %v8869_v43 = vmul.f32 %v12718_v31, %v16893_v0 }
 0x954   : > { %8571 = vmatmul.mubr.bf16.gmra.mrb[136].mxu0 %v8448_v2 }
 0x955   : > { %v8098_v6 = vpop.xlane.xlu1 %8097  ;;  %v8101_v54 = vpop.xlane.xlu0 %8100  ;;  %v8873_v39 = vpack.c.bf16 %v8869_v43, %v8868_v18 }
 0x956   : > { %12723 = vrcp.f32 %v8098_v6  ;;  %v18742_v6 = vld [vmem:[#allocation51_spill] sm:$0xff] }
 0x957   : > { %12725 = vrcp.f32 %v8101_v54  ;;  %12185 = vmatprep.subr.msk.bf16.mxu1 %vm1066_vm0, %v8873_v39  ;;  %v8884_v52 = vsel %vm1066_vm0, %v8873_v39, 0 }
 0x958   : > { %11581 = vmatpush3.bf16.xpose.msra.mxu1 %v8884_v52  ;;  %v12720_v22 = vpop.eup %12719 }
 0x959   : > { %v8107_v26 = vpop.xlane.xlu0 %8106  ;;  %11614 = vmatprep.subr.bf16.mxu1 %v12523_v38  ;;  %v8203_v62 = vmul.f32 %v12720_v22, %v16907_v25  ;;  %v8202_v13 = vmul.f32 %v12720_v22, %v16905_v24 }
 0x95a   : > { %v8104_v37 = vpop.xlane.xlu1 %8103 }
 0x95b   : > { %12727 = vrcp.f32 %v8104_v37  ;;  %v18744_v37 = vld [vmem:[#allocation48_spill] sm:$0xff] }
 0x95c   : > { %12729 = vrcp.f32 %v8107_v26  ;;  %v12722_v56 = vpop.eup %12721 }
 0x95d   : > { %v8113_v40 = vpop.xlane.xlu0 %8112  ;;  %v8205_v16 = vmul.f32 %v12722_v56, %v16928_v60  ;;  %v8204_v49 = vmul.f32 %v12722_v56, %v18733_v12  ;;  %v18745_v56 = vld [vmem:[#allocation49_spill] sm:$0xff] }
 0x95e   : > { %v8110_v0 = vpop.xlane.xlu1 %8109  ;;  %v18747_v12 = vld [vmem:[#allocation57_spill] sm:$0xff] }
 0x95f   : > { %12731 = vrcp.f32 %v8110_v0  ;;  %11583 = vmatmul.mubr.msk.bf16.vlgmr.msra.gmra.mrb[112].mxu1 %vm1066_vm0, %v18734_v33  ;;  %v8451_v44 = vpack.c.bf16 %v8205_v16, %v8203_v62  ;;  %v8450_v36 = vpack.c.bf16 %v8204_v49, %v8202_v13  ;;  %v18748_v33 = vld [vmem:[#allocation64_spill] sm:$0xff] }
 0x960   : > { %v12724_v61 = vpop.eup %12723  ;;  %12733 = vrcp.f32 %v8113_v40  ;;  %11586 = vmatprep.mubr.msk.bf16.mxu1 %vm1066_vm0, %v18736_v63  ;;  %11615 = vmatpush3.bf16.msra.mxu1 %v12523_v38  ;;  %v18743_v38 = vld [vmem:[#allocation93_spill] sm:$0xff]  ;;  %v18749_v63 = vld [vmem:[#allocation50_spill] sm:$0xff] }
 0x961   : > { %v12726_v1 = vpop.eup %12725  ;;  %v8207_v45 = vmul.f32 %v12724_v61, %v18735_v14  ;;  %8578 = vmatprep.mubr.bf16.mxu0 %v8451_v44  ;;  %v8206_v47 = vmul.f32 %v12724_v61, %v18737_v7  ;;  %v8119_v19 = vpop.xlane.xlu0 %8118 }
 0x962   : > { %v8209_v24 = vmul.f32 %v12726_v1, %v16916_v23  ;;  %8579 = vmatmul.mubr.bf16.gmra.mrb[140].mxu0 %v8450_v36  ;;  %v8208_v8 = vmul.f32 %v12726_v1, %v18738_v34 }
 0x964   : > { %v8453_v25 = vpack.c.bf16 %v8209_v24, %v8207_v45  ;;  %v8452_v23 = vpack.c.bf16 %v8208_v8, %v8206_v47  ;;  %v18751_v47 = vld [vmem:[#allocation139_spill] sm:$0xff] }
 0x965   : > { %v12728_v60 = vpop.eup %12727  ;;  %v8116_v10 = vpop.xlane.xlu1 %8115 }
 0x966   : > { %v12730_v46 = vpop.eup %12729  ;;  %8586 = vmatprep.mubr.bf16.mxu0 %v8453_v25  ;;  %v8211_v53 = vmul.f32 %v12728_v60, %v16957_v27  ;;  %12735 = vrcp.f32 %v8116_v10  ;;  %v8210_v31 = vmul.f32 %v12728_v60, %v16954_v30  ;;  %v18741_v27 = vld [vmem:[#allocation36_spill] sm:$0xff]  ;;  %v8125_v39 = vpop.xlane.xlu0 %8124 }
 0x967   : > { %v8213_v32 = vmul.f32 %v12730_v46, %v16930_v9  ;;  %11587 = vmatmul.mubr.msk.bf16.gmra.mrb[116].mxu1 %vm1066_vm0, %v18739_v28  ;;  %12737 = vrcp.f32 %v8119_v19  ;;  %v8212_v18 = vmul.f32 %v12730_v46, %v18741_v27  ;;  %v18753_v19 = vld [vmem:[#allocation146_spill] sm:$0xff]  ;;  %v12524_v27 = vld [vmem:[#allocation19 + $0x8] sm:$0xff]  }
 0x968   : > { %11590 = vmatprep.mubr.msk.bf16.mxu1 %vm1066_vm0, %v18740_v15  ;;  %11616 = vmatprep.subr.bf16.mxu1 %v12524_v27 }
 0x969   : > { %v12732_v4 = vpop.eup %12731  ;;  %v8455_v35 = vpack.c.bf16 %v8213_v32, %v8211_v53  ;;  %v8454_v52 = vpack.c.bf16 %v8212_v18, %v8210_v31  ;;  %v18752_v53 = vld [vmem:[#allocation140_spill] sm:$0xff]  ;;  %11617 = vmatpush3.bf16.msra.mxu1 %v12524_v27 }
 0x96a   : > { %v12734_v2 = vpop.eup %12733  ;;  %8587 = vmatmul.mubr.bf16.gmra.mrb[144].mxu0 %v8452_v23  ;;  %v8215_v43 = vmul.f32 %v12732_v4, %v16967_v42  ;;  %v8214_v0 = vmul.f32 %v12732_v4, %v18745_v56  ;;  %v18746_v42 = vld [vmem:[#allocation46_spill] sm:$0xff]  ;;  %v8131_v13 = vpop.xlane.xlu0 %8130  ;;  %v18754_v4 = vld [vmem:[#allocation144_spill] sm:$0xff] }
 0x96b   : > { %8594 = vmatprep.mubr.bf16.mxu0 %v8455_v35  ;;  %v8217_v54 = vmul.f32 %v12734_v2, %v18742_v6  ;;  %v8216_v40 = vmul.f32 %v12734_v2, %v18746_v42  ;;  %v18755_v2 = vld [vmem:[#allocation147_spill] sm:$0xff] }
 0x96d   : > { %v8122_v9 = vpop.xlane.xlu1 %8121  ;;  %v8457_v26 = vpack.c.bf16 %v8217_v54, %v8215_v43  ;;  %v8456_v61 = vpack.c.bf16 %v8216_v40, %v8214_v0 }
 0x96e   : > { %12739 = vrcp.f32 %v8122_v9  ;;  %v8137_v25 = vpop.xlane.xlu0 %8136 }
 0x96f   : > { %11591 = vmatmul.mubr.msk.bf16.gmra.mrb[120].mxu1 %vm1066_vm0, %v18743_v38  ;;  %12741 = vrcp.f32 %v8125_v39 }
 0x970   : > { %11594 = vmatprep.mubr.msk.bf16.mxu1 %vm1066_vm0, %v18744_v37  ;;  %v12736_v22 = vpop.eup %12735 }
 0x971   : > { %v12738_v30 = vpop.eup %12737  ;;  %v8219_v16 = vmul.f32 %v12736_v22, %v16990_v48  ;;  %v8218_v14 = vmul.f32 %v12736_v22, %v16988_v55 }
 0x972   : > { %8595 = vmatmul.mubr.bf16.gmra.mrb[148].mxu0 %v8454_v52  ;;  %v8221_v49 = vmul.f32 %v12738_v30, %v16976_v51  ;;  %v8220_v24 = vmul.f32 %v12738_v30, %v18749_v63  ;;  %v18750_v51 = vld [vmem:[#allocation68_spill] sm:$0xff] }
 0x973   : > { %8602 = vmatprep.mubr.bf16.mxu0 %v8457_v26 }
 0x974   : > { %v8459_v44 = vpack.c.bf16 %v8221_v49, %v8219_v16  ;;  %v8458_v7 = vpack.c.bf16 %v8220_v24, %v8218_v14  ;;  %v12526_v16 = vld [vmem:[#allocation19 + $0x18] sm:$0xff]  }
 0x975   : > { %v8128_v62 = vpop.xlane.xlu1 %8127 }
 0x976   : > { %12743 = vrcp.f32 %v8128_v62 }
 0x977   : > { %11595 = vmatmul.mubr.msk.bf16.gmra.mrb[124].mxu1 %vm1066_vm0, %v18747_v12  ;;  %12745 = vrcp.f32 %v8131_v13 }
 0x978   : > { %11598 = vmatprep.mubr.msk.bf16.mxu1 %vm1066_vm0, %v18748_v33  ;;  %v12740_v36 = vpop.eup %12739 }
 0x979   : > { %v12742_v1 = vpop.eup %12741  ;;  %v8223_v45 = vmul.f32 %v12740_v36, %v17015_v58  ;;  %v8222_v58 = vmul.f32 %v12740_v36, %v17013_v3 }
 0x97a   : > { %8603 = vmatmul.mubr.bf16.gmra.mrb[152].mxu0 %v8456_v61  ;;  %v8225_v60 = vmul.f32 %v12742_v1, %v16984_v59  ;;  %v8224_v10 = vmul.f32 %v12742_v1, %v16982_v21 }
 0x97b   : > { %8610 = vmatprep.mubr.bf16.mxu0 %v8459_v44 }
 0x97c   : > { %v8461_v34 = vpack.c.bf16 %v8225_v60, %v8223_v45  ;;  %v8460_v32 = vpack.c.bf16 %v8224_v10, %v8222_v58 }
 0x97d   : > { %v8134_v48 = vpop.xlane.xlu1 %8133 }
 0x97e   : > { %12747 = vrcp.f32 %v8134_v48 }
 0x97f   : > { %11599 = vmatmul.mubr.msk.bf16.gmra.mrb[128].mxu1 %vm1066_vm0, %v18750_v51  ;;  %12749 = vrcp.f32 %v8137_v25 }
 0x980   : > { %11602 = vmatprep.mubr.msk.bf16.mxu1 %vm1066_vm0, %v18751_v47  ;;  %v12744_v8 = vpop.eup %12743 }
 0x981   : > { %v12746_v55 = vpop.eup %12745  ;;  %v8227_v46 = vmul.f32 %v12744_v8, %v17029_v20  ;;  %v8226_v3 = vmul.f32 %v12744_v8, %v17027_v17 }
 0x982   : > { %8611 = vmatmul.mubr.bf16.gmra.mrb[156].mxu0 %v8458_v7  ;;  %v8229_v59 = vmul.f32 %v12746_v55, %v17004_v50  ;;  %v8228_v21 = vmul.f32 %v12746_v55, %v16997_v29  ;;  %v18756_v29 = vld [vmem:[#allocation148_spill] sm:$0xff] }
 0x983   : > { %8618 = vmatprep.mubr.bf16.mxu0 %v8461_v34 }
 0x984   : > { %v8463_v28 = vpack.c.bf16 %v8229_v59, %v8227_v46  ;;  %v8462_v35 = vpack.c.bf16 %v8228_v21, %v8226_v3  ;;  %v17166_v21 = vpop.permute.xlu0 %9054 }
 0x987   : > { %11603 = vmatmul.mubr.msk.bf16.gmra.mrb[132].mxu1 %vm1066_vm0, %v18752_v53 }
 0x988   : > { %11606 = vmatprep.mubr.msk.bf16.mxu1 %vm1066_vm0, %v18753_v19  ;;  %v12748_v23 = vpop.eup %12747 }
 0x989   : > { %v12750_v15 = vpop.eup %12749  ;;  %v8231_v20 = vmul.f32 %v12748_v23, %v17039_v57  ;;  %v8230_v18 = vmul.f32 %v12748_v23, %v17037_v5 }
 0x98a   : > { %8619 = vmatmul.mubr.bf16.gmra.mrb[160].mxu0 %v8460_v32  ;;  %v8233_v50 = vmul.f32 %v12750_v15, %v17009_v41  ;;  %v8232_v17 = vmul.f32 %v12750_v15, %v17007_v11  ;;  %v12525_v41 = vld [vmem:[#allocation19 + $0x10] sm:$0xff]   ;;  %v17161_v15 = vpop.permute.xlu1 %8650 }
 0x98b   : > { %8626 = vmatprep.mubr.bf16.mxu0 %v8463_v28  ;;  %11618 = vmatprep.subr.bf16.mxu1 %v12525_v41 }
 0x98c   : > { %v8465_v31 = vpack.c.bf16 %v8233_v50, %v8231_v20  ;;  %v8464_v57 = vpack.c.bf16 %v8232_v17, %v8230_v18  ;;  %11619 = vmatpush3.bf16.msra.mxu1 %v12525_v41  ;;  %v17164_v20 = vld [vmem:[#allocation11] ss:$0 sm:$0xff]  ;;  %v12753_v41 = vld [vmem:[%s13602_s6 + $0x28] sm:$0xff] }
 0x98d   : > { %11620 = vmatprep.subr.bf16.mxu1 %v12526_v16 }
 0x98f   : > { %11607 = vmatmul.mubr.msk.bf16.gmra.mrb[136].mxu1 %vm1066_vm0, %v18754_v4 }
 0x990   : > { %11610 = vmatprep.mubr.msk.bf16.mxu1 %vm1066_vm0, %v18755_v2  ;;  %11621 = vmatpush3.bf16.msra.mxu1 %v12526_v16 }
 0x992   : > { %8627 = vmatmul.mubr.bf16.gmra.mrb[164].mxu0 %v8462_v35 }
 0x993   : > { %8634 = vmatprep.mubr.bf16.mxu0 %v8465_v31 }
 0x997   : > { %11611 = vmatmul.mubr.msk.bf16.gmra.mrb[140].mxu1 %vm1066_vm0, %v18756_v29  ;;  %v18757_v29 = vld [vmem:[#allocation154_spill] sm:$0xff] }
 0x99a   : > { %8635 = vmatmul.mubr.bf16.gmra.mrb[168].mxu0 %v8464_v57  ;;  %v7099_v57 = vadd.f32 %v18757_v29, %v17164_v20 }
 0x9a7   : > { %v10526_v9 = vpop.f32.mrb[108].mxu0 }
 0x9a8   : > { %v10527_v43 = vpop.f32.mrb[109].mxu0 }
 0x9a9   : > { %v10528_v6 = vadd.f32 %v10527_v43, %v10526_v9  ;;  %v10529_v54 = vpop.f32.mrb[110].mxu0 }
 0x9aa   : > { %v10530_v39 = vpop.f32.mrb[111].mxu0 }
 0x9ab   : > { %v10531_v38 = vadd.f32 %v10530_v39, %v10529_v54  ;;  %v8653_v4 = vmul.f32 %v10528_v6, %v17161_v15 }
 0x9ad   : > { %v8654_v27 = vmul.f32 %v10531_v38, %v17161_v15 }
 0x9af   : > { %v10532_v52 = vpop.f32.mrb[112].mxu0 }
 0x9b0   : > { %v10533_v5 = vpop.f32.mrb[113].mxu0 }
 0x9b1   : > { %v10534_v37 = vadd.f32 %v10533_v5, %v10532_v52  ;;  %v10535_v26 = vpop.f32.mrb[114].mxu0  ;;  %v18758_v52 = vld [vmem:[#allocation153_spill] sm:$0xff] }
 0x9b2   : > { %v10536_v11 = vpop.f32.mrb[115].mxu0  ;;  %v7097_v5 = vadd.f32 %v18758_v52, %v17164_v20 }
 0x9b3   : > { %v10537_v22 = vadd.f32 %v10536_v11, %v10535_v26  ;;  %v8655_v3 = vmul.f32 %v10534_v37, %v17161_v15  ;;  %v12754_v37 = vld [vmem:[%s13602_s6 + $0x18] sm:$0xff] }
 0x9b4   : > { %v8685_v38 = vadd.f32 %v12754_v37, %v8653_v4 }
 0x9b5   : > { %v8656_v35 = vmul.f32 %v10537_v22, %v17161_v15  ;;  %v8687_v9 = vadd.f32 %v12753_v41, %v8655_v3 }
 0x9b7   : > { %v10538_v30 = vpop.f32.mrb[116].mxu0 }
 0x9b8   : > { %v10539_v56 = vpop.f32.mrb[117].mxu0 }
 0x9b9   : > { %v17137_v0 = vadd.f32 %v10539_v56, %v10538_v30  ;;  %v10541_v42 = vpop.f32.mrb[118].mxu0  ;;  %v12755_v30 = vld [vmem:[%s13602_s6 + $0x30] sm:$0xff] }
 0x9ba   : > { %v10542_v40 = vpop.f32.mrb[119].mxu0  ;;  %v8688_v56 = vadd.f32 %v12755_v30, %v8656_v35  ;;  %v18762_v35 = vld [vmem:[#allocation164_spill] sm:$0xff] }
 0x9bb   : > { %v17139_v62 = vadd.f32 %v10542_v40, %v10541_v42 }
 0x9bf   : > { %v10544_v13 = vpop.f32.mrb[120].mxu0 }
 0x9c0   : > { %v10545_v12 = vpop.f32.mrb[121].mxu0 }
 0x9c1   : > { %v17141_v49 = vadd.f32 %v10545_v12, %v10544_v13  ;;  %v10547_v61 = vpop.f32.mrb[122].mxu0  ;;  %v18759_v12 = vld [vmem:[#allocation156_spill] sm:$0xff] }
 0x9c2   : > { %v10548_v33 = vpop.f32.mrb[123].mxu0 }
 0x9c3   : > { %v17143_v44 = vadd.f32 %v10548_v33, %v10547_v61  ;;  %v7100_v61 = vadd.f32 %v18759_v12, %v17164_v20  ;;  %v12756_v33 = vld [vmem:[%s13602_s6 + $0x20] sm:$0xff] }
 0x9c7   : > { %v10550_v36 = vpop.f32.mrb[124].mxu0 }
 0x9c8   : > { %v10551_v1 = vpop.f32.mrb[125].mxu0 }
 0x9c9   : > { %v17145_v14 = vadd.f32 %v10551_v1, %v10550_v36  ;;  %v10553_v48 = vpop.f32.mrb[126].mxu0  ;;  %v8686_v36 = vadd.f32 %v12756_v33, %v8654_v27 }
 0x9ca   : > { %v10554_v45 = vpop.f32.mrb[127].mxu0 }
 0x9cb   : > { %v17147_v63 = vadd.f32 %v10554_v45, %v10553_v48 }
 0xa0b   : > { %v10556_v24 = vpop.f32.mrb[128].mxu0 }
 0xa0c   : > { %v10557_v25 = vpop.f32.mrb[129].mxu0 }
 0xa0d   : > { %v17149_v51 = vadd.f32 %v10557_v25, %v10556_v24  ;;  %v10559_v60 = vpop.f32.mrb[130].mxu0  ;;  %v8659_v24 = vmul.f32 %v17141_v49, %v17161_v15  ;;  %v8660_v49 = vmul.f32 %v17143_v44, %v17161_v15 }
 0xa0e   : > { %v10560_v7 = vpop.f32.mrb[131].mxu0 }
 0xa0f   : > { %v17151_v47 = vadd.f32 %v10560_v7, %v10559_v60 }
 0xa15   : > { %v10562_v34 = vpop.f32.mrb[132].mxu0 }
 0xa16   : > { %v10563_v8 = vpop.f32.mrb[133].mxu0 }
 0xa17   : > { %v17153_v55 = vadd.f32 %v10563_v8, %v10562_v34  ;;  %v10565_v58 = vpop.f32.mrb[134].mxu0  ;;  %v18760_v34 = vld [vmem:[#allocation163_spill] sm:$0xff] }
 0xa18   : > { %v10566_v46 = vpop.f32.mrb[135].mxu0  ;;  %v7098_v8 = vadd.f32 %v18760_v34, %v17164_v20 }
 0xa19   : > { %v17155_v10 = vadd.f32 %v10566_v46, %v10565_v58  ;;  %v8657_v58 = vmul.f32 %v17137_v0, %v17161_v15  ;;  %v8658_v0 = vmul.f32 %v17139_v62, %v17161_v15 }
 0xa27   : > { %v10568_v53 = vpop.f32.mrb[136].mxu0 }
 0xa28   : > { %v10569_v59 = vpop.f32.mrb[137].mxu0 }
 0xa29   : > { %v17157_v32 = vadd.f32 %v10569_v59, %v10568_v53  ;;  %v10571_v19 = vpop.f32.mrb[138].mxu0 }
 0xa2a   : > { %v10572_v28 = vpop.f32.mrb[139].mxu0 }
 0xa2b   : > { %v17159_v23 = vadd.f32 %v10572_v28, %v10571_v19  ;;  %v18761_v19 = vld [vmem:[#allocation165_spill] sm:$0xff] }
 0xa2c   : > { %v7103_v28 = vadd.f32 %v18761_v19, %v17164_v20 }
 0xa32   : > { %v11584_v50 = vpop.f32.mrb[112].mxu1 }
 0xa33   : > { %v9059_v2 = vmul.f32 %v11584_v50, %v17166_v21  ;;  %v8920_v31 = vpop.f32.mrb[113].mxu1 }
 0xa34   : > { %v9057_v18 = vmul.f32 %v17166_v21, %v8920_v31  ;;  %v11585_v17 = vpop.f32.mrb[114].mxu1 }
 0xa35   : > { %v9091_v43 = vadd.f32 %v12753_v41, %v9059_v2  ;;  %v10574_v6 = vpop.f32.mrb[140].mxu0  ;;  %v9060_v54 = vmul.f32 %v11585_v17, %v17166_v21  ;;  %v8923_v39 = vpop.f32.mrb[115].mxu1  ;;  %v7101_v2 = vadd.f32 %v18762_v35, %v17164_v20  ;;  %v12757_v17 = vld [vmem:[%s13602_s6 + $0x48] sm:$0xff] }
 0xa36   : > { %v9089_v26 = vadd.f32 %v12754_v37, %v9057_v18  ;;  %v10575_v11 = vpop.f32.mrb[141].mxu0  ;;  %v9058_v22 = vmul.f32 %v17166_v21, %v8923_v39  ;;  %v8691_v29 = vadd.f32 %v12757_v17, %v8659_v24  ;;  %v12759_v37 = vld [vmem:[%s13602_s6 + $0x50] sm:$0xff]  ;;  %v18764_v24 = vld [vmem:[#allocation169_spill] sm:$0xff] }
 0xa37   : > { %v9123_v42 = vadd.f32 %v9091_v43, %v8687_v9  ;;  %v9092_v40 = vadd.f32 %v12755_v30, %v9060_v54  ;;  %v17182_v16 = vadd.f32 %v10575_v11, %v10574_v6  ;;  %v10577_v13 = vpop.f32.mrb[142].mxu0  ;;  %v12758_v6 = vld [vmem:[%s13602_s6 + $0x38] sm:$0xff] }
 0xa38   : > { %v9121_v1 = vadd.f32 %v9089_v26, %v8685_v38  ;;  %v9090_v48 = vadd.f32 %v12756_v33, %v9058_v22  ;;  %v10578_v45 = vpop.f32.mrb[143].mxu0  ;;  %v8689_v54 = vadd.f32 %v12758_v6, %v8657_v58  ;;  %v8692_v38 = vadd.f32 %v12759_v37, %v8660_v49  ;;  %v18766_v49 = vld [vmem:[#allocation98_spill] sm:$0xff] }
 0xa39   : > { %v9155_v25 = vmul.f32 %v9123_v42, %v7099_v57  ;;  %v9124_v60 = vadd.f32 %v9092_v40, %v8688_v56  ;;  %v17189_v7 = vadd.f32 %v10578_v45, %v10577_v13  ;;  %v18763_v56 = vld [vmem:[#allocation168_spill] sm:$0xff] }
 0xa3a   : > { %v9153_v46 = vmul.f32 %v9121_v1, %v7097_v5  ;;  %v9122_v53 = vadd.f32 %v9090_v48, %v8686_v36  ;;  %v11588_v59 = vpop.f32.mrb[116].mxu1  ;;  %v7104_v42 = vadd.f32 %v18763_v56, %v17164_v20  ;;  %v12760_v40 = vld [vmem:[%s13602_s6 + $0x40] sm:$0xff]  ;;  %v8663_v36 = vmul.f32 %v17149_v51, %v17161_v15 }
 0xa3b   : > { %v9156_v3 = vmul.f32 %v9124_v60, %v7100_v61  ;;  %v9063_v4 = vmul.f32 %v11588_v59, %v17166_v21  ;;  %v8936_v50 = vpop.f32.mrb[117].mxu1  ;;  %v8690_v13 = vadd.f32 %v12760_v40, %v8658_v0  ;;  %v8661_v60 = vmul.f32 %v17145_v14, %v17161_v15 }
 0xa3c   : > { %v9154_v31 = vmul.f32 %v9122_v53, %v7098_v8  ;;  %v9061_v27 = vmul.f32 %v17166_v21, %v8936_v50  ;;  %v11589_v18 = vpop.f32.mrb[118].mxu1  ;;  %v8664_v51 = vmul.f32 %v17151_v47, %v17161_v15  ;;  %v8662_v14 = vmul.f32 %v17147_v63, %v17161_v15 }
 0xa3d   : > { %v9186_v57 = vpack.c.bf16 %v9156_v3, %v9155_v25  ;;  %v9095_v44 = vadd.f32 %v12757_v17, %v9063_v4  ;;  %v10580_v41 = vpop.f32.mrb[144].mxu0  ;;  %v9064_v9 = vmul.f32 %v11589_v18, %v17166_v21  ;;  %v8939_v43 = vpop.f32.mrb[119].mxu1  ;;  %v7102_v25 = vadd.f32 %v18764_v24, %v17164_v20 }
 0xa3e   : > { %v9093_v39 = vadd.f32 %v12758_v6, %v9061_v27  ;;  %v10581_v52 = vpop.f32.mrb[145].mxu0  ;;  %v9062_v62 = vmul.f32 %v17166_v21, %v8939_v43  ;;  %v9185_v5 = vpack.c.bf16 %v9154_v31, %v9153_v46  ;;  %v18765_v46 = vld [vmem:[#allocation167_spill] sm:$0xff]  ;;  %v7105_v3 = vadd.f32 %v18766_v49, %v17164_v20 }
 0xa3f   : > { %v9127_v26 = vadd.f32 %v9095_v44, %v8691_v29  ;;  %v9096_v11 = vadd.f32 %v12759_v37, %v9064_v9  ;;  %v17210_v22 = vadd.f32 %v10581_v52, %v10580_v41  ;;  %v10583_v30 = vpop.f32.mrb[146].mxu0  ;;  %v7107_v53 = vadd.f32 %v18765_v46, %v17164_v20  ;;  %v12762_v29 = vld [vmem:[%s13602_s6 + $0x58] sm:$0xff]  ;;  %v12763_v43 = vld [vmem:[%s13602_s6 + $0x70] sm:$0xff] }
 0xa40   : > { %v9125_v12 = vadd.f32 %v9093_v39, %v8689_v54  ;;  %v9094_v61 = vadd.f32 %v12760_v40, %v9062_v62  ;;  %v10584_v33 = vpop.f32.mrb[147].mxu0  ;;  %11622 = vmatprep.mubr.msk.bf16.mxu1 %vm1066_vm0, %v9185_v5  ;;  %v8696_v6 = vadd.f32 %v12763_v43, %v8664_v51  ;;  %v18767_v5 = vld [vmem:[#allocation94_spill] sm:$0xff]  ;;  %v18770_v46 = vld [vmem:[#allocation127_spill] sm:$0xff] }
 0xa41   : > { %v9159_v1 = vmul.f32 %v9127_v26, %v7103_v28  ;;  %v9128_v48 = vadd.f32 %v9096_v11, %v8692_v38  ;;  %v17218_v45 = vadd.f32 %v10584_v33, %v10583_v30  ;;  %11623 = vmatmul.mubr.msk.bf16.vlgmr.msra.gmra.mrb[144].mxu1 %vm1066_vm0, %v9186_v57  ;;  %v8693_v57 = vadd.f32 %v12762_v29, %v8661_v60  ;;  %v12764_v38 = vld [vmem:[%s13602_s6 + $0x60] sm:$0xff] }
 0xa42   : > { %v9157_v34 = vmul.f32 %v9125_v12, %v7101_v2  ;;  %v9126_v8 = vadd.f32 %v9094_v61, %v8690_v13  ;;  %v11592_v58 = vpop.f32.mrb[120].mxu1  ;;  %v12761_v2 = vld [vmem:[%s13602_s6 + $0x68] sm:$0xff]  ;;  %v7108_v37 = vadd.f32 %v18767_v5, %v17164_v20  ;;  %v8694_v26 = vadd.f32 %v12764_v38, %v8662_v14 }
 0xa43   : > { %v9160_v59 = vmul.f32 %v9128_v48, %v7104_v42  ;;  %v9067_v19 = vmul.f32 %v11592_v58, %v17166_v21  ;;  %v8952_v28 = vpop.f32.mrb[121].mxu1  ;;  %v8695_v0 = vadd.f32 %v12761_v2, %v8663_v36  ;;  %v8667_v42 = vmul.f32 %v17157_v32, %v17161_v15  ;;  %v18768_v61 = vld [vmem:[#allocation97_spill] sm:$0xff] }
 0xa44   : > { %v9158_v4 = vmul.f32 %v9126_v8, %v7102_v25  ;;  %v9065_v50 = vmul.f32 %v17166_v21, %v8952_v28  ;;  %v11593_v35 = vpop.f32.mrb[122].mxu1  ;;  %v7106_v33 = vadd.f32 %v18768_v61, %v17164_v20  ;;  %v8665_v36 = vmul.f32 %v17153_v55, %v17161_v15  ;;  %v18769_v25 = vld [vmem:[#allocation171_spill] sm:$0xff]  ;;  %v12765_v28 = vld [vmem:[%s13602_s6 + $0x88] sm:$0xff] }
 0xa45   : > { %v9099_v31 = vadd.f32 %v12761_v2, %v9067_v19  ;;  %v10586_v47 = vpop.f32.mrb[148].mxu0  ;;  %v9068_v27 = vmul.f32 %v11593_v35, %v17166_v21  ;;  %v8955_v18 = vpop.f32.mrb[123].mxu1  ;;  %v9188_v17 = vpack.c.bf16 %v9160_v59, %v9159_v1  ;;  %v7111_v60 = vadd.f32 %v18769_v25, %v17164_v20  ;;  %v12766_v35 = vld [vmem:[%s13602_s6 + $0x78] sm:$0xff] }
 0xa46   : > { %v9097_v44 = vadd.f32 %v12762_v29, %v9065_v50  ;;  %v10587_v41 = vpop.f32.mrb[149].mxu0  ;;  %v9066_v63 = vmul.f32 %v17166_v21, %v8955_v18  ;;  %v9187_v9 = vpack.c.bf16 %v9158_v4, %v9157_v34  ;;  %v8668_v32 = vmul.f32 %v17159_v23, %v17161_v15 }
 0xa47   : > { %v9131_v54 = vadd.f32 %v9099_v31, %v8695_v0  ;;  %v9100_v39 = vadd.f32 %v12763_v43, %v9068_v27  ;;  %v17240_v52 = vadd.f32 %v10587_v41, %v10586_v47  ;;  %v10589_v62 = vpop.f32.mrb[150].mxu0  ;;  %v8666_v55 = vmul.f32 %v17155_v10, %v17161_v15  ;;  %v12767_v27 = vld [vmem:[%s13602_s6 + $0x90] sm:$0xff] }
 0xa48   : > { %v9129_v11 = vadd.f32 %v9097_v44, %v8693_v57  ;;  %v9098_v30 = vadd.f32 %v12764_v38, %v9066_v63  ;;  %v10590_v56 = vpop.f32.mrb[151].mxu0  ;;  %11626 = vmatprep.mubr.msk.bf16.mxu1 %vm1066_vm0, %v9187_v9  ;;  %v8699_v49 = vadd.f32 %v12765_v28, %v8667_v42  ;;  %v8697_v2 = vadd.f32 %v12766_v35, %v8665_v36  ;;  %v18771_v41 = vld [vmem:[#allocation174_spill] sm:$0xff]  ;;  %v12768_v9 = vld [vmem:[%s13602_s6 + $0x80] sm:$0xff] }
 0xa49   : > { %v9163_v40 = vmul.f32 %v9131_v54, %v7107_v53  ;;  %v9132_v13 = vadd.f32 %v9100_v39, %v8696_v6  ;;  %v17248_v12 = vadd.f32 %v10590_v56, %v10589_v62  ;;  %11627 = vmatmul.mubr.msk.bf16.gmra.mrb[148].mxu1 %vm1066_vm0, %v9188_v17  ;;  %v7109_v53 = vadd.f32 %v17164_v20, %v18770_v46 }
 0xa4a   : > { %v9161_v1 = vmul.f32 %v9129_v11, %v7105_v3  ;;  %v9130_v48 = vadd.f32 %v9098_v30, %v8694_v26  ;;  %v11596_v24 = vpop.f32.mrb[124].mxu1  ;;  %v8700_v18 = vadd.f32 %v12767_v27, %v8668_v32  ;;  %v7112_v63 = vadd.f32 %v18771_v41, %v17164_v20  ;;  %v18772_v26 = vld [vmem:[#allocation126_spill] sm:$0xff] }
 0xa4b   : > { %v9164_v34 = vmul.f32 %v9132_v13, %v7108_v37  ;;  %v9071_v8 = vmul.f32 %v11596_v24, %v17166_v21  ;;  %v8968_v58 = vpop.f32.mrb[125].mxu1  ;;  %v8698_v43 = vadd.f32 %v12768_v9, %v8666_v55  ;;  %v8671_v62 = vmul.f32 %v17210_v22, %v17161_v15  ;;  %v18773_v13 = vld [vmem:[#allocation85_spill] sm:$0xff] }
 0xa4c   : > { %v9162_v51 = vmul.f32 %v9130_v48, %v7106_v33  ;;  %v9069_v59 = vmul.f32 %v17166_v21, %v8968_v58  ;;  %v11597_v19 = vpop.f32.mrb[126].mxu1  ;;  %v7110_v11 = vadd.f32 %v17164_v20, %v18772_v26  ;;  %v8669_v30 = vmul.f32 %v17182_v16, %v17161_v15  ;;  %v18774_v48 = vld [vmem:[#allocation86_spill] sm:$0xff] }
 0xa4d   : > { %v9103_v3 = vadd.f32 %v12765_v28, %v9071_v8  ;;  %v10592_v23 = vpop.f32.mrb[152].mxu0  ;;  %v9072_v14 = vmul.f32 %v11597_v19, %v17166_v21  ;;  %v8971_v4 = vpop.f32.mrb[127].mxu1  ;;  %v9190_v50 = vpack.c.bf16 %v9164_v34, %v9163_v40  ;;  %v7115_v61 = vadd.f32 %v18773_v13, %v17164_v20  ;;  %v12769_v34 = vld [vmem:[%s13602_s6 + $0xa8] sm:$0xff] }
 0xa4e   : > { %v9101_v0 = vadd.f32 %v12766_v35, %v9069_v59  ;;  %v10593_v31 = vpop.f32.mrb[153].mxu0  ;;  %v9070_v10 = vmul.f32 %v17166_v21, %v8971_v4  ;;  %v9189_v47 = vpack.c.bf16 %v9162_v51, %v9161_v1  ;;  %v8672_v22 = vmul.f32 %v17218_v45, %v17161_v15  ;;  %v12770_v51 = vld [vmem:[%s13602_s6 + $0x98] sm:$0xff] }
 0xa4f   : > { %v9135_v17 = vadd.f32 %v9103_v3, %v8699_v49  ;;  %v9104_v29 = vadd.f32 %v12767_v27, %v9072_v14  ;;  %v10594_v57 = vadd.f32 %v10593_v31, %v10592_v23  ;;  %v10595_v44 = vpop.f32.mrb[154].mxu0  ;;  %v7113_v24 = vadd.f32 %v17164_v20, %v18774_v48  ;;  %v12771_v3 = vld [vmem:[%s13602_s6 + $0xb0] sm:$0xff]  ;;  %v12772_v31 = vld [vmem:[%s13602_s6 + $0xa0] sm:$0xff] }
 0xa50   : > { %v9133_v6 = vadd.f32 %v9101_v0, %v8697_v2  ;;  %v9102_v54 = vadd.f32 %v12768_v9, %v9070_v10  ;;  %v10596_v39 = vpop.f32.mrb[155].mxu0  ;;  %11630 = vmatprep.mubr.msk.bf16.mxu1 %vm1066_vm0, %v9189_v47  ;;  %v8670_v16 = vmul.f32 %v17189_v7, %v17161_v15  ;;  %v8703_v8 = vadd.f32 %v12769_v34, %v8671_v62  ;;  %v18775_v2 = vld [vmem:[#allocation82_spill] sm:$0xff]  ;;  %v18777_v62 = vld [vmem:[#allocation105_spill] sm:$0xff] }
 0xa51   : > { %v9167_v5 = vmul.f32 %v9135_v17, %v7111_v60  ;;  %v9136_v37 = vadd.f32 %v9104_v29, %v8700_v18  ;;  %v10597_v38 = vadd.f32 %v10596_v39, %v10595_v44  ;;  %11631 = vmatmul.mubr.msk.bf16.gmra.mrb[152].mxu1 %vm1066_vm0, %v9190_v50  ;;  %v8701_v59 = vadd.f32 %v12770_v51, %v8669_v30  ;;  %v18778_v30 = vld [vmem:[#allocation106_spill] sm:$0xff] }
 0xa52   : > { %v9165_v56 = vmul.f32 %v9133_v6, %v7109_v53  ;;  %v9134_v42 = vadd.f32 %v9102_v54, %v8698_v43  ;;  %v11600_v40 = vpop.f32.mrb[128].mxu1  ;;  %v8704_v23 = vadd.f32 %v12771_v3, %v8672_v22  ;;  %v7116_v0 = vadd.f32 %v18775_v2, %v17164_v20 }
 0xa53   : > { %v9168_v33 = vmul.f32 %v9136_v37, %v7112_v63  ;;  %v9075_v36 = vmul.f32 %v11600_v40, %v17166_v21  ;;  %v8984_v1 = vpop.f32.mrb[129].mxu1  ;;  %v8702_v10 = vadd.f32 %v12772_v31, %v8670_v16  ;;  %v8675_v17 = vmul.f32 %v10594_v57, %v17161_v15  ;;  %v18776_v63 = vld [vmem:[#allocation90_spill] sm:$0xff] }
 0xa54   : > { %v9166_v25 = vmul.f32 %v9134_v42, %v7110_v11  ;;  %v9073_v60 = vmul.f32 %v17166_v21, %v8984_v1  ;;  %v11601_v32 = vpop.f32.mrb[130].mxu1  ;;  %v7114_v9 = vadd.f32 %v17164_v20, %v18776_v63  ;;  %v8673_v43 = vmul.f32 %v17240_v52, %v17161_v15 }
 0xa55   : > { %v9107_v58 = vadd.f32 %v12769_v34, %v9075_v36  ;;  %v10598_v45 = vpop.f32.mrb[156].mxu0  ;;  %v9076_v46 = vmul.f32 %v11601_v32, %v17166_v21  ;;  %v8987_v53 = vpop.f32.mrb[131].mxu1  ;;  %v9192_v55 = vpack.c.bf16 %v9168_v33, %v9167_v5  ;;  %v7119_v5 = vadd.f32 %v18777_v62, %v17164_v20  ;;  %v12775_v34 = vld [vmem:[%s13602_s6 + $0xd0] sm:$0xff] }
 0xa56   : > { %v9105_v19 = vadd.f32 %v12770_v51, %v9073_v60  ;;  %v10599_v28 = vpop.f32.mrb[157].mxu0  ;;  %v9074_v7 = vmul.f32 %v17166_v21, %v8987_v53  ;;  %v9191_v49 = vpack.c.bf16 %v9166_v25, %v9165_v56  ;;  %v8676_v57 = vmul.f32 %v10597_v38, %v17161_v15 }
 0xa57   : > { %v9139_v14 = vadd.f32 %v9107_v58, %v8703_v8  ;;  %v9108_v4 = vadd.f32 %v12771_v3, %v9076_v46  ;;  %v10600_v50 = vadd.f32 %v10599_v28, %v10598_v45  ;;  %v10601_v35 = vpop.f32.mrb[158].mxu0  ;;  %v7117_v56 = vadd.f32 %v17164_v20, %v18778_v30 }
 0xa58   : > { %v9137_v47 = vadd.f32 %v9105_v19, %v8701_v59  ;;  %v9106_v27 = vadd.f32 %v12772_v31, %v9074_v7  ;;  %v10602_v18 = vpop.f32.mrb[159].mxu0  ;;  %11634 = vmatprep.mubr.msk.bf16.mxu1 %vm1066_vm0, %v9191_v49  ;;  %v8674_v42 = vmul.f32 %v17248_v12, %v17161_v15  ;;  %v8708_v8 = vadd.f32 %v12775_v34, %v8676_v57  ;;  %v12776_v59 = vld [vmem:[%s13602_s6 + $0xc0] sm:$0xff] }
 0xa59   : > { %v9171_v29 = vmul.f32 %v9139_v14, %v7115_v61  ;;  %v9140_v44 = vadd.f32 %v9108_v4, %v8704_v23  ;;  %v10603_v41 = vadd.f32 %v10602_v18, %v10601_v35  ;;  %11635 = vmatmul.mubr.msk.bf16.gmra.mrb[156].mxu1 %vm1066_vm0, %v9192_v55  ;;  %v12773_v61 = vld [vmem:[%s13602_s6 + $0xc8] sm:$0xff] }
 0xa5a   : > { %v9169_v6 = vmul.f32 %v9137_v47, %v7113_v24  ;;  %v9138_v54 = vadd.f32 %v9106_v27, %v8702_v10  ;;  %v11604_v39 = vpop.f32.mrb[132].mxu1  ;;  %v8707_v22 = vadd.f32 %v12773_v61, %v8675_v17  ;;  %v12774_v24 = vld [vmem:[%s13602_s6 + $0xb8] sm:$0xff]  ;;  %v18779_v55 = vld [vmem:[#allocation102_spill] sm:$0xff]  ;;  %v8706_v19 = vadd.f32 %v12776_v59, %v8674_v42  ;;  %v18780_v35 = vld [vmem:[#allocation109_spill] sm:$0xff] }
 0xa5b   : > { %v9172_v37 = vmul.f32 %v9140_v44, %v7116_v0  ;;  %v9079_v26 = vmul.f32 %v11604_v39, %v17166_v21  ;;  %v9000_v11 = vpop.f32.mrb[133].mxu1  ;;  %v8705_v16 = vadd.f32 %v12774_v24, %v8673_v43  ;;  %v7120_v51 = vadd.f32 %v18779_v55, %v17164_v20  ;;  %v18781_v44 = vld [vmem:[#allocation121_spill] sm:$0xff] }
 0xa5c   : > { %v9170_v52 = vmul.f32 %v9138_v54, %v7114_v9  ;;  %v9077_v40 = vmul.f32 %v17166_v21, %v9000_v11  ;;  %v11605_v13 = vpop.f32.mrb[134].mxu1  ;;  %v7118_v2 = vadd.f32 %v17164_v20, %v18780_v35  ;;  %v8677_v0 = vmul.f32 %v10600_v50, %v17161_v15  ;;  %v12777_v54 = vld [vmem:[%s13602_s6 + $0xe8] sm:$0xff]  ;;  %v12778_v11 = vld [vmem:[%s13602_s6 + $0xd8] sm:$0xff] }
 0xa5d   : > { %v9111_v33 = vadd.f32 %v12773_v61, %v9079_v26  ;;  %v10604_v38 = vpop.f32.mrb[160].mxu0  ;;  %v9080_v36 = vmul.f32 %v11605_v13, %v17166_v21  ;;  %v9003_v1 = vpop.f32.mrb[135].mxu1  ;;  %v9194_v48 = vpack.c.bf16 %v9172_v37, %v9171_v29  ;;  %v7123_v63 = vadd.f32 %v18781_v44, %v17164_v20  ;;  %v18785_v44 = vld [vmem:[#allocation59_spill] sm:$0xff] }
 0xa5e   : > { %v9109_v25 = vadd.f32 %v12774_v24, %v9077_v40  ;;  %v10605_v60 = vpop.f32.mrb[161].mxu0  ;;  %v9078_v12 = vmul.f32 %v17166_v21, %v9003_v1  ;;  %v9193_v32 = vpack.c.bf16 %v9170_v52, %v9169_v6  ;;  %v8678_v9 = vmul.f32 %v10603_v41, %v17161_v15  ;;  %v12779_v40 = vld [vmem:[%s13602_s6 + $0xf0] sm:$0xff] }
 0xa5f   : > { %v9143_v58 = vadd.f32 %v9111_v33, %v8707_v22  ;;  %v9112_v45 = vadd.f32 %v12775_v34, %v9080_v36  ;;  %v10606_v46 = vadd.f32 %v10605_v60, %v10604_v38  ;;  %v10607_v53 = vpop.f32.mrb[162].mxu0  ;;  %v8709_v30 = vadd.f32 %v12778_v11, %v8677_v0  ;;  %v18782_v36 = vld [vmem:[#allocation122_spill] sm:$0xff] }
 0xa60   : > { %v9141_v28 = vadd.f32 %v9109_v25, %v8705_v16  ;;  %v9110_v7 = vadd.f32 %v12776_v59, %v9078_v12  ;;  %v10608_v49 = vpop.f32.mrb[163].mxu0  ;;  %11638 = vmatprep.mubr.msk.bf16.mxu1 %vm1066_vm0, %v9193_v32  ;;  %v7121_v1 = vadd.f32 %v17164_v20, %v18782_v36  ;;  %v18783_v12 = vld [vmem:[#allocation117_spill] sm:$0xff]  ;;  %v18788_v36 = vld [vmem:[#allocation56_spill] sm:$0xff] }
 0xa61   : > { %v9175_v3 = vmul.f32 %v9143_v58, %v7119_v5  ;;  %v9144_v23 = vadd.f32 %v9112_v45, %v8708_v8  ;;  %v8679_v14 = vmul.f32 %v10606_v46, %v17161_v15  ;;  %v10609_v4 = vadd.f32 %v10608_v49, %v10607_v53  ;;  %11639 = vmatmul.mubr.msk.bf16.gmra.mrb[160].mxu1 %vm1066_vm0, %v9194_v48  ;;  %v12780_v48 = vld [vmem:[%s13602_s6 + $0xe0] sm:$0xff]  ;;  %v18784_v45 = vld [vmem:[#allocation123_spill] sm:$0xff] }
 0xa62   : > { %v9173_v31 = vmul.f32 %v9141_v28, %v7117_v56  ;;  %v9142_v10 = vadd.f32 %v9110_v7, %v8706_v19  ;;  %v11608_v47 = vpop.f32.mrb[136].mxu1  ;;  %v8710_v24 = vadd.f32 %v12780_v48, %v8678_v9  ;;  %v7124_v32 = vadd.f32 %v18783_v12, %v17164_v20  ;;  %v12782_v9 = vld [vmem:[%s13602_s6 + $0x100] sm:$0xff] }
 0xa63   : > { %v9176_v27 = vmul.f32 %v9144_v23, %v7120_v51  ;;  %v8680_v18 = vmul.f32 %v10609_v4, %v17161_v15  ;;  %v9083_v17 = vmul.f32 %v11608_v47, %v17166_v21  ;;  %v9016_v29 = vpop.f32.mrb[137].mxu1  ;;  %v8711_v39 = vadd.f32 %v12777_v54, %v8679_v14 }
 0xa64   : > { %v9174_v43 = vmul.f32 %v9142_v10, %v7118_v2  ;;  %v9081_v6 = vmul.f32 %v17166_v21, %v9016_v29  ;;  %v11609_v50 = vpop.f32.mrb[138].mxu1  ;;  %v7122_v46 = vadd.f32 %v17164_v20, %v18784_v45  ;;  %v12781_v2 = vld [vmem:[%s13602_s6 + $0xf8] sm:$0xff] }
 0xa65   : > { %v9115_v62 = vadd.f32 %v12777_v54, %v9083_v17  ;;  %v10610_v5 = vpop.f32.mrb[164].mxu0  ;;  %v9084_v57 = vmul.f32 %v11609_v50, %v17166_v21  ;;  %v9019_v37 = vpop.f32.mrb[139].mxu1  ;;  %v9196_v26 = vpack.c.bf16 %v9176_v27, %v9175_v3  ;;  %v8712_v13 = vadd.f32 %v12779_v40, %v8680_v18 }
 0xa66   : > { %v9113_v56 = vadd.f32 %v12778_v11, %v9081_v6  ;;  %v10611_v42 = vpop.f32.mrb[165].mxu0  ;;  %v9082_v41 = vmul.f32 %v17166_v21, %v9019_v37  ;;  %v9195_v52 = vpack.c.bf16 %v9174_v43, %v9173_v31 }
 0xa67   : > { %v9147_v61 = vadd.f32 %v9115_v62, %v8711_v39  ;;  %v9116_v22 = vadd.f32 %v12779_v40, %v9084_v57  ;;  %v10612_v33 = vadd.f32 %v10611_v42, %v10610_v5  ;;  %v10613_v38 = vpop.f32.mrb[166].mxu0  ;;  %v18786_v57 = vld [vmem:[#allocation63_spill] sm:$0xff] }
 0xa68   : > { %v9145_v16 = vadd.f32 %v9113_v56, %v8709_v30  ;;  %v9114_v25 = vadd.f32 %v12780_v48, %v9082_v41  ;;  %v10614_v60 = vpop.f32.mrb[167].mxu0  ;;  %11642 = vmatprep.mubr.msk.bf16.mxu1 %vm1066_vm0, %v9195_v52  ;;  %v7126_v37 = vadd.f32 %v17164_v20, %v18786_v57  ;;  %v12783_v30 = vld [vmem:[%s13602_s6 + $0x108] sm:$0xff] }
 0xa69   : > { %v9179_v34 = vmul.f32 %v9147_v61, %v7123_v63  ;;  %v9148_v8 = vadd.f32 %v9116_v22, %v8712_v13  ;;  %v10615_v58 = vadd.f32 %v10614_v60, %v10613_v38  ;;  %11643 = vmatmul.mubr.msk.bf16.gmra.mrb[164].mxu1 %vm1066_vm0, %v9196_v26  ;;  %v8681_v55 = vmul.f32 %v10612_v33, %v17161_v15  ;;  %v12784_v13 = vld [vmem:[%s13602_s6 + $0x110] sm:$0xff]  ;;  %s17380_s6 = scalar_lea.vmem [#allocation22], %s9712_s24 }
 0xa6a   : > { %v9177_v53 = vmul.f32 %v9145_v16, %v7121_v1  ;;  %v9146_v51 = vadd.f32 %v9114_v25, %v8710_v24  ;;  %v11612_v59 = vpop.f32.mrb[140].mxu1  ;;  %v7125_v63 = vadd.f32 %v17164_v20, %v18785_v44  ;;  %v7128_v1 = vadd.f32 %v18788_v36, %v17164_v20  ;;  %s9500_s28 = sshll.u32 %s17380_s6, 4  ;;  %s17476_s28 = int_to_ptr.vmem [resolvable:$true] %s9500_s28 }
 0xa6b   : > { %v9180_v19 = vmul.f32 %v9148_v8, %v7124_v32  ;;  %v9032_v28 = vpop.f32.mrb[141].mxu1  ;;  %v8682_v49 = vmul.f32 %v10615_v58, %v17161_v15  ;;  %v8713_v0 = vadd.f32 %v12781_v2, %v8681_v55  ;;  %v9087_v18 = vmul.f32 %v11612_v59, %v17166_v21  ;;  %s13065_s30 = scalar_lea.vmem %s17476_s28, 4096  ;;  %p13072_p5 = scmp.lt.s32.totalorder %s17476_s28, %s13070_s19 }
 0xa6c   : > { %v9178_v7 = vmul.f32 %v9146_v51, %v7122_v46  ;;  %v9085_v3 = vmul.f32 %v17166_v21, %v9032_v28  ;;  %v11613_v23 = vpop.f32.mrb[142].mxu1  ;;  %p13066_p13 = scmp.ne.s32.totalorder %s17476_s28, %s13065_s30  ;;  %p13073_p9 = scmp.lt.s32.totalorder %s13071_s21, %s13065_s30 }
 0xa6d   : > { %v10616_v14 = vpop.f32.mrb[168].mxu0  ;;  %v9035_v4 = vpop.f32.mrb[143].mxu1  ;;  %v9198_v35 = vpack.c.bf16 %v9180_v19, %v9179_v34  ;;  %v8714_v43 = vadd.f32 %v12782_v9, %v8682_v49  ;;  %v9088_v39 = vmul.f32 %v11613_v23, %v17166_v21  ;;  %v9119_v56 = vadd.f32 %v12783_v30, %v9087_v18 }
 0xa6e   : > { %v9117_v31 = vadd.f32 %v12781_v2, %v9085_v3  ;;  %v10617_v10 = vpop.f32.mrb[169].mxu0  ;;  %v9086_v47 = vmul.f32 %v17166_v21, %v9035_v4  ;;  %v9197_v27 = vpack.c.bf16 %v9178_v7, %v9177_v53  ;;  %v18787_v21 = vld [vmem:[#allocation58_spill] sm:$0xff]  ;;  %p13067_p0 = pnand %p13066_p13, %p18791_p1  ;;  %p13074_p12 = por %p13073_p9, %p13072_p5 }
 0xa6f   : > { %v10618_v17 = vadd.f32 %v10617_v10, %v10616_v14  ;;  %v10619_v29 = vpop.f32.mrb[170].mxu0  ;;  %v7127_v40 = vadd.f32 %v18787_v21, %v17164_v20  ;;  %v9120_v61 = vadd.f32 %v12784_v13, %v9088_v39 }
 0xa70   : > { %v9149_v6 = vadd.f32 %v9117_v31, %v8713_v0  ;;  %v9118_v50 = vadd.f32 %v12782_v9, %v9086_v47  ;;  %v10620_v54 = vpop.f32.mrb[171].mxu0  ;;  %11646 = vmatprep.mubr.msk.bf16.mxu1 %vm1066_vm0, %v9197_v27  ;;  %p13068_p6 = pneg %p13067_p0 }
 0xa71   : > { %v8683_v62 = vmul.f32 %v10618_v17, %v17161_v15  ;;  %v10621_v5 = vadd.f32 %v10620_v54, %v10619_v29  ;;  %11647 = vmatmul.mubr.msk.bf16.gmra.mrb[168].mxu1 %vm1066_vm0, %v9198_v35 }
 0xa72   : > { %v9181_v26 = vmul.f32 %v9149_v6, %v7125_v63  ;;  %v9150_v11 = vadd.f32 %v9118_v50, %v8714_v43  ;;  %p13075_p10 = pnand %p13074_p12, %p13068_p6 }
 0xa73   : > { %v8715_v42 = vadd.f32 %v12783_v30, %v8683_v62  ;;  %v8684_v41 = vmul.f32 %v10621_v5, %v17161_v15  ;;  %v17376_v15 = vld [vmem:[#allocation20] ss:$0 sm:$0xff] }
 0xa74   : > { %v9182_v52 = vmul.f32 %v9150_v11, %v7126_v37 }
 0xa75   : > { %v9151_v22 = vadd.f32 %v9119_v56, %v8715_v42  ;;  %v8716_v33 = vadd.f32 %v12784_v13, %v8684_v41 }
 0xa76   : > { %v9199_v38 = vpack.c.bf16 %v9182_v52, %v9181_v26 }
 0xa77   : > { %v9183_v48 = vmul.f32 %v9151_v22, %v7127_v40  ;;  %v9152_v24 = vadd.f32 %v9120_v61, %v8716_v33 }
 0xa78   : > { %11650 = vmatprep.mubr.msk.bf16.mxu1 %vm1066_vm0, %v9199_v38 }
 0xa79   : > { %v9184_v16 = vmul.f32 %v9152_v24, %v7128_v1 }
 0xa7b   : > { %v9200_v25 = vpack.c.bf16 %v9184_v16, %v9183_v48 }
 0xa7d   : > { %11651 = vmatmul.mubr.msk.bf16.gmra.mrb[172].mxu1 %vm1066_vm0, %v9200_v25 }
 0xb14   : > { %v11624_v60 = vpop.f32.mrb[144].mxu1 }
 0xb15   : > { %v9331_v12 = vadd.f32 %v11624_v60, %v17376_v15  ;;  %v9322_v32 = vpop.f32.mrb[145].mxu1 }
 0xb16   : > { %v9323_v34 = vadd.f32 %v17376_v15, %v9322_v32  ;;  %v11625_v20 = vpop.f32.mrb[146].mxu1 }
 0xb17   : > { %9451 = vst.msk [vmem:[%s17380_s6 + $0x10] sm:$0xff] %vm1066_vm0, %v9331_v12  ;;  %v9334_v8 = vadd.f32 %v11625_v20, %v17376_v15  ;;  %v9325_v58 = vpop.f32.mrb[147].mxu1 }
 0xb18   : > { %9449 = vst.msk [vmem:[%s17380_s6] sm:$0xff] %vm1066_vm0, %v9323_v34  ;;  %v9326_v45 = vadd.f32 %v17376_v15, %v9325_v58 }
 0xb19   : > { %9452 = vst.msk [vmem:[%s17380_s6 + $0x18] sm:$0xff] %vm1066_vm0, %v9334_v8 }
 0xb1a   : > { %9450 = vst.msk [vmem:[%s17380_s6 + $0x8] sm:$0xff] %vm1066_vm0, %v9326_v45 }
 0xb1c   : > { %v11628_v46 = vpop.f32.mrb[148].mxu1 }
 0xb1d   : > { %v9347_v53 = vadd.f32 %v11628_v46, %v17376_v15  ;;  %v9338_v55 = vpop.f32.mrb[149].mxu1 }
 0xb1e   : > { %v9339_v51 = vadd.f32 %v17376_v15, %v9338_v55  ;;  %v11629_v59 = vpop.f32.mrb[150].mxu1 }
 0xb1f   : > { %9455 = vst.msk [vmem:[%s17380_s6 + $0x30] sm:$0xff] %vm1066_vm0, %v9347_v53  ;;  %v9350_v19 = vadd.f32 %v11629_v59, %v17376_v15  ;;  %v9341_v28 = vpop.f32.mrb[151].mxu1 }
 0xb20   : > { %9453 = vst.msk [vmem:[%s17380_s6 + $0x20] sm:$0xff] %vm1066_vm0, %v9339_v51  ;;  %v9342_v7 = vadd.f32 %v17376_v15, %v9341_v28 }
 0xb21   : > { %9456 = vst.msk [vmem:[%s17380_s6 + $0x38] sm:$0xff] %vm1066_vm0, %v9350_v19 }
 0xb22   : > { %9454 = vst.msk [vmem:[%s17380_s6 + $0x28] sm:$0xff] %vm1066_vm0, %v9342_v7 }
 0xb24   : > { %v11632_v49 = vpop.f32.mrb[152].mxu1 }
 0xb25   : > { %v9363_v3 = vadd.f32 %v11632_v49, %v17376_v15  ;;  %v9354_v23 = vpop.f32.mrb[153].mxu1 }
 0xb26   : > { %v9355_v14 = vadd.f32 %v17376_v15, %v9354_v23  ;;  %v11633_v4 = vpop.f32.mrb[154].mxu1 }
 0xb27   : > { %9459 = vst.msk [vmem:[%s17380_s6 + $0x50] sm:$0xff] %vm1066_vm0, %v9363_v3  ;;  %v9366_v35 = vadd.f32 %v11633_v4, %v17376_v15  ;;  %v9357_v2 = vpop.f32.mrb[155].mxu1 }
 0xb28   : > { %9457 = vst.msk [vmem:[%s17380_s6 + $0x40] sm:$0xff] %vm1066_vm0, %v9355_v14  ;;  %v9358_v0 = vadd.f32 %v17376_v15, %v9357_v2 }
 0xb29   : > { %9460 = vst.msk [vmem:[%s17380_s6 + $0x58] sm:$0xff] %vm1066_vm0, %v9366_v35 }
 0xb2a   : > { %9458 = vst.msk [vmem:[%s17380_s6 + $0x48] sm:$0xff] %vm1066_vm0, %v9358_v0 }
 0xb2c   : > { %v11636_v31 = vpop.f32.mrb[156].mxu1 }
 0xb2d   : > { %v9379_v10 = vadd.f32 %v11636_v31, %v17376_v15  ;;  %v9370_v47 = vpop.f32.mrb[157].mxu1 }
 0xb2e   : > { %v9371_v27 = vadd.f32 %v17376_v15, %v9370_v47  ;;  %v11637_v18 = vpop.f32.mrb[158].mxu1 }
 0xb2f   : > { %9463 = vst.msk [vmem:[%s17380_s6 + $0x70] sm:$0xff] %vm1066_vm0, %v9379_v10  ;;  %v9382_v17 = vadd.f32 %v11637_v18, %v17376_v15  ;;  %v9373_v29 = vpop.f32.mrb[159].mxu1 }
 0xb30   : > { %9461 = vst.msk [vmem:[%s17380_s6 + $0x60] sm:$0xff] %vm1066_vm0, %v9371_v27  ;;  %v9374_v44 = vadd.f32 %v17376_v15, %v9373_v29 }
 0xb31   : > { %9464 = vst.msk [vmem:[%s17380_s6 + $0x78] sm:$0xff] %vm1066_vm0, %v9382_v17 }
 0xb32   : > { %9462 = vst.msk [vmem:[%s17380_s6 + $0x68] sm:$0xff] %vm1066_vm0, %v9374_v44 }
 0xb34   : > { %v11640_v63 = vpop.f32.mrb[160].mxu1 }
 0xb35   : > { %v9395_v9 = vadd.f32 %v11640_v63, %v17376_v15  ;;  %v9386_v43 = vpop.f32.mrb[161].mxu1 }
 0xb36   : > { %v9387_v6 = vadd.f32 %v17376_v15, %v9386_v43  ;;  %v11641_v50 = vpop.f32.mrb[162].mxu1 }
 0xb37   : > { %9467 = vst.msk [vmem:[%s17380_s6 + $0x90] sm:$0xff] %vm1066_vm0, %v9395_v9  ;;  %v9398_v54 = vadd.f32 %v11641_v50, %v17376_v15  ;;  %v9389_v39 = vpop.f32.mrb[163].mxu1 }
 0xb38   : > { %9465 = vst.msk [vmem:[%s17380_s6 + $0x80] sm:$0xff] %vm1066_vm0, %v9387_v6  ;;  %v9390_v62 = vadd.f32 %v17376_v15, %v9389_v39 }
 0xb39   : > { %9468 = vst.msk [vmem:[%s17380_s6 + $0x98] sm:$0xff] %vm1066_vm0, %v9398_v54 }
 0xb3a   : > { %9466 = vst.msk [vmem:[%s17380_s6 + $0x88] sm:$0xff] %vm1066_vm0, %v9390_v62 }
 0xb3c   : > { %v11644_v5 = vpop.f32.mrb[164].mxu1 }
 0xb3d   : > { %v9411_v57 = vadd.f32 %v11644_v5, %v17376_v15  ;;  %v9402_v37 = vpop.f32.mrb[165].mxu1 }
 0xb3e   : > { %v9403_v26 = vadd.f32 %v17376_v15, %v9402_v37  ;;  %v11645_v11 = vpop.f32.mrb[166].mxu1 }
 0xb3f   : > { %9471 = vst.msk [vmem:[%s17380_s6 + $0xb0] sm:$0xff] %vm1066_vm0, %v9411_v57  ;;  %v9414_v30 = vadd.f32 %v11645_v11, %v17376_v15  ;;  %v9405_v56 = vpop.f32.mrb[167].mxu1 }
 0xb40   : > { %9469 = vst.msk [vmem:[%s17380_s6 + $0xa0] sm:$0xff] %vm1066_vm0, %v9403_v26  ;;  %v9406_v42 = vadd.f32 %v17376_v15, %v9405_v56 }
 0xb41   : > { %9472 = vst.msk [vmem:[%s17380_s6 + $0xb8] sm:$0xff] %vm1066_vm0, %v9414_v30 }
 0xb42   : > { %9470 = vst.msk [vmem:[%s17380_s6 + $0xa8] sm:$0xff] %vm1066_vm0, %v9406_v42 }
 0xb44   : > { %v11648_v41 = vpop.f32.mrb[168].mxu1 }
 0xb45   : > { %v9427_v52 = vadd.f32 %v11648_v41, %v17376_v15  ;;  %v9418_v21 = vpop.f32.mrb[169].mxu1 }
 0xb46   : > { %v9419_v40 = vadd.f32 %v17376_v15, %v9418_v21  ;;  %v11649_v13 = vpop.f32.mrb[170].mxu1 }
 0xb47   : > { %9475 = vst.msk [vmem:[%s17380_s6 + $0xd0] sm:$0xff] %vm1066_vm0, %v9427_v52  ;;  %v9430_v61 = vadd.f32 %v11649_v13, %v17376_v15  ;;  %v9421_v22 = vpop.f32.mrb[171].mxu1 }
 0xb48   : > { %9473 = vst.msk [vmem:[%s17380_s6 + $0xc0] sm:$0xff] %vm1066_vm0, %v9419_v40  ;;  %v9422_v33 = vadd.f32 %v17376_v15, %v9421_v22 }
 0xb49   : > { %9476 = vst.msk [vmem:[%s17380_s6 + $0xd8] sm:$0xff] %vm1066_vm0, %v9430_v61 }
 0xb4a   : > { %9474 = vst.msk [vmem:[%s17380_s6 + $0xc8] sm:$0xff] %vm1066_vm0, %v9422_v33 }
 0xb50   : > { %v11652_v38 = vpop.f32.mrb[172].mxu1 }
 0xb51   : > { %v9443_v36 = vadd.f32 %v11652_v38, %v17376_v15  ;;  %v9434_v1 = vpop.f32.mrb[173].mxu1 }
 0xb52   : > { %v9435_v48 = vadd.f32 %v17376_v15, %v9434_v1  ;;  %v11653_v24 = vpop.f32.mrb[174].mxu1 }
 0xb53   : > { %9479 = vst.msk [vmem:[%s17380_s6 + $0xf0] sm:$0xff] %vm1066_vm0, %v9443_v36  ;;  %v9446_v16 = vadd.f32 %v11653_v24, %v17376_v15  ;;  %v9437_v25 = vpop.f32.mrb[175].mxu1 }
 0xb54   : > { %9477 = vst.msk [vmem:[%s17380_s6 + $0xe0] sm:$0xff] %vm1066_vm0, %v9435_v48  ;;  %v9438_v60 = vadd.f32 %v17376_v15, %v9437_v25 }
 0xb55   : > { %9480 = vst.msk [vmem:[%s17380_s6 + $0xf8] sm:$0xff] %vm1066_vm0, %v9446_v16 }
 0xb56   : > { %9478 = vst.msk [vmem:[%s17380_s6 + $0xe8] sm:$0xff] %vm1066_vm0, %v9438_v60 }
 0xb57   : > { %13078 = shalt.err (!%p13075_p10)
}
 0xb58   : > { %s13079_s4 = scalar_lea.hbm %s17474_s27, 4096  ;;  %s13083_s17 = scalar_lea.hbm %s18790_s22, 8192 }
 0xb59   : > { %p13080_p2 = scmp.ne.s32.totalorder %s17474_s27, %s13079_s4  ;;  %p13084_p7 = scmp.lt.u32.totalorder %s17474_s27, %s18790_s22 }
 0xb5a   : > { %p13085_p8 = scmp.lt.u32.totalorder %s13083_s17, %s13079_s4  ;;  %p13087_p13 = scmp.lt.u32.totalorder %s13079_s4, %s17474_s27 }
 0xb5b   : > { %p13081_p3 = pnand %p13080_p2, %p18791_p1 }
 0xb5c   : > { %p13086_p11 = por %p13085_p8, %p13084_p7 }
 0xb5d   : > { %p13082_p4 = pneg %p13081_p3 }
 0xb5e   : > { %p13088_p0 = por %p13087_p13, %p13086_p11 }
 0xb60   : > { %p13089_p6 = pnand %p13088_p0, %p13082_p4 }
 0xb62   : > { %13092 = shalt.err (!%p13089_p6)
}
 0xb63   : > { %s13168_s24 = smov 128   ;;  %s13169_s6 = smov 8  }
 0xb64   : > { %12227 = dma.vmem_to_hbm [thread:$0]  (%p18791_p1), %s17476_s28, 4096, %s17474_s27, %s17487_s14, %s13168_s24, %s13168_s24, %s13169_s6  }
 0xb65 PF: > { %s18792_s20 = sld [smem:[#allocation32_spill]]  ;;  %s18793_s23 = sld [smem:[#allocation30_spill]] }
 0xb66   : > { %s18794_s15 = sld [smem:[#allocation35_spill]] }
 0xb6b   : > { %p12284_p5 = scmp.ge.s32.totalorder %s18792_s20, 2  ;;  %s9518_s13 = sand.u32 1, %s18793_s23  }
 0xb6c   : > { %p18795_p9 = scmp.ne.s32.totalorder %s18794_s15, 0  ;;  %s9519_s30 = scalar_lea.sflag [#allocation7], %s9518_s13 }
 0xb6e   : > { %p12261_p12 = pnand %p12284_p5, %p18795_p9 }
 0xb70   : > { %13134 = dma.done.wait (!%p12261_p12), %s9519_s30, 4096  }
 0xb71   : > { %13136 = vsyncadd (!%p12261_p12), %s9519_s30, 4294963200  ;;  %s18796_s13 = sld [smem:[#allocation33_spill]]  ;;  %s18797_s8 = sld [smem:[#allocation31_spill]] }
 0xb72   : > { %s18798_s27 = sld [smem:[#allocation34_spill]]  ;;  %s18799_s25 = smov %s13143_s26 }
 0xb77   : > { %p37_p10 = scmp.ge.s32.totalorder %s18796_s13, 4   ;;  %s18800_s26 = smov %s18797_s8 }
 0xb79   :  { %39 = sbr.rel (!%p37_p10) target bundleno = 16 (0x10), region = 168 }
 0xb80   :  { %9532 = vsyncpa [#allocation6], 1 }
 0xb81   :  { %9534 = vsyncpa [#allocation6 + $0x1], 1 }
 0xb82   :  { %9535 = vsyncpa [#allocation9], 1 }
 0xb83   :  { %9536 = vsyncpa [#allocation12], 1 }
 0xb84   :  { %9537 = vsyncpa [#allocation15], 1 }
 0xb85   :  { %9538 = vsyncpa [#allocation18], 1 }
 0xb86   :  { %9539 = vsyncpa [#allocation21], 1 }
 0xb87   :  { %9540 = vsyncpa [#allocation7], 1 }
 0xb88   :  { %9542 = vsyncpa [#allocation7 + $0x1], 1 }

</bundles_post_ra>
